<compile_context>
chip_gen: v7x
topology: tpu7x:2x2x1
jax: 0.10.0
libtpu: 0.0.40
codegen_flags: <defaults>
</compile_context>

<pallas_src>
import functools
import math

import jax
import jax.numpy as jnp
from jax import lax
from jax.experimental import pallas as pl
from jax.experimental.pallas import tpu as pltpu

LN_EPS = 1e-5
NEG_INF = -1e9   # finite large-negative mask: avoids (-inf) - (-inf) = NaN rows


# ----------------------------------------------------------------------------
# In-kernel building blocks (operate on VMEM values, never touch HBM)
# ----------------------------------------------------------------------------
def _layer_norm(y, gamma, beta):
    mean = jnp.mean(y, axis=-1, keepdims=True)
    yc = y - mean
    var = jnp.mean(yc * yc, axis=-1, keepdims=True)
    return (yc * lax.rsqrt(var + LN_EPS)) * gamma + beta


def _mm_t(x_bf16, w_bf16):
    """x @ w.T with bf16 MXU operands and f32 accumulation."""
    return lax.dot_general(x_bf16, w_bf16, (((1,), (1,)), ((), ())),
                           preferred_element_type=jnp.float32)


def _mha_block(x, kv, bias, wqkv, bqkv, wo, bo, g, b_ln, num_heads):
    """Multi-head attention + residual + LayerNorm (post-norm)."""
    Lq, E = x.shape
    H = num_heads
    Dh = E // H
    scale = 1.0 / math.sqrt(Dh)

    x_b = x.astype(jnp.bfloat16)       # single cast per sub-step
    kv_b = kv.astype(jnp.bfloat16)

    # Fused QKV projections over the whole (L, E) slab (one weight slab).
    q = _mm_t(x_b, wqkv[0:E, :]) + bqkv[:, 0:E]
    k = _mm_t(kv_b, wqkv[E:2 * E, :]) + bqkv[:, E:2 * E]
    v = _mm_t(kv_b, wqkv[2 * E:3 * E, :]) + bqkv[:, 2 * E:3 * E]
    q = (q * scale).astype(jnp.bfloat16)    # scale q (O(L*Dh)), not scores
    k = k.astype(jnp.bfloat16)
    v = v.astype(jnp.bfloat16)

    # Per-head scores / softmax / P@V with the out-projection folded into a
    # single f32 accumulator: no ctx scratch, no per-head partial stores.
    acc = jnp.zeros((Lq, E), jnp.float32)
    for h in range(H):                       # static unroll, H is tiny
        sl = slice(h * Dh, (h + 1) * Dh)
        s = _mm_t(q[:, sl], k[:, sl])        # (Lq, Lk) f32
        if bias is not None:
            s = s + bias
        m = jnp.max(s, axis=-1, keepdims=True)
        p = jnp.exp(s - m)                   # f32 softmax (v5e-safe)
        p = p * pl.reciprocal(jnp.sum(p, axis=-1, keepdims=True), approx=True)
        ctx = lax.dot_general(p.astype(jnp.bfloat16), v[:, sl],
                              (((1,), (0,)), ((), ())),
                              preferred_element_type=jnp.float32)     # (Lq, Dh)
        acc = acc + _mm_t(ctx.astype(jnp.bfloat16), wo[:, sl])        # (Lq, E)

    y = x + acc + bo                         # residual + out_proj bias
    return _layer_norm(y, g, b_ln)


def _ffn_block(x, w1, b1, w2, b2, g, b_ln):
    h = _mm_t(x.astype(jnp.bfloat16), w1) + b1     # (L, F) f32
    h = jnp.maximum(h, 0.0).astype(jnp.bfloat16)   # ReLU, cast once
    y = _mm_t(h, w2) + b2                          # (L, E) f32
    return _layer_norm(x + y, g, b_ln)


# ----------------------------------------------------------------------------
# Fused encoder stack: all layers + final encoder LayerNorm in one launch
# ----------------------------------------------------------------------------
def encoder_stack_kernel(x_ref, kb_ref,
                         in_w, in_b, out_w, out_b,
                         lin1_w, lin1_b, lin2_w, lin2_b,
                         n1_g, n1_b, n2_g, n2_b,
                         fin_g, fin_b,
                         o_ref, *, num_heads, n_layers):
    S, E = x_ref.shape
    x = x_ref[...]                                          # (S, E) f32
    # Key-padding bias broadcast ONCE per invocation (reused by all layers/heads).
    key_bias = jnp.broadcast_to(kb_ref[...], (S, S))
    for l in range(n_layers):                               # static unroll
        x = _mha_block(x, x, key_bias, in_w[l], in_b[l], out_w[l], out_b[l],
                       n1_g[l], n1_b[l], num_heads)
        x = _ffn_block(x, lin1_w[l], lin1_b[l], lin2_w[l], lin2_b[l],
                       n2_g[l], n2_b[l])
    o_ref[...] = _layer_norm(x, fin_g[...], fin_b[...])     # final encoder norm


# ----------------------------------------------------------------------------
# Fused decoder stack: all layers + final decoder LayerNorm + vocab projection
# ----------------------------------------------------------------------------
def decoder_stack_kernel(y_ref, mem_ref,
                         s_in_w, s_in_b, s_out_w, s_out_b,
                         c_in_w, c_in_b, c_out_w, c_out_b,
                         lin1_w, lin1_b, lin2_w, lin2_b,
                         n1_g, n1_b, n2_g, n2_b, n3_g, n3_b,
                         fin_g, fin_b, fc_w, fc_b,
                         o_ref, *, num_heads, n_layers):
    T, E = y_ref.shape
    y = y_ref[...]                                          # (T, E) f32
    mem = mem_ref[...]                                      # (S, E) f32
    # Causal bias built ONCE per invocation, reused across layers & heads.
    qi = lax.broadcasted_iota(jnp.int32, (T, T), 0)
    kj = lax.broadcasted_iota(jnp.int32, (T, T), 1)
    causal_bias = jnp.where(kj > qi, NEG_INF, 0.0).astype(jnp.float32)

    for l in range(n_layers):                               # static unroll
        y = _mha_block(y, y, causal_bias, s_in_w[l], s_in_b[l],
                       s_out_w[l], s_out_b[l], n1_g[l], n1_b[l], num_heads)
        # nn.Transformer passes no memory mask to cross-attention.
        y = _mha_block(y, mem, None, c_in_w[l], c_in_b[l],
                       c_out_w[l], c_out_b[l], n2_g[l], n2_b[l], num_heads)
        y = _ffn_block(y, lin1_w[l], lin1_b[l], lin2_w[l], lin2_b[l],
                       n3_g[l], n3_b[l])

    y = _layer_norm(y, fin_g[...], fin_b[...])              # final decoder norm
    # Vocab projection into a 128-lane-padded output -> unmasked lane-dense store.
    o_ref[...] = _mm_t(y.astype(jnp.bfloat16), fc_w[...]) + fc_b[...]


# ----------------------------------------------------------------------------
# pallas_call wrappers (2 launches total)
# ----------------------------------------------------------------------------
ENC_KEYS = ("in_w", "in_b", "out_w", "out_b",
            "lin1_w", "lin1_b", "lin2_w", "lin2_b",
            "n1_g", "n1_b", "n2_g", "n2_b")

DEC_KEYS = ("self_in_w", "self_in_b", "self_out_w", "self_out_b",
            "cross_in_w", "cross_in_b", "cross_out_w", "cross_out_b",
            "lin1_w", "lin1_b", "lin2_w", "lin2_b",
            "n1_g", "n1_b", "n2_g", "n2_b", "n3_g", "n3_b")


def _full_spec(a):
    # Whole-array block, constant index map -> fetched once across the grid.
    nd = a.ndim
    return pl.BlockSpec(a.shape, lambda b, _nd=nd: (0,) * _nd)


def encoder_stack(x, key_bias, enc, fin_g, fin_b, num_heads):
    N, S, E = x.shape
    n_layers = enc["in_w"].shape[0]
    weights = [enc[k] for k in ENC_KEYS] + [fin_g, fin_b]
    kernel = functools.partial(encoder_stack_kernel,
                               num_heads=num_heads, n_layers=n_layers)
    return pl.pallas_call(
        kernel,
        out_shape=jax.ShapeDtypeStruct((N, S, E), jnp.float32),
        grid_spec=pltpu.PrefetchScalarGridSpec(
            num_scalar_prefetch=0,
            grid=(N,),                                   # one step per batch row
            in_specs=[pl.BlockSpec((None, S, E), lambda b: (b, 0, 0)),
                      pl.BlockSpec((None, 1, S), lambda b: (b, 0, 0))]
                     + [_full_spec(w) for w in weights],
            out_specs=pl.BlockSpec((None, S, E), lambda b: (b, 0, 0)),
        ),
        compiler_params=pltpu.CompilerParams(
            dimension_semantics=("parallel",)),          # v7x: 2 TCs share batch
    )(x, key_bias, *weights)


def decoder_stack(y, memory, dec, fin_g, fin_b, fc_w, fc_b, num_heads):
    N, T, E = y.shape
    S = memory.shape[1]
    Vp = fc_w.shape[0]                                   # padded vocab (mult of 128)
    n_layers = dec["self_in_w"].shape[0]
    weights = [dec[k] for k in DEC_KEYS] + [fin_g, fin_b, fc_w, fc_b]
    kernel = functools.partial(decoder_stack_kernel,
                               num_heads=num_heads, n_layers=n_layers)
    return pl.pallas_call(
        kernel,
        out_shape=jax.ShapeDtypeStruct((N, T, Vp), jnp.float32),
        grid_spec=pltpu.PrefetchScalarGridSpec(
            num_scalar_prefetch=0,
            grid=(N,),
            in_specs=[pl.BlockSpec((None, T, E), lambda b: (b, 0, 0)),
                      pl.BlockSpec((None, S, E), lambda b: (b, 0, 0))]
                     + [_full_spec(w) for w in weights],
            out_specs=pl.BlockSpec((None, T, Vp), lambda b: (b, 0, 0)),
        ),
        compiler_params=pltpu.CompilerParams(
            dimension_semantics=("parallel",)),
    )(y, memory, *weights)


# ----------------------------------------------------------------------------
# Full forward (matches nn.Transformer post-norm, ReLU, eval-mode dropout)
# ----------------------------------------------------------------------------
def transformer_forward(params, src, trg, num_heads, src_pad_idx, trg_vocab):
    # src: (S, N) int32, trg: (T, N) int32 (seq-first, like the torch module).
    S, N = src.shape
    T, _ = trg.shape

    src_bt = src.T                                       # (N, S)
    trg_bt = trg.T                                       # (N, T)

    # Embedding gathers in plain JAX (glue), batch-first internal layout.
    x = params["src_word_emb"][src_bt] + params["src_pos_emb"][jnp.arange(S)][None]
    y = params["trg_word_emb"][trg_bt] + params["trg_pos_emb"][jnp.arange(T)][None]
    # TODO(synk): dropout on embeddings / sublayers omitted (eval semantics).

    # Compact per-key additive bias; full (L, L) masks are built in-kernel.
    src_key_bias = jnp.where(src_bt == src_pad_idx, NEG_INF, 0.0)
    src_key_bias = src_key_bias.astype(jnp.float32).reshape(N, 1, S)

    memory = encoder_stack(x, src_key_bias, params["enc"],
                           params["enc_norm_g"], params["enc_norm_b"], num_heads)
    logits_pad = decoder_stack(y, memory, params["dec"],
                               params["dec_norm_g"], params["dec_norm_b"],
                               params["fc_w"], params["fc_b"], num_heads)
    # Slice padded vocab back to V, return seq-first (T, N, V).
    return logits_pad[:, :, :trg_vocab].transpose(1, 0, 2)


# ----------------------------------------------------------------------------
# Deterministic parameter init: per-layer weights stacked along a leading axis
# (single DMA per call); matmul weights bf16, biases/norms/embeddings f32.
# Vocab projection padded to a multiple of 128 lanes.
# ----------------------------------------------------------------------------
def init_params(key, E, src_vocab, trg_vocab, max_len, F, n_enc, n_dec,
                lane_pad=128):
    keys = iter(jax.random.split(key, 64))

    def w(shape, scale=0.02, dtype=jnp.bfloat16):
        return (scale * jax.random.normal(next(keys), shape, jnp.float32)).astype(dtype)

    def ones(shape):
        return jnp.ones(shape, jnp.float32)

    def zeros(shape):
        return jnp.zeros(shape, jnp.float32)

    enc = dict(
        in_w=w((n_enc, 3 * E, E)),  in_b=zeros((n_enc, 1, 3 * E)),
        out_w=w((n_enc, E, E)),     out_b=zeros((n_enc, 1, E)),
        lin1_w=w((n_enc, F, E)),    lin1_b=zeros((n_enc, 1, F)),
        lin2_w=w((n_enc, E, F)),    lin2_b=zeros((n_enc, 1, E)),
        n1_g=ones((n_enc, 1, E)),   n1_b=zeros((n_enc, 1, E)),
        n2_g=ones((n_enc, 1, E)),   n2_b=zeros((n_enc, 1, E)),
    )
    dec = dict(
        self_in_w=w((n_dec, 3 * E, E)),  self_in_b=zeros((n_dec, 1, 3 * E)),
        self_out_w=w((n_dec, E, E)),     self_out_b=zeros((n_dec, 1, E)),
        cross_in_w=w((n_dec, 3 * E, E)), cross_in_b=zeros((n_dec, 1, 3 * E)),
        cross_out_w=w((n_dec, E, E)),    cross_out_b=zeros((n_dec, 1, E)),
        lin1_w=w((n_dec, F, E)),    lin1_b=zeros((n_dec, 1, F)),
        lin2_w=w((n_dec, E, F)),    lin2_b=zeros((n_dec, 1, E)),
        n1_g=ones((n_dec, 1, E)),   n1_b=zeros((n_dec, 1, E)),
        n2_g=ones((n_dec, 1, E)),   n2_b=zeros((n_dec, 1, E)),
        n3_g=ones((n_dec, 1, E)),   n3_b=zeros((n_dec, 1, E)),
    )

    v_pad = ((trg_vocab + lane_pad - 1) // lane_pad) * lane_pad
    return dict(
        src_word_emb=w((src_vocab, E), 1.0, jnp.float32),
        src_pos_emb=w((max_len, E), 1.0, jnp.float32),
        trg_word_emb=w((trg_vocab, E), 1.0, jnp.float32),
        trg_pos_emb=w((max_len, E), 1.0, jnp.float32),
        enc=enc, dec=dec,
        enc_norm_g=ones((1, E)), enc_norm_b=zeros((1, E)),
        dec_norm_g=ones((1, E)), dec_norm_b=zeros((1, E)),
        fc_w=w((v_pad, E)),                 # padded rows are sliced off in wrapper
        fc_b=zeros((1, v_pad)),
    )


# ----------------------------------------------------------------------------
if __name__ == "__main__":
    EMBED = 32
    HEADS = 4
    SRC_VOCAB = 50
    TRG_VOCAB = 60
    SRC_PAD_IDX = 0
    N_ENC_LAYERS = 2
    N_DEC_LAYERS = 2
    FWD_EXPANSION = 64      # dim_feedforward in nn.Transformer
    MAX_LEN = 16
    S_LEN, T_LEN, BATCH = 10, 8, 2

    key = jax.random.PRNGKey(0)
    k_params, k_src, k_trg = jax.random.split(key, 3)

    params = init_params(k_params, EMBED, SRC_VOCAB, TRG_VOCAB, MAX_LEN,
                         FWD_EXPANSION, N_ENC_LAYERS, N_DEC_LAYERS)

    src = jax.random.randint(k_src, (S_LEN, BATCH), 1, SRC_VOCAB, dtype=jnp.int32)
    src = src.at[-2:, 0].set(SRC_PAD_IDX)   # exercise the src padding mask
    trg = jax.random.randint(k_trg, (T_LEN, BATCH), 1, TRG_VOCAB, dtype=jnp.int32)

    fwd = jax.jit(functools.partial(transformer_forward,
                                    num_heads=HEADS,
                                    src_pad_idx=SRC_PAD_IDX,
                                    trg_vocab=TRG_VOCAB))
    out = jax.block_until_ready(fwd(params, src, trg))

    assert out.shape == (T_LEN, BATCH, TRG_VOCAB), out.shape
    assert bool(jnp.all(jnp.isfinite(out)))
    print("KERNEL_OK")
</pallas_src>

<mosaic_0001>
module attributes {stable_mosaic.version = 11 : i64} {
  func.func @encoder_stack_kernel(%arg0: i32, %arg1: memref<1x10x32xf32, #tpu.memory_space<vmem>>, %arg2: memref<1x1x10xf32, #tpu.memory_space<vmem>>, %arg3: memref<2x96x32xbf16, #tpu.memory_space<vmem>>, %arg4: memref<2x1x96xf32, #tpu.memory_space<vmem>>, %arg5: memref<2x32x32xbf16, #tpu.memory_space<vmem>>, %arg6: memref<2x1x32xf32, #tpu.memory_space<vmem>>, %arg7: memref<2x64x32xbf16, #tpu.memory_space<vmem>>, %arg8: memref<2x1x64xf32, #tpu.memory_space<vmem>>, %arg9: memref<2x32x64xbf16, #tpu.memory_space<vmem>>, %arg10: memref<2x1x32xf32, #tpu.memory_space<vmem>>, %arg11: memref<2x1x32xf32, #tpu.memory_space<vmem>>, %arg12: memref<2x1x32xf32, #tpu.memory_space<vmem>>, %arg13: memref<2x1x32xf32, #tpu.memory_space<vmem>>, %arg14: memref<2x1x32xf32, #tpu.memory_space<vmem>>, %arg15: memref<1x32xf32, #tpu.memory_space<vmem>>, %arg16: memref<1x32xf32, #tpu.memory_space<vmem>>, %arg17: memref<1x10x32xf32, #tpu.memory_space<vmem>>) attributes {dimension_semantics = [#tpu.dimension_semantics<parallel>], iteration_bounds = array<i64: 2>, scalar_prefetch = 0 : i64, scratch_operands = 0 : i64, tpu.core_type = #tpu.core_type<tc>, window_params = [{transform_indices = @transform_0, window_bounds = array<i64: 1, 10, 32>}, {transform_indices = @transform_1, window_bounds = array<i64: 1, 1, 10>}, {pipeline_mode = #tpu.pipeline_mode<synchronous>, transform_indices = @transform_2, window_bounds = array<i64: 2, 96, 32>}, {pipeline_mode = #tpu.pipeline_mode<synchronous>, transform_indices = @transform_3, window_bounds = array<i64: 2, 1, 96>}, {pipeline_mode = #tpu.pipeline_mode<synchronous>, transform_indices = @transform_4, window_bounds = array<i64: 2, 32, 32>}, {pipeline_mode = #tpu.pipeline_mode<synchronous>, transform_indices = @transform_5, window_bounds = array<i64: 2, 1, 32>}, {pipeline_mode = #tpu.pipeline_mode<synchronous>, transform_indices = @transform_6, window_bounds = array<i64: 2, 64, 32>}, {pipeline_mode = #tpu.pipeline_mode<synchronous>, transform_indices = @transform_7, window_bounds = array<i64: 2, 1, 64>}, {pipeline_mode = #tpu.pipeline_mode<synchronous>, transform_indices = @transform_8, window_bounds = array<i64: 2, 32, 64>}, {pipeline_mode = #tpu.pipeline_mode<synchronous>, transform_indices = @transform_9, window_bounds = array<i64: 2, 1, 32>}, {pipeline_mode = #tpu.pipeline_mode<synchronous>, transform_indices = @transform_10, window_bounds = array<i64: 2, 1, 32>}, {pipeline_mode = #tpu.pipeline_mode<synchronous>, transform_indices = @transform_11, window_bounds = array<i64: 2, 1, 32>}, {pipeline_mode = #tpu.pipeline_mode<synchronous>, transform_indices = @transform_12, window_bounds = array<i64: 2, 1, 32>}, {pipeline_mode = #tpu.pipeline_mode<synchronous>, transform_indices = @transform_13, window_bounds = array<i64: 2, 1, 32>}, {pipeline_mode = #tpu.pipeline_mode<synchronous>, transform_indices = @transform_14, window_bounds = array<i64: 1, 32>}, {pipeline_mode = #tpu.pipeline_mode<synchronous>, transform_indices = @transform_15, window_bounds = array<i64: 1, 32>}, {transform_indices = @transform_16, window_bounds = array<i64: 1, 10, 32>}]} {
    %c0 = arith.constant 0 : index
    %c0_0 = arith.constant 0 : index
    %c0_1 = arith.constant 0 : index
    %0 = vector.load %arg1[%c0, %c0_0, %c0_1] : memref<1x10x32xf32, #tpu.memory_space<vmem>>, vector<1x10x32xf32>
    %1 = vector.shape_cast %0 : vector<1x10x32xf32> to vector<10x32xf32>
    %c0_2 = arith.constant 0 : index
    %c0_3 = arith.constant 0 : index
    %c0_4 = arith.constant 0 : index
    %2 = vector.load %arg2[%c0_2, %c0_3, %c0_4] : memref<1x1x10xf32, #tpu.memory_space<vmem>>, vector<1x1x10xf32>
    %3 = vector.shape_cast %2 : vector<1x1x10xf32> to vector<1x10xf32>
    %4 = vector.shape_cast %3 : vector<1x10xf32> to vector<1x10xf32>
    %5 = vector.broadcast %4 : vector<1x10xf32> to vector<10x10xf32>
    %c0_5 = arith.constant 0 : index
    %c0_6 = arith.constant 0 : index
    %c0_7 = arith.constant 0 : index
    %6 = vector.load %arg3[%c0_5, %c0_6, %c0_7] : memref<2x96x32xbf16, #tpu.memory_space<vmem>>, vector<1x96x32xbf16>
    %7 = vector.shape_cast %6 : vector<1x96x32xbf16> to vector<96x32xbf16>
    %c0_8 = arith.constant 0 : index
    %c0_9 = arith.constant 0 : index
    %c0_10 = arith.constant 0 : index
    %8 = vector.load %arg4[%c0_8, %c0_9, %c0_10] : memref<2x1x96xf32, #tpu.memory_space<vmem>>, vector<1x1x96xf32>
    %9 = vector.shape_cast %8 : vector<1x1x96xf32> to vector<1x96xf32>
    %c0_11 = arith.constant 0 : index
    %c0_12 = arith.constant 0 : index
    %c0_13 = arith.constant 0 : index
    %10 = vector.load %arg5[%c0_11, %c0_12, %c0_13] : memref<2x32x32xbf16, #tpu.memory_space<vmem>>, vector<1x32x32xbf16>
    %11 = vector.shape_cast %10 : vector<1x32x32xbf16> to vector<32x32xbf16>
    %c0_14 = arith.constant 0 : index
    %c0_15 = arith.constant 0 : index
    %c0_16 = arith.constant 0 : index
    %12 = vector.load %arg6[%c0_14, %c0_15, %c0_16] : memref<2x1x32xf32, #tpu.memory_space<vmem>>, vector<1x1x32xf32>
    %13 = vector.shape_cast %12 : vector<1x1x32xf32> to vector<1x32xf32>
    %c0_17 = arith.constant 0 : index
    %c0_18 = arith.constant 0 : index
    %c0_19 = arith.constant 0 : index
    %14 = vector.load %arg11[%c0_17, %c0_18, %c0_19] : memref<2x1x32xf32, #tpu.memory_space<vmem>>, vector<1x1x32xf32>
    %15 = vector.shape_cast %14 : vector<1x1x32xf32> to vector<1x32xf32>
    %c0_20 = arith.constant 0 : index
    %c0_21 = arith.constant 0 : index
    %c0_22 = arith.constant 0 : index
    %16 = vector.load %arg12[%c0_20, %c0_21, %c0_22] : memref<2x1x32xf32, #tpu.memory_space<vmem>>, vector<1x1x32xf32>
    %17 = vector.shape_cast %16 : vector<1x1x32xf32> to vector<1x32xf32>
    %18 = arith.truncf %1 : vector<10x32xf32> to vector<10x32xbf16>
    %19 = arith.truncf %1 : vector<10x32xf32> to vector<10x32xbf16>
    %20 = vector.extract_strided_slice %7 {offsets = [0, 0], sizes = [32, 32], strides = [1, 1]} : vector<96x32xbf16> to vector<32x32xbf16>
    %cst = arith.constant dense<0.000000e+00> : vector<10x32xf32>
    %21 = tpu.matmul %18, %20, %cst {dimension_numbers = #tpu.dot_dimension_numbers<[1], [1], [0], [0], [0, 0, 1, 0], [], []>} : vector<10x32xbf16>, vector<32x32xbf16>, vector<10x32xf32> -> vector<10x32xf32>
    %22 = vector.extract_strided_slice %9 {offsets = [0, 0], sizes = [1, 32], strides = [1, 1]} : vector<1x96xf32> to vector<1x32xf32>
    %23 = vector.broadcast %22 : vector<1x32xf32> to vector<10x32xf32>
    %24 = arith.addf %21, %23 : vector<10x32xf32>
    %25 = vector.extract_strided_slice %7 {offsets = [32, 0], sizes = [32, 32], strides = [1, 1]} : vector<96x32xbf16> to vector<32x32xbf16>
    %cst_23 = arith.constant dense<0.000000e+00> : vector<10x32xf32>
    %26 = tpu.matmul %19, %25, %cst_23 {dimension_numbers = #tpu.dot_dimension_numbers<[1], [1], [0], [0], [0, 0, 1, 0], [], []>} : vector<10x32xbf16>, vector<32x32xbf16>, vector<10x32xf32> -> vector<10x32xf32>
    %27 = vector.extract_strided_slice %9 {offsets = [0, 32], sizes = [1, 32], strides = [1, 1]} : vector<1x96xf32> to vector<1x32xf32>
    %28 = vector.broadcast %27 : vector<1x32xf32> to vector<10x32xf32>
    %29 = arith.addf %26, %28 : vector<10x32xf32>
    %30 = vector.extract_strided_slice %7 {offsets = [64, 0], sizes = [32, 32], strides = [1, 1]} : vector<96x32xbf16> to vector<32x32xbf16>
    %cst_24 = arith.constant dense<0.000000e+00> : vector<10x32xf32>
    %31 = tpu.matmul %19, %30, %cst_24 {dimension_numbers = #tpu.dot_dimension_numbers<[1], [1], [0], [0], [0, 0, 1, 0], [], []>} : vector<10x32xbf16>, vector<32x32xbf16>, vector<10x32xf32> -> vector<10x32xf32>
    %32 = vector.extract_strided_slice %9 {offsets = [0, 64], sizes = [1, 32], strides = [1, 1]} : vector<1x96xf32> to vector<1x32xf32>
    %33 = vector.broadcast %32 : vector<1x32xf32> to vector<10x32xf32>
    %34 = arith.addf %31, %33 : vector<10x32xf32>
    %cst_25 = arith.constant 0.353553385 : f32
    %35 = vector.broadcast %cst_25 : f32 to vector<10x32xf32>
    %36 = arith.mulf %24, %35 : vector<10x32xf32>
    %37 = arith.truncf %36 : vector<10x32xf32> to vector<10x32xbf16>
    %38 = arith.truncf %29 : vector<10x32xf32> to vector<10x32xbf16>
    %39 = arith.truncf %34 : vector<10x32xf32> to vector<10x32xbf16>
    %cst_26 = arith.constant 0.000000e+00 : f32
    %40 = vector.broadcast %cst_26 : f32 to vector<10x32xf32>
    %41 = vector.extract_strided_slice %37 {offsets = [0, 0], sizes = [10, 8], strides = [1, 1]} : vector<10x32xbf16> to vector<10x8xbf16>
    %42 = vector.extract_strided_slice %38 {offsets = [0, 0], sizes = [10, 8], strides = [1, 1]} : vector<10x32xbf16> to vector<10x8xbf16>
    %cst_27 = arith.constant dense<0.000000e+00> : vector<10x10xf32>
    %43 = tpu.matmul %41, %42, %cst_27 {dimension_numbers = #tpu.dot_dimension_numbers<[1], [1], [0], [0], [0, 0, 1, 0], [], []>} : vector<10x8xbf16>, vector<10x8xbf16>, vector<10x10xf32> -> vector<10x10xf32>
    %44 = arith.addf %43, %5 : vector<10x10xf32>
    %cst_28 = arith.constant dense<0xFF800000> : vector<10xf32>
    %45 = vector.multi_reduction <maximumf>, %44, %cst_28 [1] : vector<10x10xf32> to vector<10xf32>
    %46 = vector.shape_cast %45 : vector<10xf32> to vector<10x1xf32>
    %47 = vector.broadcast %46 : vector<10x1xf32> to vector<10x10xf32>
    %48 = arith.subf %44, %47 : vector<10x10xf32>
    %49 = math.exp %48 : vector<10x10xf32>
    %cst_29 = arith.constant dense<0.000000e+00> : vector<10xf32>
    %50 = vector.multi_reduction <add>, %49, %cst_29 [1] : vector<10x10xf32> to vector<10xf32>
    %51 = vector.shape_cast %50 : vector<10xf32> to vector<10x1xf32>
    %52 = tpu.reciprocal %51 {approx = true} : vector<10x1xf32> -> vector<10x1xf32>
    %53 = vector.broadcast %52 : vector<10x1xf32> to vector<10x10xf32>
    %54 = arith.mulf %49, %53 : vector<10x10xf32>
    %55 = arith.truncf %54 : vector<10x10xf32> to vector<10x10xbf16>
    %56 = vector.extract_strided_slice %39 {offsets = [0, 0], sizes = [10, 8], strides = [1, 1]} : vector<10x32xbf16> to vector<10x8xbf16>
    %cst_30 = arith.constant dense<0.000000e+00> : vector<10x8xf32>
    %57 = tpu.matmul %55, %56, %cst_30 {dimension_numbers = #tpu.dot_dimension_numbers<[1], [0], [0], [1], [0, 0, 1, 1], [], []>} : vector<10x10xbf16>, vector<10x8xbf16>, vector<10x8xf32> -> vector<10x8xf32>
    %58 = arith.truncf %57 : vector<10x8xf32> to vector<10x8xbf16>
    %59 = vector.extract_strided_slice %11 {offsets = [0, 0], sizes = [32, 8], strides = [1, 1]} : vector<32x32xbf16> to vector<32x8xbf16>
    %cst_31 = arith.constant dense<0.000000e+00> : vector<10x32xf32>
    %60 = tpu.matmul %58, %59, %cst_31 {dimension_numbers = #tpu.dot_dimension_numbers<[1], [1], [0], [0], [0, 0, 1, 0], [], []>} : vector<10x8xbf16>, vector<32x8xbf16>, vector<10x32xf32> -> vector<10x32xf32>
    %61 = arith.addf %40, %60 : vector<10x32xf32>
    %62 = vector.extract_strided_slice %37 {offsets = [0, 8], sizes = [10, 8], strides = [1, 1]} : vector<10x32xbf16> to vector<10x8xbf16>
    %63 = vector.extract_strided_slice %38 {offsets = [0, 8], sizes = [10, 8], strides = [1, 1]} : vector<10x32xbf16> to vector<10x8xbf16>
    %cst_32 = arith.constant dense<0.000000e+00> : vector<10x10xf32>
    %64 = tpu.matmul %62, %63, %cst_32 {dimension_numbers = #tpu.dot_dimension_numbers<[1], [1], [0], [0], [0, 0, 1, 0], [], []>} : vector<10x8xbf16>, vector<10x8xbf16>, vector<10x10xf32> -> vector<10x10xf32>
    %65 = arith.addf %64, %5 : vector<10x10xf32>
    %cst_33 = arith.constant dense<0xFF800000> : vector<10xf32>
    %66 = vector.multi_reduction <maximumf>, %65, %cst_33 [1] : vector<10x10xf32> to vector<10xf32>
    %67 = vector.shape_cast %66 : vector<10xf32> to vector<10x1xf32>
    %68 = vector.broadcast %67 : vector<10x1xf32> to vector<10x10xf32>
    %69 = arith.subf %65, %68 : vector<10x10xf32>
    %70 = math.exp %69 : vector<10x10xf32>
    %cst_34 = arith.constant dense<0.000000e+00> : vector<10xf32>
    %71 = vector.multi_reduction <add>, %70, %cst_34 [1] : vector<10x10xf32> to vector<10xf32>
    %72 = vector.shape_cast %71 : vector<10xf32> to vector<10x1xf32>
    %73 = tpu.reciprocal %72 {approx = true} : vector<10x1xf32> -> vector<10x1xf32>
    %74 = vector.broadcast %73 : vector<10x1xf32> to vector<10x10xf32>
    %75 = arith.mulf %70, %74 : vector<10x10xf32>
    %76 = arith.truncf %75 : vector<10x10xf32> to vector<10x10xbf16>
    %77 = vector.extract_strided_slice %39 {offsets = [0, 8], sizes = [10, 8], strides = [1, 1]} : vector<10x32xbf16> to vector<10x8xbf16>
    %cst_35 = arith.constant dense<0.000000e+00> : vector<10x8xf32>
    %78 = tpu.matmul %76, %77, %cst_35 {dimension_numbers = #tpu.dot_dimension_numbers<[1], [0], [0], [1], [0, 0, 1, 1], [], []>} : vector<10x10xbf16>, vector<10x8xbf16>, vector<10x8xf32> -> vector<10x8xf32>
    %79 = arith.truncf %78 : vector<10x8xf32> to vector<10x8xbf16>
    %80 = vector.extract_strided_slice %11 {offsets = [0, 8], sizes = [32, 8], strides = [1, 1]} : vector<32x32xbf16> to vector<32x8xbf16>
    %cst_36 = arith.constant dense<0.000000e+00> : vector<10x32xf32>
    %81 = tpu.matmul %79, %80, %cst_36 {dimension_numbers = #tpu.dot_dimension_numbers<[1], [1], [0], [0], [0, 0, 1, 0], [], []>} : vector<10x8xbf16>, vector<32x8xbf16>, vector<10x32xf32> -> vector<10x32xf32>
    %82 = arith.addf %61, %81 : vector<10x32xf32>
    %83 = vector.extract_strided_slice %37 {offsets = [0, 16], sizes = [10, 8], strides = [1, 1]} : vector<10x32xbf16> to vector<10x8xbf16>
    %84 = vector.extract_strided_slice %38 {offsets = [0, 16], sizes = [10, 8], strides = [1, 1]} : vector<10x32xbf16> to vector<10x8xbf16>
    %cst_37 = arith.constant dense<0.000000e+00> : vector<10x10xf32>
    %85 = tpu.matmul %83, %84, %cst_37 {dimension_numbers = #tpu.dot_dimension_numbers<[1], [1], [0], [0], [0, 0, 1, 0], [], []>} : vector<10x8xbf16>, vector<10x8xbf16>, vector<10x10xf32> -> vector<10x10xf32>
    %86 = arith.addf %85, %5 : vector<10x10xf32>
    %cst_38 = arith.constant dense<0xFF800000> : vector<10xf32>
    %87 = vector.multi_reduction <maximumf>, %86, %cst_38 [1] : vector<10x10xf32> to vector<10xf32>
    %88 = vector.shape_cast %87 : vector<10xf32> to vector<10x1xf32>
    %89 = vector.broadcast %88 : vector<10x1xf32> to vector<10x10xf32>
    %90 = arith.subf %86, %89 : vector<10x10xf32>
    %91 = math.exp %90 : vector<10x10xf32>
    %cst_39 = arith.constant dense<0.000000e+00> : vector<10xf32>
    %92 = vector.multi_reduction <add>, %91, %cst_39 [1] : vector<10x10xf32> to vector<10xf32>
    %93 = vector.shape_cast %92 : vector<10xf32> to vector<10x1xf32>
    %94 = tpu.reciprocal %93 {approx = true} : vector<10x1xf32> -> vector<10x1xf32>
    %95 = vector.broadcast %94 : vector<10x1xf32> to vector<10x10xf32>
    %96 = arith.mulf %91, %95 : vector<10x10xf32>
    %97 = arith.truncf %96 : vector<10x10xf32> to vector<10x10xbf16>
    %98 = vector.extract_strided_slice %39 {offsets = [0, 16], sizes = [10, 8], strides = [1, 1]} : vector<10x32xbf16> to vector<10x8xbf16>
    %cst_40 = arith.constant dense<0.000000e+00> : vector<10x8xf32>
    %99 = tpu.matmul %97, %98, %cst_40 {dimension_numbers = #tpu.dot_dimension_numbers<[1], [0], [0], [1], [0, 0, 1, 1], [], []>} : vector<10x10xbf16>, vector<10x8xbf16>, vector<10x8xf32> -> vector<10x8xf32>
    %100 = arith.truncf %99 : vector<10x8xf32> to vector<10x8xbf16>
    %101 = vector.extract_strided_slice %11 {offsets = [0, 16], sizes = [32, 8], strides = [1, 1]} : vector<32x32xbf16> to vector<32x8xbf16>
    %cst_41 = arith.constant dense<0.000000e+00> : vector<10x32xf32>
    %102 = tpu.matmul %100, %101, %cst_41 {dimension_numbers = #tpu.dot_dimension_numbers<[1], [1], [0], [0], [0, 0, 1, 0], [], []>} : vector<10x8xbf16>, vector<32x8xbf16>, vector<10x32xf32> -> vector<10x32xf32>
    %103 = arith.addf %82, %102 : vector<10x32xf32>
    %104 = vector.extract_strided_slice %37 {offsets = [0, 24], sizes = [10, 8], strides = [1, 1]} : vector<10x32xbf16> to vector<10x8xbf16>
    %105 = vector.extract_strided_slice %38 {offsets = [0, 24], sizes = [10, 8], strides = [1, 1]} : vector<10x32xbf16> to vector<10x8xbf16>
    %cst_42 = arith.constant dense<0.000000e+00> : vector<10x10xf32>
    %106 = tpu.matmul %104, %105, %cst_42 {dimension_numbers = #tpu.dot_dimension_numbers<[1], [1], [0], [0], [0, 0, 1, 0], [], []>} : vector<10x8xbf16>, vector<10x8xbf16>, vector<10x10xf32> -> vector<10x10xf32>
    %107 = arith.addf %106, %5 : vector<10x10xf32>
    %cst_43 = arith.constant dense<0xFF800000> : vector<10xf32>
    %108 = vector.multi_reduction <maximumf>, %107, %cst_43 [1] : vector<10x10xf32> to vector<10xf32>
    %109 = vector.shape_cast %108 : vector<10xf32> to vector<10x1xf32>
    %110 = vector.broadcast %109 : vector<10x1xf32> to vector<10x10xf32>
    %111 = arith.subf %107, %110 : vector<10x10xf32>
    %112 = math.exp %111 : vector<10x10xf32>
    %cst_44 = arith.constant dense<0.000000e+00> : vector<10xf32>
    %113 = vector.multi_reduction <add>, %112, %cst_44 [1] : vector<10x10xf32> to vector<10xf32>
    %114 = vector.shape_cast %113 : vector<10xf32> to vector<10x1xf32>
    %115 = tpu.reciprocal %114 {approx = true} : vector<10x1xf32> -> vector<10x1xf32>
    %116 = vector.broadcast %115 : vector<10x1xf32> to vector<10x10xf32>
    %117 = arith.mulf %112, %116 : vector<10x10xf32>
    %118 = arith.truncf %117 : vector<10x10xf32> to vector<10x10xbf16>
    %119 = vector.extract_strided_slice %39 {offsets = [0, 24], sizes = [10, 8], strides = [1, 1]} : vector<10x32xbf16> to vector<10x8xbf16>
    %cst_45 = arith.constant dense<0.000000e+00> : vector<10x8xf32>
    %120 = tpu.matmul %118, %119, %cst_45 {dimension_numbers = #tpu.dot_dimension_numbers<[1], [0], [0], [1], [0, 0, 1, 1], [], []>} : vector<10x10xbf16>, vector<10x8xbf16>, vector<10x8xf32> -> vector<10x8xf32>
    %121 = arith.truncf %120 : vector<10x8xf32> to vector<10x8xbf16>
    %122 = vector.extract_strided_slice %11 {offsets = [0, 24], sizes = [32, 8], strides = [1, 1]} : vector<32x32xbf16> to vector<32x8xbf16>
    %cst_46 = arith.constant dense<0.000000e+00> : vector<10x32xf32>
    %123 = tpu.matmul %121, %122, %cst_46 {dimension_numbers = #tpu.dot_dimension_numbers<[1], [1], [0], [0], [0, 0, 1, 0], [], []>} : vector<10x8xbf16>, vector<32x8xbf16>, vector<10x32xf32> -> vector<10x32xf32>
    %124 = arith.addf %103, %123 : vector<10x32xf32>
    %125 = arith.addf %1, %124 : vector<10x32xf32>
    %126 = vector.broadcast %13 : vector<1x32xf32> to vector<10x32xf32>
    %127 = arith.addf %125, %126 : vector<10x32xf32>
    %cst_47 = arith.constant dense<0.000000e+00> : vector<10xf32>
    %128 = vector.multi_reduction <add>, %127, %cst_47 [1] : vector<10x32xf32> to vector<10xf32>
    %129 = vector.shape_cast %128 : vector<10xf32> to vector<10x1xf32>
    %cst_48 = arith.constant 3.200000e+01 : f32
    %130 = vector.broadcast %cst_48 : f32 to vector<10x1xf32>
    %131 = arith.divf %129, %130 : vector<10x1xf32>
    %132 = vector.broadcast %131 : vector<10x1xf32> to vector<10x32xf32>
    %133 = arith.subf %127, %132 : vector<10x32xf32>
    %134 = arith.mulf %133, %133 : vector<10x32xf32>
    %cst_49 = arith.constant dense<0.000000e+00> : vector<10xf32>
    %135 = vector.multi_reduction <add>, %134, %cst_49 [1] : vector<10x32xf32> to vector<10xf32>
    %136 = vector.shape_cast %135 : vector<10xf32> to vector<10x1xf32>
    %cst_50 = arith.constant 3.200000e+01 : f32
    %137 = vector.broadcast %cst_50 : f32 to vector<10x1xf32>
    %138 = arith.divf %136, %137 : vector<10x1xf32>
    %cst_51 = arith.constant 9.99999974E-6 : f32
    %139 = vector.broadcast %cst_51 : f32 to vector<10x1xf32>
    %140 = arith.addf %138, %139 : vector<10x1xf32>
    %141 = math.rsqrt %140 : vector<10x1xf32>
    %142 = vector.broadcast %141 : vector<10x1xf32> to vector<10x32xf32>
    %143 = arith.mulf %133, %142 : vector<10x32xf32>
    %144 = vector.broadcast %15 : vector<1x32xf32> to vector<10x32xf32>
    %145 = arith.mulf %143, %144 : vector<10x32xf32>
    %146 = vector.broadcast %17 : vector<1x32xf32> to vector<10x32xf32>
    %147 = arith.addf %145, %146 : vector<10x32xf32>
    %c0_52 = arith.constant 0 : index
    %c0_53 = arith.constant 0 : index
    %c0_54 = arith.constant 0 : index
    %148 = vector.load %arg7[%c0_52, %c0_53, %c0_54] : memref<2x64x32xbf16, #tpu.memory_space<vmem>>, vector<1x64x32xbf16>
    %149 = vector.shape_cast %148 : vector<1x64x32xbf16> to vector<64x32xbf16>
    %c0_55 = arith.constant 0 : index
    %c0_56 = arith.constant 0 : index
    %c0_57 = arith.constant 0 : index
    %150 = vector.load %arg8[%c0_55, %c0_56, %c0_57] : memref<2x1x64xf32, #tpu.memory_space<vmem>>, vector<1x1x64xf32>
    %151 = vector.shape_cast %150 : vector<1x1x64xf32> to vector<1x64xf32>
    %c0_58 = arith.constant 0 : index
    %c0_59 = arith.constant 0 : index
    %c0_60 = arith.constant 0 : index
    %152 = vector.load %arg9[%c0_58, %c0_59, %c0_60] : memref<2x32x64xbf16, #tpu.memory_space<vmem>>, vector<1x32x64xbf16>
    %153 = vector.shape_cast %152 : vector<1x32x64xbf16> to vector<32x64xbf16>
    %c0_61 = arith.constant 0 : index
    %c0_62 = arith.constant 0 : index
    %c0_63 = arith.constant 0 : index
    %154 = vector.load %arg10[%c0_61, %c0_62, %c0_63] : memref<2x1x32xf32, #tpu.memory_space<vmem>>, vector<1x1x32xf32>
    %155 = vector.shape_cast %154 : vector<1x1x32xf32> to vector<1x32xf32>
    %c0_64 = arith.constant 0 : index
    %c0_65 = arith.constant 0 : index
    %c0_66 = arith.constant 0 : index
    %156 = vector.load %arg13[%c0_64, %c0_65, %c0_66] : memref<2x1x32xf32, #tpu.memory_space<vmem>>, vector<1x1x32xf32>
    %157 = vector.shape_cast %156 : vector<1x1x32xf32> to vector<1x32xf32>
    %c0_67 = arith.constant 0 : index
    %c0_68 = arith.constant 0 : index
    %c0_69 = arith.constant 0 : index
    %158 = vector.load %arg14[%c0_67, %c0_68, %c0_69] : memref<2x1x32xf32, #tpu.memory_space<vmem>>, vector<1x1x32xf32>
    %159 = vector.shape_cast %158 : vector<1x1x32xf32> to vector<1x32xf32>
    %160 = arith.truncf %147 : vector<10x32xf32> to vector<10x32xbf16>
    %cst_70 = arith.constant dense<0.000000e+00> : vector<10x64xf32>
    %161 = tpu.matmul %160, %149, %cst_70 {dimension_numbers = #tpu.dot_dimension_numbers<[1], [1], [0], [0], [0, 0, 1, 0], [], []>} : vector<10x32xbf16>, vector<64x32xbf16>, vector<10x64xf32> -> vector<10x64xf32>
    %162 = vector.broadcast %151 : vector<1x64xf32> to vector<10x64xf32>
    %163 = arith.addf %161, %162 : vector<10x64xf32>
    %cst_71 = arith.constant 0.000000e+00 : f32
    %164 = vector.broadcast %cst_71 : f32 to vector<10x64xf32>
    %165 = arith.maximumf %163, %164 : vector<10x64xf32>
    %166 = arith.truncf %165 : vector<10x64xf32> to vector<10x64xbf16>
    %cst_72 = arith.constant dense<0.000000e+00> : vector<10x32xf32>
    %167 = tpu.matmul %166, %153, %cst_72 {dimension_numbers = #tpu.dot_dimension_numbers<[1], [1], [0], [0], [0, 0, 1, 0], [], []>} : vector<10x64xbf16>, vector<32x64xbf16>, vector<10x32xf32> -> vector<10x32xf32>
    %168 = vector.broadcast %155 : vector<1x32xf32> to vector<10x32xf32>
    %169 = arith.addf %167, %168 : vector<10x32xf32>
    %170 = arith.addf %147, %169 : vector<10x32xf32>
    %cst_73 = arith.constant dense<0.000000e+00> : vector<10xf32>
    %171 = vector.multi_reduction <add>, %170, %cst_73 [1] : vector<10x32xf32> to vector<10xf32>
    %172 = vector.shape_cast %171 : vector<10xf32> to vector<10x1xf32>
    %cst_74 = arith.constant 3.200000e+01 : f32
    %173 = vector.broadcast %cst_74 : f32 to vector<10x1xf32>
    %174 = arith.divf %172, %173 : vector<10x1xf32>
    %175 = vector.broadcast %174 : vector<10x1xf32> to vector<10x32xf32>
    %176 = arith.subf %170, %175 : vector<10x32xf32>
    %177 = arith.mulf %176, %176 : vector<10x32xf32>
    %cst_75 = arith.constant dense<0.000000e+00> : vector<10xf32>
    %178 = vector.multi_reduction <add>, %177, %cst_75 [1] : vector<10x32xf32> to vector<10xf32>
    %179 = vector.shape_cast %178 : vector<10xf32> to vector<10x1xf32>
    %cst_76 = arith.constant 3.200000e+01 : f32
    %180 = vector.broadcast %cst_76 : f32 to vector<10x1xf32>
    %181 = arith.divf %179, %180 : vector<10x1xf32>
    %cst_77 = arith.constant 9.99999974E-6 : f32
    %182 = vector.broadcast %cst_77 : f32 to vector<10x1xf32>
    %183 = arith.addf %181, %182 : vector<10x1xf32>
    %184 = math.rsqrt %183 : vector<10x1xf32>
    %185 = vector.broadcast %184 : vector<10x1xf32> to vector<10x32xf32>
    %186 = arith.mulf %176, %185 : vector<10x32xf32>
    %187 = vector.broadcast %157 : vector<1x32xf32> to vector<10x32xf32>
    %188 = arith.mulf %186, %187 : vector<10x32xf32>
    %189 = vector.broadcast %159 : vector<1x32xf32> to vector<10x32xf32>
    %190 = arith.addf %188, %189 : vector<10x32xf32>
    %c1 = arith.constant 1 : index
    %c0_78 = arith.constant 0 : index
    %c0_79 = arith.constant 0 : index
    %191 = vector.load %arg3[%c1, %c0_78, %c0_79] : memref<2x96x32xbf16, #tpu.memory_space<vmem>>, vector<1x96x32xbf16>
    %192 = vector.shape_cast %191 : vector<1x96x32xbf16> to vector<96x32xbf16>
    %c1_80 = arith.constant 1 : index
    %c0_81 = arith.constant 0 : index
    %c0_82 = arith.constant 0 : index
    %193 = vector.load %arg4[%c1_80, %c0_81, %c0_82] : memref<2x1x96xf32, #tpu.memory_space<vmem>>, vector<1x1x96xf32>
    %194 = vector.shape_cast %193 : vector<1x1x96xf32> to vector<1x96xf32>
    %c1_83 = arith.constant 1 : index
    %c0_84 = arith.constant 0 : index
    %c0_85 = arith.constant 0 : index
    %195 = vector.load %arg5[%c1_83, %c0_84, %c0_85] : memref<2x32x32xbf16, #tpu.memory_space<vmem>>, vector<1x32x32xbf16>
    %196 = vector.shape_cast %195 : vector<1x32x32xbf16> to vector<32x32xbf16>
    %c1_86 = arith.constant 1 : index
    %c0_87 = arith.constant 0 : index
    %c0_88 = arith.constant 0 : index
    %197 = vector.load %arg6[%c1_86, %c0_87, %c0_88] : memref<2x1x32xf32, #tpu.memory_space<vmem>>, vector<1x1x32xf32>
    %198 = vector.shape_cast %197 : vector<1x1x32xf32> to vector<1x32xf32>
    %c1_89 = arith.constant 1 : index
    %c0_90 = arith.constant 0 : index
    %c0_91 = arith.constant 0 : index
    %199 = vector.load %arg11[%c1_89, %c0_90, %c0_91] : memref<2x1x32xf32, #tpu.memory_space<vmem>>, vector<1x1x32xf32>
    %200 = vector.shape_cast %199 : vector<1x1x32xf32> to vector<1x32xf32>
    %c1_92 = arith.constant 1 : index
    %c0_93 = arith.constant 0 : index
    %c0_94 = arith.constant 0 : index
    %201 = vector.load %arg12[%c1_92, %c0_93, %c0_94] : memref<2x1x32xf32, #tpu.memory_space<vmem>>, vector<1x1x32xf32>
    %202 = vector.shape_cast %201 : vector<1x1x32xf32> to vector<1x32xf32>
    %203 = arith.truncf %190 : vector<10x32xf32> to vector<10x32xbf16>
    %204 = arith.truncf %190 : vector<10x32xf32> to vector<10x32xbf16>
    %205 = vector.extract_strided_slice %192 {offsets = [0, 0], sizes = [32, 32], strides = [1, 1]} : vector<96x32xbf16> to vector<32x32xbf16>
    %cst_95 = arith.constant dense<0.000000e+00> : vector<10x32xf32>
    %206 = tpu.matmul %203, %205, %cst_95 {dimension_numbers = #tpu.dot_dimension_numbers<[1], [1], [0], [0], [0, 0, 1, 0], [], []>} : vector<10x32xbf16>, vector<32x32xbf16>, vector<10x32xf32> -> vector<10x32xf32>
    %207 = vector.extract_strided_slice %194 {offsets = [0, 0], sizes = [1, 32], strides = [1, 1]} : vector<1x96xf32> to vector<1x32xf32>
    %208 = vector.broadcast %207 : vector<1x32xf32> to vector<10x32xf32>
    %209 = arith.addf %206, %208 : vector<10x32xf32>
    %210 = vector.extract_strided_slice %192 {offsets = [32, 0], sizes = [32, 32], strides = [1, 1]} : vector<96x32xbf16> to vector<32x32xbf16>
    %cst_96 = arith.constant dense<0.000000e+00> : vector<10x32xf32>
    %211 = tpu.matmul %204, %210, %cst_96 {dimension_numbers = #tpu.dot_dimension_numbers<[1], [1], [0], [0], [0, 0, 1, 0], [], []>} : vector<10x32xbf16>, vector<32x32xbf16>, vector<10x32xf32> -> vector<10x32xf32>
    %212 = vector.extract_strided_slice %194 {offsets = [0, 32], sizes = [1, 32], strides = [1, 1]} : vector<1x96xf32> to vector<1x32xf32>
    %213 = vector.broadcast %212 : vector<1x32xf32> to vector<10x32xf32>
    %214 = arith.addf %211, %213 : vector<10x32xf32>
    %215 = vector.extract_strided_slice %192 {offsets = [64, 0], sizes = [32, 32], strides = [1, 1]} : vector<96x32xbf16> to vector<32x32xbf16>
    %cst_97 = arith.constant dense<0.000000e+00> : vector<10x32xf32>
    %216 = tpu.matmul %204, %215, %cst_97 {dimension_numbers = #tpu.dot_dimension_numbers<[1], [1], [0], [0], [0, 0, 1, 0], [], []>} : vector<10x32xbf16>, vector<32x32xbf16>, vector<10x32xf32> -> vector<10x32xf32>
    %217 = vector.extract_strided_slice %194 {offsets = [0, 64], sizes = [1, 32], strides = [1, 1]} : vector<1x96xf32> to vector<1x32xf32>
    %218 = vector.broadcast %217 : vector<1x32xf32> to vector<10x32xf32>
    %219 = arith.addf %216, %218 : vector<10x32xf32>
    %cst_98 = arith.constant 0.353553385 : f32
    %220 = vector.broadcast %cst_98 : f32 to vector<10x32xf32>
    %221 = arith.mulf %209, %220 : vector<10x32xf32>
    %222 = arith.truncf %221 : vector<10x32xf32> to vector<10x32xbf16>
    %223 = arith.truncf %214 : vector<10x32xf32> to vector<10x32xbf16>
    %224 = arith.truncf %219 : vector<10x32xf32> to vector<10x32xbf16>
    %cst_99 = arith.constant 0.000000e+00 : f32
    %225 = vector.broadcast %cst_99 : f32 to vector<10x32xf32>
    %226 = vector.extract_strided_slice %222 {offsets = [0, 0], sizes = [10, 8], strides = [1, 1]} : vector<10x32xbf16> to vector<10x8xbf16>
    %227 = vector.extract_strided_slice %223 {offsets = [0, 0], sizes = [10, 8], strides = [1, 1]} : vector<10x32xbf16> to vector<10x8xbf16>
    %cst_100 = arith.constant dense<0.000000e+00> : vector<10x10xf32>
    %228 = tpu.matmul %226, %227, %cst_100 {dimension_numbers = #tpu.dot_dimension_numbers<[1], [1], [0], [0], [0, 0, 1, 0], [], []>} : vector<10x8xbf16>, vector<10x8xbf16>, vector<10x10xf32> -> vector<10x10xf32>
    %229 = arith.addf %228, %5 : vector<10x10xf32>
    %cst_101 = arith.constant dense<0xFF800000> : vector<10xf32>
    %230 = vector.multi_reduction <maximumf>, %229, %cst_101 [1] : vector<10x10xf32> to vector<10xf32>
    %231 = vector.shape_cast %230 : vector<10xf32> to vector<10x1xf32>
    %232 = vector.broadcast %231 : vector<10x1xf32> to vector<10x10xf32>
    %233 = arith.subf %229, %232 : vector<10x10xf32>
    %234 = math.exp %233 : vector<10x10xf32>
    %cst_102 = arith.constant dense<0.000000e+00> : vector<10xf32>
    %235 = vector.multi_reduction <add>, %234, %cst_102 [1] : vector<10x10xf32> to vector<10xf32>
    %236 = vector.shape_cast %235 : vector<10xf32> to vector<10x1xf32>
    %237 = tpu.reciprocal %236 {approx = true} : vector<10x1xf32> -> vector<10x1xf32>
    %238 = vector.broadcast %237 : vector<10x1xf32> to vector<10x10xf32>
    %239 = arith.mulf %234, %238 : vector<10x10xf32>
    %240 = arith.truncf %239 : vector<10x10xf32> to vector<10x10xbf16>
    %241 = vector.extract_strided_slice %224 {offsets = [0, 0], sizes = [10, 8], strides = [1, 1]} : vector<10x32xbf16> to vector<10x8xbf16>
    %cst_103 = arith.constant dense<0.000000e+00> : vector<10x8xf32>
    %242 = tpu.matmul %240, %241, %cst_103 {dimension_numbers = #tpu.dot_dimension_numbers<[1], [0], [0], [1], [0, 0, 1, 1], [], []>} : vector<10x10xbf16>, vector<10x8xbf16>, vector<10x8xf32> -> vector<10x8xf32>
    %243 = arith.truncf %242 : vector<10x8xf32> to vector<10x8xbf16>
    %244 = vector.extract_strided_slice %196 {offsets = [0, 0], sizes = [32, 8], strides = [1, 1]} : vector<32x32xbf16> to vector<32x8xbf16>
    %cst_104 = arith.constant dense<0.000000e+00> : vector<10x32xf32>
    %245 = tpu.matmul %243, %244, %cst_104 {dimension_numbers = #tpu.dot_dimension_numbers<[1], [1], [0], [0], [0, 0, 1, 0], [], []>} : vector<10x8xbf16>, vector<32x8xbf16>, vector<10x32xf32> -> vector<10x32xf32>
    %246 = arith.addf %225, %245 : vector<10x32xf32>
    %247 = vector.extract_strided_slice %222 {offsets = [0, 8], sizes = [10, 8], strides = [1, 1]} : vector<10x32xbf16> to vector<10x8xbf16>
    %248 = vector.extract_strided_slice %223 {offsets = [0, 8], sizes = [10, 8], strides = [1, 1]} : vector<10x32xbf16> to vector<10x8xbf16>
    %cst_105 = arith.constant dense<0.000000e+00> : vector<10x10xf32>
    %249 = tpu.matmul %247, %248, %cst_105 {dimension_numbers = #tpu.dot_dimension_numbers<[1], [1], [0], [0], [0, 0, 1, 0], [], []>} : vector<10x8xbf16>, vector<10x8xbf16>, vector<10x10xf32> -> vector<10x10xf32>
    %250 = arith.addf %249, %5 : vector<10x10xf32>
    %cst_106 = arith.constant dense<0xFF800000> : vector<10xf32>
    %251 = vector.multi_reduction <maximumf>, %250, %cst_106 [1] : vector<10x10xf32> to vector<10xf32>
    %252 = vector.shape_cast %251 : vector<10xf32> to vector<10x1xf32>
    %253 = vector.broadcast %252 : vector<10x1xf32> to vector<10x10xf32>
    %254 = arith.subf %250, %253 : vector<10x10xf32>
    %255 = math.exp %254 : vector<10x10xf32>
    %cst_107 = arith.constant dense<0.000000e+00> : vector<10xf32>
    %256 = vector.multi_reduction <add>, %255, %cst_107 [1] : vector<10x10xf32> to vector<10xf32>
    %257 = vector.shape_cast %256 : vector<10xf32> to vector<10x1xf32>
    %258 = tpu.reciprocal %257 {approx = true} : vector<10x1xf32> -> vector<10x1xf32>
    %259 = vector.broadcast %258 : vector<10x1xf32> to vector<10x10xf32>
    %260 = arith.mulf %255, %259 : vector<10x10xf32>
    %261 = arith.truncf %260 : vector<10x10xf32> to vector<10x10xbf16>
    %262 = vector.extract_strided_slice %224 {offsets = [0, 8], sizes = [10, 8], strides = [1, 1]} : vector<10x32xbf16> to vector<10x8xbf16>
    %cst_108 = arith.constant dense<0.000000e+00> : vector<10x8xf32>
    %263 = tpu.matmul %261, %262, %cst_108 {dimension_numbers = #tpu.dot_dimension_numbers<[1], [0], [0], [1], [0, 0, 1, 1], [], []>} : vector<10x10xbf16>, vector<10x8xbf16>, vector<10x8xf32> -> vector<10x8xf32>
    %264 = arith.truncf %263 : vector<10x8xf32> to vector<10x8xbf16>
    %265 = vector.extract_strided_slice %196 {offsets = [0, 8], sizes = [32, 8], strides = [1, 1]} : vector<32x32xbf16> to vector<32x8xbf16>
    %cst_109 = arith.constant dense<0.000000e+00> : vector<10x32xf32>
    %266 = tpu.matmul %264, %265, %cst_109 {dimension_numbers = #tpu.dot_dimension_numbers<[1], [1], [0], [0], [0, 0, 1, 0], [], []>} : vector<10x8xbf16>, vector<32x8xbf16>, vector<10x32xf32> -> vector<10x32xf32>
    %267 = arith.addf %246, %266 : vector<10x32xf32>
    %268 = vector.extract_strided_slice %222 {offsets = [0, 16], sizes = [10, 8], strides = [1, 1]} : vector<10x32xbf16> to vector<10x8xbf16>
    %269 = vector.extract_strided_slice %223 {offsets = [0, 16], sizes = [10, 8], strides = [1, 1]} : vector<10x32xbf16> to vector<10x8xbf16>
    %cst_110 = arith.constant dense<0.000000e+00> : vector<10x10xf32>
    %270 = tpu.matmul %268, %269, %cst_110 {dimension_numbers = #tpu.dot_dimension_numbers<[1], [1], [0], [0], [0, 0, 1, 0], [], []>} : vector<10x8xbf16>, vector<10x8xbf16>, vector<10x10xf32> -> vector<10x10xf32>
    %271 = arith.addf %270, %5 : vector<10x10xf32>
    %cst_111 = arith.constant dense<0xFF800000> : vector<10xf32>
    %272 = vector.multi_reduction <maximumf>, %271, %cst_111 [1] : vector<10x10xf32> to vector<10xf32>
    %273 = vector.shape_cast %272 : vector<10xf32> to vector<10x1xf32>
    %274 = vector.broadcast %273 : vector<10x1xf32> to vector<10x10xf32>
    %275 = arith.subf %271, %274 : vector<10x10xf32>
    %276 = math.exp %275 : vector<10x10xf32>
    %cst_112 = arith.constant dense<0.000000e+00> : vector<10xf32>
    %277 = vector.multi_reduction <add>, %276, %cst_112 [1] : vector<10x10xf32> to vector<10xf32>
    %278 = vector.shape_cast %277 : vector<10xf32> to vector<10x1xf32>
    %279 = tpu.reciprocal %278 {approx = true} : vector<10x1xf32> -> vector<10x1xf32>
    %280 = vector.broadcast %279 : vector<10x1xf32> to vector<10x10xf32>
    %281 = arith.mulf %276, %280 : vector<10x10xf32>
    %282 = arith.truncf %281 : vector<10x10xf32> to vector<10x10xbf16>
    %283 = vector.extract_strided_slice %224 {offsets = [0, 16], sizes = [10, 8], strides = [1, 1]} : vector<10x32xbf16> to vector<10x8xbf16>
    %cst_113 = arith.constant dense<0.000000e+00> : vector<10x8xf32>
    %284 = tpu.matmul %282, %283, %cst_113 {dimension_numbers = #tpu.dot_dimension_numbers<[1], [0], [0], [1], [0, 0, 1, 1], [], []>} : vector<10x10xbf16>, vector<10x8xbf16>, vector<10x8xf32> -> vector<10x8xf32>
    %285 = arith.truncf %284 : vector<10x8xf32> to vector<10x8xbf16>
    %286 = vector.extract_strided_slice %196 {offsets = [0, 16], sizes = [32, 8], strides = [1, 1]} : vector<32x32xbf16> to vector<32x8xbf16>
    %cst_114 = arith.constant dense<0.000000e+00> : vector<10x32xf32>
    %287 = tpu.matmul %285, %286, %cst_114 {dimension_numbers = #tpu.dot_dimension_numbers<[1], [1], [0], [0], [0, 0, 1, 0], [], []>} : vector<10x8xbf16>, vector<32x8xbf16>, vector<10x32xf32> -> vector<10x32xf32>
    %288 = arith.addf %267, %287 : vector<10x32xf32>
    %289 = vector.extract_strided_slice %222 {offsets = [0, 24], sizes = [10, 8], strides = [1, 1]} : vector<10x32xbf16> to vector<10x8xbf16>
    %290 = vector.extract_strided_slice %223 {offsets = [0, 24], sizes = [10, 8], strides = [1, 1]} : vector<10x32xbf16> to vector<10x8xbf16>
    %cst_115 = arith.constant dense<0.000000e+00> : vector<10x10xf32>
    %291 = tpu.matmul %289, %290, %cst_115 {dimension_numbers = #tpu.dot_dimension_numbers<[1], [1], [0], [0], [0, 0, 1, 0], [], []>} : vector<10x8xbf16>, vector<10x8xbf16>, vector<10x10xf32> -> vector<10x10xf32>
    %292 = arith.addf %291, %5 : vector<10x10xf32>
    %cst_116 = arith.constant dense<0xFF800000> : vector<10xf32>
    %293 = vector.multi_reduction <maximumf>, %292, %cst_116 [1] : vector<10x10xf32> to vector<10xf32>
    %294 = vector.shape_cast %293 : vector<10xf32> to vector<10x1xf32>
    %295 = vector.broadcast %294 : vector<10x1xf32> to vector<10x10xf32>
    %296 = arith.subf %292, %295 : vector<10x10xf32>
    %297 = math.exp %296 : vector<10x10xf32>
    %cst_117 = arith.constant dense<0.000000e+00> : vector<10xf32>
    %298 = vector.multi_reduction <add>, %297, %cst_117 [1] : vector<10x10xf32> to vector<10xf32>
    %299 = vector.shape_cast %298 : vector<10xf32> to vector<10x1xf32>
    %300 = tpu.reciprocal %299 {approx = true} : vector<10x1xf32> -> vector<10x1xf32>
    %301 = vector.broadcast %300 : vector<10x1xf32> to vector<10x10xf32>
    %302 = arith.mulf %297, %301 : vector<10x10xf32>
    %303 = arith.truncf %302 : vector<10x10xf32> to vector<10x10xbf16>
    %304 = vector.extract_strided_slice %224 {offsets = [0, 24], sizes = [10, 8], strides = [1, 1]} : vector<10x32xbf16> to vector<10x8xbf16>
    %cst_118 = arith.constant dense<0.000000e+00> : vector<10x8xf32>
    %305 = tpu.matmul %303, %304, %cst_118 {dimension_numbers = #tpu.dot_dimension_numbers<[1], [0], [0], [1], [0, 0, 1, 1], [], []>} : vector<10x10xbf16>, vector<10x8xbf16>, vector<10x8xf32> -> vector<10x8xf32>
    %306 = arith.truncf %305 : vector<10x8xf32> to vector<10x8xbf16>
    %307 = vector.extract_strided_slice %196 {offsets = [0, 24], sizes = [32, 8], strides = [1, 1]} : vector<32x32xbf16> to vector<32x8xbf16>
    %cst_119 = arith.constant dense<0.000000e+00> : vector<10x32xf32>
    %308 = tpu.matmul %306, %307, %cst_119 {dimension_numbers = #tpu.dot_dimension_numbers<[1], [1], [0], [0], [0, 0, 1, 0], [], []>} : vector<10x8xbf16>, vector<32x8xbf16>, vector<10x32xf32> -> vector<10x32xf32>
    %309 = arith.addf %288, %308 : vector<10x32xf32>
    %310 = arith.addf %190, %309 : vector<10x32xf32>
    %311 = vector.broadcast %198 : vector<1x32xf32> to vector<10x32xf32>
    %312 = arith.addf %310, %311 : vector<10x32xf32>
    %cst_120 = arith.constant dense<0.000000e+00> : vector<10xf32>
    %313 = vector.multi_reduction <add>, %312, %cst_120 [1] : vector<10x32xf32> to vector<10xf32>
    %314 = vector.shape_cast %313 : vector<10xf32> to vector<10x1xf32>
    %cst_121 = arith.constant 3.200000e+01 : f32
    %315 = vector.broadcast %cst_121 : f32 to vector<10x1xf32>
    %316 = arith.divf %314, %315 : vector<10x1xf32>
    %317 = vector.broadcast %316 : vector<10x1xf32> to vector<10x32xf32>
    %318 = arith.subf %312, %317 : vector<10x32xf32>
    %319 = arith.mulf %318, %318 : vector<10x32xf32>
    %cst_122 = arith.constant dense<0.000000e+00> : vector<10xf32>
    %320 = vector.multi_reduction <add>, %319, %cst_122 [1] : vector<10x32xf32> to vector<10xf32>
    %321 = vector.shape_cast %320 : vector<10xf32> to vector<10x1xf32>
    %cst_123 = arith.constant 3.200000e+01 : f32
    %322 = vector.broadcast %cst_123 : f32 to vector<10x1xf32>
    %323 = arith.divf %321, %322 : vector<10x1xf32>
    %cst_124 = arith.constant 9.99999974E-6 : f32
    %324 = vector.broadcast %cst_124 : f32 to vector<10x1xf32>
    %325 = arith.addf %323, %324 : vector<10x1xf32>
    %326 = math.rsqrt %325 : vector<10x1xf32>
    %327 = vector.broadcast %326 : vector<10x1xf32> to vector<10x32xf32>
    %328 = arith.mulf %318, %327 : vector<10x32xf32>
    %329 = vector.broadcast %200 : vector<1x32xf32> to vector<10x32xf32>
    %330 = arith.mulf %328, %329 : vector<10x32xf32>
    %331 = vector.broadcast %202 : vector<1x32xf32> to vector<10x32xf32>
    %332 = arith.addf %330, %331 : vector<10x32xf32>
    %c1_125 = arith.constant 1 : index
    %c0_126 = arith.constant 0 : index
    %c0_127 = arith.constant 0 : index
    %333 = vector.load %arg7[%c1_125, %c0_126, %c0_127] : memref<2x64x32xbf16, #tpu.memory_space<vmem>>, vector<1x64x32xbf16>
    %334 = vector.shape_cast %333 : vector<1x64x32xbf16> to vector<64x32xbf16>
    %c1_128 = arith.constant 1 : index
    %c0_129 = arith.constant 0 : index
    %c0_130 = arith.constant 0 : index
    %335 = vector.load %arg8[%c1_128, %c0_129, %c0_130] : memref<2x1x64xf32, #tpu.memory_space<vmem>>, vector<1x1x64xf32>
    %336 = vector.shape_cast %335 : vector<1x1x64xf32> to vector<1x64xf32>
    %c1_131 = arith.constant 1 : index
    %c0_132 = arith.constant 0 : index
    %c0_133 = arith.constant 0 : index
    %337 = vector.load %arg9[%c1_131, %c0_132, %c0_133] : memref<2x32x64xbf16, #tpu.memory_space<vmem>>, vector<1x32x64xbf16>
    %338 = vector.shape_cast %337 : vector<1x32x64xbf16> to vector<32x64xbf16>
    %c1_134 = arith.constant 1 : index
    %c0_135 = arith.constant 0 : index
    %c0_136 = arith.constant 0 : index
    %339 = vector.load %arg10[%c1_134, %c0_135, %c0_136] : memref<2x1x32xf32, #tpu.memory_space<vmem>>, vector<1x1x32xf32>
    %340 = vector.shape_cast %339 : vector<1x1x32xf32> to vector<1x32xf32>
    %c1_137 = arith.constant 1 : index
    %c0_138 = arith.constant 0 : index
    %c0_139 = arith.constant 0 : index
    %341 = vector.load %arg13[%c1_137, %c0_138, %c0_139] : memref<2x1x32xf32, #tpu.memory_space<vmem>>, vector<1x1x32xf32>
    %342 = vector.shape_cast %341 : vector<1x1x32xf32> to vector<1x32xf32>
    %c1_140 = arith.constant 1 : index
    %c0_141 = arith.constant 0 : index
    %c0_142 = arith.constant 0 : index
    %343 = vector.load %arg14[%c1_140, %c0_141, %c0_142] : memref<2x1x32xf32, #tpu.memory_space<vmem>>, vector<1x1x32xf32>
    %344 = vector.shape_cast %343 : vector<1x1x32xf32> to vector<1x32xf32>
    %345 = arith.truncf %332 : vector<10x32xf32> to vector<10x32xbf16>
    %cst_143 = arith.constant dense<0.000000e+00> : vector<10x64xf32>
    %346 = tpu.matmul %345, %334, %cst_143 {dimension_numbers = #tpu.dot_dimension_numbers<[1], [1], [0], [0], [0, 0, 1, 0], [], []>} : vector<10x32xbf16>, vector<64x32xbf16>, vector<10x64xf32> -> vector<10x64xf32>
    %347 = vector.broadcast %336 : vector<1x64xf32> to vector<10x64xf32>
    %348 = arith.addf %346, %347 : vector<10x64xf32>
    %cst_144 = arith.constant 0.000000e+00 : f32
    %349 = vector.broadcast %cst_144 : f32 to vector<10x64xf32>
    %350 = arith.maximumf %348, %349 : vector<10x64xf32>
    %351 = arith.truncf %350 : vector<10x64xf32> to vector<10x64xbf16>
    %cst_145 = arith.constant dense<0.000000e+00> : vector<10x32xf32>
    %352 = tpu.matmul %351, %338, %cst_145 {dimension_numbers = #tpu.dot_dimension_numbers<[1], [1], [0], [0], [0, 0, 1, 0], [], []>} : vector<10x64xbf16>, vector<32x64xbf16>, vector<10x32xf32> -> vector<10x32xf32>
    %353 = vector.broadcast %340 : vector<1x32xf32> to vector<10x32xf32>
    %354 = arith.addf %352, %353 : vector<10x32xf32>
    %355 = arith.addf %332, %354 : vector<10x32xf32>
    %cst_146 = arith.constant dense<0.000000e+00> : vector<10xf32>
    %356 = vector.multi_reduction <add>, %355, %cst_146 [1] : vector<10x32xf32> to vector<10xf32>
    %357 = vector.shape_cast %356 : vector<10xf32> to vector<10x1xf32>
    %cst_147 = arith.constant 3.200000e+01 : f32
    %358 = vector.broadcast %cst_147 : f32 to vector<10x1xf32>
    %359 = arith.divf %357, %358 : vector<10x1xf32>
    %360 = vector.broadcast %359 : vector<10x1xf32> to vector<10x32xf32>
    %361 = arith.subf %355, %360 : vector<10x32xf32>
    %362 = arith.mulf %361, %361 : vector<10x32xf32>
    %cst_148 = arith.constant dense<0.000000e+00> : vector<10xf32>
    %363 = vector.multi_reduction <add>, %362, %cst_148 [1] : vector<10x32xf32> to vector<10xf32>
    %364 = vector.shape_cast %363 : vector<10xf32> to vector<10x1xf32>
    %cst_149 = arith.constant 3.200000e+01 : f32
    %365 = vector.broadcast %cst_149 : f32 to vector<10x1xf32>
    %366 = arith.divf %364, %365 : vector<10x1xf32>
    %cst_150 = arith.constant 9.99999974E-6 : f32
    %367 = vector.broadcast %cst_150 : f32 to vector<10x1xf32>
    %368 = arith.addf %366, %367 : vector<10x1xf32>
    %369 = math.rsqrt %368 : vector<10x1xf32>
    %370 = vector.broadcast %369 : vector<10x1xf32> to vector<10x32xf32>
    %371 = arith.mulf %361, %370 : vector<10x32xf32>
    %372 = vector.broadcast %342 : vector<1x32xf32> to vector<10x32xf32>
    %373 = arith.mulf %371, %372 : vector<10x32xf32>
    %374 = vector.broadcast %344 : vector<1x32xf32> to vector<10x32xf32>
    %375 = arith.addf %373, %374 : vector<10x32xf32>
    %c0_151 = arith.constant 0 : index
    %c0_152 = arith.constant 0 : index
    %376 = vector.load %arg15[%c0_151, %c0_152] : memref<1x32xf32, #tpu.memory_space<vmem>>, vector<1x32xf32>
    %c0_153 = arith.constant 0 : index
    %c0_154 = arith.constant 0 : index
    %377 = vector.load %arg16[%c0_153, %c0_154] : memref<1x32xf32, #tpu.memory_space<vmem>>, vector<1x32xf32>
    %cst_155 = arith.constant dense<0.000000e+00> : vector<10xf32>
    %378 = vector.multi_reduction <add>, %375, %cst_155 [1] : vector<10x32xf32> to vector<10xf32>
    %379 = vector.shape_cast %378 : vector<10xf32> to vector<10x1xf32>
    %cst_156 = arith.constant 3.200000e+01 : f32
    %380 = vector.broadcast %cst_156 : f32 to vector<10x1xf32>
    %381 = arith.divf %379, %380 : vector<10x1xf32>
    %382 = vector.broadcast %381 : vector<10x1xf32> to vector<10x32xf32>
    %383 = arith.subf %375, %382 : vector<10x32xf32>
    %384 = arith.mulf %383, %383 : vector<10x32xf32>
    %cst_157 = arith.constant dense<0.000000e+00> : vector<10xf32>
    %385 = vector.multi_reduction <add>, %384, %cst_157 [1] : vector<10x32xf32> to vector<10xf32>
    %386 = vector.shape_cast %385 : vector<10xf32> to vector<10x1xf32>
    %cst_158 = arith.constant 3.200000e+01 : f32
    %387 = vector.broadcast %cst_158 : f32 to vector<10x1xf32>
    %388 = arith.divf %386, %387 : vector<10x1xf32>
    %cst_159 = arith.constant 9.99999974E-6 : f32
    %389 = vector.broadcast %cst_159 : f32 to vector<10x1xf32>
    %390 = arith.addf %388, %389 : vector<10x1xf32>
    %391 = math.rsqrt %390 : vector<10x1xf32>
    %392 = vector.broadcast %391 : vector<10x1xf32> to vector<10x32xf32>
    %393 = arith.mulf %383, %392 : vector<10x32xf32>
    %394 = vector.broadcast %376 : vector<1x32xf32> to vector<10x32xf32>
    %395 = arith.mulf %393, %394 : vector<10x32xf32>
    %396 = vector.broadcast %377 : vector<1x32xf32> to vector<10x32xf32>
    %397 = arith.addf %395, %396 : vector<10x32xf32>
    %c0_160 = arith.constant 0 : index
    %c0_161 = arith.constant 0 : index
    %c0_162 = arith.constant 0 : index
    %398 = vector.load %arg17[%c0_160, %c0_161, %c0_162] : memref<1x10x32xf32, #tpu.memory_space<vmem>>, vector<1x10x32xf32>
    %399 = vector.shape_cast %398 : vector<1x10x32xf32> to vector<10x32xf32>
    %400 = vector.shape_cast %397 : vector<10x32xf32> to vector<1x10x32xf32>
    tpu.vector_store %arg17[%c0_160, %c0_161, %c0_162], %400 {strides = array<i32>} : memref<1x10x32xf32, #tpu.memory_space<vmem>>, vector<1x10x32xf32>,
    return
  }
  func.func @transform_0(%arg0: i32) -> (i32, i32, i32) {
    %c0_i32 = arith.constant 0 : i32
    %c0_i32_0 = arith.constant 0 : i32
    %c0_i32_1 = arith.constant 0 : i32
    return %arg0, %c0_i32, %c0_i32_0 : i32, i32, i32
  }
  func.func @transform_1(%arg0: i32) -> (i32, i32, i32) {
    %c0_i32 = arith.constant 0 : i32
    %c0_i32_0 = arith.constant 0 : i32
    %c0_i32_1 = arith.constant 0 : i32
    return %arg0, %c0_i32, %c0_i32_0 : i32, i32, i32
  }
  func.func @transform_2(%arg0: i32) -> (i32, i32, i32) {
    %c0_i32 = arith.constant 0 : i32
    %c0_i32_0 = arith.constant 0 : i32
    %c0_i32_1 = arith.constant 0 : i32
    %c0_i32_2 = arith.constant 0 : i32
    return %c0_i32, %c0_i32_0, %c0_i32_1 : i32, i32, i32
  }
  func.func @transform_3(%arg0: i32) -> (i32, i32, i32) {
    %c0_i32 = arith.constant 0 : i32
    %c0_i32_0 = arith.constant 0 : i32
    %c0_i32_1 = arith.constant 0 : i32
    %c0_i32_2 = arith.constant 0 : i32
    return %c0_i32, %c0_i32_0, %c0_i32_1 : i32, i32, i32
  }
  func.func @transform_4(%arg0: i32) -> (i32, i32, i32) {
    %c0_i32 = arith.constant 0 : i32
    %c0_i32_0 = arith.constant 0 : i32
    %c0_i32_1 = arith.constant 0 : i32
    %c0_i32_2 = arith.constant 0 : i32
    return %c0_i32, %c0_i32_0, %c0_i32_1 : i32, i32, i32
  }
  func.func @transform_5(%arg0: i32) -> (i32, i32, i32) {
    %c0_i32 = arith.constant 0 : i32
    %c0_i32_0 = arith.constant 0 : i32
    %c0_i32_1 = arith.constant 0 : i32
    %c0_i32_2 = arith.constant 0 : i32
    return %c0_i32, %c0_i32_0, %c0_i32_1 : i32, i32, i32
  }
  func.func @transform_6(%arg0: i32) -> (i32, i32, i32) {
    %c0_i32 = arith.constant 0 : i32
    %c0_i32_0 = arith.constant 0 : i32
    %c0_i32_1 = arith.constant 0 : i32
    %c0_i32_2 = arith.constant 0 : i32
    return %c0_i32, %c0_i32_0, %c0_i32_1 : i32, i32, i32
  }
  func.func @transform_7(%arg0: i32) -> (i32, i32, i32) {
    %c0_i32 = arith.constant 0 : i32
    %c0_i32_0 = arith.constant 0 : i32
    %c0_i32_1 = arith.constant 0 : i32
    %c0_i32_2 = arith.constant 0 : i32
    return %c0_i32, %c0_i32_0, %c0_i32_1 : i32, i32, i32
  }
  func.func @transform_8(%arg0: i32) -> (i32, i32, i32) {
    %c0_i32 = arith.constant 0 : i32
    %c0_i32_0 = arith.constant 0 : i32
    %c0_i32_1 = arith.constant 0 : i32
    %c0_i32_2 = arith.constant 0 : i32
    return %c0_i32, %c0_i32_0, %c0_i32_1 : i32, i32, i32
  }
  func.func @transform_9(%arg0: i32) -> (i32, i32, i32) {
    %c0_i32 = arith.constant 0 : i32
    %c0_i32_0 = arith.constant 0 : i32
    %c0_i32_1 = arith.constant 0 : i32
    %c0_i32_2 = arith.constant 0 : i32
    return %c0_i32, %c0_i32_0, %c0_i32_1 : i32, i32, i32
  }
  func.func @transform_10(%arg0: i32) -> (i32, i32, i32) {
    %c0_i32 = arith.constant 0 : i32
    %c0_i32_0 = arith.constant 0 : i32
    %c0_i32_1 = arith.constant 0 : i32
    %c0_i32_2 = arith.constant 0 : i32
    return %c0_i32, %c0_i32_0, %c0_i32_1 : i32, i32, i32
  }
  func.func @transform_11(%arg0: i32) -> (i32, i32, i32) {
    %c0_i32 = arith.constant 0 : i32
    %c0_i32_0 = arith.constant 0 : i32
    %c0_i32_1 = arith.constant 0 : i32
    %c0_i32_2 = arith.constant 0 : i32
    return %c0_i32, %c0_i32_0, %c0_i32_1 : i32, i32, i32
  }
  func.func @transform_12(%arg0: i32) -> (i32, i32, i32) {
    %c0_i32 = arith.constant 0 : i32
    %c0_i32_0 = arith.constant 0 : i32
    %c0_i32_1 = arith.constant 0 : i32
    %c0_i32_2 = arith.constant 0 : i32
    return %c0_i32, %c0_i32_0, %c0_i32_1 : i32, i32, i32
  }
  func.func @transform_13(%arg0: i32) -> (i32, i32, i32) {
    %c0_i32 = arith.constant 0 : i32
    %c0_i32_0 = arith.constant 0 : i32
    %c0_i32_1 = arith.constant 0 : i32
    %c0_i32_2 = arith.constant 0 : i32
    return %c0_i32, %c0_i32_0, %c0_i32_1 : i32, i32, i32
  }
  func.func @transform_14(%arg0: i32) -> (i32, i32) {
    %c0_i32 = arith.constant 0 : i32
    %c0_i32_0 = arith.constant 0 : i32
    %c0_i32_1 = arith.constant 0 : i32
    return %c0_i32, %c0_i32_0 : i32, i32
  }
  func.func @transform_15(%arg0: i32) -> (i32, i32) {
    %c0_i32 = arith.constant 0 : i32
    %c0_i32_0 = arith.constant 0 : i32
    %c0_i32_1 = arith.constant 0 : i32
    return %c0_i32, %c0_i32_0 : i32, i32
  }
  func.func @transform_16(%arg0: i32) -> (i32, i32, i32) {
    %c0_i32 = arith.constant 0 : i32
    %c0_i32_0 = arith.constant 0 : i32
    %c0_i32_1 = arith.constant 0 : i32
    return %arg0, %c0_i32, %c0_i32_0 : i32, i32, i32
  }
}

module attributes {stable_mosaic.version = 11 : i64} {
  func.func @decoder_stack_kernel(%arg0: i32, %arg1: memref<1x8x32xf32, #tpu.memory_space<vmem>>, %arg2: memref<1x10x32xf32, #tpu.memory_space<vmem>>, %arg3: memref<2x96x32xbf16, #tpu.memory_space<vmem>>, %arg4: memref<2x1x96xf32, #tpu.memory_space<vmem>>, %arg5: memref<2x32x32xbf16, #tpu.memory_space<vmem>>, %arg6: memref<2x1x32xf32, #tpu.memory_space<vmem>>, %arg7: memref<2x96x32xbf16, #tpu.memory_space<vmem>>, %arg8: memref<2x1x96xf32, #tpu.memory_space<vmem>>, %arg9: memref<2x32x32xbf16, #tpu.memory_space<vmem>>, %arg10: memref<2x1x32xf32, #tpu.memory_space<vmem>>, %arg11: memref<2x64x32xbf16, #tpu.memory_space<vmem>>, %arg12: memref<2x1x64xf32, #tpu.memory_space<vmem>>, %arg13: memref<2x32x64xbf16, #tpu.memory_space<vmem>>, %arg14: memref<2x1x32xf32, #tpu.memory_space<vmem>>, %arg15: memref<2x1x32xf32, #tpu.memory_space<vmem>>, %arg16: memref<2x1x32xf32, #tpu.memory_space<vmem>>, %arg17: memref<2x1x32xf32, #tpu.memory_space<vmem>>, %arg18: memref<2x1x32xf32, #tpu.memory_space<vmem>>, %arg19: memref<2x1x32xf32, #tpu.memory_space<vmem>>, %arg20: memref<2x1x32xf32, #tpu.memory_space<vmem>>, %arg21: memref<1x32xf32, #tpu.memory_space<vmem>>, %arg22: memref<1x32xf32, #tpu.memory_space<vmem>>, %arg23: memref<128x32xbf16, #tpu.memory_space<vmem>>, %arg24: memref<1x128xf32, #tpu.memory_space<vmem>>, %arg25: memref<1x8x128xf32, #tpu.memory_space<vmem>>) attributes {dimension_semantics = [#tpu.dimension_semantics<parallel>], iteration_bounds = array<i64: 2>, scalar_prefetch = 0 : i64, scratch_operands = 0 : i64, tpu.core_type = #tpu.core_type<tc>, window_params = [{transform_indices = @transform_0, window_bounds = array<i64: 1, 8, 32>}, {transform_indices = @transform_1, window_bounds = array<i64: 1, 10, 32>}, {pipeline_mode = #tpu.pipeline_mode<synchronous>, transform_indices = @transform_2, window_bounds = array<i64: 2, 96, 32>}, {pipeline_mode = #tpu.pipeline_mode<synchronous>, transform_indices = @transform_3, window_bounds = array<i64: 2, 1, 96>}, {pipeline_mode = #tpu.pipeline_mode<synchronous>, transform_indices = @transform_4, window_bounds = array<i64: 2, 32, 32>}, {pipeline_mode = #tpu.pipeline_mode<synchronous>, transform_indices = @transform_5, window_bounds = array<i64: 2, 1, 32>}, {pipeline_mode = #tpu.pipeline_mode<synchronous>, transform_indices = @transform_6, window_bounds = array<i64: 2, 96, 32>}, {pipeline_mode = #tpu.pipeline_mode<synchronous>, transform_indices = @transform_7, window_bounds = array<i64: 2, 1, 96>}, {pipeline_mode = #tpu.pipeline_mode<synchronous>, transform_indices = @transform_8, window_bounds = array<i64: 2, 32, 32>}, {pipeline_mode = #tpu.pipeline_mode<synchronous>, transform_indices = @transform_9, window_bounds = array<i64: 2, 1, 32>}, {pipeline_mode = #tpu.pipeline_mode<synchronous>, transform_indices = @transform_10, window_bounds = array<i64: 2, 64, 32>}, {pipeline_mode = #tpu.pipeline_mode<synchronous>, transform_indices = @transform_11, window_bounds = array<i64: 2, 1, 64>}, {pipeline_mode = #tpu.pipeline_mode<synchronous>, transform_indices = @transform_12, window_bounds = array<i64: 2, 32, 64>}, {pipeline_mode = #tpu.pipeline_mode<synchronous>, transform_indices = @transform_13, window_bounds = array<i64: 2, 1, 32>}, {pipeline_mode = #tpu.pipeline_mode<synchronous>, transform_indices = @transform_14, window_bounds = array<i64: 2, 1, 32>}, {pipeline_mode = #tpu.pipeline_mode<synchronous>, transform_indices = @transform_15, window_bounds = array<i64: 2, 1, 32>}, {pipeline_mode = #tpu.pipeline_mode<synchronous>, transform_indices = @transform_16, window_bounds = array<i64: 2, 1, 32>}, {pipeline_mode = #tpu.pipeline_mode<synchronous>, transform_indices = @transform_17, window_bounds = array<i64: 2, 1, 32>}, {pipeline_mode = #tpu.pipeline_mode<synchronous>, transform_indices = @transform_18, window_bounds = array<i64: 2, 1, 32>}, {pipeline_mode = #tpu.pipeline_mode<synchronous>, transform_indices = @transform_19, window_bounds = array<i64: 2, 1, 32>}, {pipeline_mode = #tpu.pipeline_mode<synchronous>, transform_indices = @transform_20, window_bounds = array<i64: 1, 32>}, {pipeline_mode = #tpu.pipeline_mode<synchronous>, transform_indices = @transform_21, window_bounds = array<i64: 1, 32>}, {pipeline_mode = #tpu.pipeline_mode<synchronous>, transform_indices = @transform_22, window_bounds = array<i64: 128, 32>}, {pipeline_mode = #tpu.pipeline_mode<synchronous>, transform_indices = @transform_23, window_bounds = array<i64: 1, 128>}, {transform_indices = @transform_24, window_bounds = array<i64: 1, 8, 128>}]} {
    %c0 = arith.constant 0 : index
    %c0_0 = arith.constant 0 : index
    %c0_1 = arith.constant 0 : index
    %0 = vector.load %arg1[%c0, %c0_0, %c0_1] : memref<1x8x32xf32, #tpu.memory_space<vmem>>, vector<1x8x32xf32>
    %1 = vector.shape_cast %0 : vector<1x8x32xf32> to vector<8x32xf32>
    %c0_2 = arith.constant 0 : index
    %c0_3 = arith.constant 0 : index
    %c0_4 = arith.constant 0 : index
    %2 = vector.load %arg2[%c0_2, %c0_3, %c0_4] : memref<1x10x32xf32, #tpu.memory_space<vmem>>, vector<1x10x32xf32>
    %3 = vector.shape_cast %2 : vector<1x10x32xf32> to vector<10x32xf32>
    %4 = tpu.iota {dimensions = array<i32: 0>} : vector<8x8xi32>
    %5 = tpu.iota {dimensions = array<i32: 1>} : vector<8x8xi32>
    %6 = arith.cmpi sgt, %5, %4 : vector<8x8xi32>
    %cst = arith.constant -1.000000e+09 : f32
    %cst_5 = arith.constant 0.000000e+00 : f32
    %7 = vector.broadcast %cst : f32 to vector<8x8xf32>
    %8 = vector.broadcast %cst_5 : f32 to vector<8x8xf32>
    %9 = arith.select %6, %7, %8 : vector<8x8xi1>, vector<8x8xf32>
    %c0_6 = arith.constant 0 : index
    %c0_7 = arith.constant 0 : index
    %c0_8 = arith.constant 0 : index
    %10 = vector.load %arg3[%c0_6, %c0_7, %c0_8] : memref<2x96x32xbf16, #tpu.memory_space<vmem>>, vector<1x96x32xbf16>
    %11 = vector.shape_cast %10 : vector<1x96x32xbf16> to vector<96x32xbf16>
    %c0_9 = arith.constant 0 : index
    %c0_10 = arith.constant 0 : index
    %c0_11 = arith.constant 0 : index
    %12 = vector.load %arg4[%c0_9, %c0_10, %c0_11] : memref<2x1x96xf32, #tpu.memory_space<vmem>>, vector<1x1x96xf32>
    %13 = vector.shape_cast %12 : vector<1x1x96xf32> to vector<1x96xf32>
    %c0_12 = arith.constant 0 : index
    %c0_13 = arith.constant 0 : index
    %c0_14 = arith.constant 0 : index
    %14 = vector.load %arg5[%c0_12, %c0_13, %c0_14] : memref<2x32x32xbf16, #tpu.memory_space<vmem>>, vector<1x32x32xbf16>
    %15 = vector.shape_cast %14 : vector<1x32x32xbf16> to vector<32x32xbf16>
    %c0_15 = arith.constant 0 : index
    %c0_16 = arith.constant 0 : index
    %c0_17 = arith.constant 0 : index
    %16 = vector.load %arg6[%c0_15, %c0_16, %c0_17] : memref<2x1x32xf32, #tpu.memory_space<vmem>>, vector<1x1x32xf32>
    %17 = vector.shape_cast %16 : vector<1x1x32xf32> to vector<1x32xf32>
    %c0_18 = arith.constant 0 : index
    %c0_19 = arith.constant 0 : index
    %c0_20 = arith.constant 0 : index
    %18 = vector.load %arg15[%c0_18, %c0_19, %c0_20] : memref<2x1x32xf32, #tpu.memory_space<vmem>>, vector<1x1x32xf32>
    %19 = vector.shape_cast %18 : vector<1x1x32xf32> to vector<1x32xf32>
    %c0_21 = arith.constant 0 : index
    %c0_22 = arith.constant 0 : index
    %c0_23 = arith.constant 0 : index
    %20 = vector.load %arg16[%c0_21, %c0_22, %c0_23] : memref<2x1x32xf32, #tpu.memory_space<vmem>>, vector<1x1x32xf32>
    %21 = vector.shape_cast %20 : vector<1x1x32xf32> to vector<1x32xf32>
    %22 = arith.truncf %1 : vector<8x32xf32> to vector<8x32xbf16>
    %23 = arith.truncf %1 : vector<8x32xf32> to vector<8x32xbf16>
    %24 = vector.extract_strided_slice %11 {offsets = [0, 0], sizes = [32, 32], strides = [1, 1]} : vector<96x32xbf16> to vector<32x32xbf16>
    %cst_24 = arith.constant dense<0.000000e+00> : vector<8x32xf32>
    %25 = tpu.matmul %22, %24, %cst_24 {dimension_numbers = #tpu.dot_dimension_numbers<[1], [1], [0], [0], [0, 0, 1, 0], [], []>} : vector<8x32xbf16>, vector<32x32xbf16>, vector<8x32xf32> -> vector<8x32xf32>
    %26 = vector.extract_strided_slice %13 {offsets = [0, 0], sizes = [1, 32], strides = [1, 1]} : vector<1x96xf32> to vector<1x32xf32>
    %27 = vector.broadcast %26 : vector<1x32xf32> to vector<8x32xf32>
    %28 = arith.addf %25, %27 : vector<8x32xf32>
    %29 = vector.extract_strided_slice %11 {offsets = [32, 0], sizes = [32, 32], strides = [1, 1]} : vector<96x32xbf16> to vector<32x32xbf16>
    %cst_25 = arith.constant dense<0.000000e+00> : vector<8x32xf32>
    %30 = tpu.matmul %23, %29, %cst_25 {dimension_numbers = #tpu.dot_dimension_numbers<[1], [1], [0], [0], [0, 0, 1, 0], [], []>} : vector<8x32xbf16>, vector<32x32xbf16>, vector<8x32xf32> -> vector<8x32xf32>
    %31 = vector.extract_strided_slice %13 {offsets = [0, 32], sizes = [1, 32], strides = [1, 1]} : vector<1x96xf32> to vector<1x32xf32>
    %32 = vector.broadcast %31 : vector<1x32xf32> to vector<8x32xf32>
    %33 = arith.addf %30, %32 : vector<8x32xf32>
    %34 = vector.extract_strided_slice %11 {offsets = [64, 0], sizes = [32, 32], strides = [1, 1]} : vector<96x32xbf16> to vector<32x32xbf16>
    %cst_26 = arith.constant dense<0.000000e+00> : vector<8x32xf32>
    %35 = tpu.matmul %23, %34, %cst_26 {dimension_numbers = #tpu.dot_dimension_numbers<[1], [1], [0], [0], [0, 0, 1, 0], [], []>} : vector<8x32xbf16>, vector<32x32xbf16>, vector<8x32xf32> -> vector<8x32xf32>
    %36 = vector.extract_strided_slice %13 {offsets = [0, 64], sizes = [1, 32], strides = [1, 1]} : vector<1x96xf32> to vector<1x32xf32>
    %37 = vector.broadcast %36 : vector<1x32xf32> to vector<8x32xf32>
    %38 = arith.addf %35, %37 : vector<8x32xf32>
    %cst_27 = arith.constant 0.353553385 : f32
    %39 = vector.broadcast %cst_27 : f32 to vector<8x32xf32>
    %40 = arith.mulf %28, %39 : vector<8x32xf32>
    %41 = arith.truncf %40 : vector<8x32xf32> to vector<8x32xbf16>
    %42 = arith.truncf %33 : vector<8x32xf32> to vector<8x32xbf16>
    %43 = arith.truncf %38 : vector<8x32xf32> to vector<8x32xbf16>
    %cst_28 = arith.constant 0.000000e+00 : f32
    %44 = vector.broadcast %cst_28 : f32 to vector<8x32xf32>
    %45 = vector.extract_strided_slice %41 {offsets = [0, 0], sizes = [8, 8], strides = [1, 1]} : vector<8x32xbf16> to vector<8x8xbf16>
    %46 = vector.extract_strided_slice %42 {offsets = [0, 0], sizes = [8, 8], strides = [1, 1]} : vector<8x32xbf16> to vector<8x8xbf16>
    %cst_29 = arith.constant dense<0.000000e+00> : vector<8x8xf32>
    %47 = tpu.matmul %45, %46, %cst_29 {dimension_numbers = #tpu.dot_dimension_numbers<[1], [1], [0], [0], [0, 0, 1, 0], [], []>} : vector<8x8xbf16>, vector<8x8xbf16>, vector<8x8xf32> -> vector<8x8xf32>
    %48 = arith.addf %47, %9 : vector<8x8xf32>
    %cst_30 = arith.constant dense<0xFF800000> : vector<8xf32>
    %49 = vector.multi_reduction <maximumf>, %48, %cst_30 [1] : vector<8x8xf32> to vector<8xf32>
    %50 = vector.shape_cast %49 : vector<8xf32> to vector<8x1xf32>
    %51 = vector.broadcast %50 : vector<8x1xf32> to vector<8x8xf32>
    %52 = arith.subf %48, %51 : vector<8x8xf32>
    %53 = math.exp %52 : vector<8x8xf32>
    %cst_31 = arith.constant dense<0.000000e+00> : vector<8xf32>
    %54 = vector.multi_reduction <add>, %53, %cst_31 [1] : vector<8x8xf32> to vector<8xf32>
    %55 = vector.shape_cast %54 : vector<8xf32> to vector<8x1xf32>
    %56 = tpu.reciprocal %55 {approx = true} : vector<8x1xf32> -> vector<8x1xf32>
    %57 = vector.broadcast %56 : vector<8x1xf32> to vector<8x8xf32>
    %58 = arith.mulf %53, %57 : vector<8x8xf32>
    %59 = arith.truncf %58 : vector<8x8xf32> to vector<8x8xbf16>
    %60 = vector.extract_strided_slice %43 {offsets = [0, 0], sizes = [8, 8], strides = [1, 1]} : vector<8x32xbf16> to vector<8x8xbf16>
    %cst_32 = arith.constant dense<0.000000e+00> : vector<8x8xf32>
    %61 = tpu.matmul %59, %60, %cst_32 {dimension_numbers = #tpu.dot_dimension_numbers<[1], [0], [0], [1], [0, 0, 1, 1], [], []>} : vector<8x8xbf16>, vector<8x8xbf16>, vector<8x8xf32> -> vector<8x8xf32>
    %62 = arith.truncf %61 : vector<8x8xf32> to vector<8x8xbf16>
    %63 = vector.extract_strided_slice %15 {offsets = [0, 0], sizes = [32, 8], strides = [1, 1]} : vector<32x32xbf16> to vector<32x8xbf16>
    %cst_33 = arith.constant dense<0.000000e+00> : vector<8x32xf32>
    %64 = tpu.matmul %62, %63, %cst_33 {dimension_numbers = #tpu.dot_dimension_numbers<[1], [1], [0], [0], [0, 0, 1, 0], [], []>} : vector<8x8xbf16>, vector<32x8xbf16>, vector<8x32xf32> -> vector<8x32xf32>
    %65 = arith.addf %44, %64 : vector<8x32xf32>
    %66 = vector.extract_strided_slice %41 {offsets = [0, 8], sizes = [8, 8], strides = [1, 1]} : vector<8x32xbf16> to vector<8x8xbf16>
    %67 = vector.extract_strided_slice %42 {offsets = [0, 8], sizes = [8, 8], strides = [1, 1]} : vector<8x32xbf16> to vector<8x8xbf16>
    %cst_34 = arith.constant dense<0.000000e+00> : vector<8x8xf32>
    %68 = tpu.matmul %66, %67, %cst_34 {dimension_numbers = #tpu.dot_dimension_numbers<[1], [1], [0], [0], [0, 0, 1, 0], [], []>} : vector<8x8xbf16>, vector<8x8xbf16>, vector<8x8xf32> -> vector<8x8xf32>
    %69 = arith.addf %68, %9 : vector<8x8xf32>
    %cst_35 = arith.constant dense<0xFF800000> : vector<8xf32>
    %70 = vector.multi_reduction <maximumf>, %69, %cst_35 [1] : vector<8x8xf32> to vector<8xf32>
    %71 = vector.shape_cast %70 : vector<8xf32> to vector<8x1xf32>
    %72 = vector.broadcast %71 : vector<8x1xf32> to vector<8x8xf32>
    %73 = arith.subf %69, %72 : vector<8x8xf32>
    %74 = math.exp %73 : vector<8x8xf32>
    %cst_36 = arith.constant dense<0.000000e+00> : vector<8xf32>
    %75 = vector.multi_reduction <add>, %74, %cst_36 [1] : vector<8x8xf32> to vector<8xf32>
    %76 = vector.shape_cast %75 : vector<8xf32> to vector<8x1xf32>
    %77 = tpu.reciprocal %76 {approx = true} : vector<8x1xf32> -> vector<8x1xf32>
    %78 = vector.broadcast %77 : vector<8x1xf32> to vector<8x8xf32>
    %79 = arith.mulf %74, %78 : vector<8x8xf32>
    %80 = arith.truncf %79 : vector<8x8xf32> to vector<8x8xbf16>
    %81 = vector.extract_strided_slice %43 {offsets = [0, 8], sizes = [8, 8], strides = [1, 1]} : vector<8x32xbf16> to vector<8x8xbf16>
    %cst_37 = arith.constant dense<0.000000e+00> : vector<8x8xf32>
    %82 = tpu.matmul %80, %81, %cst_37 {dimension_numbers = #tpu.dot_dimension_numbers<[1], [0], [0], [1], [0, 0, 1, 1], [], []>} : vector<8x8xbf16>, vector<8x8xbf16>, vector<8x8xf32> -> vector<8x8xf32>
    %83 = arith.truncf %82 : vector<8x8xf32> to vector<8x8xbf16>
    %84 = vector.extract_strided_slice %15 {offsets = [0, 8], sizes = [32, 8], strides = [1, 1]} : vector<32x32xbf16> to vector<32x8xbf16>
    %cst_38 = arith.constant dense<0.000000e+00> : vector<8x32xf32>
    %85 = tpu.matmul %83, %84, %cst_38 {dimension_numbers = #tpu.dot_dimension_numbers<[1], [1], [0], [0], [0, 0, 1, 0], [], []>} : vector<8x8xbf16>, vector<32x8xbf16>, vector<8x32xf32> -> vector<8x32xf32>
    %86 = arith.addf %65, %85 : vector<8x32xf32>
    %87 = vector.extract_strided_slice %41 {offsets = [0, 16], sizes = [8, 8], strides = [1, 1]} : vector<8x32xbf16> to vector<8x8xbf16>
    %88 = vector.extract_strided_slice %42 {offsets = [0, 16], sizes = [8, 8], strides = [1, 1]} : vector<8x32xbf16> to vector<8x8xbf16>
    %cst_39 = arith.constant dense<0.000000e+00> : vector<8x8xf32>
    %89 = tpu.matmul %87, %88, %cst_39 {dimension_numbers = #tpu.dot_dimension_numbers<[1], [1], [0], [0], [0, 0, 1, 0], [], []>} : vector<8x8xbf16>, vector<8x8xbf16>, vector<8x8xf32> -> vector<8x8xf32>
    %90 = arith.addf %89, %9 : vector<8x8xf32>
    %cst_40 = arith.constant dense<0xFF800000> : vector<8xf32>
    %91 = vector.multi_reduction <maximumf>, %90, %cst_40 [1] : vector<8x8xf32> to vector<8xf32>
    %92 = vector.shape_cast %91 : vector<8xf32> to vector<8x1xf32>
    %93 = vector.broadcast %92 : vector<8x1xf32> to vector<8x8xf32>
    %94 = arith.subf %90, %93 : vector<8x8xf32>
    %95 = math.exp %94 : vector<8x8xf32>
    %cst_41 = arith.constant dense<0.000000e+00> : vector<8xf32>
    %96 = vector.multi_reduction <add>, %95, %cst_41 [1] : vector<8x8xf32> to vector<8xf32>
    %97 = vector.shape_cast %96 : vector<8xf32> to vector<8x1xf32>
    %98 = tpu.reciprocal %97 {approx = true} : vector<8x1xf32> -> vector<8x1xf32>
    %99 = vector.broadcast %98 : vector<8x1xf32> to vector<8x8xf32>
    %100 = arith.mulf %95, %99 : vector<8x8xf32>
    %101 = arith.truncf %100 : vector<8x8xf32> to vector<8x8xbf16>
    %102 = vector.extract_strided_slice %43 {offsets = [0, 16], sizes = [8, 8], strides = [1, 1]} : vector<8x32xbf16> to vector<8x8xbf16>
    %cst_42 = arith.constant dense<0.000000e+00> : vector<8x8xf32>
    %103 = tpu.matmul %101, %102, %cst_42 {dimension_numbers = #tpu.dot_dimension_numbers<[1], [0], [0], [1], [0, 0, 1, 1], [], []>} : vector<8x8xbf16>, vector<8x8xbf16>, vector<8x8xf32> -> vector<8x8xf32>
    %104 = arith.truncf %103 : vector<8x8xf32> to vector<8x8xbf16>
    %105 = vector.extract_strided_slice %15 {offsets = [0, 16], sizes = [32, 8], strides = [1, 1]} : vector<32x32xbf16> to vector<32x8xbf16>
    %cst_43 = arith.constant dense<0.000000e+00> : vector<8x32xf32>
    %106 = tpu.matmul %104, %105, %cst_43 {dimension_numbers = #tpu.dot_dimension_numbers<[1], [1], [0], [0], [0, 0, 1, 0], [], []>} : vector<8x8xbf16>, vector<32x8xbf16>, vector<8x32xf32> -> vector<8x32xf32>
    %107 = arith.addf %86, %106 : vector<8x32xf32>
    %108 = vector.extract_strided_slice %41 {offsets = [0, 24], sizes = [8, 8], strides = [1, 1]} : vector<8x32xbf16> to vector<8x8xbf16>
    %109 = vector.extract_strided_slice %42 {offsets = [0, 24], sizes = [8, 8], strides = [1, 1]} : vector<8x32xbf16> to vector<8x8xbf16>
    %cst_44 = arith.constant dense<0.000000e+00> : vector<8x8xf32>
    %110 = tpu.matmul %108, %109, %cst_44 {dimension_numbers = #tpu.dot_dimension_numbers<[1], [1], [0], [0], [0, 0, 1, 0], [], []>} : vector<8x8xbf16>, vector<8x8xbf16>, vector<8x8xf32> -> vector<8x8xf32>
    %111 = arith.addf %110, %9 : vector<8x8xf32>
    %cst_45 = arith.constant dense<0xFF800000> : vector<8xf32>
    %112 = vector.multi_reduction <maximumf>, %111, %cst_45 [1] : vector<8x8xf32> to vector<8xf32>
    %113 = vector.shape_cast %112 : vector<8xf32> to vector<8x1xf32>
    %114 = vector.broadcast %113 : vector<8x1xf32> to vector<8x8xf32>
    %115 = arith.subf %111, %114 : vector<8x8xf32>
    %116 = math.exp %115 : vector<8x8xf32>
    %cst_46 = arith.constant dense<0.000000e+00> : vector<8xf32>
    %117 = vector.multi_reduction <add>, %116, %cst_46 [1] : vector<8x8xf32> to vector<8xf32>
    %118 = vector.shape_cast %117 : vector<8xf32> to vector<8x1xf32>
    %119 = tpu.reciprocal %118 {approx = true} : vector<8x1xf32> -> vector<8x1xf32>
    %120 = vector.broadcast %119 : vector<8x1xf32> to vector<8x8xf32>
    %121 = arith.mulf %116, %120 : vector<8x8xf32>
    %122 = arith.truncf %121 : vector<8x8xf32> to vector<8x8xbf16>
    %123 = vector.extract_strided_slice %43 {offsets = [0, 24], sizes = [8, 8], strides = [1, 1]} : vector<8x32xbf16> to vector<8x8xbf16>
    %cst_47 = arith.constant dense<0.000000e+00> : vector<8x8xf32>
    %124 = tpu.matmul %122, %123, %cst_47 {dimension_numbers = #tpu.dot_dimension_numbers<[1], [0], [0], [1], [0, 0, 1, 1], [], []>} : vector<8x8xbf16>, vector<8x8xbf16>, vector<8x8xf32> -> vector<8x8xf32>
    %125 = arith.truncf %124 : vector<8x8xf32> to vector<8x8xbf16>
    %126 = vector.extract_strided_slice %15 {offsets = [0, 24], sizes = [32, 8], strides = [1, 1]} : vector<32x32xbf16> to vector<32x8xbf16>
    %cst_48 = arith.constant dense<0.000000e+00> : vector<8x32xf32>
    %127 = tpu.matmul %125, %126, %cst_48 {dimension_numbers = #tpu.dot_dimension_numbers<[1], [1], [0], [0], [0, 0, 1, 0], [], []>} : vector<8x8xbf16>, vector<32x8xbf16>, vector<8x32xf32> -> vector<8x32xf32>
    %128 = arith.addf %107, %127 : vector<8x32xf32>
    %129 = arith.addf %1, %128 : vector<8x32xf32>
    %130 = vector.broadcast %17 : vector<1x32xf32> to vector<8x32xf32>
    %131 = arith.addf %129, %130 : vector<8x32xf32>
    %cst_49 = arith.constant dense<0.000000e+00> : vector<8xf32>
    %132 = vector.multi_reduction <add>, %131, %cst_49 [1] : vector<8x32xf32> to vector<8xf32>
    %133 = vector.shape_cast %132 : vector<8xf32> to vector<8x1xf32>
    %cst_50 = arith.constant 3.200000e+01 : f32
    %134 = vector.broadcast %cst_50 : f32 to vector<8x1xf32>
    %135 = arith.divf %133, %134 : vector<8x1xf32>
    %136 = vector.broadcast %135 : vector<8x1xf32> to vector<8x32xf32>
    %137 = arith.subf %131, %136 : vector<8x32xf32>
    %138 = arith.mulf %137, %137 : vector<8x32xf32>
    %cst_51 = arith.constant dense<0.000000e+00> : vector<8xf32>
    %139 = vector.multi_reduction <add>, %138, %cst_51 [1] : vector<8x32xf32> to vector<8xf32>
    %140 = vector.shape_cast %139 : vector<8xf32> to vector<8x1xf32>
    %cst_52 = arith.constant 3.200000e+01 : f32
    %141 = vector.broadcast %cst_52 : f32 to vector<8x1xf32>
    %142 = arith.divf %140, %141 : vector<8x1xf32>
    %cst_53 = arith.constant 9.99999974E-6 : f32
    %143 = vector.broadcast %cst_53 : f32 to vector<8x1xf32>
    %144 = arith.addf %142, %143 : vector<8x1xf32>
    %145 = math.rsqrt %144 : vector<8x1xf32>
    %146 = vector.broadcast %145 : vector<8x1xf32> to vector<8x32xf32>
    %147 = arith.mulf %137, %146 : vector<8x32xf32>
    %148 = vector.broadcast %19 : vector<1x32xf32> to vector<8x32xf32>
    %149 = arith.mulf %147, %148 : vector<8x32xf32>
    %150 = vector.broadcast %21 : vector<1x32xf32> to vector<8x32xf32>
    %151 = arith.addf %149, %150 : vector<8x32xf32>
    %c0_54 = arith.constant 0 : index
    %c0_55 = arith.constant 0 : index
    %c0_56 = arith.constant 0 : index
    %152 = vector.load %arg7[%c0_54, %c0_55, %c0_56] : memref<2x96x32xbf16, #tpu.memory_space<vmem>>, vector<1x96x32xbf16>
    %153 = vector.shape_cast %152 : vector<1x96x32xbf16> to vector<96x32xbf16>
    %c0_57 = arith.constant 0 : index
    %c0_58 = arith.constant 0 : index
    %c0_59 = arith.constant 0 : index
    %154 = vector.load %arg8[%c0_57, %c0_58, %c0_59] : memref<2x1x96xf32, #tpu.memory_space<vmem>>, vector<1x1x96xf32>
    %155 = vector.shape_cast %154 : vector<1x1x96xf32> to vector<1x96xf32>
    %c0_60 = arith.constant 0 : index
    %c0_61 = arith.constant 0 : index
    %c0_62 = arith.constant 0 : index
    %156 = vector.load %arg9[%c0_60, %c0_61, %c0_62] : memref<2x32x32xbf16, #tpu.memory_space<vmem>>, vector<1x32x32xbf16>
    %157 = vector.shape_cast %156 : vector<1x32x32xbf16> to vector<32x32xbf16>
    %c0_63 = arith.constant 0 : index
    %c0_64 = arith.constant 0 : index
    %c0_65 = arith.constant 0 : index
    %158 = vector.load %arg10[%c0_63, %c0_64, %c0_65] : memref<2x1x32xf32, #tpu.memory_space<vmem>>, vector<1x1x32xf32>
    %159 = vector.shape_cast %158 : vector<1x1x32xf32> to vector<1x32xf32>
    %c0_66 = arith.constant 0 : index
    %c0_67 = arith.constant 0 : index
    %c0_68 = arith.constant 0 : index
    %160 = vector.load %arg17[%c0_66, %c0_67, %c0_68] : memref<2x1x32xf32, #tpu.memory_space<vmem>>, vector<1x1x32xf32>
    %161 = vector.shape_cast %160 : vector<1x1x32xf32> to vector<1x32xf32>
    %c0_69 = arith.constant 0 : index
    %c0_70 = arith.constant 0 : index
    %c0_71 = arith.constant 0 : index
    %162 = vector.load %arg18[%c0_69, %c0_70, %c0_71] : memref<2x1x32xf32, #tpu.memory_space<vmem>>, vector<1x1x32xf32>
    %163 = vector.shape_cast %162 : vector<1x1x32xf32> to vector<1x32xf32>
    %164 = arith.truncf %151 : vector<8x32xf32> to vector<8x32xbf16>
    %165 = arith.truncf %3 : vector<10x32xf32> to vector<10x32xbf16>
    %166 = vector.extract_strided_slice %153 {offsets = [0, 0], sizes = [32, 32], strides = [1, 1]} : vector<96x32xbf16> to vector<32x32xbf16>
    %cst_72 = arith.constant dense<0.000000e+00> : vector<8x32xf32>
    %167 = tpu.matmul %164, %166, %cst_72 {dimension_numbers = #tpu.dot_dimension_numbers<[1], [1], [0], [0], [0, 0, 1, 0], [], []>} : vector<8x32xbf16>, vector<32x32xbf16>, vector<8x32xf32> -> vector<8x32xf32>
    %168 = vector.extract_strided_slice %155 {offsets = [0, 0], sizes = [1, 32], strides = [1, 1]} : vector<1x96xf32> to vector<1x32xf32>
    %169 = vector.broadcast %168 : vector<1x32xf32> to vector<8x32xf32>
    %170 = arith.addf %167, %169 : vector<8x32xf32>
    %171 = vector.extract_strided_slice %153 {offsets = [32, 0], sizes = [32, 32], strides = [1, 1]} : vector<96x32xbf16> to vector<32x32xbf16>
    %cst_73 = arith.constant dense<0.000000e+00> : vector<10x32xf32>
    %172 = tpu.matmul %165, %171, %cst_73 {dimension_numbers = #tpu.dot_dimension_numbers<[1], [1], [0], [0], [0, 0, 1, 0], [], []>} : vector<10x32xbf16>, vector<32x32xbf16>, vector<10x32xf32> -> vector<10x32xf32>
    %173 = vector.extract_strided_slice %155 {offsets = [0, 32], sizes = [1, 32], strides = [1, 1]} : vector<1x96xf32> to vector<1x32xf32>
    %174 = vector.broadcast %173 : vector<1x32xf32> to vector<10x32xf32>
    %175 = arith.addf %172, %174 : vector<10x32xf32>
    %176 = vector.extract_strided_slice %153 {offsets = [64, 0], sizes = [32, 32], strides = [1, 1]} : vector<96x32xbf16> to vector<32x32xbf16>
    %cst_74 = arith.constant dense<0.000000e+00> : vector<10x32xf32>
    %177 = tpu.matmul %165, %176, %cst_74 {dimension_numbers = #tpu.dot_dimension_numbers<[1], [1], [0], [0], [0, 0, 1, 0], [], []>} : vector<10x32xbf16>, vector<32x32xbf16>, vector<10x32xf32> -> vector<10x32xf32>
    %178 = vector.extract_strided_slice %155 {offsets = [0, 64], sizes = [1, 32], strides = [1, 1]} : vector<1x96xf32> to vector<1x32xf32>
    %179 = vector.broadcast %178 : vector<1x32xf32> to vector<10x32xf32>
    %180 = arith.addf %177, %179 : vector<10x32xf32>
    %cst_75 = arith.constant 0.353553385 : f32
    %181 = vector.broadcast %cst_75 : f32 to vector<8x32xf32>
    %182 = arith.mulf %170, %181 : vector<8x32xf32>
    %183 = arith.truncf %182 : vector<8x32xf32> to vector<8x32xbf16>
    %184 = arith.truncf %175 : vector<10x32xf32> to vector<10x32xbf16>
    %185 = arith.truncf %180 : vector<10x32xf32> to vector<10x32xbf16>
    %cst_76 = arith.constant 0.000000e+00 : f32
    %186 = vector.broadcast %cst_76 : f32 to vector<8x32xf32>
    %187 = vector.extract_strided_slice %183 {offsets = [0, 0], sizes = [8, 8], strides = [1, 1]} : vector<8x32xbf16> to vector<8x8xbf16>
    %188 = vector.extract_strided_slice %184 {offsets = [0, 0], sizes = [10, 8], strides = [1, 1]} : vector<10x32xbf16> to vector<10x8xbf16>
    %cst_77 = arith.constant dense<0.000000e+00> : vector<8x10xf32>
    %189 = tpu.matmul %187, %188, %cst_77 {dimension_numbers = #tpu.dot_dimension_numbers<[1], [1], [0], [0], [0, 0, 1, 0], [], []>} : vector<8x8xbf16>, vector<10x8xbf16>, vector<8x10xf32> -> vector<8x10xf32>
    %cst_78 = arith.constant dense<0xFF800000> : vector<8xf32>
    %190 = vector.multi_reduction <maximumf>, %189, %cst_78 [1] : vector<8x10xf32> to vector<8xf32>
    %191 = vector.shape_cast %190 : vector<8xf32> to vector<8x1xf32>
    %192 = vector.broadcast %191 : vector<8x1xf32> to vector<8x10xf32>
    %193 = arith.subf %189, %192 : vector<8x10xf32>
    %194 = math.exp %193 : vector<8x10xf32>
    %cst_79 = arith.constant dense<0.000000e+00> : vector<8xf32>
    %195 = vector.multi_reduction <add>, %194, %cst_79 [1] : vector<8x10xf32> to vector<8xf32>
    %196 = vector.shape_cast %195 : vector<8xf32> to vector<8x1xf32>
    %197 = tpu.reciprocal %196 {approx = true} : vector<8x1xf32> -> vector<8x1xf32>
    %198 = vector.broadcast %197 : vector<8x1xf32> to vector<8x10xf32>
    %199 = arith.mulf %194, %198 : vector<8x10xf32>
    %200 = arith.truncf %199 : vector<8x10xf32> to vector<8x10xbf16>
    %201 = vector.extract_strided_slice %185 {offsets = [0, 0], sizes = [10, 8], strides = [1, 1]} : vector<10x32xbf16> to vector<10x8xbf16>
    %cst_80 = arith.constant dense<0.000000e+00> : vector<8x8xf32>
    %202 = tpu.matmul %200, %201, %cst_80 {dimension_numbers = #tpu.dot_dimension_numbers<[1], [0], [0], [1], [0, 0, 1, 1], [], []>} : vector<8x10xbf16>, vector<10x8xbf16>, vector<8x8xf32> -> vector<8x8xf32>
    %203 = arith.truncf %202 : vector<8x8xf32> to vector<8x8xbf16>
    %204 = vector.extract_strided_slice %157 {offsets = [0, 0], sizes = [32, 8], strides = [1, 1]} : vector<32x32xbf16> to vector<32x8xbf16>
    %cst_81 = arith.constant dense<0.000000e+00> : vector<8x32xf32>
    %205 = tpu.matmul %203, %204, %cst_81 {dimension_numbers = #tpu.dot_dimension_numbers<[1], [1], [0], [0], [0, 0, 1, 0], [], []>} : vector<8x8xbf16>, vector<32x8xbf16>, vector<8x32xf32> -> vector<8x32xf32>
    %206 = arith.addf %186, %205 : vector<8x32xf32>
    %207 = vector.extract_strided_slice %183 {offsets = [0, 8], sizes = [8, 8], strides = [1, 1]} : vector<8x32xbf16> to vector<8x8xbf16>
    %208 = vector.extract_strided_slice %184 {offsets = [0, 8], sizes = [10, 8], strides = [1, 1]} : vector<10x32xbf16> to vector<10x8xbf16>
    %cst_82 = arith.constant dense<0.000000e+00> : vector<8x10xf32>
    %209 = tpu.matmul %207, %208, %cst_82 {dimension_numbers = #tpu.dot_dimension_numbers<[1], [1], [0], [0], [0, 0, 1, 0], [], []>} : vector<8x8xbf16>, vector<10x8xbf16>, vector<8x10xf32> -> vector<8x10xf32>
    %cst_83 = arith.constant dense<0xFF800000> : vector<8xf32>
    %210 = vector.multi_reduction <maximumf>, %209, %cst_83 [1] : vector<8x10xf32> to vector<8xf32>
    %211 = vector.shape_cast %210 : vector<8xf32> to vector<8x1xf32>
    %212 = vector.broadcast %211 : vector<8x1xf32> to vector<8x10xf32>
    %213 = arith.subf %209, %212 : vector<8x10xf32>
    %214 = math.exp %213 : vector<8x10xf32>
    %cst_84 = arith.constant dense<0.000000e+00> : vector<8xf32>
    %215 = vector.multi_reduction <add>, %214, %cst_84 [1] : vector<8x10xf32> to vector<8xf32>
    %216 = vector.shape_cast %215 : vector<8xf32> to vector<8x1xf32>
    %217 = tpu.reciprocal %216 {approx = true} : vector<8x1xf32> -> vector<8x1xf32>
    %218 = vector.broadcast %217 : vector<8x1xf32> to vector<8x10xf32>
    %219 = arith.mulf %214, %218 : vector<8x10xf32>
    %220 = arith.truncf %219 : vector<8x10xf32> to vector<8x10xbf16>
    %221 = vector.extract_strided_slice %185 {offsets = [0, 8], sizes = [10, 8], strides = [1, 1]} : vector<10x32xbf16> to vector<10x8xbf16>
    %cst_85 = arith.constant dense<0.000000e+00> : vector<8x8xf32>
    %222 = tpu.matmul %220, %221, %cst_85 {dimension_numbers = #tpu.dot_dimension_numbers<[1], [0], [0], [1], [0, 0, 1, 1], [], []>} : vector<8x10xbf16>, vector<10x8xbf16>, vector<8x8xf32> -> vector<8x8xf32>
    %223 = arith.truncf %222 : vector<8x8xf32> to vector<8x8xbf16>
    %224 = vector.extract_strided_slice %157 {offsets = [0, 8], sizes = [32, 8], strides = [1, 1]} : vector<32x32xbf16> to vector<32x8xbf16>
    %cst_86 = arith.constant dense<0.000000e+00> : vector<8x32xf32>
    %225 = tpu.matmul %223, %224, %cst_86 {dimension_numbers = #tpu.dot_dimension_numbers<[1], [1], [0], [0], [0, 0, 1, 0], [], []>} : vector<8x8xbf16>, vector<32x8xbf16>, vector<8x32xf32> -> vector<8x32xf32>
    %226 = arith.addf %206, %225 : vector<8x32xf32>
    %227 = vector.extract_strided_slice %183 {offsets = [0, 16], sizes = [8, 8], strides = [1, 1]} : vector<8x32xbf16> to vector<8x8xbf16>
    %228 = vector.extract_strided_slice %184 {offsets = [0, 16], sizes = [10, 8], strides = [1, 1]} : vector<10x32xbf16> to vector<10x8xbf16>
    %cst_87 = arith.constant dense<0.000000e+00> : vector<8x10xf32>
    %229 = tpu.matmul %227, %228, %cst_87 {dimension_numbers = #tpu.dot_dimension_numbers<[1], [1], [0], [0], [0, 0, 1, 0], [], []>} : vector<8x8xbf16>, vector<10x8xbf16>, vector<8x10xf32> -> vector<8x10xf32>
    %cst_88 = arith.constant dense<0xFF800000> : vector<8xf32>
    %230 = vector.multi_reduction <maximumf>, %229, %cst_88 [1] : vector<8x10xf32> to vector<8xf32>
    %231 = vector.shape_cast %230 : vector<8xf32> to vector<8x1xf32>
    %232 = vector.broadcast %231 : vector<8x1xf32> to vector<8x10xf32>
    %233 = arith.subf %229, %232 : vector<8x10xf32>
    %234 = math.exp %233 : vector<8x10xf32>
    %cst_89 = arith.constant dense<0.000000e+00> : vector<8xf32>
    %235 = vector.multi_reduction <add>, %234, %cst_89 [1] : vector<8x10xf32> to vector<8xf32>
    %236 = vector.shape_cast %235 : vector<8xf32> to vector<8x1xf32>
    %237 = tpu.reciprocal %236 {approx = true} : vector<8x1xf32> -> vector<8x1xf32>
    %238 = vector.broadcast %237 : vector<8x1xf32> to vector<8x10xf32>
    %239 = arith.mulf %234, %238 : vector<8x10xf32>
    %240 = arith.truncf %239 : vector<8x10xf32> to vector<8x10xbf16>
    %241 = vector.extract_strided_slice %185 {offsets = [0, 16], sizes = [10, 8], strides = [1, 1]} : vector<10x32xbf16> to vector<10x8xbf16>
    %cst_90 = arith.constant dense<0.000000e+00> : vector<8x8xf32>
    %242 = tpu.matmul %240, %241, %cst_90 {dimension_numbers = #tpu.dot_dimension_numbers<[1], [0], [0], [1], [0, 0, 1, 1], [], []>} : vector<8x10xbf16>, vector<10x8xbf16>, vector<8x8xf32> -> vector<8x8xf32>
    %243 = arith.truncf %242 : vector<8x8xf32> to vector<8x8xbf16>
    %244 = vector.extract_strided_slice %157 {offsets = [0, 16], sizes = [32, 8], strides = [1, 1]} : vector<32x32xbf16> to vector<32x8xbf16>
    %cst_91 = arith.constant dense<0.000000e+00> : vector<8x32xf32>
    %245 = tpu.matmul %243, %244, %cst_91 {dimension_numbers = #tpu.dot_dimension_numbers<[1], [1], [0], [0], [0, 0, 1, 0], [], []>} : vector<8x8xbf16>, vector<32x8xbf16>, vector<8x32xf32> -> vector<8x32xf32>
    %246 = arith.addf %226, %245 : vector<8x32xf32>
    %247 = vector.extract_strided_slice %183 {offsets = [0, 24], sizes = [8, 8], strides = [1, 1]} : vector<8x32xbf16> to vector<8x8xbf16>
    %248 = vector.extract_strided_slice %184 {offsets = [0, 24], sizes = [10, 8], strides = [1, 1]} : vector<10x32xbf16> to vector<10x8xbf16>
    %cst_92 = arith.constant dense<0.000000e+00> : vector<8x10xf32>
    %249 = tpu.matmul %247, %248, %cst_92 {dimension_numbers = #tpu.dot_dimension_numbers<[1], [1], [0], [0], [0, 0, 1, 0], [], []>} : vector<8x8xbf16>, vector<10x8xbf16>, vector<8x10xf32> -> vector<8x10xf32>
    %cst_93 = arith.constant dense<0xFF800000> : vector<8xf32>
    %250 = vector.multi_reduction <maximumf>, %249, %cst_93 [1] : vector<8x10xf32> to vector<8xf32>
    %251 = vector.shape_cast %250 : vector<8xf32> to vector<8x1xf32>
    %252 = vector.broadcast %251 : vector<8x1xf32> to vector<8x10xf32>
    %253 = arith.subf %249, %252 : vector<8x10xf32>
    %254 = math.exp %253 : vector<8x10xf32>
    %cst_94 = arith.constant dense<0.000000e+00> : vector<8xf32>
    %255 = vector.multi_reduction <add>, %254, %cst_94 [1] : vector<8x10xf32> to vector<8xf32>
    %256 = vector.shape_cast %255 : vector<8xf32> to vector<8x1xf32>
    %257 = tpu.reciprocal %256 {approx = true} : vector<8x1xf32> -> vector<8x1xf32>
    %258 = vector.broadcast %257 : vector<8x1xf32> to vector<8x10xf32>
    %259 = arith.mulf %254, %258 : vector<8x10xf32>
    %260 = arith.truncf %259 : vector<8x10xf32> to vector<8x10xbf16>
    %261 = vector.extract_strided_slice %185 {offsets = [0, 24], sizes = [10, 8], strides = [1, 1]} : vector<10x32xbf16> to vector<10x8xbf16>
    %cst_95 = arith.constant dense<0.000000e+00> : vector<8x8xf32>
    %262 = tpu.matmul %260, %261, %cst_95 {dimension_numbers = #tpu.dot_dimension_numbers<[1], [0], [0], [1], [0, 0, 1, 1], [], []>} : vector<8x10xbf16>, vector<10x8xbf16>, vector<8x8xf32> -> vector<8x8xf32>
    %263 = arith.truncf %262 : vector<8x8xf32> to vector<8x8xbf16>
    %264 = vector.extract_strided_slice %157 {offsets = [0, 24], sizes = [32, 8], strides = [1, 1]} : vector<32x32xbf16> to vector<32x8xbf16>
    %cst_96 = arith.constant dense<0.000000e+00> : vector<8x32xf32>
    %265 = tpu.matmul %263, %264, %cst_96 {dimension_numbers = #tpu.dot_dimension_numbers<[1], [1], [0], [0], [0, 0, 1, 0], [], []>} : vector<8x8xbf16>, vector<32x8xbf16>, vector<8x32xf32> -> vector<8x32xf32>
    %266 = arith.addf %246, %265 : vector<8x32xf32>
    %267 = arith.addf %151, %266 : vector<8x32xf32>
    %268 = vector.broadcast %159 : vector<1x32xf32> to vector<8x32xf32>
    %269 = arith.addf %267, %268 : vector<8x32xf32>
    %cst_97 = arith.constant dense<0.000000e+00> : vector<8xf32>
    %270 = vector.multi_reduction <add>, %269, %cst_97 [1] : vector<8x32xf32> to vector<8xf32>
    %271 = vector.shape_cast %270 : vector<8xf32> to vector<8x1xf32>
    %cst_98 = arith.constant 3.200000e+01 : f32
    %272 = vector.broadcast %cst_98 : f32 to vector<8x1xf32>
    %273 = arith.divf %271, %272 : vector<8x1xf32>
    %274 = vector.broadcast %273 : vector<8x1xf32> to vector<8x32xf32>
    %275 = arith.subf %269, %274 : vector<8x32xf32>
    %276 = arith.mulf %275, %275 : vector<8x32xf32>
    %cst_99 = arith.constant dense<0.000000e+00> : vector<8xf32>
    %277 = vector.multi_reduction <add>, %276, %cst_99 [1] : vector<8x32xf32> to vector<8xf32>
    %278 = vector.shape_cast %277 : vector<8xf32> to vector<8x1xf32>
    %cst_100 = arith.constant 3.200000e+01 : f32
    %279 = vector.broadcast %cst_100 : f32 to vector<8x1xf32>
    %280 = arith.divf %278, %279 : vector<8x1xf32>
    %cst_101 = arith.constant 9.99999974E-6 : f32
    %281 = vector.broadcast %cst_101 : f32 to vector<8x1xf32>
    %282 = arith.addf %280, %281 : vector<8x1xf32>
    %283 = math.rsqrt %282 : vector<8x1xf32>
    %284 = vector.broadcast %283 : vector<8x1xf32> to vector<8x32xf32>
    %285 = arith.mulf %275, %284 : vector<8x32xf32>
    %286 = vector.broadcast %161 : vector<1x32xf32> to vector<8x32xf32>
    %287 = arith.mulf %285, %286 : vector<8x32xf32>
    %288 = vector.broadcast %163 : vector<1x32xf32> to vector<8x32xf32>
    %289 = arith.addf %287, %288 : vector<8x32xf32>
    %c0_102 = arith.constant 0 : index
    %c0_103 = arith.constant 0 : index
    %c0_104 = arith.constant 0 : index
    %290 = vector.load %arg11[%c0_102, %c0_103, %c0_104] : memref<2x64x32xbf16, #tpu.memory_space<vmem>>, vector<1x64x32xbf16>
    %291 = vector.shape_cast %290 : vector<1x64x32xbf16> to vector<64x32xbf16>
    %c0_105 = arith.constant 0 : index
    %c0_106 = arith.constant 0 : index
    %c0_107 = arith.constant 0 : index
    %292 = vector.load %arg12[%c0_105, %c0_106, %c0_107] : memref<2x1x64xf32, #tpu.memory_space<vmem>>, vector<1x1x64xf32>
    %293 = vector.shape_cast %292 : vector<1x1x64xf32> to vector<1x64xf32>
    %c0_108 = arith.constant 0 : index
    %c0_109 = arith.constant 0 : index
    %c0_110 = arith.constant 0 : index
    %294 = vector.load %arg13[%c0_108, %c0_109, %c0_110] : memref<2x32x64xbf16, #tpu.memory_space<vmem>>, vector<1x32x64xbf16>
    %295 = vector.shape_cast %294 : vector<1x32x64xbf16> to vector<32x64xbf16>
    %c0_111 = arith.constant 0 : index
    %c0_112 = arith.constant 0 : index
    %c0_113 = arith.constant 0 : index
    %296 = vector.load %arg14[%c0_111, %c0_112, %c0_113] : memref<2x1x32xf32, #tpu.memory_space<vmem>>, vector<1x1x32xf32>
    %297 = vector.shape_cast %296 : vector<1x1x32xf32> to vector<1x32xf32>
    %c0_114 = arith.constant 0 : index
    %c0_115 = arith.constant 0 : index
    %c0_116 = arith.constant 0 : index
    %298 = vector.load %arg19[%c0_114, %c0_115, %c0_116] : memref<2x1x32xf32, #tpu.memory_space<vmem>>, vector<1x1x32xf32>
    %299 = vector.shape_cast %298 : vector<1x1x32xf32> to vector<1x32xf32>
    %c0_117 = arith.constant 0 : index
    %c0_118 = arith.constant 0 : index
    %c0_119 = arith.constant 0 : index
    %300 = vector.load %arg20[%c0_117, %c0_118, %c0_119] : memref<2x1x32xf32, #tpu.memory_space<vmem>>, vector<1x1x32xf32>
    %301 = vector.shape_cast %300 : vector<1x1x32xf32> to vector<1x32xf32>
    %302 = arith.truncf %289 : vector<8x32xf32> to vector<8x32xbf16>
    %cst_120 = arith.constant dense<0.000000e+00> : vector<8x64xf32>
    %303 = tpu.matmul %302, %291, %cst_120 {dimension_numbers = #tpu.dot_dimension_numbers<[1], [1], [0], [0], [0, 0, 1, 0], [], []>} : vector<8x32xbf16>, vector<64x32xbf16>, vector<8x64xf32> -> vector<8x64xf32>
    %304 = vector.broadcast %293 : vector<1x64xf32> to vector<8x64xf32>
    %305 = arith.addf %303, %304 : vector<8x64xf32>
    %cst_121 = arith.constant 0.000000e+00 : f32
    %306 = vector.broadcast %cst_121 : f32 to vector<8x64xf32>
    %307 = arith.maximumf %305, %306 : vector<8x64xf32>
    %308 = arith.truncf %307 : vector<8x64xf32> to vector<8x64xbf16>
    %cst_122 = arith.constant dense<0.000000e+00> : vector<8x32xf32>
    %309 = tpu.matmul %308, %295, %cst_122 {dimension_numbers = #tpu.dot_dimension_numbers<[1], [1], [0], [0], [0, 0, 1, 0], [], []>} : vector<8x64xbf16>, vector<32x64xbf16>, vector<8x32xf32> -> vector<8x32xf32>
    %310 = vector.broadcast %297 : vector<1x32xf32> to vector<8x32xf32>
    %311 = arith.addf %309, %310 : vector<8x32xf32>
    %312 = arith.addf %289, %311 : vector<8x32xf32>
    %cst_123 = arith.constant dense<0.000000e+00> : vector<8xf32>
    %313 = vector.multi_reduction <add>, %312, %cst_123 [1] : vector<8x32xf32> to vector<8xf32>
    %314 = vector.shape_cast %313 : vector<8xf32> to vector<8x1xf32>
    %cst_124 = arith.constant 3.200000e+01 : f32
    %315 = vector.broadcast %cst_124 : f32 to vector<8x1xf32>
    %316 = arith.divf %314, %315 : vector<8x1xf32>
    %317 = vector.broadcast %316 : vector<8x1xf32> to vector<8x32xf32>
    %318 = arith.subf %312, %317 : vector<8x32xf32>
    %319 = arith.mulf %318, %318 : vector<8x32xf32>
    %cst_125 = arith.constant dense<0.000000e+00> : vector<8xf32>
    %320 = vector.multi_reduction <add>, %319, %cst_125 [1] : vector<8x32xf32> to vector<8xf32>
    %321 = vector.shape_cast %320 : vector<8xf32> to vector<8x1xf32>
    %cst_126 = arith.constant 3.200000e+01 : f32
    %322 = vector.broadcast %cst_126 : f32 to vector<8x1xf32>
    %323 = arith.divf %321, %322 : vector<8x1xf32>
    %cst_127 = arith.constant 9.99999974E-6 : f32
    %324 = vector.broadcast %cst_127 : f32 to vector<8x1xf32>
    %325 = arith.addf %323, %324 : vector<8x1xf32>
    %326 = math.rsqrt %325 : vector<8x1xf32>
    %327 = vector.broadcast %326 : vector<8x1xf32> to vector<8x32xf32>
    %328 = arith.mulf %318, %327 : vector<8x32xf32>
    %329 = vector.broadcast %299 : vector<1x32xf32> to vector<8x32xf32>
    %330 = arith.mulf %328, %329 : vector<8x32xf32>
    %331 = vector.broadcast %301 : vector<1x32xf32> to vector<8x32xf32>
    %332 = arith.addf %330, %331 : vector<8x32xf32>
    %c1 = arith.constant 1 : index
    %c0_128 = arith.constant 0 : index
    %c0_129 = arith.constant 0 : index
    %333 = vector.load %arg3[%c1, %c0_128, %c0_129] : memref<2x96x32xbf16, #tpu.memory_space<vmem>>, vector<1x96x32xbf16>
    %334 = vector.shape_cast %333 : vector<1x96x32xbf16> to vector<96x32xbf16>
    %c1_130 = arith.constant 1 : index
    %c0_131 = arith.constant 0 : index
    %c0_132 = arith.constant 0 : index
    %335 = vector.load %arg4[%c1_130, %c0_131, %c0_132] : memref<2x1x96xf32, #tpu.memory_space<vmem>>, vector<1x1x96xf32>
    %336 = vector.shape_cast %335 : vector<1x1x96xf32> to vector<1x96xf32>
    %c1_133 = arith.constant 1 : index
    %c0_134 = arith.constant 0 : index
    %c0_135 = arith.constant 0 : index
    %337 = vector.load %arg5[%c1_133, %c0_134, %c0_135] : memref<2x32x32xbf16, #tpu.memory_space<vmem>>, vector<1x32x32xbf16>
    %338 = vector.shape_cast %337 : vector<1x32x32xbf16> to vector<32x32xbf16>
    %c1_136 = arith.constant 1 : index
    %c0_137 = arith.constant 0 : index
    %c0_138 = arith.constant 0 : index
    %339 = vector.load %arg6[%c1_136, %c0_137, %c0_138] : memref<2x1x32xf32, #tpu.memory_space<vmem>>, vector<1x1x32xf32>
    %340 = vector.shape_cast %339 : vector<1x1x32xf32> to vector<1x32xf32>
    %c1_139 = arith.constant 1 : index
    %c0_140 = arith.constant 0 : index
    %c0_141 = arith.constant 0 : index
    %341 = vector.load %arg15[%c1_139, %c0_140, %c0_141] : memref<2x1x32xf32, #tpu.memory_space<vmem>>, vector<1x1x32xf32>
    %342 = vector.shape_cast %341 : vector<1x1x32xf32> to vector<1x32xf32>
    %c1_142 = arith.constant 1 : index
    %c0_143 = arith.constant 0 : index
    %c0_144 = arith.constant 0 : index
    %343 = vector.load %arg16[%c1_142, %c0_143, %c0_144] : memref<2x1x32xf32, #tpu.memory_space<vmem>>, vector<1x1x32xf32>
    %344 = vector.shape_cast %343 : vector<1x1x32xf32> to vector<1x32xf32>
    %345 = arith.truncf %332 : vector<8x32xf32> to vector<8x32xbf16>
    %346 = arith.truncf %332 : vector<8x32xf32> to vector<8x32xbf16>
    %347 = vector.extract_strided_slice %334 {offsets = [0, 0], sizes = [32, 32], strides = [1, 1]} : vector<96x32xbf16> to vector<32x32xbf16>
    %cst_145 = arith.constant dense<0.000000e+00> : vector<8x32xf32>
    %348 = tpu.matmul %345, %347, %cst_145 {dimension_numbers = #tpu.dot_dimension_numbers<[1], [1], [0], [0], [0, 0, 1, 0], [], []>} : vector<8x32xbf16>, vector<32x32xbf16>, vector<8x32xf32> -> vector<8x32xf32>
    %349 = vector.extract_strided_slice %336 {offsets = [0, 0], sizes = [1, 32], strides = [1, 1]} : vector<1x96xf32> to vector<1x32xf32>
    %350 = vector.broadcast %349 : vector<1x32xf32> to vector<8x32xf32>
    %351 = arith.addf %348, %350 : vector<8x32xf32>
    %352 = vector.extract_strided_slice %334 {offsets = [32, 0], sizes = [32, 32], strides = [1, 1]} : vector<96x32xbf16> to vector<32x32xbf16>
    %cst_146 = arith.constant dense<0.000000e+00> : vector<8x32xf32>
    %353 = tpu.matmul %346, %352, %cst_146 {dimension_numbers = #tpu.dot_dimension_numbers<[1], [1], [0], [0], [0, 0, 1, 0], [], []>} : vector<8x32xbf16>, vector<32x32xbf16>, vector<8x32xf32> -> vector<8x32xf32>
    %354 = vector.extract_strided_slice %336 {offsets = [0, 32], sizes = [1, 32], strides = [1, 1]} : vector<1x96xf32> to vector<1x32xf32>
    %355 = vector.broadcast %354 : vector<1x32xf32> to vector<8x32xf32>
    %356 = arith.addf %353, %355 : vector<8x32xf32>
    %357 = vector.extract_strided_slice %334 {offsets = [64, 0], sizes = [32, 32], strides = [1, 1]} : vector<96x32xbf16> to vector<32x32xbf16>
    %cst_147 = arith.constant dense<0.000000e+00> : vector<8x32xf32>
    %358 = tpu.matmul %346, %357, %cst_147 {dimension_numbers = #tpu.dot_dimension_numbers<[1], [1], [0], [0], [0, 0, 1, 0], [], []>} : vector<8x32xbf16>, vector<32x32xbf16>, vector<8x32xf32> -> vector<8x32xf32>
    %359 = vector.extract_strided_slice %336 {offsets = [0, 64], sizes = [1, 32], strides = [1, 1]} : vector<1x96xf32> to vector<1x32xf32>
    %360 = vector.broadcast %359 : vector<1x32xf32> to vector<8x32xf32>
    %361 = arith.addf %358, %360 : vector<8x32xf32>
    %cst_148 = arith.constant 0.353553385 : f32
    %362 = vector.broadcast %cst_148 : f32 to vector<8x32xf32>
    %363 = arith.mulf %351, %362 : vector<8x32xf32>
    %364 = arith.truncf %363 : vector<8x32xf32> to vector<8x32xbf16>
    %365 = arith.truncf %356 : vector<8x32xf32> to vector<8x32xbf16>
    %366 = arith.truncf %361 : vector<8x32xf32> to vector<8x32xbf16>
    %cst_149 = arith.constant 0.000000e+00 : f32
    %367 = vector.broadcast %cst_149 : f32 to vector<8x32xf32>
    %368 = vector.extract_strided_slice %364 {offsets = [0, 0], sizes = [8, 8], strides = [1, 1]} : vector<8x32xbf16> to vector<8x8xbf16>
    %369 = vector.extract_strided_slice %365 {offsets = [0, 0], sizes = [8, 8], strides = [1, 1]} : vector<8x32xbf16> to vector<8x8xbf16>
    %cst_150 = arith.constant dense<0.000000e+00> : vector<8x8xf32>
    %370 = tpu.matmul %368, %369, %cst_150 {dimension_numbers = #tpu.dot_dimension_numbers<[1], [1], [0], [0], [0, 0, 1, 0], [], []>} : vector<8x8xbf16>, vector<8x8xbf16>, vector<8x8xf32> -> vector<8x8xf32>
    %371 = arith.addf %370, %9 : vector<8x8xf32>
    %cst_151 = arith.constant dense<0xFF800000> : vector<8xf32>
    %372 = vector.multi_reduction <maximumf>, %371, %cst_151 [1] : vector<8x8xf32> to vector<8xf32>
    %373 = vector.shape_cast %372 : vector<8xf32> to vector<8x1xf32>
    %374 = vector.broadcast %373 : vector<8x1xf32> to vector<8x8xf32>
    %375 = arith.subf %371, %374 : vector<8x8xf32>
    %376 = math.exp %375 : vector<8x8xf32>
    %cst_152 = arith.constant dense<0.000000e+00> : vector<8xf32>
    %377 = vector.multi_reduction <add>, %376, %cst_152 [1] : vector<8x8xf32> to vector<8xf32>
    %378 = vector.shape_cast %377 : vector<8xf32> to vector<8x1xf32>
    %379 = tpu.reciprocal %378 {approx = true} : vector<8x1xf32> -> vector<8x1xf32>
    %380 = vector.broadcast %379 : vector<8x1xf32> to vector<8x8xf32>
    %381 = arith.mulf %376, %380 : vector<8x8xf32>
    %382 = arith.truncf %381 : vector<8x8xf32> to vector<8x8xbf16>
    %383 = vector.extract_strided_slice %366 {offsets = [0, 0], sizes = [8, 8], strides = [1, 1]} : vector<8x32xbf16> to vector<8x8xbf16>
    %cst_153 = arith.constant dense<0.000000e+00> : vector<8x8xf32>
    %384 = tpu.matmul %382, %383, %cst_153 {dimension_numbers = #tpu.dot_dimension_numbers<[1], [0], [0], [1], [0, 0, 1, 1], [], []>} : vector<8x8xbf16>, vector<8x8xbf16>, vector<8x8xf32> -> vector<8x8xf32>
    %385 = arith.truncf %384 : vector<8x8xf32> to vector<8x8xbf16>
    %386 = vector.extract_strided_slice %338 {offsets = [0, 0], sizes = [32, 8], strides = [1, 1]} : vector<32x32xbf16> to vector<32x8xbf16>
    %cst_154 = arith.constant dense<0.000000e+00> : vector<8x32xf32>
    %387 = tpu.matmul %385, %386, %cst_154 {dimension_numbers = #tpu.dot_dimension_numbers<[1], [1], [0], [0], [0, 0, 1, 0], [], []>} : vector<8x8xbf16>, vector<32x8xbf16>, vector<8x32xf32> -> vector<8x32xf32>
    %388 = arith.addf %367, %387 : vector<8x32xf32>
    %389 = vector.extract_strided_slice %364 {offsets = [0, 8], sizes = [8, 8], strides = [1, 1]} : vector<8x32xbf16> to vector<8x8xbf16>
    %390 = vector.extract_strided_slice %365 {offsets = [0, 8], sizes = [8, 8], strides = [1, 1]} : vector<8x32xbf16> to vector<8x8xbf16>
    %cst_155 = arith.constant dense<0.000000e+00> : vector<8x8xf32>
    %391 = tpu.matmul %389, %390, %cst_155 {dimension_numbers = #tpu.dot_dimension_numbers<[1], [1], [0], [0], [0, 0, 1, 0], [], []>} : vector<8x8xbf16>, vector<8x8xbf16>, vector<8x8xf32> -> vector<8x8xf32>
    %392 = arith.addf %391, %9 : vector<8x8xf32>
    %cst_156 = arith.constant dense<0xFF800000> : vector<8xf32>
    %393 = vector.multi_reduction <maximumf>, %392, %cst_156 [1] : vector<8x8xf32> to vector<8xf32>
    %394 = vector.shape_cast %393 : vector<8xf32> to vector<8x1xf32>
    %395 = vector.broadcast %394 : vector<8x1xf32> to vector<8x8xf32>
    %396 = arith.subf %392, %395 : vector<8x8xf32>
    %397 = math.exp %396 : vector<8x8xf32>
    %cst_157 = arith.constant dense<0.000000e+00> : vector<8xf32>
    %398 = vector.multi_reduction <add>, %397, %cst_157 [1] : vector<8x8xf32> to vector<8xf32>
    %399 = vector.shape_cast %398 : vector<8xf32> to vector<8x1xf32>
    %400 = tpu.reciprocal %399 {approx = true} : vector<8x1xf32> -> vector<8x1xf32>
    %401 = vector.broadcast %400 : vector<8x1xf32> to vector<8x8xf32>
    %402 = arith.mulf %397, %401 : vector<8x8xf32>
    %403 = arith.truncf %402 : vector<8x8xf32> to vector<8x8xbf16>
    %404 = vector.extract_strided_slice %366 {offsets = [0, 8], sizes = [8, 8], strides = [1, 1]} : vector<8x32xbf16> to vector<8x8xbf16>
    %cst_158 = arith.constant dense<0.000000e+00> : vector<8x8xf32>
    %405 = tpu.matmul %403, %404, %cst_158 {dimension_numbers = #tpu.dot_dimension_numbers<[1], [0], [0], [1], [0, 0, 1, 1], [], []>} : vector<8x8xbf16>, vector<8x8xbf16>, vector<8x8xf32> -> vector<8x8xf32>
    %406 = arith.truncf %405 : vector<8x8xf32> to vector<8x8xbf16>
    %407 = vector.extract_strided_slice %338 {offsets = [0, 8], sizes = [32, 8], strides = [1, 1]} : vector<32x32xbf16> to vector<32x8xbf16>
    %cst_159 = arith.constant dense<0.000000e+00> : vector<8x32xf32>
    %408 = tpu.matmul %406, %407, %cst_159 {dimension_numbers = #tpu.dot_dimension_numbers<[1], [1], [0], [0], [0, 0, 1, 0], [], []>} : vector<8x8xbf16>, vector<32x8xbf16>, vector<8x32xf32> -> vector<8x32xf32>
    %409 = arith.addf %388, %408 : vector<8x32xf32>
    %410 = vector.extract_strided_slice %364 {offsets = [0, 16], sizes = [8, 8], strides = [1, 1]} : vector<8x32xbf16> to vector<8x8xbf16>
    %411 = vector.extract_strided_slice %365 {offsets = [0, 16], sizes = [8, 8], strides = [1, 1]} : vector<8x32xbf16> to vector<8x8xbf16>
    %cst_160 = arith.constant dense<0.000000e+00> : vector<8x8xf32>
    %412 = tpu.matmul %410, %411, %cst_160 {dimension_numbers = #tpu.dot_dimension_numbers<[1], [1], [0], [0], [0, 0, 1, 0], [], []>} : vector<8x8xbf16>, vector<8x8xbf16>, vector<8x8xf32> -> vector<8x8xf32>
    %413 = arith.addf %412, %9 : vector<8x8xf32>
    %cst_161 = arith.constant dense<0xFF800000> : vector<8xf32>
    %414 = vector.multi_reduction <maximumf>, %413, %cst_161 [1] : vector<8x8xf32> to vector<8xf32>
    %415 = vector.shape_cast %414 : vector<8xf32> to vector<8x1xf32>
    %416 = vector.broadcast %415 : vector<8x1xf32> to vector<8x8xf32>
    %417 = arith.subf %413, %416 : vector<8x8xf32>
    %418 = math.exp %417 : vector<8x8xf32>
    %cst_162 = arith.constant dense<0.000000e+00> : vector<8xf32>
    %419 = vector.multi_reduction <add>, %418, %cst_162 [1] : vector<8x8xf32> to vector<8xf32>
    %420 = vector.shape_cast %419 : vector<8xf32> to vector<8x1xf32>
    %421 = tpu.reciprocal %420 {approx = true} : vector<8x1xf32> -> vector<8x1xf32>
    %422 = vector.broadcast %421 : vector<8x1xf32> to vector<8x8xf32>
    %423 = arith.mulf %418, %422 : vector<8x8xf32>
    %424 = arith.truncf %423 : vector<8x8xf32> to vector<8x8xbf16>
    %425 = vector.extract_strided_slice %366 {offsets = [0, 16], sizes = [8, 8], strides = [1, 1]} : vector<8x32xbf16> to vector<8x8xbf16>
    %cst_163 = arith.constant dense<0.000000e+00> : vector<8x8xf32>
    %426 = tpu.matmul %424, %425, %cst_163 {dimension_numbers = #tpu.dot_dimension_numbers<[1], [0], [0], [1], [0, 0, 1, 1], [], []>} : vector<8x8xbf16>, vector<8x8xbf16>, vector<8x8xf32> -> vector<8x8xf32>
    %427 = arith.truncf %426 : vector<8x8xf32> to vector<8x8xbf16>
    %428 = vector.extract_strided_slice %338 {offsets = [0, 16], sizes = [32, 8], strides = [1, 1]} : vector<32x32xbf16> to vector<32x8xbf16>
    %cst_164 = arith.constant dense<0.000000e+00> : vector<8x32xf32>
    %429 = tpu.matmul %427, %428, %cst_164 {dimension_numbers = #tpu.dot_dimension_numbers<[1], [1], [0], [0], [0, 0, 1, 0], [], []>} : vector<8x8xbf16>, vector<32x8xbf16>, vector<8x32xf32> -> vector<8x32xf32>
    %430 = arith.addf %409, %429 : vector<8x32xf32>
    %431 = vector.extract_strided_slice %364 {offsets = [0, 24], sizes = [8, 8], strides = [1, 1]} : vector<8x32xbf16> to vector<8x8xbf16>
    %432 = vector.extract_strided_slice %365 {offsets = [0, 24], sizes = [8, 8], strides = [1, 1]} : vector<8x32xbf16> to vector<8x8xbf16>
    %cst_165 = arith.constant dense<0.000000e+00> : vector<8x8xf32>
    %433 = tpu.matmul %431, %432, %cst_165 {dimension_numbers = #tpu.dot_dimension_numbers<[1], [1], [0], [0], [0, 0, 1, 0], [], []>} : vector<8x8xbf16>, vector<8x8xbf16>, vector<8x8xf32> -> vector<8x8xf32>
    %434 = arith.addf %433, %9 : vector<8x8xf32>
    %cst_166 = arith.constant dense<0xFF800000> : vector<8xf32>
    %435 = vector.multi_reduction <maximumf>, %434, %cst_166 [1] : vector<8x8xf32> to vector<8xf32>
    %436 = vector.shape_cast %435 : vector<8xf32> to vector<8x1xf32>
    %437 = vector.broadcast %436 : vector<8x1xf32> to vector<8x8xf32>
    %438 = arith.subf %434, %437 : vector<8x8xf32>
    %439 = math.exp %438 : vector<8x8xf32>
    %cst_167 = arith.constant dense<0.000000e+00> : vector<8xf32>
    %440 = vector.multi_reduction <add>, %439, %cst_167 [1] : vector<8x8xf32> to vector<8xf32>
    %441 = vector.shape_cast %440 : vector<8xf32> to vector<8x1xf32>
    %442 = tpu.reciprocal %441 {approx = true} : vector<8x1xf32> -> vector<8x1xf32>
    %443 = vector.broadcast %442 : vector<8x1xf32> to vector<8x8xf32>
    %444 = arith.mulf %439, %443 : vector<8x8xf32>
    %445 = arith.truncf %444 : vector<8x8xf32> to vector<8x8xbf16>
    %446 = vector.extract_strided_slice %366 {offsets = [0, 24], sizes = [8, 8], strides = [1, 1]} : vector<8x32xbf16> to vector<8x8xbf16>
    %cst_168 = arith.constant dense<0.000000e+00> : vector<8x8xf32>
    %447 = tpu.matmul %445, %446, %cst_168 {dimension_numbers = #tpu.dot_dimension_numbers<[1], [0], [0], [1], [0, 0, 1, 1], [], []>} : vector<8x8xbf16>, vector<8x8xbf16>, vector<8x8xf32> -> vector<8x8xf32>
    %448 = arith.truncf %447 : vector<8x8xf32> to vector<8x8xbf16>
    %449 = vector.extract_strided_slice %338 {offsets = [0, 24], sizes = [32, 8], strides = [1, 1]} : vector<32x32xbf16> to vector<32x8xbf16>
    %cst_169 = arith.constant dense<0.000000e+00> : vector<8x32xf32>
    %450 = tpu.matmul %448, %449, %cst_169 {dimension_numbers = #tpu.dot_dimension_numbers<[1], [1], [0], [0], [0, 0, 1, 0], [], []>} : vector<8x8xbf16>, vector<32x8xbf16>, vector<8x32xf32> -> vector<8x32xf32>
    %451 = arith.addf %430, %450 : vector<8x32xf32>
    %452 = arith.addf %332, %451 : vector<8x32xf32>
    %453 = vector.broadcast %340 : vector<1x32xf32> to vector<8x32xf32>
    %454 = arith.addf %452, %453 : vector<8x32xf32>
    %cst_170 = arith.constant dense<0.000000e+00> : vector<8xf32>
    %455 = vector.multi_reduction <add>, %454, %cst_170 [1] : vector<8x32xf32> to vector<8xf32>
    %456 = vector.shape_cast %455 : vector<8xf32> to vector<8x1xf32>
    %cst_171 = arith.constant 3.200000e+01 : f32
    %457 = vector.broadcast %cst_171 : f32 to vector<8x1xf32>
    %458 = arith.divf %456, %457 : vector<8x1xf32>
    %459 = vector.broadcast %458 : vector<8x1xf32> to vector<8x32xf32>
    %460 = arith.subf %454, %459 : vector<8x32xf32>
    %461 = arith.mulf %460, %460 : vector<8x32xf32>
    %cst_172 = arith.constant dense<0.000000e+00> : vector<8xf32>
    %462 = vector.multi_reduction <add>, %461, %cst_172 [1] : vector<8x32xf32> to vector<8xf32>
    %463 = vector.shape_cast %462 : vector<8xf32> to vector<8x1xf32>
    %cst_173 = arith.constant 3.200000e+01 : f32
    %464 = vector.broadcast %cst_173 : f32 to vector<8x1xf32>
    %465 = arith.divf %463, %464 : vector<8x1xf32>
    %cst_174 = arith.constant 9.99999974E-6 : f32
    %466 = vector.broadcast %cst_174 : f32 to vector<8x1xf32>
    %467 = arith.addf %465, %466 : vector<8x1xf32>
    %468 = math.rsqrt %467 : vector<8x1xf32>
    %469 = vector.broadcast %468 : vector<8x1xf32> to vector<8x32xf32>
    %470 = arith.mulf %460, %469 : vector<8x32xf32>
    %471 = vector.broadcast %342 : vector<1x32xf32> to vector<8x32xf32>
    %472 = arith.mulf %470, %471 : vector<8x32xf32>
    %473 = vector.broadcast %344 : vector<1x32xf32> to vector<8x32xf32>
    %474 = arith.addf %472, %473 : vector<8x32xf32>
    %c1_175 = arith.constant 1 : index
    %c0_176 = arith.constant 0 : index
    %c0_177 = arith.constant 0 : index
    %475 = vector.load %arg7[%c1_175, %c0_176, %c0_177] : memref<2x96x32xbf16, #tpu.memory_space<vmem>>, vector<1x96x32xbf16>
    %476 = vector.shape_cast %475 : vector<1x96x32xbf16> to vector<96x32xbf16>
    %c1_178 = arith.constant 1 : index
    %c0_179 = arith.constant 0 : index
    %c0_180 = arith.constant 0 : index
    %477 = vector.load %arg8[%c1_178, %c0_179, %c0_180] : memref<2x1x96xf32, #tpu.memory_space<vmem>>, vector<1x1x96xf32>
    %478 = vector.shape_cast %477 : vector<1x1x96xf32> to vector<1x96xf32>
    %c1_181 = arith.constant 1 : index
    %c0_182 = arith.constant 0 : index
    %c0_183 = arith.constant 0 : index
    %479 = vector.load %arg9[%c1_181, %c0_182, %c0_183] : memref<2x32x32xbf16, #tpu.memory_space<vmem>>, vector<1x32x32xbf16>
    %480 = vector.shape_cast %479 : vector<1x32x32xbf16> to vector<32x32xbf16>
    %c1_184 = arith.constant 1 : index
    %c0_185 = arith.constant 0 : index
    %c0_186 = arith.constant 0 : index
    %481 = vector.load %arg10[%c1_184, %c0_185, %c0_186] : memref<2x1x32xf32, #tpu.memory_space<vmem>>, vector<1x1x32xf32>
    %482 = vector.shape_cast %481 : vector<1x1x32xf32> to vector<1x32xf32>
    %c1_187 = arith.constant 1 : index
    %c0_188 = arith.constant 0 : index
    %c0_189 = arith.constant 0 : index
    %483 = vector.load %arg17[%c1_187, %c0_188, %c0_189] : memref<2x1x32xf32, #tpu.memory_space<vmem>>, vector<1x1x32xf32>
    %484 = vector.shape_cast %483 : vector<1x1x32xf32> to vector<1x32xf32>
    %c1_190 = arith.constant 1 : index
    %c0_191 = arith.constant 0 : index
    %c0_192 = arith.constant 0 : index
    %485 = vector.load %arg18[%c1_190, %c0_191, %c0_192] : memref<2x1x32xf32, #tpu.memory_space<vmem>>, vector<1x1x32xf32>
    %486 = vector.shape_cast %485 : vector<1x1x32xf32> to vector<1x32xf32>
    %487 = arith.truncf %474 : vector<8x32xf32> to vector<8x32xbf16>
    %488 = arith.truncf %3 : vector<10x32xf32> to vector<10x32xbf16>
    %489 = vector.extract_strided_slice %476 {offsets = [0, 0], sizes = [32, 32], strides = [1, 1]} : vector<96x32xbf16> to vector<32x32xbf16>
    %cst_193 = arith.constant dense<0.000000e+00> : vector<8x32xf32>
    %490 = tpu.matmul %487, %489, %cst_193 {dimension_numbers = #tpu.dot_dimension_numbers<[1], [1], [0], [0], [0, 0, 1, 0], [], []>} : vector<8x32xbf16>, vector<32x32xbf16>, vector<8x32xf32> -> vector<8x32xf32>
    %491 = vector.extract_strided_slice %478 {offsets = [0, 0], sizes = [1, 32], strides = [1, 1]} : vector<1x96xf32> to vector<1x32xf32>
    %492 = vector.broadcast %491 : vector<1x32xf32> to vector<8x32xf32>
    %493 = arith.addf %490, %492 : vector<8x32xf32>
    %494 = vector.extract_strided_slice %476 {offsets = [32, 0], sizes = [32, 32], strides = [1, 1]} : vector<96x32xbf16> to vector<32x32xbf16>
    %cst_194 = arith.constant dense<0.000000e+00> : vector<10x32xf32>
    %495 = tpu.matmul %488, %494, %cst_194 {dimension_numbers = #tpu.dot_dimension_numbers<[1], [1], [0], [0], [0, 0, 1, 0], [], []>} : vector<10x32xbf16>, vector<32x32xbf16>, vector<10x32xf32> -> vector<10x32xf32>
    %496 = vector.extract_strided_slice %478 {offsets = [0, 32], sizes = [1, 32], strides = [1, 1]} : vector<1x96xf32> to vector<1x32xf32>
    %497 = vector.broadcast %496 : vector<1x32xf32> to vector<10x32xf32>
    %498 = arith.addf %495, %497 : vector<10x32xf32>
    %499 = vector.extract_strided_slice %476 {offsets = [64, 0], sizes = [32, 32], strides = [1, 1]} : vector<96x32xbf16> to vector<32x32xbf16>
    %cst_195 = arith.constant dense<0.000000e+00> : vector<10x32xf32>
    %500 = tpu.matmul %488, %499, %cst_195 {dimension_numbers = #tpu.dot_dimension_numbers<[1], [1], [0], [0], [0, 0, 1, 0], [], []>} : vector<10x32xbf16>, vector<32x32xbf16>, vector<10x32xf32> -> vector<10x32xf32>
    %501 = vector.extract_strided_slice %478 {offsets = [0, 64], sizes = [1, 32], strides = [1, 1]} : vector<1x96xf32> to vector<1x32xf32>
    %502 = vector.broadcast %501 : vector<1x32xf32> to vector<10x32xf32>
    %503 = arith.addf %500, %502 : vector<10x32xf32>
    %cst_196 = arith.constant 0.353553385 : f32
    %504 = vector.broadcast %cst_196 : f32 to vector<8x32xf32>
    %505 = arith.mulf %493, %504 : vector<8x32xf32>
    %506 = arith.truncf %505 : vector<8x32xf32> to vector<8x32xbf16>
    %507 = arith.truncf %498 : vector<10x32xf32> to vector<10x32xbf16>
    %508 = arith.truncf %503 : vector<10x32xf32> to vector<10x32xbf16>
    %cst_197 = arith.constant 0.000000e+00 : f32
    %509 = vector.broadcast %cst_197 : f32 to vector<8x32xf32>
    %510 = vector.extract_strided_slice %506 {offsets = [0, 0], sizes = [8, 8], strides = [1, 1]} : vector<8x32xbf16> to vector<8x8xbf16>
    %511 = vector.extract_strided_slice %507 {offsets = [0, 0], sizes = [10, 8], strides = [1, 1]} : vector<10x32xbf16> to vector<10x8xbf16>
    %cst_198 = arith.constant dense<0.000000e+00> : vector<8x10xf32>
    %512 = tpu.matmul %510, %511, %cst_198 {dimension_numbers = #tpu.dot_dimension_numbers<[1], [1], [0], [0], [0, 0, 1, 0], [], []>} : vector<8x8xbf16>, vector<10x8xbf16>, vector<8x10xf32> -> vector<8x10xf32>
    %cst_199 = arith.constant dense<0xFF800000> : vector<8xf32>
    %513 = vector.multi_reduction <maximumf>, %512, %cst_199 [1] : vector<8x10xf32> to vector<8xf32>
    %514 = vector.shape_cast %513 : vector<8xf32> to vector<8x1xf32>
    %515 = vector.broadcast %514 : vector<8x1xf32> to vector<8x10xf32>
    %516 = arith.subf %512, %515 : vector<8x10xf32>
    %517 = math.exp %516 : vector<8x10xf32>
    %cst_200 = arith.constant dense<0.000000e+00> : vector<8xf32>
    %518 = vector.multi_reduction <add>, %517, %cst_200 [1] : vector<8x10xf32> to vector<8xf32>
    %519 = vector.shape_cast %518 : vector<8xf32> to vector<8x1xf32>
    %520 = tpu.reciprocal %519 {approx = true} : vector<8x1xf32> -> vector<8x1xf32>
    %521 = vector.broadcast %520 : vector<8x1xf32> to vector<8x10xf32>
    %522 = arith.mulf %517, %521 : vector<8x10xf32>
    %523 = arith.truncf %522 : vector<8x10xf32> to vector<8x10xbf16>
    %524 = vector.extract_strided_slice %508 {offsets = [0, 0], sizes = [10, 8], strides = [1, 1]} : vector<10x32xbf16> to vector<10x8xbf16>
    %cst_201 = arith.constant dense<0.000000e+00> : vector<8x8xf32>
    %525 = tpu.matmul %523, %524, %cst_201 {dimension_numbers = #tpu.dot_dimension_numbers<[1], [0], [0], [1], [0, 0, 1, 1], [], []>} : vector<8x10xbf16>, vector<10x8xbf16>, vector<8x8xf32> -> vector<8x8xf32>
    %526 = arith.truncf %525 : vector<8x8xf32> to vector<8x8xbf16>
    %527 = vector.extract_strided_slice %480 {offsets = [0, 0], sizes = [32, 8], strides = [1, 1]} : vector<32x32xbf16> to vector<32x8xbf16>
    %cst_202 = arith.constant dense<0.000000e+00> : vector<8x32xf32>
    %528 = tpu.matmul %526, %527, %cst_202 {dimension_numbers = #tpu.dot_dimension_numbers<[1], [1], [0], [0], [0, 0, 1, 0], [], []>} : vector<8x8xbf16>, vector<32x8xbf16>, vector<8x32xf32> -> vector<8x32xf32>
    %529 = arith.addf %509, %528 : vector<8x32xf32>
    %530 = vector.extract_strided_slice %506 {offsets = [0, 8], sizes = [8, 8], strides = [1, 1]} : vector<8x32xbf16> to vector<8x8xbf16>
    %531 = vector.extract_strided_slice %507 {offsets = [0, 8], sizes = [10, 8], strides = [1, 1]} : vector<10x32xbf16> to vector<10x8xbf16>
    %cst_203 = arith.constant dense<0.000000e+00> : vector<8x10xf32>
    %532 = tpu.matmul %530, %531, %cst_203 {dimension_numbers = #tpu.dot_dimension_numbers<[1], [1], [0], [0], [0, 0, 1, 0], [], []>} : vector<8x8xbf16>, vector<10x8xbf16>, vector<8x10xf32> -> vector<8x10xf32>
    %cst_204 = arith.constant dense<0xFF800000> : vector<8xf32>
    %533 = vector.multi_reduction <maximumf>, %532, %cst_204 [1] : vector<8x10xf32> to vector<8xf32>
    %534 = vector.shape_cast %533 : vector<8xf32> to vector<8x1xf32>
    %535 = vector.broadcast %534 : vector<8x1xf32> to vector<8x10xf32>
    %536 = arith.subf %532, %535 : vector<8x10xf32>
    %537 = math.exp %536 : vector<8x10xf32>
    %cst_205 = arith.constant dense<0.000000e+00> : vector<8xf32>
    %538 = vector.multi_reduction <add>, %537, %cst_205 [1] : vector<8x10xf32> to vector<8xf32>
    %539 = vector.shape_cast %538 : vector<8xf32> to vector<8x1xf32>
    %540 = tpu.reciprocal %539 {approx = true} : vector<8x1xf32> -> vector<8x1xf32>
    %541 = vector.broadcast %540 : vector<8x1xf32> to vector<8x10xf32>
    %542 = arith.mulf %537, %541 : vector<8x10xf32>
    %543 = arith.truncf %542 : vector<8x10xf32> to vector<8x10xbf16>
    %544 = vector.extract_strided_slice %508 {offsets = [0, 8], sizes = [10, 8], strides = [1, 1]} : vector<10x32xbf16> to vector<10x8xbf16>
    %cst_206 = arith.constant dense<0.000000e+00> : vector<8x8xf32>
    %545 = tpu.matmul %543, %544, %cst_206 {dimension_numbers = #tpu.dot_dimension_numbers<[1], [0], [0], [1], [0, 0, 1, 1], [], []>} : vector<8x10xbf16>, vector<10x8xbf16>, vector<8x8xf32> -> vector<8x8xf32>
    %546 = arith.truncf %545 : vector<8x8xf32> to vector<8x8xbf16>
    %547 = vector.extract_strided_slice %480 {offsets = [0, 8], sizes = [32, 8], strides = [1, 1]} : vector<32x32xbf16> to vector<32x8xbf16>
    %cst_207 = arith.constant dense<0.000000e+00> : vector<8x32xf32>
    %548 = tpu.matmul %546, %547, %cst_207 {dimension_numbers = #tpu.dot_dimension_numbers<[1], [1], [0], [0], [0, 0, 1, 0], [], []>} : vector<8x8xbf16>, vector<32x8xbf16>, vector<8x32xf32> -> vector<8x32xf32>
    %549 = arith.addf %529, %548 : vector<8x32xf32>
    %550 = vector.extract_strided_slice %506 {offsets = [0, 16], sizes = [8, 8], strides = [1, 1]} : vector<8x32xbf16> to vector<8x8xbf16>
    %551 = vector.extract_strided_slice %507 {offsets = [0, 16], sizes = [10, 8], strides = [1, 1]} : vector<10x32xbf16> to vector<10x8xbf16>
    %cst_208 = arith.constant dense<0.000000e+00> : vector<8x10xf32>
    %552 = tpu.matmul %550, %551, %cst_208 {dimension_numbers = #tpu.dot_dimension_numbers<[1], [1], [0], [0], [0, 0, 1, 0], [], []>} : vector<8x8xbf16>, vector<10x8xbf16>, vector<8x10xf32> -> vector<8x10xf32>
    %cst_209 = arith.constant dense<0xFF800000> : vector<8xf32>
    %553 = vector.multi_reduction <maximumf>, %552, %cst_209 [1] : vector<8x10xf32> to vector<8xf32>
    %554 = vector.shape_cast %553 : vector<8xf32> to vector<8x1xf32>
    %555 = vector.broadcast %554 : vector<8x1xf32> to vector<8x10xf32>
    %556 = arith.subf %552, %555 : vector<8x10xf32>
    %557 = math.exp %556 : vector<8x10xf32>
    %cst_210 = arith.constant dense<0.000000e+00> : vector<8xf32>
    %558 = vector.multi_reduction <add>, %557, %cst_210 [1] : vector<8x10xf32> to vector<8xf32>
    %559 = vector.shape_cast %558 : vector<8xf32> to vector<8x1xf32>
    %560 = tpu.reciprocal %559 {approx = true} : vector<8x1xf32> -> vector<8x1xf32>
    %561 = vector.broadcast %560 : vector<8x1xf32> to vector<8x10xf32>
    %562 = arith.mulf %557, %561 : vector<8x10xf32>
    %563 = arith.truncf %562 : vector<8x10xf32> to vector<8x10xbf16>
    %564 = vector.extract_strided_slice %508 {offsets = [0, 16], sizes = [10, 8], strides = [1, 1]} : vector<10x32xbf16> to vector<10x8xbf16>
    %cst_211 = arith.constant dense<0.000000e+00> : vector<8x8xf32>
    %565 = tpu.matmul %563, %564, %cst_211 {dimension_numbers = #tpu.dot_dimension_numbers<[1], [0], [0], [1], [0, 0, 1, 1], [], []>} : vector<8x10xbf16>, vector<10x8xbf16>, vector<8x8xf32> -> vector<8x8xf32>
    %566 = arith.truncf %565 : vector<8x8xf32> to vector<8x8xbf16>
    %567 = vector.extract_strided_slice %480 {offsets = [0, 16], sizes = [32, 8], strides = [1, 1]} : vector<32x32xbf16> to vector<32x8xbf16>
    %cst_212 = arith.constant dense<0.000000e+00> : vector<8x32xf32>
    %568 = tpu.matmul %566, %567, %cst_212 {dimension_numbers = #tpu.dot_dimension_numbers<[1], [1], [0], [0], [0, 0, 1, 0], [], []>} : vector<8x8xbf16>, vector<32x8xbf16>, vector<8x32xf32> -> vector<8x32xf32>
    %569 = arith.addf %549, %568 : vector<8x32xf32>
    %570 = vector.extract_strided_slice %506 {offsets = [0, 24], sizes = [8, 8], strides = [1, 1]} : vector<8x32xbf16> to vector<8x8xbf16>
    %571 = vector.extract_strided_slice %507 {offsets = [0, 24], sizes = [10, 8], strides = [1, 1]} : vector<10x32xbf16> to vector<10x8xbf16>
    %cst_213 = arith.constant dense<0.000000e+00> : vector<8x10xf32>
    %572 = tpu.matmul %570, %571, %cst_213 {dimension_numbers = #tpu.dot_dimension_numbers<[1], [1], [0], [0], [0, 0, 1, 0], [], []>} : vector<8x8xbf16>, vector<10x8xbf16>, vector<8x10xf32> -> vector<8x10xf32>
    %cst_214 = arith.constant dense<0xFF800000> : vector<8xf32>
    %573 = vector.multi_reduction <maximumf>, %572, %cst_214 [1] : vector<8x10xf32> to vector<8xf32>
    %574 = vector.shape_cast %573 : vector<8xf32> to vector<8x1xf32>
    %575 = vector.broadcast %574 : vector<8x1xf32> to vector<8x10xf32>
    %576 = arith.subf %572, %575 : vector<8x10xf32>
    %577 = math.exp %576 : vector<8x10xf32>
    %cst_215 = arith.constant dense<0.000000e+00> : vector<8xf32>
    %578 = vector.multi_reduction <add>, %577, %cst_215 [1] : vector<8x10xf32> to vector<8xf32>
    %579 = vector.shape_cast %578 : vector<8xf32> to vector<8x1xf32>
    %580 = tpu.reciprocal %579 {approx = true} : vector<8x1xf32> -> vector<8x1xf32>
    %581 = vector.broadcast %580 : vector<8x1xf32> to vector<8x10xf32>
    %582 = arith.mulf %577, %581 : vector<8x10xf32>
    %583 = arith.truncf %582 : vector<8x10xf32> to vector<8x10xbf16>
    %584 = vector.extract_strided_slice %508 {offsets = [0, 24], sizes = [10, 8], strides = [1, 1]} : vector<10x32xbf16> to vector<10x8xbf16>
    %cst_216 = arith.constant dense<0.000000e+00> : vector<8x8xf32>
    %585 = tpu.matmul %583, %584, %cst_216 {dimension_numbers = #tpu.dot_dimension_numbers<[1], [0], [0], [1], [0, 0, 1, 1], [], []>} : vector<8x10xbf16>, vector<10x8xbf16>, vector<8x8xf32> -> vector<8x8xf32>
    %586 = arith.truncf %585 : vector<8x8xf32> to vector<8x8xbf16>
    %587 = vector.extract_strided_slice %480 {offsets = [0, 24], sizes = [32, 8], strides = [1, 1]} : vector<32x32xbf16> to vector<32x8xbf16>
    %cst_217 = arith.constant dense<0.000000e+00> : vector<8x32xf32>
    %588 = tpu.matmul %586, %587, %cst_217 {dimension_numbers = #tpu.dot_dimension_numbers<[1], [1], [0], [0], [0, 0, 1, 0], [], []>} : vector<8x8xbf16>, vector<32x8xbf16>, vector<8x32xf32> -> vector<8x32xf32>
    %589 = arith.addf %569, %588 : vector<8x32xf32>
    %590 = arith.addf %474, %589 : vector<8x32xf32>
    %591 = vector.broadcast %482 : vector<1x32xf32> to vector<8x32xf32>
    %592 = arith.addf %590, %591 : vector<8x32xf32>
    %cst_218 = arith.constant dense<0.000000e+00> : vector<8xf32>
    %593 = vector.multi_reduction <add>, %592, %cst_218 [1] : vector<8x32xf32> to vector<8xf32>
    %594 = vector.shape_cast %593 : vector<8xf32> to vector<8x1xf32>
    %cst_219 = arith.constant 3.200000e+01 : f32
    %595 = vector.broadcast %cst_219 : f32 to vector<8x1xf32>
    %596 = arith.divf %594, %595 : vector<8x1xf32>
    %597 = vector.broadcast %596 : vector<8x1xf32> to vector<8x32xf32>
    %598 = arith.subf %592, %597 : vector<8x32xf32>
    %599 = arith.mulf %598, %598 : vector<8x32xf32>
    %cst_220 = arith.constant dense<0.000000e+00> : vector<8xf32>
    %600 = vector.multi_reduction <add>, %599, %cst_220 [1] : vector<8x32xf32> to vector<8xf32>
    %601 = vector.shape_cast %600 : vector<8xf32> to vector<8x1xf32>
    %cst_221 = arith.constant 3.200000e+01 : f32
    %602 = vector.broadcast %cst_221 : f32 to vector<8x1xf32>
    %603 = arith.divf %601, %602 : vector<8x1xf32>
    %cst_222 = arith.constant 9.99999974E-6 : f32
    %604 = vector.broadcast %cst_222 : f32 to vector<8x1xf32>
    %605 = arith.addf %603, %604 : vector<8x1xf32>
    %606 = math.rsqrt %605 : vector<8x1xf32>
    %607 = vector.broadcast %606 : vector<8x1xf32> to vector<8x32xf32>
    %608 = arith.mulf %598, %607 : vector<8x32xf32>
    %609 = vector.broadcast %484 : vector<1x32xf32> to vector<8x32xf32>
    %610 = arith.mulf %608, %609 : vector<8x32xf32>
    %611 = vector.broadcast %486 : vector<1x32xf32> to vector<8x32xf32>
    %612 = arith.addf %610, %611 : vector<8x32xf32>
    %c1_223 = arith.constant 1 : index
    %c0_224 = arith.constant 0 : index
    %c0_225 = arith.constant 0 : index
    %613 = vector.load %arg11[%c1_223, %c0_224, %c0_225] : memref<2x64x32xbf16, #tpu.memory_space<vmem>>, vector<1x64x32xbf16>
    %614 = vector.shape_cast %613 : vector<1x64x32xbf16> to vector<64x32xbf16>
    %c1_226 = arith.constant 1 : index
    %c0_227 = arith.constant 0 : index
    %c0_228 = arith.constant 0 : index
    %615 = vector.load %arg12[%c1_226, %c0_227, %c0_228] : memref<2x1x64xf32, #tpu.memory_space<vmem>>, vector<1x1x64xf32>
    %616 = vector.shape_cast %615 : vector<1x1x64xf32> to vector<1x64xf32>
    %c1_229 = arith.constant 1 : index
    %c0_230 = arith.constant 0 : index
    %c0_231 = arith.constant 0 : index
    %617 = vector.load %arg13[%c1_229, %c0_230, %c0_231] : memref<2x32x64xbf16, #tpu.memory_space<vmem>>, vector<1x32x64xbf16>
    %618 = vector.shape_cast %617 : vector<1x32x64xbf16> to vector<32x64xbf16>
    %c1_232 = arith.constant 1 : index
    %c0_233 = arith.constant 0 : index
    %c0_234 = arith.constant 0 : index
    %619 = vector.load %arg14[%c1_232, %c0_233, %c0_234] : memref<2x1x32xf32, #tpu.memory_space<vmem>>, vector<1x1x32xf32>
    %620 = vector.shape_cast %619 : vector<1x1x32xf32> to vector<1x32xf32>
    %c1_235 = arith.constant 1 : index
    %c0_236 = arith.constant 0 : index
    %c0_237 = arith.constant 0 : index
    %621 = vector.load %arg19[%c1_235, %c0_236, %c0_237] : memref<2x1x32xf32, #tpu.memory_space<vmem>>, vector<1x1x32xf32>
    %622 = vector.shape_cast %621 : vector<1x1x32xf32> to vector<1x32xf32>
    %c1_238 = arith.constant 1 : index
    %c0_239 = arith.constant 0 : index
    %c0_240 = arith.constant 0 : index
    %623 = vector.load %arg20[%c1_238, %c0_239, %c0_240] : memref<2x1x32xf32, #tpu.memory_space<vmem>>, vector<1x1x32xf32>
    %624 = vector.shape_cast %623 : vector<1x1x32xf32> to vector<1x32xf32>
    %625 = arith.truncf %612 : vector<8x32xf32> to vector<8x32xbf16>
    %cst_241 = arith.constant dense<0.000000e+00> : vector<8x64xf32>
    %626 = tpu.matmul %625, %614, %cst_241 {dimension_numbers = #tpu.dot_dimension_numbers<[1], [1], [0], [0], [0, 0, 1, 0], [], []>} : vector<8x32xbf16>, vector<64x32xbf16>, vector<8x64xf32> -> vector<8x64xf32>
    %627 = vector.broadcast %616 : vector<1x64xf32> to vector<8x64xf32>
    %628 = arith.addf %626, %627 : vector<8x64xf32>
    %cst_242 = arith.constant 0.000000e+00 : f32
    %629 = vector.broadcast %cst_242 : f32 to vector<8x64xf32>
    %630 = arith.maximumf %628, %629 : vector<8x64xf32>
    %631 = arith.truncf %630 : vector<8x64xf32> to vector<8x64xbf16>
    %cst_243 = arith.constant dense<0.000000e+00> : vector<8x32xf32>
    %632 = tpu.matmul %631, %618, %cst_243 {dimension_numbers = #tpu.dot_dimension_numbers<[1], [1], [0], [0], [0, 0, 1, 0], [], []>} : vector<8x64xbf16>, vector<32x64xbf16>, vector<8x32xf32> -> vector<8x32xf32>
    %633 = vector.broadcast %620 : vector<1x32xf32> to vector<8x32xf32>
    %634 = arith.addf %632, %633 : vector<8x32xf32>
    %635 = arith.addf %612, %634 : vector<8x32xf32>
    %cst_244 = arith.constant dense<0.000000e+00> : vector<8xf32>
    %636 = vector.multi_reduction <add>, %635, %cst_244 [1] : vector<8x32xf32> to vector<8xf32>
    %637 = vector.shape_cast %636 : vector<8xf32> to vector<8x1xf32>
    %cst_245 = arith.constant 3.200000e+01 : f32
    %638 = vector.broadcast %cst_245 : f32 to vector<8x1xf32>
    %639 = arith.divf %637, %638 : vector<8x1xf32>
    %640 = vector.broadcast %639 : vector<8x1xf32> to vector<8x32xf32>
    %641 = arith.subf %635, %640 : vector<8x32xf32>
    %642 = arith.mulf %641, %641 : vector<8x32xf32>
    %cst_246 = arith.constant dense<0.000000e+00> : vector<8xf32>
    %643 = vector.multi_reduction <add>, %642, %cst_246 [1] : vector<8x32xf32> to vector<8xf32>
    %644 = vector.shape_cast %643 : vector<8xf32> to vector<8x1xf32>
    %cst_247 = arith.constant 3.200000e+01 : f32
    %645 = vector.broadcast %cst_247 : f32 to vector<8x1xf32>
    %646 = arith.divf %644, %645 : vector<8x1xf32>
    %cst_248 = arith.constant 9.99999974E-6 : f32
    %647 = vector.broadcast %cst_248 : f32 to vector<8x1xf32>
    %648 = arith.addf %646, %647 : vector<8x1xf32>
    %649 = math.rsqrt %648 : vector<8x1xf32>
    %650 = vector.broadcast %649 : vector<8x1xf32> to vector<8x32xf32>
    %651 = arith.mulf %641, %650 : vector<8x32xf32>
    %652 = vector.broadcast %622 : vector<1x32xf32> to vector<8x32xf32>
    %653 = arith.mulf %651, %652 : vector<8x32xf32>
    %654 = vector.broadcast %624 : vector<1x32xf32> to vector<8x32xf32>
    %655 = arith.addf %653, %654 : vector<8x32xf32>
    %c0_249 = arith.constant 0 : index
    %c0_250 = arith.constant 0 : index
    %656 = vector.load %arg21[%c0_249, %c0_250] : memref<1x32xf32, #tpu.memory_space<vmem>>, vector<1x32xf32>
    %c0_251 = arith.constant 0 : index
    %c0_252 = arith.constant 0 : index
    %657 = vector.load %arg22[%c0_251, %c0_252] : memref<1x32xf32, #tpu.memory_space<vmem>>, vector<1x32xf32>
    %cst_253 = arith.constant dense<0.000000e+00> : vector<8xf32>
    %658 = vector.multi_reduction <add>, %655, %cst_253 [1] : vector<8x32xf32> to vector<8xf32>
    %659 = vector.shape_cast %658 : vector<8xf32> to vector<8x1xf32>
    %cst_254 = arith.constant 3.200000e+01 : f32
    %660 = vector.broadcast %cst_254 : f32 to vector<8x1xf32>
    %661 = arith.divf %659, %660 : vector<8x1xf32>
    %662 = vector.broadcast %661 : vector<8x1xf32> to vector<8x32xf32>
    %663 = arith.subf %655, %662 : vector<8x32xf32>
    %664 = arith.mulf %663, %663 : vector<8x32xf32>
    %cst_255 = arith.constant dense<0.000000e+00> : vector<8xf32>
    %665 = vector.multi_reduction <add>, %664, %cst_255 [1] : vector<8x32xf32> to vector<8xf32>
    %666 = vector.shape_cast %665 : vector<8xf32> to vector<8x1xf32>
    %cst_256 = arith.constant 3.200000e+01 : f32
    %667 = vector.broadcast %cst_256 : f32 to vector<8x1xf32>
    %668 = arith.divf %666, %667 : vector<8x1xf32>
    %cst_257 = arith.constant 9.99999974E-6 : f32
    %669 = vector.broadcast %cst_257 : f32 to vector<8x1xf32>
    %670 = arith.addf %668, %669 : vector<8x1xf32>
    %671 = math.rsqrt %670 : vector<8x1xf32>
    %672 = vector.broadcast %671 : vector<8x1xf32> to vector<8x32xf32>
    %673 = arith.mulf %663, %672 : vector<8x32xf32>
    %674 = vector.broadcast %656 : vector<1x32xf32> to vector<8x32xf32>
    %675 = arith.mulf %673, %674 : vector<8x32xf32>
    %676 = vector.broadcast %657 : vector<1x32xf32> to vector<8x32xf32>
    %677 = arith.addf %675, %676 : vector<8x32xf32>
    %678 = arith.truncf %677 : vector<8x32xf32> to vector<8x32xbf16>
    %c0_258 = arith.constant 0 : index
    %c0_259 = arith.constant 0 : index
    %679 = vector.load %arg23[%c0_258, %c0_259] : memref<128x32xbf16, #tpu.memory_space<vmem>>, vector<128x32xbf16>
    %cst_260 = arith.constant dense<0.000000e+00> : vector<8x128xf32>
    %680 = tpu.matmul %678, %679, %cst_260 {dimension_numbers = #tpu.dot_dimension_numbers<[1], [1], [0], [0], [0, 0, 1, 0], [], []>} : vector<8x32xbf16>, vector<128x32xbf16>, vector<8x128xf32> -> vector<8x128xf32>
    %c0_261 = arith.constant 0 : index
    %c0_262 = arith.constant 0 : index
    %681 = vector.load %arg24[%c0_261, %c0_262] : memref<1x128xf32, #tpu.memory_space<vmem>>, vector<1x128xf32>
    %682 = vector.broadcast %681 : vector<1x128xf32> to vector<8x128xf32>
    %683 = arith.addf %680, %682 : vector<8x128xf32>
    %c0_263 = arith.constant 0 : index
    %c0_264 = arith.constant 0 : index
    %c0_265 = arith.constant 0 : index
    %684 = vector.load %arg25[%c0_263, %c0_264, %c0_265] : memref<1x8x128xf32, #tpu.memory_space<vmem>>, vector<1x8x128xf32>
    %685 = vector.shape_cast %684 : vector<1x8x128xf32> to vector<8x128xf32>
    %686 = vector.shape_cast %683 : vector<8x128xf32> to vector<1x8x128xf32>
    tpu.vector_store %arg25[%c0_263, %c0_264, %c0_265], %686 {strides = array<i32>} : memref<1x8x128xf32, #tpu.memory_space<vmem>>, vector<1x8x128xf32>,
    return
  }
  func.func @transform_0(%arg0: i32) -> (i32, i32, i32) {
    %c0_i32 = arith.constant 0 : i32
    %c0_i32_0 = arith.constant 0 : i32
    %c0_i32_1 = arith.constant 0 : i32
    return %arg0, %c0_i32, %c0_i32_0 : i32, i32, i32
  }
  func.func @transform_1(%arg0: i32) -> (i32, i32, i32) {
    %c0_i32 = arith.constant 0 : i32
    %c0_i32_0 = arith.constant 0 : i32
    %c0_i32_1 = arith.constant 0 : i32
    return %arg0, %c0_i32, %c0_i32_0 : i32, i32, i32
  }
  func.func @transform_2(%arg0: i32) -> (i32, i32, i32) {
    %c0_i32 = arith.constant 0 : i32
    %c0_i32_0 = arith.constant 0 : i32
    %c0_i32_1 = arith.constant 0 : i32
    %c0_i32_2 = arith.constant 0 : i32
    return %c0_i32, %c0_i32_0, %c0_i32_1 : i32, i32, i32
  }
  func.func @transform_3(%arg0: i32) -> (i32, i32, i32) {
    %c0_i32 = arith.constant 0 : i32
    %c0_i32_0 = arith.constant 0 : i32
    %c0_i32_1 = arith.constant 0 : i32
    %c0_i32_2 = arith.constant 0 : i32
    return %c0_i32, %c0_i32_0, %c0_i32_1 : i32, i32, i32
  }
  func.func @transform_4(%arg0: i32) -> (i32, i32, i32) {
    %c0_i32 = arith.constant 0 : i32
    %c0_i32_0 = arith.constant 0 : i32
    %c0_i32_1 = arith.constant 0 : i32
    %c0_i32_2 = arith.constant 0 : i32
    return %c0_i32, %c0_i32_0, %c0_i32_1 : i32, i32, i32
  }
  func.func @transform_5(%arg0: i32) -> (i32, i32, i32) {
    %c0_i32 = arith.constant 0 : i32
    %c0_i32_0 = arith.constant 0 : i32
    %c0_i32_1 = arith.constant 0 : i32
    %c0_i32_2 = arith.constant 0 : i32
    return %c0_i32, %c0_i32_0, %c0_i32_1 : i32, i32, i32
  }
  func.func @transform_6(%arg0: i32) -> (i32, i32, i32) {
    %c0_i32 = arith.constant 0 : i32
    %c0_i32_0 = arith.constant 0 : i32
    %c0_i32_1 = arith.constant 0 : i32
    %c0_i32_2 = arith.constant 0 : i32
    return %c0_i32, %c0_i32_0, %c0_i32_1 : i32, i32, i32
  }
  func.func @transform_7(%arg0: i32) -> (i32, i32, i32) {
    %c0_i32 = arith.constant 0 : i32
    %c0_i32_0 = arith.constant 0 : i32
    %c0_i32_1 = arith.constant 0 : i32
    %c0_i32_2 = arith.constant 0 : i32
    return %c0_i32, %c0_i32_0, %c0_i32_1 : i32, i32, i32
  }
  func.func @transform_8(%arg0: i32) -> (i32, i32, i32) {
    %c0_i32 = arith.constant 0 : i32
    %c0_i32_0 = arith.constant 0 : i32
    %c0_i32_1 = arith.constant 0 : i32
    %c0_i32_2 = arith.constant 0 : i32
    return %c0_i32, %c0_i32_0, %c0_i32_1 : i32, i32, i32
  }
  func.func @transform_9(%arg0: i32) -> (i32, i32, i32) {
    %c0_i32 = arith.constant 0 : i32
    %c0_i32_0 = arith.constant 0 : i32
    %c0_i32_1 = arith.constant 0 : i32
    %c0_i32_2 = arith.constant 0 : i32
    return %c0_i32, %c0_i32_0, %c0_i32_1 : i32, i32, i32
  }
  func.func @transform_10(%arg0: i32) -> (i32, i32, i32) {
    %c0_i32 = arith.constant 0 : i32
    %c0_i32_0 = arith.constant 0 : i32
    %c0_i32_1 = arith.constant 0 : i32
    %c0_i32_2 = arith.constant 0 : i32
    return %c0_i32, %c0_i32_0, %c0_i32_1 : i32, i32, i32
  }
  func.func @transform_11(%arg0: i32) -> (i32, i32, i32) {
    %c0_i32 = arith.constant 0 : i32
    %c0_i32_0 = arith.constant 0 : i32
    %c0_i32_1 = arith.constant 0 : i32
    %c0_i32_2 = arith.constant 0 : i32
    return %c0_i32, %c0_i32_0, %c0_i32_1 : i32, i32, i32
  }
  func.func @transform_12(%arg0: i32) -> (i32, i32, i32) {
    %c0_i32 = arith.constant 0 : i32
    %c0_i32_0 = arith.constant 0 : i32
    %c0_i32_1 = arith.constant 0 : i32
    %c0_i32_2 = arith.constant 0 : i32
    return %c0_i32, %c0_i32_0, %c0_i32_1 : i32, i32, i32
  }
  func.func @transform_13(%arg0: i32) -> (i32, i32, i32) {
    %c0_i32 = arith.constant 0 : i32
    %c0_i32_0 = arith.constant 0 : i32
    %c0_i32_1 = arith.constant 0 : i32
    %c0_i32_2 = arith.constant 0 : i32
    return %c0_i32, %c0_i32_0, %c0_i32_1 : i32, i32, i32
  }
  func.func @transform_14(%arg0: i32) -> (i32, i32, i32) {
    %c0_i32 = arith.constant 0 : i32
    %c0_i32_0 = arith.constant 0 : i32
    %c0_i32_1 = arith.constant 0 : i32
    %c0_i32_2 = arith.constant 0 : i32
    return %c0_i32, %c0_i32_0, %c0_i32_1 : i32, i32, i32
  }
  func.func @transform_15(%arg0: i32) -> (i32, i32, i32) {
    %c0_i32 = arith.constant 0 : i32
    %c0_i32_0 = arith.constant 0 : i32
    %c0_i32_1 = arith.constant 0 : i32
    %c0_i32_2 = arith.constant 0 : i32
    return %c0_i32, %c0_i32_0, %c0_i32_1 : i32, i32, i32
  }
  func.func @transform_16(%arg0: i32) -> (i32, i32, i32) {
    %c0_i32 = arith.constant 0 : i32
    %c0_i32_0 = arith.constant 0 : i32
    %c0_i32_1 = arith.constant 0 : i32
    %c0_i32_2 = arith.constant 0 : i32
    return %c0_i32, %c0_i32_0, %c0_i32_1 : i32, i32, i32
  }
  func.func @transform_17(%arg0: i32) -> (i32, i32, i32) {
    %c0_i32 = arith.constant 0 : i32
    %c0_i32_0 = arith.constant 0 : i32
    %c0_i32_1 = arith.constant 0 : i32
    %c0_i32_2 = arith.constant 0 : i32
    return %c0_i32, %c0_i32_0, %c0_i32_1 : i32, i32, i32
  }
  func.func @transform_18(%arg0: i32) -> (i32, i32, i32) {
    %c0_i32 = arith.constant 0 : i32
    %c0_i32_0 = arith.constant 0 : i32
    %c0_i32_1 = arith.constant 0 : i32
    %c0_i32_2 = arith.constant 0 : i32
    return %c0_i32, %c0_i32_0, %c0_i32_1 : i32, i32, i32
  }
  func.func @transform_19(%arg0: i32) -> (i32, i32, i32) {
    %c0_i32 = arith.constant 0 : i32
    %c0_i32_0 = arith.constant 0 : i32
    %c0_i32_1 = arith.constant 0 : i32
    %c0_i32_2 = arith.constant 0 : i32
    return %c0_i32, %c0_i32_0, %c0_i32_1 : i32, i32, i32
  }
  func.func @transform_20(%arg0: i32) -> (i32, i32) {
    %c0_i32 = arith.constant 0 : i32
    %c0_i32_0 = arith.constant 0 : i32
    %c0_i32_1 = arith.constant 0 : i32
    return %c0_i32, %c0_i32_0 : i32, i32
  }
  func.func @transform_21(%arg0: i32) -> (i32, i32) {
    %c0_i32 = arith.constant 0 : i32
    %c0_i32_0 = arith.constant 0 : i32
    %c0_i32_1 = arith.constant 0 : i32
    return %c0_i32, %c0_i32_0 : i32, i32
  }
  func.func @transform_22(%arg0: i32) -> (i32, i32) {
    %c0_i32 = arith.constant 0 : i32
    %c0_i32_0 = arith.constant 0 : i32
    %c0_i32_1 = arith.constant 0 : i32
    return %c0_i32, %c0_i32_0 : i32, i32
  }
  func.func @transform_23(%arg0: i32) -> (i32, i32) {
    %c0_i32 = arith.constant 0 : i32
    %c0_i32_0 = arith.constant 0 : i32
    %c0_i32_1 = arith.constant 0 : i32
    return %c0_i32, %c0_i32_0 : i32, i32
  }
  func.func @transform_24(%arg0: i32) -> (i32, i32, i32) {
    %c0_i32 = arith.constant 0 : i32
    %c0_i32_0 = arith.constant 0 : i32
    %c0_i32_1 = arith.constant 0 : i32
    return %arg0, %c0_i32, %c0_i32_0 : i32, i32, i32
  }
}

</mosaic_0001>

<bundles_post_ra>
// kernel: transformer_forward.2
= control target key start
LH: loop header
LB: loop body
LE: loop exit
PB: predicated region body
PF: predicated region fallthrough
CT: control target
= control target key end

     0   :  { %s3762_s21 = smov 0   ;;  %s4354_s0 = inlined_call_operand.vmem [shape: f32[2,10,32], index: 0, kind: input, shape index: {}]   ;;  %s4355_s1 = inlined_call_operand.vmem [shape: f32[2,1,10], index: 1, kind: input, shape index: {}]   ;;  %s4356_s2 = inlined_call_operand.vmem [shape: bf16[2,96,32], index: 2, kind: input, shape index: {}]   ;;  %s4357_s3 = inlined_call_operand.vmem [shape: f32[2,1,96], index: 3, kind: input, shape index: {}]   ;;  %s4358_s4 = inlined_call_operand.vmem [shape: bf16[2,32,32], index: 4, kind: input, shape index: {}]   ;;  %s4359_s5 = inlined_call_operand.vmem [shape: f32[2,1,32], index: 5, kind: input, shape index: {}]   ;;  %s4360_s6 = inlined_call_operand.vmem [shape: bf16[2,64,32], index: 6, kind: input, shape index: {}]   ;;  %s4361_s7 = inlined_call_operand.vmem [shape: f32[2,1,64], index: 7, kind: input, shape index: {}]   ;;  %s4362_s8 = inlined_call_operand.vmem [shape: bf16[2,32,64], index: 8, kind: input, shape index: {}]   ;;  %s4363_s9 = inlined_call_operand.vmem [shape: f32[2,1,32], index: 9, kind: input, shape index: {}]   ;;  %s4364_s10 = inlined_call_operand.vmem [shape: f32[2,1,32], index: 10, kind: input, shape index: {}]   ;;  %s4365_s11 = inlined_call_operand.vmem [shape: f32[2,1,32], index: 11, kind: input, shape index: {}]   ;;  %s4366_s12 = inlined_call_operand.vmem [shape: f32[2,1,32], index: 12, kind: input, shape index: {}]   ;;  %s4367_s13 = inlined_call_operand.vmem [shape: f32[2,1,32], index: 13, kind: input, shape index: {}]   ;;  %s4368_s14 = inlined_call_operand.vmem [shape: f32[1,32], index: 14, kind: input, shape index: {}]   ;;  %s4369_s15 = inlined_call_operand.vmem [shape: f32[1,32], index: 15, kind: input, shape index: {}]   ;;  %s4370_s16 = inlined_call_operand.vmem [shape: f32[2,10,32], index: 16, kind: output, shape index: {}]  }
   0x1   :  { %4371 = sst [smem:[#allocation2_spill]] %s4354_s0 }
   0x2 LB: > { %s3066_s22 = sadd.s32 4294967295, %s3668_s21   ;;  %p3070_p0 = scmp.ge.s32.totalorder %s3668_s21, 1  ;;  %s3668_s21 = sphi %s3762_s21, %s26_s21  }
   0x3   : > { %p470_p1 = scmp.lt.s32.totalorder %s3668_s21, 3 }
   0x5   : > { %p471_p2 = pnand %p3070_p0, %p470_p1 }
   0x6   : > { %vm583_vm0 = vcmask (!%p471_p2), 261120   ;;  %v3670_v0 = vmov (!%p471_p2), 0.0   ;;  %v3549_v1 = vld [vmem:[%s4356_s2 + $0x10] sm:$0xff] (!%p471_p2)   ;;  %v3550_v2 = vld [vmem:[%s4356_s2] sm:$0xff] (!%p471_p2)   ;;  %vm3671_vm1 = vmmov (!%p471_p2), 0   ;;  %p523_p3 = scmp.lt.s32.totalorder (!%p471_p2), %s3066_s22, 1 }
   0x7   : > { %474 = sbr.rel (%p471_p2) target bundleno = 7690 (0x1e0a), region = 84  ;;  %3294 = vmatprep.subr.bf16.mxu1 (!%p471_p2), %v3670_v0  ;;  %3286 = vmatprep.subr.bf16.mxu0 (!%p471_p2), %v3670_v0  ;;  %v648_v3 = vsel (!%p471_p2), %vm583_vm0, %v3549_v1, 0  ;;  %v588_v4 = vsel (!%p471_p2), %vm583_vm0, %v3550_v2, 0  ;;  %v3551_v5 = vld [vmem:[%s4356_s2 + $0x18] sm:$0xff] (!%p471_p2)   ;;  %v3552_v6 = vld [vmem:[%s4356_s2 + $0x8] sm:$0xff] (!%p471_p2)   ;;  %s3672_s19 = smov (!%p471_p2), 96  }
   0x8   : > { %3298 = vmatprep.mubr.msk.bf16.mxu1 (!%p471_p2), %vm3671_vm1, %v3670_v0  ;;  %3290 = vmatprep.mubr.msk.bf16.mxu0 (!%p471_p2), %vm3671_vm1, %v3670_v0  ;;  %v3795_v7 = vld [vmem:[%s4357_s3] ss:$0 sm:$0xff] (!%p471_p2)  ;;  %s4372_s24 = sld [smem:[#allocation2_spill]] (!%p471_p2)  ;;  %v651_v8 = vsel (!%p471_p2), %vm583_vm0, %v3551_v5, 0  ;;  %v591_v9 = vsel (!%p471_p2), %vm583_vm0, %v3552_v6, 0  ;;  %v3554_v15 = vld [vmem:[%s4356_s2 + $0x28] sm:$0xff] (!%p471_p2)  }
   0x9   : > { %3295 = vmatpush3.bf16.xpose.msra.mxu1 (!%p471_p2), %v648_v3  ;;  %3287 = vmatpush3.bf16.xpose.msra.mxu0 (!%p471_p2), %v588_v4  ;;  %v3553_v13 = vld [vmem:[%s4356_s2 + $0x20] sm:$0xff] (!%p471_p2)   ;;  %v711_v16 = vsel (!%p471_p2), %vm583_vm0, %v3554_v15, 0  ;;  %vm759_vm2 = vcmask (!%p471_p2), 64512   ;;  %s3673_s30 = smov (!%p471_p2), 120   ;;  %vm807_vm3 = vcmask (!%p471_p2), 80896   ;;  %vm811_vm4 = vcmask (!%p471_p2), 74752  }
   0xa   : > { %3296 = vmatprep.subr.bf16.mxu1 (!%p471_p2), %v3670_v0  ;;  %3288 = vmatprep.subr.bf16.mxu0 (!%p471_p2), %v3670_v0  ;;  %v708_v14 = vsel (!%p471_p2), %vm583_vm0, %v3553_v13, 0  ;;  %s3674_s23 = smov (!%p471_p2), 64   ;;  %v3884_v59 = vld [vmem:[%s4358_s4] sm:$0xff] (!%p471_p2)   ;;  %v3891_v61 = vld [vmem:[%s4358_s4 + $0x8] sm:$0xff] (!%p471_p2)   ;;  %s3675_s28 = smov (!%p471_p2), 112   ;;  %vm835_vm5 = vcmask (!%p471_p2), 1044480  }
   0xb   : > { %644 = vrot.lane.b32.xlu0 (!%p471_p2), %v3795_v7, %s3672_s19  ;;  %s3676_s29 = smov (!%p471_p2), 104   ;;  %vm1495_vm6 = vcmask (!%p471_p2), 254976   ;;  %vm1654_vm7 = vcmask (!%p471_p2), 523264  }
   0xe   : > { %s4374_s22 = smov (!%p523_p3, %s3066_s22), 1 }
   0xf   : > { %s3194_s18 = sshll.u32 %s4374_s22, 4  ;;  %s3866_s20 = scalar_lea.vmem %s4355_s1, %s4374_s22 }
  0x10   : > { %s527_s25 = scalar_lea.vmem %s4372_s24, %s3194_s18  ;;  %v3869_v42 = vld [vmem:[%s3866_s20] ss:$0 sm:$0xff] }
  0x11   : > { %v3809_v10 = vld [vmem:[%s527_s25] sm:$0xff]  ;;  %v3811_v11 = vld [vmem:[%s527_s25 + $0x8] sm:$0x3]  ;;  %3297 = vmatpush3.bf16.xpose.msra.mxu1 %v651_v8  ;;  %3289 = vmatpush3.bf16.xpose.msra.mxu0 %v591_v9 }
  0x12   : > { %3310 = vmatprep.subr.bf16.mxu1 %v3670_v0  ;;  %3302 = vmatprep.subr.bf16.mxu0 %v3670_v0  ;;  %v566_v12 = vpack.c.bf16 %v3811_v11, %v3809_v10 }
  0x18   : > { %3299 = vmatmul.mubr.msk.bf16.vlgmr.msra.gmra.mrb[0].mxu1 %vm583_vm0, %v566_v12  ;;  %3291 = vmatmul.mubr.msk.bf16.vlgmr.msra.gmra.mrb[0].mxu0 %vm583_vm0, %v566_v12 }
  0x19   : > { %3312 = vmatprep.mubr.msk.bf16.mxu1 %vm3671_vm1, %v3670_v0  ;;  %3306 = vmatprep.mubr.msk.bf16.mxu0 %vm3671_vm1, %v3670_v0 }
  0x1a   : > { %3303 = vmatpush3.bf16.xpose.msra.mxu0 %v708_v14 }
  0x1b   : > { %3304 = vmatprep.subr.bf16.mxu0 %v3670_v0 }
  0x22   : > { %3305 = vmatpush3.bf16.xpose.msra.mxu0 %v711_v16 }
  0x23   : > { %3322 = vmatprep.subr.bf16.mxu0 %v3670_v0 }
  0x29   : > { %3307 = vmatmul.mubr.msk.bf16.vlgmr.msra.gmra.mrb[4].mxu0 %vm583_vm0, %v566_v12 }
  0x2a   : > { %3324 = vmatprep.mubr.msk.bf16.mxu0 %vm3671_vm1, %v3670_v0 }
  0x7d   : > { %v645_v17 = vpop.permute.xlu0 %644 }
  0xeb   : > { %v687_v18 = vpop.f32.mrb[0].mxu1  ;;  %v627_v20 = vpop.f32.mrb[0].mxu0 }
  0xec   : > { %v3300_v19 = vpop.f32.mrb[1].mxu1  ;;  %v628_v22 = vadd.f32 %v3795_v7, %v627_v20  ;;  %v3292_v23 = vpop.f32.mrb[1].mxu0  ;;  %v688_v24 = vadd.f32 %v687_v18, %v645_v17 }
  0xed   : > { %v690_v21 = vpop.f32.mrb[2].mxu1  ;;  %v630_v27 = vpop.f32.mrb[2].mxu0 }
  0xee   : > { %v691_v25 = vadd.f32 %v690_v21, %v645_v17  ;;  %v3301_v26 = vpop.f32.mrb[3].mxu1  ;;  %v754_v28 = vmul.f32 0.35355338, %v628_v22  ;;  %v631_v29 = vadd.f32 %v3795_v7, %v630_v27  ;;  %v3293_v30 = vpop.f32.mrb[3].mxu0 }
  0xf0   : > { %v3838_v31 = vpack.c.bf16 %v691_v25, %v688_v24  ;;  %v755_v32 = vmul.f32 0.35355338, %v631_v29 }
  0xf2   : > { %885 = vrot.lane.b32.xlu0 %v3838_v31, %s3673_s30  ;;  %v764_v33 = vsel %vm759_vm2, %v3838_v31, 0  ;;  %v3844_v34 = vpack.c.bf16 %v755_v32, %v754_v28 }
  0xf3   : > { %3311 = vmatpush3.bf16.xpose.msra.mxu1 %v764_v33 }
  0xf4   : > { %3316 = vmatprep.subr.bf16.mxu1 %v3670_v0  ;;  %882 = vrot.lane.b32.xlu1 %v3844_v34, %s3673_s30 }
  0xfa   : > { %3313 = vmatmul.mubr.msk.bf16.vlgmr.msra.gmra.mrb[4].mxu1 %vm759_vm2, %v3844_v34 }
  0xfb   : > { %3318 = vmatprep.mubr.msk.bf16.mxu1 %vm3671_vm1, %v3670_v0 }
  0xfc   : > { %v3853_v35 = vpop.f32.mrb[4].mxu0 }
  0xfd   : > { %v3308_v36 = vpop.f32.mrb[5].mxu0 }
  0xfe   : > { %v3855_v37 = vpop.f32.mrb[6].mxu0 }
  0xff   : > { %v3309_v38 = vpop.f32.mrb[7].mxu0 }
 0x164   : > { %v886_v39 = vpop.permute.xlu0 %885 }
 0x165   : > { %v891_v40 = vsel %vm759_vm2, %v886_v39, 0 }
 0x166   : > { %3323 = vmatpush3.bf16.xpose.msra.mxu0 %v891_v40  ;;  %v883_v41 = vpop.permute.xlu1 %882 }
 0x167   : > { %3334 = vmatprep.subr.bf16.mxu0 %v3670_v0 }
 0x16d   : > { %3325 = vmatmul.mubr.msk.bf16.vlgmr.msra.gmra.mrb[8].mxu0 %vm759_vm2, %v883_v41 }
 0x16e   : > { %3338 = vmatprep.mubr.msk.bf16.mxu0 %vm3671_vm1, %v3670_v0 }
 0x1cd   : > { %v800_v43 = vpop.f32.mrb[4].mxu1 }
 0x1ce   : > { %v801_v44 = vadd.f32 %v3869_v42, %v800_v43  ;;  %v3314_v45 = vpop.f32.mrb[5].mxu1 }
 0x1cf   : > { %v803_v46 = vpop.f32.mrb[6].mxu1 }
 0x1d0   : > { %v804_v47 = vadd.f32 %v3869_v42, %v803_v46  ;;  %v3315_v48 = vpop.f32.mrb[7].mxu1  ;;  %v808_v49 = vsel %vm807_vm3, %v801_v44, -inf }
 0x1d1   : > { %809 = vmax.xlane.f32.xlu1 %v808_v49  ;;  %v1076_v48 = vsel %vm759_vm2, %v3884_v59, 0  ;;  %v1079_v49 = vsel %vm759_vm2, %v3891_v61, 0 }
 0x1d2   : > { %v812_v50 = vsel %vm811_vm4, %v804_v47, -inf }
 0x1d3   : > { %813 = vmax.xlane.f32.xlu0 %v812_v50 }
 0x240   : > { %v927_v51 = vpop.f32.mrb[8].mxu0 }
 0x241   : > { %v928_v52 = vadd.f32 %v3869_v42, %v927_v51  ;;  %v3326_v53 = vpop.f32.mrb[9].mxu0 }
 0x242   : > { %v930_v54 = vpop.f32.mrb[10].mxu0 }
 0x243   : > { %v931_v55 = vadd.f32 %v3869_v42, %v930_v54  ;;  %v3327_v56 = vpop.f32.mrb[11].mxu0  ;;  %v934_v57 = vsel %vm807_vm3, %v928_v52, -inf }
 0x244   : > { %935 = vmax.xlane.f32.xlu0 %v934_v57 }
 0x245   : > { %v937_v58 = vsel %vm811_vm4, %v931_v55, -inf }
 0x246   : > { %938 = vmax.xlane.f32.xlu1 %v937_v58 }
 0x25a   : > { %704 = vrot.lane.b32.xlu0 %v3795_v7, %s3674_s23 }
 0x25e   : > { %v810_v60 = vpop.xlane.xlu1 %809  ;;  %1018 = vrot.lane.b32.xlu0 %v3884_v59, %s3673_s30 }
 0x25f   : > { %v815_v62 = vsub.f32 %v801_v44, %v810_v60 }
 0x260   : > { %v814_v63 = vpop.xlane.xlu0 %813 }
 0x261   : > { %v817_v1 = vmul.f32 1.442695, %v815_v62  ;;  %v816_v2 = vsub.f32 %v804_v47, %v814_v63 }
 0x262   : > { %1020 = vrot.lane.b32.xlu0 %v3891_v61, %s3673_s30 }
 0x263   : > { %3577 = vpow2.f32 %v817_v1  ;;  %v819_v3 = vmul.f32 1.442695, %v816_v2 }
 0x265   : > { %3579 = vpow2.f32 %v819_v3 }
 0x266   : > { %1124 = vrot.lane.b32.xlu0 %v3838_v31, %s3675_s28 }
 0x26a   : > { %1122 = vrot.lane.b32.xlu0 %v3844_v34, %s3675_s28 }
 0x26d   : > { %v3578_v4 = vpop.eup %3577 }
 0x26e   : > { %v821_v5 = vsel %vm807_vm3, %v3578_v4, 0.0 }
 0x26f   : > { %v3580_v6 = vpop.eup %3579  ;;  %822 = vadd.xlane.f32.xlu1 %v821_v5 }
 0x270   : > { %v824_v7 = vsel %vm811_vm4, %v3580_v6, 0.0 }
 0x273   : > { %825 = vadd.xlane.f32.xlu1 %v824_v7 }
 0x2d1   : > { %v936_v8 = vpop.xlane.xlu0 %935 }
 0x2d2   : > { %v940_v9 = vsub.f32 %v928_v52, %v936_v8 }
 0x2d3   : > { %v939_v12 = vpop.xlane.xlu1 %938 }
 0x2d4   : > { %v942_v13 = vmul.f32 1.442695, %v940_v9  ;;  %v941_v14 = vsub.f32 %v931_v55, %v939_v12 }
 0x2d5   : > { %v705_v15 = vpop.permute.xlu0 %704 }
 0x2d6   : > { %3581 = vpow2.f32 %v942_v13  ;;  %v944_v16 = vmul.f32 1.442695, %v941_v14  ;;  %v748_v17 = vadd.f32 %v3853_v35, %v705_v15  ;;  %v751_v18 = vadd.f32 %v3855_v37, %v705_v15 }
 0x2d8   : > { %3583 = vpow2.f32 %v944_v16  ;;  %v3903_v19 = vpack.c.bf16 %v751_v18, %v748_v17 }
 0x2d9   : > { %v1019_v20 = vpop.permute.xlu0 %1018 }
 0x2da   : > { %v1026_v21 = vsel %vm759_vm2, %v1019_v20, 0  ;;  %v837_v22 = vsel %vm835_vm5, %v3903_v19, 0 }
 0x2db   : > { %3317 = vmatpush3.bf16.msra.mxu1 %v837_v22  ;;  %3335 = vmatpush3.bf16.xpose.msra.mxu0 %v1026_v21 }
 0x2dc   : > { %3328 = vmatprep.subr.bf16.mxu1 %v3670_v0  ;;  %3336 = vmatprep.subr.bf16.mxu0 %v3670_v0 }
 0x2dd   : > { %v1021_v23 = vpop.permute.xlu0 %1020 }
 0x2de   : > { %v1029_v25 = vsel %vm759_vm2, %v1021_v23, 0 }
 0x2e0   : > { %v3582_v24 = vpop.eup %3581 }
 0x2e1   : > { %v946_v26 = vsel %vm807_vm3, %v3582_v24, 0.0  ;;  %v1125_v57 = vpop.permute.xlu0 %1124 }
 0x2e2   : > { %v3584_v27 = vpop.eup %3583  ;;  %947 = vadd.xlane.f32.xlu1 %v946_v26  ;;  %v1130_v63 = vsel %vm759_vm2, %v1125_v57, 0 }
 0x2e3   : > { %3337 = vmatpush3.bf16.xpose.msra.mxu0 %v1029_v25  ;;  %v949_v28 = vsel %vm811_vm4, %v3584_v27, 0.0 }
 0x2e4   : > { %3350 = vmatprep.subr.bf16.mxu0 %v3670_v0 }
 0x2e5   : > { %v1123_v1 = vpop.permute.xlu0 %1122 }
 0x2e6   : > { %950 = vadd.xlane.f32.xlu1 %v949_v28 }
 0x2f7   : > { %958 = vrot.lane.b32.xlu1 %v3903_v19, %s3673_s30 }
 0x2fc   : > { %v823_v29 = vpop.xlane.xlu1 %822 }
 0x2fd   : > { %3585 = vrcp.f32 %v823_v29 }
 0x300   : > { %v826_v30 = vpop.xlane.xlu1 %825 }
 0x301   : > { %3587 = vrcp.f32 %v826_v30 }
 0x307   : > { %v3586_v32 = vpop.eup %3585 }
 0x308   : > { %v829_v35 = vmul.f32 %v3586_v32, %v3578_v4 }
 0x30b   : > { %v3588_v33 = vpop.eup %3587 }
 0x30c   : > { %v830_v36 = vmul.f32 %v3588_v33, %v3580_v6 }
 0x30e   : > { %v831_v37 = vpack.c.bf16 %v830_v36, %v829_v35 }
 0x310   : > { %3319 = vmatmul.mubr.msk.bf16.vlgmr.msra.gmra.mrb[8].mxu1 %vm807_vm3, %v831_v37 }
 0x311   : > { %3330 = vmatprep.mubr.msk.bf16.mxu1 %vm3671_vm1, %v3670_v0 }
 0x36f   : > { %v948_v38 = vpop.xlane.xlu1 %947 }
 0x370   : > { %3589 = vrcp.f32 %v948_v38 }
 0x373   : > { %v951_v39 = vpop.xlane.xlu1 %950 }
 0x374   : > { %3591 = vrcp.f32 %v951_v39 }
 0x377   : > { %v959_v40 = vpop.permute.xlu1 %958 }
 0x378   : > { %v964_v41 = vsel %vm835_vm5, %v959_v40, 0 }
 0x379   : > { %3329 = vmatpush3.bf16.msra.mxu1 %v964_v41 }
 0x37a   : > { %3342 = vmatprep.subr.bf16.mxu1 %v3670_v0  ;;  %v3590_v43 = vpop.eup %3589 }
 0x37b   : > { %v954_v45 = vmul.f32 %v3590_v43, %v3582_v24 }
 0x37e   : > { %v3592_v44 = vpop.eup %3591 }
 0x37f   : > { %v955_v46 = vmul.f32 %v3592_v44, %v3584_v27 }
 0x381   : > { %v956_v47 = vpack.c.bf16 %v955_v46, %v954_v45 }
 0x383   : > { %3331 = vmatmul.mubr.msk.bf16.vlgmr.msra.gmra.mrb[12].mxu1 %vm807_vm3, %v956_v47 }
 0x384   : > { %3343 = vmatpush3.bf16.xpose.msra.mxu1 %v1076_v48  ;;  %3346 = vmatprep.mubr.msk.bf16.mxu1 %vm3671_vm1, %v3670_v0 }
 0x385   : > { %3344 = vmatprep.subr.bf16.mxu1 %v3670_v0 }
 0x38c   : > { %3345 = vmatpush3.bf16.xpose.msra.mxu1 %v1079_v49 }
 0x38d   : > { %3356 = vmatprep.subr.bf16.mxu1 %v3670_v0 }
 0x3e3   : > { %v873_v50 = vpop.f32.mrb[8].mxu1 }
 0x3e4   : > { %v3320_v51 = vpop.f32.mrb[9].mxu1 }
 0x3e5   : > { %v876_v52 = vpop.f32.mrb[10].mxu1 }
 0x3e6   : > { %v880_v53 = vpack.c.bf16 %v876_v52, %v873_v50  ;;  %v3321_v54 = vpop.f32.mrb[11].mxu1 }
 0x3e8   : > { %3347 = vmatmul.mubr.msk.bf16.vlgmr.msra.gmra.mrb[16].mxu1 %vm759_vm2, %v880_v53 }
 0x3e9   : > { %3358 = vmatprep.mubr.msk.bf16.mxu1 %vm3671_vm1, %v3670_v0 }
 0x456   : > { %v1000_v55 = vpop.f32.mrb[12].mxu1 }
 0x457   : > { %v3332_v56 = vpop.f32.mrb[13].mxu1 }
 0x458   : > { %v1003_v58 = vpop.f32.mrb[14].mxu1 }
 0x459   : > { %v1007_v60 = vpack.c.bf16 %v1003_v58, %v1000_v55  ;;  %v3333_v62 = vpop.f32.mrb[15].mxu1 }
 0x45b   : > { %3339 = vmatmul.mubr.msk.bf16.vlgmr.msra.gmra.mrb[12].mxu0 %vm759_vm2, %v1007_v60 }
 0x45c   : > { %3351 = vmatpush3.bf16.xpose.msra.mxu0 %v1130_v63  ;;  %3352 = vmatprep.mubr.msk.bf16.mxu0 %vm3671_vm1, %v3670_v0 }
 0x45d   : > { %3362 = vmatprep.subr.bf16.mxu0 %v3670_v0 }
 0x463   : > { %3353 = vmatmul.mubr.msk.bf16.vlgmr.msra.gmra.mrb[16].mxu0 %vm759_vm2, %v1123_v1 }
 0x464   : > { %3366 = vmatprep.mubr.msk.bf16.mxu0 %vm3671_vm1, %v3670_v0 }
 0x4bb   : > { %v1115_v2 = vpop.f32.mrb[16].mxu1 }
 0x4bc   : > { %v3348_v3 = vpop.f32.mrb[17].mxu1 }
 0x4bd   : > { %v1118_v4 = vpop.f32.mrb[18].mxu1 }
 0x4be   : > { %v3349_v5 = vpop.f32.mrb[19].mxu1 }
 0x52e   : > { %v1065_v6 = vpop.f32.mrb[12].mxu0 }
 0x52f   : > { %v3941_v7 = vadd.f32 %v1115_v2, %v1065_v6  ;;  %v3340_v8 = vpop.f32.mrb[13].mxu0 }
 0x530   : > { %v1068_v9 = vpop.f32.mrb[14].mxu0 }
 0x531   : > { %v3943_v12 = vadd.f32 %v1118_v4, %v1068_v9  ;;  %v3341_v13 = vpop.f32.mrb[15].mxu0 }
 0x536   : > { %v1166_v14 = vpop.f32.mrb[16].mxu0 }
 0x537   : > { %v1167_v15 = vadd.f32 %v3869_v42, %v1166_v14  ;;  %v3354_v16 = vpop.f32.mrb[17].mxu0 }
 0x538   : > { %v1169_v17 = vpop.f32.mrb[18].mxu0 }
 0x539   : > { %v1170_v18 = vadd.f32 %v3869_v42, %v1169_v17  ;;  %v3355_v20 = vpop.f32.mrb[19].mxu0  ;;  %v1173_v21 = vsel %vm807_vm3, %v1167_v15, -inf }
 0x53a   : > { %1174 = vmax.xlane.f32.xlu1 %v1173_v21 }
 0x53b   : > { %v1176_v22 = vsel %vm811_vm4, %v1170_v18, -inf }
 0x53c   : > { %1177 = vmax.xlane.f32.xlu0 %v1176_v22 }
 0x5c7   : > { %v1175_v23 = vpop.xlane.xlu1 %1174 }
 0x5c8   : > { %v1179_v24 = vsub.f32 %v1167_v15, %v1175_v23 }
 0x5c9   : > { %v1178_v25 = vpop.xlane.xlu0 %1177 }
 0x5ca   : > { %v1181_v26 = vmul.f32 1.442695, %v1179_v24  ;;  %v1180_v27 = vsub.f32 %v1170_v18, %v1178_v25 }
 0x5cc   : > { %3593 = vpow2.f32 %v1181_v26  ;;  %v1183_v28 = vmul.f32 1.442695, %v1180_v27 }
 0x5ce   : > { %3595 = vpow2.f32 %v1183_v28 }
 0x5d6   : > { %v3594_v29 = vpop.eup %3593 }
 0x5d7   : > { %v1185_v30 = vsel %vm807_vm3, %v3594_v29, 0.0 }
 0x5d8   : > { %v3596_v32 = vpop.eup %3595  ;;  %1186 = vadd.xlane.f32.xlu0 %v1185_v30 }
 0x5d9   : > { %v1188_v33 = vsel %vm811_vm4, %v3596_v32, 0.0 }
 0x5da   : > { %1189 = vadd.xlane.f32.xlu1 %v1188_v33 }
 0x5eb   : > { %1304 = vrot.lane.b32.xlu1 %v3838_v31, %s3676_s29 }
 0x5ee   : > { %1196 = vrot.lane.b32.xlu0 %v3903_v19, %s3675_s28 }
 0x5ef   : > { %1302 = vrot.lane.b32.xlu1 %v3844_v34, %s3676_s29 }
 0x665   : > { %v1187_v35 = vpop.xlane.xlu0 %1186 }
 0x666   : > { %3597 = vrcp.f32 %v1187_v35 }
 0x667   : > { %v1190_v36 = vpop.xlane.xlu1 %1189 }
 0x668   : > { %3599 = vrcp.f32 %v1190_v36 }
 0x669   : > { %v1197_v37 = vpop.permute.xlu0 %1196 }
 0x66a   : > { %v1202_v38 = vsel %vm835_vm5, %v1197_v37, 0 }
 0x66b   : > { %3357 = vmatpush3.bf16.msra.mxu1 %v1202_v38  ;;  %v1305_v43 = vpop.permute.xlu1 %1304 }
 0x66c   : > { %3370 = vmatprep.subr.bf16.mxu1 %v3670_v0  ;;  %v1310_v45 = vsel %vm759_vm2, %v1305_v43, 0 }
 0x66f   : > { %v1303_v34 = vpop.permute.xlu1 %1302 }
 0x670   : > { %v3598_v39 = vpop.eup %3597 }
 0x671   : > { %v1193_v41 = vmul.f32 %v3598_v39, %v3594_v29 }
 0x672   : > { %v3600_v40 = vpop.eup %3599 }
 0x673   : > { %v1194_v31 = vmul.f32 %v3600_v40, %v3596_v32 }
 0x675   : > { %v1195_v44 = vpack.c.bf16 %v1194_v31, %v1193_v41 }
 0x677   : > { %3359 = vmatmul.mubr.msk.bf16.vlgmr.msra.gmra.mrb[20].mxu1 %vm807_vm3, %v1195_v44  ;;  %v3100_v44 = vld [vmem:[%s4359_s5] ss:$0 sm:$0xff] }
 0x678   : > { %3371 = vmatpush3.bf16.xpose.msra.mxu1 %v1310_v45  ;;  %3372 = vmatprep.mubr.msk.bf16.mxu1 %vm3671_vm1, %v3670_v0 }
 0x679   : > { %3376 = vmatprep.subr.bf16.mxu1 %v3670_v0 }
 0x67f   : > { %3373 = vmatmul.mubr.msk.bf16.vlgmr.msra.gmra.mrb[24].mxu1 %vm759_vm2, %v1303_v34 }
 0x680   : > { %3378 = vmatprep.mubr.msk.bf16.mxu1 %vm3671_vm1, %v3670_v0 }
 0x74a   : > { %v1238_v46 = vpop.f32.mrb[20].mxu1 }
 0x74b   : > { %v3360_v47 = vpop.f32.mrb[21].mxu1 }
 0x74c   : > { %v1241_v48 = vpop.f32.mrb[22].mxu1 }
 0x74d   : > { %v1245_v49 = vpack.c.bf16 %v1241_v48, %v1238_v46  ;;  %v3361_v50 = vpop.f32.mrb[23].mxu1 }
 0x74e   : > { %v3557_v50 = vld [vmem:[%s4360_s6] sm:$0xff]  }
 0x752   : > { %v1346_v51 = vpop.f32.mrb[24].mxu1 }
 0x753   : > { %v1347_v52 = vadd.f32 %v3869_v42, %v1346_v51  ;;  %v3374_v53 = vpop.f32.mrb[25].mxu1  ;;  %v1583_v51 = vsel %vm583_vm0, %v3557_v50, 0 }
 0x754   : > { %v1349_v54 = vpop.f32.mrb[26].mxu1 }
 0x755   : > { %v1350_v55 = vadd.f32 %v3869_v42, %v1349_v54  ;;  %v3375_v56 = vpop.f32.mrb[27].mxu1  ;;  %v1353_v57 = vsel %vm807_vm3, %v1347_v52, -inf }
 0x756   : > { %1354 = vmax.xlane.f32.xlu0 %v1353_v57 }
 0x757   : > { %v1356_v58 = vsel %vm811_vm4, %v1350_v55, -inf }
 0x758   : > { %1357 = vmax.xlane.f32.xlu1 %v1356_v58 }
 0x769   : > { %1376 = vrot.lane.b32.xlu1 %v3903_v19, %s3676_s29 }
 0x76d   : > { %1248 = vrot.lane.b32.xlu1 %v3891_v61, %s3675_s28 }
 0x771   : > { %1426 = vrot.lane.b32.xlu1 %v3884_v59, %s3676_s29 }
 0x7e3   : > { %v1355_v60 = vpop.xlane.xlu0 %1354 }
 0x7e4   : > { %v1359_v62 = vsub.f32 %v1347_v52, %v1355_v60 }
 0x7e5   : > { %v1358_v63 = vpop.xlane.xlu1 %1357 }
 0x7e6   : > { %v1361_v1 = vmul.f32 1.442695, %v1359_v62  ;;  %v1360_v2 = vsub.f32 %v1350_v55, %v1358_v63  ;;  %v3558_v62 = vld [vmem:[%s4360_s6 + $0x8] sm:$0xff]  }
 0x7e7   : > { %v1586_v63 = vsel %vm583_vm0, %v3558_v62, 0  ;;  %v3565_v62 = vld [vmem:[%s4356_s2 + $0x38] sm:$0xff]  }
 0x7e8   : > { %3601 = vpow2.f32 %v1361_v1  ;;  %v1363_v3 = vmul.f32 1.442695, %v1360_v2  ;;  %v3559_v1 = vld [vmem:[%s4360_s6 + $0x10] sm:$0xff]  }
 0x7e9   : > { %v1377_v4 = vpop.permute.xlu1 %1376  ;;  %v1589_v2 = vsel %vm583_vm0, %v3559_v1, 0  ;;  %v1799_v1 = vsel %vm583_vm0, %v3565_v62, 0 }
 0x7ea   : > { %3603 = vpow2.f32 %v1363_v3  ;;  %v1382_v5 = vsel %vm835_vm5, %v1377_v4, 0  ;;  %v3560_v3 = vld [vmem:[%s4360_s6 + $0x18] sm:$0xff]  }
 0x7eb   : > { %3377 = vmatpush3.bf16.msra.mxu1 %v1382_v5  ;;  %v1592_v4 = vsel %vm583_vm0, %v3560_v3, 0  ;;  %v3561_v5 = vld [vmem:[%s4362_s8] sm:$0xff]  }
 0x7ec   : > { %3390 = vmatprep.subr.bf16.mxu1 %v3670_v0  ;;  %v4088_v3 = vld [vmem:[%s4357_s3 + $0x1] ss:$0 sm:$0xff] }
 0x7ed   : > { %v1249_v17 = vpop.permute.xlu1 %1248 }
 0x7ee   : > { %v1257_v21 = vsel %vm759_vm2, %v1249_v17, 0  ;;  %v3101_v17 = vld [vmem:[%s4364_s10] ss:$0 sm:$0xff] }
 0x7f2   : > { %v3602_v19 = vpop.eup %3601 }
 0x7f3   : > { %v1365_v6 = vsel %vm807_vm3, %v3602_v19, 0.0 }
 0x7f4   : > { %v3604_v8 = vpop.eup %3603  ;;  %1366 = vadd.xlane.f32.xlu0 %v1365_v6 }
 0x7f5   : > { %v1368_v9 = vsel %vm811_vm4, %v3604_v8, 0.0 }
 0x7f8   : > { %1369 = vadd.xlane.f32.xlu0 %v1368_v9 }
 0x80e   : > { %1246 = vrot.lane.b32.xlu0 %v3884_v59, %s3675_s28 }
 0x812   : > { %1428 = vrot.lane.b32.xlu0 %v3891_v61, %s3676_s29  ;;  %v1427_v61 = vpop.permute.xlu1 %1426 }
 0x813   : > { %v1434_v24 = vsel %vm759_vm2, %v1427_v61, 0 }
 0x881   : > { %v1367_v13 = vpop.xlane.xlu0 %1366 }
 0x882   : > { %3605 = vrcp.f32 %v1367_v13 }
 0x885   : > { %v1370_v14 = vpop.xlane.xlu0 %1369 }
 0x886   : > { %3607 = vrcp.f32 %v1370_v14 }
 0x889   : > { %v1247_v15 = vpop.permute.xlu0 %1246 }
 0x88a   : > { %v1254_v16 = vsel %vm759_vm2, %v1247_v15, 0 }
 0x88b   : > { %3363 = vmatpush3.bf16.xpose.msra.mxu0 %v1254_v16 }
 0x88c   : > { %3364 = vmatprep.subr.bf16.mxu0 %v3670_v0  ;;  %v3606_v18 = vpop.eup %3605 }
 0x88d   : > { %v1373_v22 = vmul.f32 %v3606_v18, %v3602_v19  ;;  %v1429_v25 = vpop.permute.xlu0 %1428  ;;  %v1659_v19 = vsel %vm1654_vm7, %v3561_v5, 0 }
 0x88e   : > { %v1437_v26 = vsel %vm759_vm2, %v1429_v25, 0 }
 0x890   : > { %v3608_v20 = vpop.eup %3607 }
 0x891   : > { %v1374_v59 = vmul.f32 %v3608_v20, %v3604_v8 }
 0x893   : > { %3365 = vmatpush3.bf16.xpose.msra.mxu0 %v1257_v21  ;;  %v1375_v23 = vpack.c.bf16 %v1374_v59, %v1373_v22  ;;  %v3102_v59 = vld [vmem:[%s4365_s11] ss:$0 sm:$0xff] }
 0x894   : > { %3382 = vmatprep.subr.bf16.mxu0 %v3670_v0 }
 0x895   : > { %3379 = vmatmul.mubr.msk.bf16.vlgmr.msra.gmra.mrb[28].mxu1 %vm807_vm3, %v1375_v23 }
 0x896   : > { %3398 = vmatprep.mubr.msk.bf16.mxu1 %vm3671_vm1, %v3670_v0  ;;  %3391 = vmatpush3.bf16.xpose.msra.mxu1 %v1583_v51 }
 0x897   : > { %3392 = vmatprep.subr.bf16.mxu1 %v3670_v0 }
 0x89a   : > { %3367 = vmatmul.mubr.msk.bf16.vlgmr.msra.gmra.mrb[20].mxu0 %vm759_vm2, %v1245_v49 }
 0x89b   : > { %3383 = vmatpush3.bf16.xpose.msra.mxu0 %v1434_v24  ;;  %3386 = vmatprep.mubr.msk.bf16.mxu0 %vm3671_vm1, %v3670_v0 }
 0x89c   : > { %3384 = vmatprep.subr.bf16.mxu0 %v3670_v0 }
 0x89e   : > { %3393 = vmatpush3.bf16.xpose.msra.mxu1 %v1586_v63  ;;  %v3566_v63 = vld [vmem:[%s4356_s2 + $0x48] sm:$0xff]  }
 0x89f   : > { %3394 = vmatprep.subr.bf16.mxu1 %v3670_v0 }
 0x8a3   : > { %3385 = vmatpush3.bf16.xpose.msra.mxu0 %v1437_v26  ;;  %v3562_v26 = vld [vmem:[%s4362_s8 + $0x8] sm:$0xff]  }
 0x8a4   : > { %3402 = vmatprep.subr.bf16.mxu0 %v3670_v0 }
 0x8a6   : > { %3395 = vmatpush3.bf16.xpose.msra.mxu1 %v1589_v2  ;;  %v1859_v2 = vsel %vm583_vm0, %v3566_v63, 0 }
 0x8a7   : > { %3396 = vmatprep.subr.bf16.mxu1 %v3670_v0 }
 0x8ae   : > { %3397 = vmatpush3.bf16.xpose.msra.mxu1 %v1592_v4 }
 0x8af   : > { %3418 = vmatprep.subr.bf16.mxu1 %v3670_v0 }
 0x968   : > { %v1418_v27 = vpop.f32.mrb[28].mxu1 }
 0x969   : > { %v3380_v28 = vpop.f32.mrb[29].mxu1 }
 0x96a   : > { %v1421_v29 = vpop.f32.mrb[30].mxu1  ;;  %v3103_v28 = vld [vmem:[%s4361_s7] ss:$0 sm:$0xff] }
 0x96b   : > { %v1425_v30 = vpack.c.bf16 %v1421_v29, %v1418_v27  ;;  %v3381_v32 = vpop.f32.mrb[31].mxu1  ;;  %v1662_v27 = vsel %vm1654_vm7, %v3562_v26, 0 }
 0x96d   : > { %v1293_v33 = vpop.f32.mrb[20].mxu0  ;;  %3387 = vmatmul.mubr.msk.bf16.vlgmr.msra.gmra.mrb[24].mxu0 %vm759_vm2, %v1425_v30 }
 0x96e   : > { %v1300_v35 = vadd.f32 %v1293_v33, %v3941_v7  ;;  %v3368_v36 = vpop.f32.mrb[21].mxu0  ;;  %3406 = vmatprep.mubr.msk.bf16.mxu0 %vm3671_vm1, %v3670_v0  ;;  %3403 = vmatpush3.bf16.xpose.msra.mxu0 %v1659_v19 }
 0x96f   : > { %v1296_v37 = vpop.f32.mrb[22].mxu0  ;;  %3404 = vmatprep.subr.bf16.mxu0 %v3670_v0 }
 0x970   : > { %v1301_v38 = vadd.f32 %v1296_v37, %v3943_v12  ;;  %v3369_v39 = vpop.f32.mrb[23].mxu0 }
 0x976   : > { %3405 = vmatpush3.bf16.xpose.msra.mxu0 %v1662_v27 }
 0x977   : > { %3410 = vmatprep.subr.bf16.mxu0 %v3670_v0 }
 0xa40   : > { %v1473_v40 = vpop.f32.mrb[24].mxu0 }
 0xa41   : > { %v1480_v41 = vadd.f32 %v1473_v40, %v1300_v35  ;;  %v3388_v31 = vpop.f32.mrb[25].mxu0  ;;  %v3109_v40 = vld [vmem:[%s4363_s9] ss:$0 sm:$0xff] }
 0xa42   : > { %v1476_v43 = vpop.f32.mrb[26].mxu0 }
 0xa43   : > { %v1482_v45 = vadd.f32 %v1480_v41, %v3809_v10  ;;  %v1481_v34 = vadd.f32 %v1476_v43, %v1301_v38  ;;  %v3389_v7 = vpop.f32.mrb[27].mxu0 }
 0xa45   : > { %v1483_v46 = vadd.f32 %v1481_v34, %v3811_v11  ;;  %v1490_v47 = vadd.f32 %v3100_v44, %v1482_v45 }
 0xa47   : > { %v1492_v48 = vsel %vm583_vm0, %v1490_v47, 0.0  ;;  %v1491_v12 = vadd.f32 %v3100_v44, %v1483_v46 }
 0xa48   : > { %1493 = vadd.xlane.f32.xlu1 %v1492_v48 }
 0xa49   : > { %v1496_v49 = vsel %vm1495_vm6, %v1491_v12, 0.0 }
 0xa4a   : > { %1497 = vadd.xlane.f32.xlu0 %v1496_v49 }
 0xad5   : > { %v1494_v10 = vpop.xlane.xlu1 %1493 }
 0xad6   : > { %v1500_v11 = vmul.f32 0.03125, %v1494_v10 }
 0xad7   : > { %v1498_v52 = vpop.xlane.xlu0 %1497 }
 0xad8   : > { %v1502_v53 = vsub.f32 %v1490_v47, %v1500_v11  ;;  %v1501_v54 = vmul.f32 0.03125, %v1498_v52 }
 0xada   : > { %v1503_v55 = vsub.f32 %v1491_v12, %v1501_v54  ;;  %v1504_v56 = vmul.f32 %v1502_v53, %v1502_v53 }
 0xadc   : > { %v1506_v57 = vsel %vm583_vm0, %v1504_v56, 0.0  ;;  %v1505_v58 = vmul.f32 %v1503_v55, %v1503_v55  ;;  %v3563_v56 = vld [vmem:[%s4356_s2 + $0x30] sm:$0xff]  }
 0xadd   : > { %1507 = vadd.xlane.f32.xlu0 %v1506_v57  ;;  %v3564_v57 = vld [vmem:[%s4356_s2 + $0x40] sm:$0xff]  }
 0xade   : > { %v1509_v60 = vsel %vm1495_vm6, %v1505_v58, 0.0  ;;  %v1796_v58 = vsel %vm583_vm0, %v3563_v56, 0 }
 0xadf   : > { %1510 = vadd.xlane.f32.xlu1 %v1509_v60  ;;  %v1856_v60 = vsel %vm583_vm0, %v3564_v57, 0 }
 0xb6a   : > { %v1508_v6 = vpop.xlane.xlu0 %1507 }
 0xb6b   : > { %v1512_v8 = vmul.f32 0.03125, %v1508_v6 }
 0xb6c   : > { %v1511_v9 = vpop.xlane.xlu1 %1510 }
 0xb6d   : > { %v1514_v13 = vadd.f32 1e-05, %v1512_v8  ;;  %v1513_v14 = vmul.f32 0.03125, %v1511_v9 }
 0xb6f   : > { %3609 = vrsqrt.f32 %v1514_v13  ;;  %v1515_v15 = vadd.f32 1e-05, %v1513_v14  ;;  %v3113_v14 = vld [vmem:[%s4366_s12] ss:$0 sm:$0xff] }
 0xb71   : > { %3611 = vrsqrt.f32 %v1515_v15 }
 0xb79   : > { %v3610_v16 = vpop.eup %3609 }
 0xb7a   : > { %v1518_v18 = vmul.f32 %v3610_v16, %v1502_v53 }
 0xb7b   : > { %v3612_v20 = vpop.eup %3611 }
 0xb7c   : > { %v1526_v21 = vmul.f32 %v3101_v17, %v1518_v18  ;;  %v1519_v22 = vmul.f32 %v3612_v20, %v1503_v55  ;;  %v3114_v20 = vld [vmem:[%s4367_s13] ss:$0 sm:$0xff] }
 0xb7e   : > { %v1527_v23 = vmul.f32 %v3101_v17, %v1519_v22  ;;  %v1534_v61 = vadd.f32 %v3102_v59, %v1526_v21  ;;  %v3567_v22 = vld [vmem:[%s4356_s2 + $0x50] sm:$0xff]  }
 0xb80   : > { %v1535_v24 = vadd.f32 %v3102_v59, %v1527_v23 }
 0xb82   : > { %v1552_v25 = vpack.c.bf16 %v1535_v24, %v1534_v61 }
 0xb84   : > { %3399 = vmatmul.mubr.msk.bf16.vlgmr.msra.gmra.mrb[32].mxu1 %vm583_vm0, %v1552_v25  ;;  %v3568_v25 = vld [vmem:[%s4356_s2 + $0x58] sm:$0xff]  }
 0xb85   : > { %3422 = vmatprep.mubr.msk.bf16.mxu1 %vm3671_vm1, %v3670_v0  ;;  %3419 = vmatpush3.bf16.xpose.msra.mxu1 %v1856_v60  ;;  %v1919_v26 = vsel %vm583_vm0, %v3568_v25, 0 }
 0xb86   : > { %3420 = vmatprep.subr.bf16.mxu1 %v3670_v0 }
 0xb8d   : > { %3421 = vmatpush3.bf16.xpose.msra.mxu1 %v1859_v2 }
 0xb8e   : > { %3434 = vmatprep.subr.bf16.mxu1 %v3670_v0 }
 0xc57   : > { %v1628_v29 = vpop.f32.mrb[32].mxu1 }
 0xc58   : > { %v1629_v30 = vadd.f32 %v3103_v28, %v1628_v29  ;;  %v3400_v32 = vpop.f32.mrb[33].mxu1 }
 0xc59   : > { %v1631_v33 = vpop.f32.mrb[34].mxu1 }
 0xc5a   : > { %v1632_v35 = vadd.f32 %v3103_v28, %v1631_v33  ;;  %v3401_v36 = vpop.f32.mrb[35].mxu1  ;;  %v1635_v37 = vmax.f32 %v1629_v30, 0.0 }
 0xc5c   : > { %v1636_v38 = vmax.f32 %v1632_v35, 0.0 }
 0xc5e   : > { %v1637_v39 = vpack.c.bf16 %v1636_v38, %v1635_v37 }
 0xc60   : > { %3407 = vmatmul.mubr.msk.bf16.vlgmr.msra.gmra.mrb[28].mxu0 %vm1654_vm7, %v1637_v39 }
 0xc61   : > { %3414 = vmatprep.mubr.msk.bf16.mxu0 %vm3671_vm1, %v3670_v0  ;;  %3411 = vmatpush3.bf16.xpose.msra.mxu0 %v1796_v58 }
 0xc62   : > { %3412 = vmatprep.subr.bf16.mxu0 %v3670_v0 }
 0xc69   : > { %3413 = vmatpush3.bf16.xpose.msra.mxu0 %v1799_v1 }
 0xc6a   : > { %3426 = vmatprep.subr.bf16.mxu0 %v3670_v0 }
 0xd33   : > { %v1698_v41 = vpop.f32.mrb[28].mxu0 }
 0xd34   : > { %v1699_v31 = vadd.f32 %v3109_v40, %v1698_v41  ;;  %v3408_v43 = vpop.f32.mrb[29].mxu0 }
 0xd35   : > { %v1701_v44 = vpop.f32.mrb[30].mxu0 }
 0xd36   : > { %v1702_v45 = vadd.f32 %v3109_v40, %v1701_v44  ;;  %v3409_v34 = vpop.f32.mrb[31].mxu0  ;;  %v1705_v7 = vadd.f32 %v1699_v31, %v1534_v61 }
 0xd38   : > { %v1707_v46 = vsel %vm583_vm0, %v1705_v7, 0.0  ;;  %v1706_v47 = vadd.f32 %v1702_v45, %v1535_v24  ;;  %v1916_v24 = vsel %vm583_vm0, %v3567_v22, 0 }
 0xd39   : > { %1708 = vadd.xlane.f32.xlu0 %v1707_v46 }
 0xd3a   : > { %v1710_v48 = vsel %vm1495_vm6, %v1706_v47, 0.0 }
 0xd3b   : > { %1711 = vadd.xlane.f32.xlu1 %v1710_v48 }
 0xdc6   : > { %v1709_v12 = vpop.xlane.xlu0 %1708 }
 0xdc7   : > { %v1713_v49 = vmul.f32 0.03125, %v1709_v12 }
 0xdc8   : > { %v1712_v50 = vpop.xlane.xlu1 %1711 }
 0xdc9   : > { %v1715_v51 = vsub.f32 %v1705_v7, %v1713_v49  ;;  %v1714_v10 = vmul.f32 0.03125, %v1712_v50 }
 0xdcb   : > { %v1716_v11 = vsub.f32 %v1706_v47, %v1714_v10  ;;  %v1717_v52 = vmul.f32 %v1715_v51, %v1715_v51 }
 0xdcd   : > { %v1719_v53 = vsel %vm583_vm0, %v1717_v52, 0.0  ;;  %v1718_v54 = vmul.f32 %v1716_v11, %v1716_v11 }
 0xdce   : > { %1720 = vadd.xlane.f32.xlu0 %v1719_v53 }
 0xdcf   : > { %v1722_v55 = vsel %vm1495_vm6, %v1718_v54, 0.0 }
 0xdd0   : > { %1723 = vadd.xlane.f32.xlu1 %v1722_v55 }
 0xde4   : > { %1852 = vrot.lane.b32.xlu0 %v4088_v3, %s3672_s19 }
 0xe5b   : > { %v1721_v4 = vpop.xlane.xlu0 %1720 }
 0xe5c   : > { %v1725_v5 = vmul.f32 0.03125, %v1721_v4 }
 0xe5d   : > { %v1724_v19 = vpop.xlane.xlu1 %1723 }
 0xe5e   : > { %v1727_v6 = vadd.f32 1e-05, %v1725_v5  ;;  %v1726_v8 = vmul.f32 0.03125, %v1724_v19 }
 0xe5f   : > { %v1853_v27 = vpop.permute.xlu0 %1852 }
 0xe60   : > { %3613 = vrsqrt.f32 %v1727_v6  ;;  %v1728_v9 = vadd.f32 1e-05, %v1726_v8 }
 0xe62   : > { %3615 = vrsqrt.f32 %v1728_v9 }
 0xe6a   : > { %v3614_v13 = vpop.eup %3613 }
 0xe6b   : > { %v1731_v15 = vmul.f32 %v3614_v13, %v1715_v51 }
 0xe6c   : > { %v3616_v16 = vpop.eup %3615 }
 0xe6d   : > { %v1739_v17 = vmul.f32 %v3113_v14, %v1731_v15  ;;  %v1732_v18 = vmul.f32 %v3616_v16, %v1716_v11 }
 0xe6f   : > { %v1740_v21 = vmul.f32 %v3113_v14, %v1732_v18  ;;  %v4101_v59 = vadd.f32 %v3114_v20, %v1739_v17  ;;  %v4164_v17 = vld [vmem:[%s4358_s4 + $0x18] sm:$0xff]  }
 0xe71   : > { %v4103_v23 = vadd.f32 %v3114_v20, %v1740_v21 }
 0xe73   : > { %v1775_v61 = vpack.c.bf16 %v4103_v23, %v4101_v59 }
 0xe75   : > { %3415 = vmatmul.mubr.msk.bf16.vlgmr.msra.gmra.mrb[32].mxu0 %vm583_vm0, %v1775_v61  ;;  %3423 = vmatmul.mubr.msk.bf16.vlgmr.msra.gmra.mrb[36].mxu1 %vm583_vm0, %v1775_v61 }
 0xe76   : > { %3427 = vmatpush3.bf16.xpose.msra.mxu0 %v1916_v24  ;;  %3430 = vmatprep.mubr.msk.bf16.mxu0 %vm3671_vm1, %v3670_v0 }
 0xe77   : > { %3428 = vmatprep.subr.bf16.mxu0 %v3670_v0  ;;  %3436 = vmatprep.mubr.msk.bf16.mxu1 %vm3671_vm1, %v3670_v0 }
 0xe7e   : > { %3429 = vmatpush3.bf16.xpose.msra.mxu0 %v1919_v26 }
 0xe7f   : > { %3446 = vmatprep.subr.bf16.mxu0 %v3670_v0 }
 0xe85   : > { %3431 = vmatmul.mubr.msk.bf16.vlgmr.msra.gmra.mrb[36].mxu0 %vm583_vm0, %v1775_v61 }
 0xe86   : > { %3448 = vmatprep.mubr.msk.bf16.mxu0 %vm3671_vm1, %v3670_v0 }
 0xf48   : > { %v1835_v28 = vpop.f32.mrb[32].mxu0  ;;  %v1895_v29 = vpop.f32.mrb[36].mxu1 }
 0xf49   : > { %v1836_v30 = vadd.f32 %v4088_v3, %v1835_v28  ;;  %v3416_v32 = vpop.f32.mrb[33].mxu0  ;;  %v3424_v33 = vpop.f32.mrb[37].mxu1  ;;  %v1896_v37 = vadd.f32 %v1895_v29, %v1853_v27 }
 0xf4a   : > { %v1838_v35 = vpop.f32.mrb[34].mxu0  ;;  %v1898_v36 = vpop.f32.mrb[38].mxu1 }
 0xf4b   : > { %v1839_v38 = vadd.f32 %v4088_v3, %v1838_v35  ;;  %v1899_v39 = vadd.f32 %v1898_v36, %v1853_v27  ;;  %v3417_v40 = vpop.f32.mrb[35].mxu0  ;;  %v3425_v41 = vpop.f32.mrb[39].mxu1  ;;  %v1962_v31 = vmul.f32 0.35355338, %v1836_v30 }
 0xf4d   : > { %v1963_v43 = vmul.f32 0.35355338, %v1839_v38  ;;  %v4125_v44 = vpack.c.bf16 %v1899_v39, %v1896_v37  ;;  %v4180_v37 = vld [vmem:[%s4358_s4 + $0x10] sm:$0xff]  }
 0xf4f   : > { %v4127_v45 = vpack.c.bf16 %v1963_v43, %v1962_v31  ;;  %2089 = vrot.lane.b32.xlu1 %v4125_v44, %s3673_s30  ;;  %v1971_v34 = vsel %vm759_vm2, %v4125_v44, 0 }
 0xf50   : > { %3435 = vmatpush3.bf16.xpose.msra.mxu1 %v1971_v34 }
 0xf51   : > { %3440 = vmatprep.subr.bf16.mxu1 %v3670_v0 }
 0xf53   : > { %2086 = vrot.lane.b32.xlu1 %v4127_v45, %s3673_s30 }
 0xf57   : > { %3437 = vmatmul.mubr.msk.bf16.vlgmr.msra.gmra.mrb[40].mxu1 %vm759_vm2, %v4127_v45 }
 0xf58   : > { %v1955_v7 = vpop.f32.mrb[36].mxu0  ;;  %3442 = vmatprep.mubr.msk.bf16.mxu1 %vm3671_vm1, %v3670_v0 }
 0xf59   : > { %v3432_v46 = vpop.f32.mrb[37].mxu0 }
 0xf5a   : > { %v1958_v47 = vpop.f32.mrb[38].mxu0 }
 0xf5b   : > { %v3433_v48 = vpop.f32.mrb[39].mxu0 }
 0xfc1   : > { %v2090_v12 = vpop.permute.xlu1 %2089 }
 0xfc2   : > { %v2095_v49 = vsel %vm759_vm2, %v2090_v12, 0 }
 0xfc3   : > { %3447 = vmatpush3.bf16.xpose.msra.mxu0 %v2095_v49 }
 0xfc4   : > { %3458 = vmatprep.subr.bf16.mxu0 %v3670_v0 }
 0xfc5   : > { %v2087_v50 = vpop.permute.xlu1 %2086 }
 0xfca   : > { %3449 = vmatmul.mubr.msk.bf16.vlgmr.msra.gmra.mrb[40].mxu0 %vm759_vm2, %v2087_v50 }
 0xfcb   : > { %3462 = vmatprep.mubr.msk.bf16.mxu0 %vm3671_vm1, %v3670_v0 }
0x102a   : > { %v2007_v51 = vpop.f32.mrb[40].mxu1 }
0x102b   : > { %v2008_v10 = vadd.f32 %v3869_v42, %v2007_v51  ;;  %v3438_v11 = vpop.f32.mrb[41].mxu1 }
0x102c   : > { %v2010_v52 = vpop.f32.mrb[42].mxu1 }
0x102d   : > { %v2011_v53 = vadd.f32 %v3869_v42, %v2010_v52  ;;  %v3439_v54 = vpop.f32.mrb[43].mxu1  ;;  %v2014_v55 = vsel %vm807_vm3, %v2008_v10, -inf }
0x102e   : > { %2015 = vmax.xlane.f32.xlu0 %v2014_v55  ;;  %v2283_v54 = vsel %vm759_vm2, %v4164_v17, 0 }
0x102f   : > { %v2017_v56 = vsel %vm811_vm4, %v2011_v53, -inf }
0x1030   : > { %2018 = vmax.xlane.f32.xlu1 %v2017_v56 }
0x1041   : > { %1912 = vrot.lane.b32.xlu1 %v4088_v3, %s3674_s23  ;;  %s535_s23 = scalar_lea.vmem %s4370_s16, %s3194_s18 }
0x109d   : > { %v2131_v57 = vpop.f32.mrb[40].mxu0 }
0x109e   : > { %v2132_v58 = vadd.f32 %v3869_v42, %v2131_v57  ;;  %v3450_v60 = vpop.f32.mrb[41].mxu0 }
0x109f   : > { %v2134_v62 = vpop.f32.mrb[42].mxu0 }
0x10a0   : > { %v2135_v63 = vadd.f32 %v3869_v42, %v2134_v62  ;;  %v3451_v1 = vpop.f32.mrb[43].mxu0  ;;  %v2138_v2 = vsel %vm807_vm3, %v2132_v58, -inf }
0x10a1   : > { %2139 = vmax.xlane.f32.xlu0 %v2138_v2 }
0x10a2   : > { %v2141_v4 = vsel %vm811_vm4, %v2135_v63, -inf }
0x10a5   : > { %2142 = vmax.xlane.f32.xlu0 %v2141_v4 }
0x10bb   : > { %v2016_v5 = vpop.xlane.xlu0 %2015 }
0x10bc   : > { %v2020_v19 = vsub.f32 %v2008_v10, %v2016_v5 }
0x10bd   : > { %v2019_v6 = vpop.xlane.xlu1 %2018 }
0x10be   : > { %v2022_v8 = vmul.f32 1.442695, %v2020_v19  ;;  %v2021_v9 = vsub.f32 %v2011_v53, %v2019_v6  ;;  %v2280_v53 = vsel %vm759_vm2, %v4180_v37, 0 }
0x10c0   : > { %3617 = vpow2.f32 %v2022_v8  ;;  %v2024_v3 = vmul.f32 1.442695, %v2021_v9 }
0x10c1   : > { %v1913_v13 = vpop.permute.xlu1 %1912 }
0x10c2   : > { %3619 = vpow2.f32 %v2024_v3  ;;  %v1956_v14 = vadd.f32 %v1955_v7, %v1913_v13  ;;  %v1959_v15 = vadd.f32 %v1958_v47, %v1913_v13 }
0x10c4   : > { %v4155_v16 = vpack.c.bf16 %v1959_v15, %v1956_v14 }
0x10c6   : > { %2162 = vrot.lane.b32.xlu1 %v4155_v16, %s3673_s30  ;;  %v2041_v42 = vsel %vm835_vm5, %v4155_v16, 0 }
0x10c7   : > { %3441 = vmatpush3.bf16.msra.mxu1 %v2041_v42 }
0x10c8   : > { %3452 = vmatprep.subr.bf16.mxu1 %v3670_v0 }
0x10ca   : > { %v3618_v18 = vpop.eup %3617  ;;  %2224 = vrot.lane.b32.xlu1 %v4164_v17, %s3673_s30 }
0x10cb   : > { %v2026_v20 = vsel %vm807_vm3, %v3618_v18, 0.0 }
0x10cc   : > { %v3620_v21 = vpop.eup %3619  ;;  %2027 = vadd.xlane.f32.xlu0 %v2026_v20 }
0x10cd   : > { %v2029_v22 = vsel %vm811_vm4, %v3620_v21, 0.0 }
0x10ce   : > { %2328 = vrot.lane.b32.xlu1 %v4125_v44, %s3675_s28 }
0x10d0   : > { %2030 = vadd.xlane.f32.xlu0 %v2029_v22 }
0x10d2   : > { %2326 = vrot.lane.b32.xlu1 %v4127_v45, %s3675_s28 }
0x112e   : > { %v2140_v61 = vpop.xlane.xlu0 %2139 }
0x112f   : > { %v2144_v24 = vsub.f32 %v2132_v58, %v2140_v61  ;;  %v3661_v61 = vld [vmem:[%s3866_s20] ss:$0 sm:$0xff] }
0x1131   : > { %v2146_v25 = vmul.f32 1.442695, %v2144_v24 }
0x1132   : > { %v2143_v26 = vpop.xlane.xlu0 %2142 }
0x1133   : > { %3621 = vpow2.f32 %v2146_v25  ;;  %v2145_v27 = vsub.f32 %v2135_v63, %v2143_v26 }
0x1135   : > { %v2148_v28 = vmul.f32 1.442695, %v2145_v27 }
0x1137   : > { %3623 = vpow2.f32 %v2148_v28 }
0x1138   : > { %v2163_v31 = vpop.permute.xlu1 %2162 }
0x1139   : > { %v2168_v34 = vsel %vm835_vm5, %v2163_v31, 0 }
0x113c   : > { %v2225_v49 = vpop.permute.xlu1 %2224 }
0x113d   : > { %v3622_v29 = vpop.eup %3621  ;;  %v2233_v51 = vsel %vm759_vm2, %v2225_v49, 0 }
0x113e   : > { %v2150_v30 = vsel %vm807_vm3, %v3622_v29, 0.0 }
0x113f   : > { %2151 = vadd.xlane.f32.xlu0 %v2150_v30 }
0x1140   : > { %v2329_v1 = vpop.permute.xlu1 %2328 }
0x1141   : > { %v3624_v32 = vpop.eup %3623  ;;  %v2334_v19 = vsel %vm759_vm2, %v2329_v1, 0 }
0x1142   : > { %v2153_v33 = vsel %vm811_vm4, %v3624_v32, 0.0 }
0x1143   : > { %2154 = vadd.xlane.f32.xlu0 %v2153_v33 }
0x1144   : > { %v2327_v6 = vpop.permute.xlu1 %2326 }
0x1159   : > { %v2028_v35 = vpop.xlane.xlu0 %2027  ;;  %2222 = vrot.lane.b32.xlu0 %v4180_v37, %s3673_s30 }
0x115a   : > { %3625 = vrcp.f32 %v2028_v35 }
0x115d   : > { %v2031_v36 = vpop.xlane.xlu0 %2030 }
0x115e   : > { %3627 = vrcp.f32 %v2031_v36 }
0x1164   : > { %v3626_v38 = vpop.eup %3625 }
0x1165   : > { %v2034_v40 = vmul.f32 %v3626_v38, %v3618_v18 }
0x1168   : > { %v3628_v39 = vpop.eup %3627 }
0x1169   : > { %v2035_v41 = vmul.f32 %v3628_v39, %v3620_v21 }
0x116b   : > { %v2036_v43 = vpack.c.bf16 %v2035_v41, %v2034_v40 }
0x116d   : > { %3443 = vmatmul.mubr.msk.bf16.vlgmr.msra.gmra.mrb[44].mxu1 %vm807_vm3, %v2036_v43 }
0x116e   : > { %3453 = vmatpush3.bf16.msra.mxu1 %v2168_v34  ;;  %3454 = vmatprep.mubr.msk.bf16.mxu1 %vm3671_vm1, %v3670_v0 }
0x116f   : > { %3466 = vmatprep.subr.bf16.mxu1 %v3670_v0 }
0x11cc   : > { %v2152_v7 = vpop.xlane.xlu0 %2151 }
0x11cd   : > { %3629 = vrcp.f32 %v2152_v7 }
0x11d0   : > { %v2155_v46 = vpop.xlane.xlu0 %2154 }
0x11d1   : > { %3631 = vrcp.f32 %v2155_v46 }
0x11d4   : > { %v2223_v47 = vpop.permute.xlu0 %2222 }
0x11d5   : > { %v2230_v48 = vsel %vm759_vm2, %v2223_v47, 0 }
0x11d6   : > { %3459 = vmatpush3.bf16.xpose.msra.mxu0 %v2230_v48 }
0x11d7   : > { %3460 = vmatprep.subr.bf16.mxu0 %v3670_v0  ;;  %v3630_v12 = vpop.eup %3629 }
0x11d8   : > { %v2158_v10 = vmul.f32 %v3630_v12, %v3622_v29 }
0x11db   : > { %v3632_v50 = vpop.eup %3631 }
0x11dc   : > { %v2159_v11 = vmul.f32 %v3632_v50, %v3624_v32 }
0x11de   : > { %v2160_v52 = vpack.c.bf16 %v2159_v11, %v2158_v10  ;;  %3461 = vmatpush3.bf16.xpose.msra.mxu0 %v2233_v51 }
0x11df   : > { %3474 = vmatprep.subr.bf16.mxu0 %v3670_v0 }
0x11e0   : > { %3455 = vmatmul.mubr.msk.bf16.vlgmr.msra.gmra.mrb[48].mxu1 %vm807_vm3, %v2160_v52 }
0x11e1   : > { %3467 = vmatpush3.bf16.xpose.msra.mxu1 %v2280_v53  ;;  %3470 = vmatprep.mubr.msk.bf16.mxu1 %vm3671_vm1, %v3670_v0 }
0x11e2   : > { %3468 = vmatprep.subr.bf16.mxu1 %v3670_v0 }
0x11e9   : > { %3469 = vmatpush3.bf16.xpose.msra.mxu1 %v2283_v54 }
0x11ea   : > { %3480 = vmatprep.subr.bf16.mxu1 %v3670_v0 }
0x1240   : > { %v2077_v55 = vpop.f32.mrb[44].mxu1 }
0x1241   : > { %v3444_v56 = vpop.f32.mrb[45].mxu1 }
0x1242   : > { %v2080_v57 = vpop.f32.mrb[46].mxu1 }
0x1243   : > { %v2084_v58 = vpack.c.bf16 %v2080_v57, %v2077_v55  ;;  %v3445_v60 = vpop.f32.mrb[47].mxu1 }
0x1245   : > { %3471 = vmatmul.mubr.msk.bf16.vlgmr.msra.gmra.mrb[52].mxu1 %vm759_vm2, %v2084_v58 }
0x1246   : > { %3482 = vmatprep.mubr.msk.bf16.mxu1 %vm3671_vm1, %v3670_v0 }
0x12b3   : > { %v2204_v62 = vpop.f32.mrb[48].mxu1 }
0x12b4   : > { %v3456_v63 = vpop.f32.mrb[49].mxu1 }
0x12b5   : > { %v2207_v2 = vpop.f32.mrb[50].mxu1 }
0x12b6   : > { %v2211_v4 = vpack.c.bf16 %v2207_v2, %v2204_v62  ;;  %v3457_v5 = vpop.f32.mrb[51].mxu1 }
0x12b8   : > { %3463 = vmatmul.mubr.msk.bf16.vlgmr.msra.gmra.mrb[44].mxu0 %vm759_vm2, %v2211_v4 }
0x12b9   : > { %3475 = vmatpush3.bf16.xpose.msra.mxu0 %v2334_v19  ;;  %3476 = vmatprep.mubr.msk.bf16.mxu0 %vm3671_vm1, %v3670_v0 }
0x12ba   : > { %3486 = vmatprep.subr.bf16.mxu0 %v3670_v0 }
0x12c0   : > { %3477 = vmatmul.mubr.msk.bf16.vlgmr.msra.gmra.mrb[48].mxu0 %vm759_vm2, %v2327_v6 }
0x12c1   : > { %3490 = vmatprep.mubr.msk.bf16.mxu0 %vm3671_vm1, %v3670_v0 }
0x1318   : > { %v2319_v8 = vpop.f32.mrb[52].mxu1 }
0x1319   : > { %v3472_v9 = vpop.f32.mrb[53].mxu1 }
0x131a   : > { %v2322_v3 = vpop.f32.mrb[54].mxu1 }
0x131b   : > { %v3473_v13 = vpop.f32.mrb[55].mxu1 }
0x138b   : > { %v2269_v14 = vpop.f32.mrb[44].mxu0 }
0x138c   : > { %v4213_v15 = vadd.f32 %v2319_v8, %v2269_v14  ;;  %v3464_v42 = vpop.f32.mrb[45].mxu0 }
0x138d   : > { %v2272_v18 = vpop.f32.mrb[46].mxu0 }
0x138e   : > { %v4215_v20 = vadd.f32 %v2322_v3, %v2272_v18  ;;  %v3465_v21 = vpop.f32.mrb[47].mxu0 }
0x1393   : > { %v2370_v22 = vpop.f32.mrb[48].mxu0 }
0x1394   : > { %v2371_v24 = vadd.f32 %v3661_v61, %v2370_v22  ;;  %v3478_v25 = vpop.f32.mrb[49].mxu0 }
0x1395   : > { %v2373_v26 = vpop.f32.mrb[50].mxu0 }
0x1396   : > { %v2374_v27 = vadd.f32 %v3661_v61, %v2373_v26  ;;  %v3479_v28 = vpop.f32.mrb[51].mxu0  ;;  %v2377_v29 = vsel %vm807_vm3, %v2371_v24, -inf }
0x1397   : > { %2378 = vmax.xlane.f32.xlu1 %v2377_v29 }
0x1398   : > { %v2380_v30 = vsel %vm811_vm4, %v2374_v27, -inf }
0x1399   : > { %2381 = vmax.xlane.f32.xlu0 %v2380_v30 }
0x1424   : > { %v2379_v32 = vpop.xlane.xlu1 %2378 }
0x1425   : > { %v2383_v33 = vsub.f32 %v2371_v24, %v2379_v32 }
0x1426   : > { %v2382_v35 = vpop.xlane.xlu0 %2381 }
0x1427   : > { %v2385_v36 = vmul.f32 1.442695, %v2383_v33  ;;  %v2384_v38 = vsub.f32 %v2374_v27, %v2382_v35 }
0x1429   : > { %3633 = vpow2.f32 %v2385_v36  ;;  %v2387_v39 = vmul.f32 1.442695, %v2384_v38 }
0x142b   : > { %3635 = vpow2.f32 %v2387_v39 }
0x1433   : > { %v3634_v40 = vpop.eup %3633 }
0x1434   : > { %v2389_v41 = vsel %vm807_vm3, %v3634_v40, 0.0 }
0x1435   : > { %v3636_v31 = vpop.eup %3635  ;;  %2390 = vadd.xlane.f32.xlu1 %v2389_v41 }
0x1436   : > { %v2392_v43 = vsel %vm811_vm4, %v3636_v31, 0.0 }
0x1437   : > { %2393 = vadd.xlane.f32.xlu0 %v2392_v43 }
0x1446   : > { %2400 = vrot.lane.b32.xlu1 %v4155_v16, %s3675_s28 }
0x144a   : > { %2506 = vrot.lane.b32.xlu1 %v4127_v45, %s3676_s29 }
0x144d   : > { %2508 = vrot.lane.b32.xlu0 %v4125_v44, %s3676_s29 }
0x14c2   : > { %v2391_v34 = vpop.xlane.xlu1 %2390 }
0x14c3   : > { %3637 = vrcp.f32 %v2391_v34 }
0x14c4   : > { %v2394_v7 = vpop.xlane.xlu0 %2393 }
0x14c5   : > { %3639 = vrcp.f32 %v2394_v7 }
0x14c6   : > { %v2401_v46 = vpop.permute.xlu1 %2400 }
0x14c7   : > { %v2406_v47 = vsel %vm835_vm5, %v2401_v46, 0 }
0x14c8   : > { %3481 = vmatpush3.bf16.msra.mxu1 %v2406_v47  ;;  %v2509_v51 = vpop.permute.xlu0 %2508 }
0x14c9   : > { %3494 = vmatprep.subr.bf16.mxu1 %v3670_v0  ;;  %v2514_v45 = vsel %vm759_vm2, %v2509_v51, 0  ;;  %v3159_v51 = vld [vmem:[%s4359_s5 + $0x1] ss:$0 sm:$0xff] }
0x14ca   : > { %v2507_v44 = vpop.permute.xlu1 %2506 }
0x14cd   : > { %v3638_v48 = vpop.eup %3637 }
0x14ce   : > { %v2397_v49 = vmul.f32 %v3638_v48, %v3634_v40 }
0x14cf   : > { %v3640_v12 = vpop.eup %3639 }
0x14d0   : > { %v2398_v50 = vmul.f32 %v3640_v12, %v3636_v31 }
0x14d2   : > { %v2399_v10 = vpack.c.bf16 %v2398_v50, %v2397_v49 }
0x14d4   : > { %3483 = vmatmul.mubr.msk.bf16.vlgmr.msra.gmra.mrb[56].mxu1 %vm807_vm3, %v2399_v10 }
0x14d5   : > { %3495 = vmatpush3.bf16.xpose.msra.mxu1 %v2514_v45  ;;  %3496 = vmatprep.mubr.msk.bf16.mxu1 %vm3671_vm1, %v3670_v0 }
0x14d6   : > { %3500 = vmatprep.subr.bf16.mxu1 %v3670_v0 }
0x14dc   : > { %3497 = vmatmul.mubr.msk.bf16.vlgmr.msra.gmra.mrb[60].mxu1 %vm759_vm2, %v2507_v44 }
0x14dd   : > { %3502 = vmatprep.mubr.msk.bf16.mxu1 %vm3671_vm1, %v3670_v0 }
0x15a7   : > { %v2442_v11 = vpop.f32.mrb[56].mxu1 }
0x15a8   : > { %v3484_v52 = vpop.f32.mrb[57].mxu1 }
0x15a9   : > { %v2445_v53 = vpop.f32.mrb[58].mxu1 }
0x15aa   : > { %v2449_v54 = vpack.c.bf16 %v2445_v53, %v2442_v11  ;;  %v3485_v55 = vpop.f32.mrb[59].mxu1 }
0x15af   : > { %v2550_v56 = vpop.f32.mrb[60].mxu1 }
0x15b0   : > { %v2551_v57 = vadd.f32 %v3661_v61, %v2550_v56  ;;  %v3498_v58 = vpop.f32.mrb[61].mxu1 }
0x15b1   : > { %v2553_v60 = vpop.f32.mrb[62].mxu1 }
0x15b2   : > { %v2554_v62 = vadd.f32 %v3661_v61, %v2553_v60  ;;  %v3499_v63 = vpop.f32.mrb[63].mxu1  ;;  %v2557_v1 = vsel %vm807_vm3, %v2551_v57, -inf }
0x15b3   : > { %2558 = vmax.xlane.f32.xlu1 %v2557_v1 }
0x15b4   : > { %v2560_v2 = vsel %vm811_vm4, %v2554_v62, -inf }
0x15b5   : > { %2561 = vmax.xlane.f32.xlu0 %v2560_v2 }
0x1640   : > { %v2559_v4 = vpop.xlane.xlu1 %2558 }
0x1641   : > { %v2563_v5 = vsub.f32 %v2551_v57, %v2559_v4  ;;  %v3572_v4 = vld [vmem:[%s4360_s6 + $0x28] sm:$0xff]  }
0x1642   : > { %v2562_v19 = vpop.xlane.xlu0 %2561 }
0x1643   : > { %v2565_v6 = vmul.f32 1.442695, %v2563_v5  ;;  %v2564_v8 = vsub.f32 %v2554_v62, %v2562_v19  ;;  %v2794_v5 = vsel %vm583_vm0, %v3572_v4, 0  ;;  %v3573_v19 = vld [vmem:[%s4360_s6 + $0x30] sm:$0xff]  }
0x1645   : > { %3641 = vpow2.f32 %v2565_v6  ;;  %v2567_v9 = vmul.f32 1.442695, %v2564_v8  ;;  %v2797_v6 = vsel %vm583_vm0, %v3573_v19, 0  ;;  %v3574_v8 = vld [vmem:[%s4360_s6 + $0x38] sm:$0xff]  }
0x1647   : > { %3643 = vpow2.f32 %v2567_v9  ;;  %v2800_v9 = vsel %vm583_vm0, %v3574_v8, 0  ;;  %v3189_v8 = vld [vmem:[%s4367_s13 + $0x1] ss:$0 sm:$0xff] }
0x164f   : > { %v3642_v3 = vpop.eup %3641 }
0x1650   : > { %v2569_v13 = vsel %vm807_vm3, %v3642_v3, 0.0 }
0x1651   : > { %v3644_v14 = vpop.eup %3643  ;;  %2570 = vadd.xlane.f32.xlu0 %v2569_v13 }
0x1652   : > { %v2572_v42 = vsel %vm811_vm4, %v3644_v14, 0.0 }
0x1653   : > { %2573 = vadd.xlane.f32.xlu1 %v2572_v42 }
0x1664   : > { %2450 = vrot.lane.b32.xlu1 %v4180_v37, %s3675_s28 }
0x1667   : > { %2580 = vrot.lane.b32.xlu0 %v4155_v16, %s3676_s29 }
0x1668   : > { %2452 = vrot.lane.b32.xlu1 %v4164_v17, %s3675_s28 }
0x166b   : > { %2630 = vrot.lane.b32.xlu0 %v4180_v37, %s3676_s29 }
0x166c   : > { %2632 = vrot.lane.b32.xlu1 %v4164_v17, %s3676_s29 }
0x16de   : > { %v2571_v18 = vpop.xlane.xlu0 %2570 }
0x16df   : > { %3645 = vrcp.f32 %v2571_v18 }
0x16e0   : > { %v2574_v21 = vpop.xlane.xlu1 %2573 }
0x16e1   : > { %3647 = vrcp.f32 %v2574_v21 }
0x16e2   : > { %v2581_v22 = vpop.permute.xlu0 %2580 }
0x16e3   : > { %v2586_v61 = vsel %vm835_vm5, %v2581_v22, 0 }
0x16e4   : > { %v2451_v24 = vpop.permute.xlu1 %2450  ;;  %3501 = vmatpush3.bf16.msra.mxu1 %v2586_v61 }
0x16e5   : > { %v2458_v16 = vsel %vm759_vm2, %v2451_v24, 0  ;;  %3514 = vmatprep.subr.bf16.mxu1 %v3670_v0 }
0x16e6   : > { %3487 = vmatpush3.bf16.xpose.msra.mxu0 %v2458_v16  ;;  %v2631_v30 = vpop.permute.xlu0 %2630 }
0x16e7   : > { %3488 = vmatprep.subr.bf16.mxu0 %v3670_v0  ;;  %v2638_v32 = vsel %vm759_vm2, %v2631_v30, 0 }
0x16e8   : > { %v2453_v37 = vpop.permute.xlu1 %2452 }
0x16e9   : > { %v3646_v25 = vpop.eup %3645  ;;  %v2461_v17 = vsel %vm759_vm2, %v2453_v37, 0  ;;  %v3160_v37 = vld [vmem:[%s4364_s10 + $0x1] ss:$0 sm:$0xff] }
0x16ea   : > { %v2577_v27 = vmul.f32 %v3646_v25, %v3642_v3  ;;  %v3575_v3 = vld [vmem:[%s4362_s8 + $0x10] sm:$0xff]  }
0x16eb   : > { %v3648_v26 = vpop.eup %3647  ;;  %v2866_v13 = vsel %vm1654_vm7, %v3575_v3, 0 }
0x16ec   : > { %v2578_v28 = vmul.f32 %v3648_v26, %v3644_v14  ;;  %v2633_v33 = vpop.permute.xlu1 %2632 }
0x16ed   : > { %v2641_v35 = vsel %vm759_vm2, %v2633_v33, 0 }
0x16ee   : > { %3489 = vmatpush3.bf16.xpose.msra.mxu0 %v2461_v17  ;;  %v2579_v29 = vpack.c.bf16 %v2578_v28, %v2577_v27 }
0x16ef   : > { %3506 = vmatprep.subr.bf16.mxu0 %v3670_v0 }
0x16f0   : > { %3503 = vmatmul.mubr.msk.bf16.vlgmr.msra.gmra.mrb[64].mxu1 %vm807_vm3, %v2579_v29 }
0x16f1   : > { %3522 = vmatprep.mubr.msk.bf16.mxu1 %vm3671_vm1, %v3670_v0 }
0x16f5   : > { %3491 = vmatmul.mubr.msk.bf16.vlgmr.msra.gmra.mrb[52].mxu0 %vm759_vm2, %v2449_v54  ;;  %v3571_v54 = vld [vmem:[%s4360_s6 + $0x20] sm:$0xff]  }
0x16f6   : > { %3507 = vmatpush3.bf16.xpose.msra.mxu0 %v2638_v32  ;;  %3510 = vmatprep.mubr.msk.bf16.mxu0 %vm3671_vm1, %v3670_v0  ;;  %v2791_v55 = vsel %vm583_vm0, %v3571_v54, 0  ;;  %v3576_v32 = vld [vmem:[%s4362_s8 + $0x18] sm:$0xff]  }
0x16f7   : > { %3508 = vmatprep.subr.bf16.mxu0 %v3670_v0  ;;  %3515 = vmatpush3.bf16.xpose.msra.mxu1 %v2791_v55  ;;  %v2869_v33 = vsel %vm1654_vm7, %v3576_v32, 0 }
0x16f8   : > { %3516 = vmatprep.subr.bf16.mxu1 %v3670_v0 }
0x16fe   : > { %3509 = vmatpush3.bf16.xpose.msra.mxu0 %v2641_v35  ;;  %v3178_v35 = vld [vmem:[%s4361_s7 + $0x1] ss:$0 sm:$0xff] }
0x16ff   : > { %3526 = vmatprep.subr.bf16.mxu0 %v3670_v0  ;;  %3517 = vmatpush3.bf16.xpose.msra.mxu1 %v2794_v5  ;;  %v3188_v5 = vld [vmem:[%s4366_s12 + $0x1] ss:$0 sm:$0xff] }
0x1700   : > { %3518 = vmatprep.subr.bf16.mxu1 %v3670_v0 }
0x1707   : > { %3519 = vmatpush3.bf16.xpose.msra.mxu1 %v2797_v6 }
0x1708   : > { %3520 = vmatprep.subr.bf16.mxu1 %v3670_v0 }
0x170f   : > { %3521 = vmatpush3.bf16.xpose.msra.mxu1 %v2800_v9 }
0x17c3   : > { %v2622_v36 = vpop.f32.mrb[64].mxu1 }
0x17c4   : > { %v3504_v38 = vpop.f32.mrb[65].mxu1 }
0x17c5   : > { %v2625_v39 = vpop.f32.mrb[66].mxu1 }
0x17c6   : > { %v2629_v40 = vpack.c.bf16 %v2625_v39, %v2622_v36  ;;  %v3505_v41 = vpop.f32.mrb[67].mxu1 }
0x17c8   : > { %v2497_v31 = vpop.f32.mrb[52].mxu0  ;;  %3511 = vmatmul.mubr.msk.bf16.vlgmr.msra.gmra.mrb[56].mxu0 %vm759_vm2, %v2629_v40 }
0x17c9   : > { %v2504_v43 = vadd.f32 %v2497_v31, %v4213_v15  ;;  %v3492_v34 = vpop.f32.mrb[53].mxu0  ;;  %3530 = vmatprep.mubr.msk.bf16.mxu0 %vm3671_vm1, %v3670_v0  ;;  %3527 = vmatpush3.bf16.xpose.msra.mxu0 %v2866_v13 }
0x17ca   : > { %v2500_v7 = vpop.f32.mrb[54].mxu0  ;;  %3528 = vmatprep.subr.bf16.mxu0 %v3670_v0  ;;  %v3161_v0 = vld [vmem:[%s4365_s11 + $0x1] ss:$0 sm:$0xff] }
0x17cb   : > { %v2505_v46 = vadd.f32 %v2500_v7, %v4215_v20  ;;  %v3493_v47 = vpop.f32.mrb[55].mxu0 }
0x17d1   : > { %3529 = vmatpush3.bf16.xpose.msra.mxu0 %v2869_v33 }
0x189b   : > { %v2677_v48 = vpop.f32.mrb[56].mxu0 }
0x189c   : > { %v2684_v12 = vadd.f32 %v2677_v48, %v2504_v43  ;;  %v3512_v49 = vpop.f32.mrb[57].mxu0 }
0x189d   : > { %v2680_v50 = vpop.f32.mrb[58].mxu0 }
0x189e   : > { %v2686_v10 = vadd.f32 %v2684_v12, %v4101_v59  ;;  %v2685_v45 = vadd.f32 %v2680_v50, %v2505_v46  ;;  %v3513_v15 = vpop.f32.mrb[59].mxu0  ;;  %v3184_v46 = vld [vmem:[%s4363_s9 + $0x1] ss:$0 sm:$0xff] }
0x18a0   : > { %v2687_v44 = vadd.f32 %v2685_v45, %v4103_v23  ;;  %v2694_v11 = vadd.f32 %v3159_v51, %v2686_v10 }
0x18a2   : > { %v2696_v52 = vsel %vm583_vm0, %v2694_v11, 0.0  ;;  %v2695_v53 = vadd.f32 %v3159_v51, %v2687_v44 }
0x18a3   : > { %2697 = vadd.xlane.f32.xlu0 %v2696_v52 }
0x18a4   : > { %v2699_v20 = vsel %vm1495_vm6, %v2695_v53, 0.0 }
0x18a5   : > { %2700 = vadd.xlane.f32.xlu1 %v2699_v20 }
0x1930   : > { %v2698_v59 = vpop.xlane.xlu0 %2697 }
0x1931   : > { %v2702_v56 = vmul.f32 0.03125, %v2698_v59 }
0x1932   : > { %v2701_v23 = vpop.xlane.xlu1 %2700 }
0x1933   : > { %v2704_v57 = vsub.f32 %v2694_v11, %v2702_v56  ;;  %v2703_v58 = vmul.f32 0.03125, %v2701_v23 }
0x1935   : > { %v2705_v60 = vsub.f32 %v2695_v53, %v2703_v58  ;;  %v2706_v62 = vmul.f32 %v2704_v57, %v2704_v57 }
0x1937   : > { %v2708_v63 = vsel %vm583_vm0, %v2706_v62, 0.0  ;;  %v2707_v1 = vmul.f32 %v2705_v60, %v2705_v60 }
0x1938   : > { %2709 = vadd.xlane.f32.xlu0 %v2708_v63 }
0x1939   : > { %v2711_v2 = vsel %vm1495_vm6, %v2707_v1, 0.0 }
0x193c   : > { %2712 = vadd.xlane.f32.xlu0 %v2711_v2 }
0x19c5   : > { %v2710_v14 = vpop.xlane.xlu0 %2709 }
0x19c6   : > { %v2714_v42 = vmul.f32 0.03125, %v2710_v14 }
0x19c8   : > { %v2716_v18 = vadd.f32 1e-05, %v2714_v42 }
0x19c9   : > { %v2713_v21 = vpop.xlane.xlu0 %2712 }
0x19ca   : > { %3649 = vrsqrt.f32 %v2716_v18  ;;  %v2715_v22 = vmul.f32 0.03125, %v2713_v21 }
0x19cc   : > { %v2717_v61 = vadd.f32 1e-05, %v2715_v22 }
0x19ce   : > { %3651 = vrsqrt.f32 %v2717_v61 }
0x19d4   : > { %v3650_v24 = vpop.eup %3649 }
0x19d5   : > { %v2720_v16 = vmul.f32 %v3650_v24, %v2704_v57 }
0x19d7   : > { %v2728_v26 = vmul.f32 %v3160_v37, %v2720_v16 }
0x19d8   : > { %v3652_v25 = vpop.eup %3651 }
0x19d9   : > { %v2721_v17 = vmul.f32 %v3652_v25, %v2705_v60  ;;  %v2736_v28 = vadd.f32 %v3161_v0, %v2728_v26 }
0x19db   : > { %v2729_v27 = vmul.f32 %v3160_v37, %v2721_v17 }
0x19dd   : > { %v2737_v29 = vadd.f32 %v3161_v0, %v2729_v27 }
0x19df   : > { %v2760_v30 = vpack.c.bf16 %v2737_v29, %v2736_v28 }
0x19e1   : > { %3523 = vmatmul.mubr.msk.bf16.vlgmr.msra.gmra.mrb[68].mxu1 %vm583_vm0, %v2760_v30 }
0x1ab4   : > { %v2836_v36 = vpop.f32.mrb[68].mxu1 }
0x1ab5   : > { %v2837_v38 = vadd.f32 %v3178_v35, %v2836_v36  ;;  %v3524_v39 = vpop.f32.mrb[69].mxu1 }
0x1ab6   : > { %v2839_v40 = vpop.f32.mrb[70].mxu1 }
0x1ab7   : > { %v2840_v41 = vadd.f32 %v3178_v35, %v2839_v40  ;;  %v3525_v31 = vpop.f32.mrb[71].mxu1  ;;  %v2843_v43 = vmax.f32 %v2837_v38, 0.0  ;;  %v3190_v38 = vld [vmem:[%s4368_s14] ss:$0 sm:$0xff] }
0x1ab9   : > { %v2844_v34 = vmax.f32 %v2840_v41, 0.0  ;;  %v3191_v41 = vld [vmem:[%s4369_s15] ss:$0 sm:$0xff] }
0x1abb   : > { %v2845_v7 = vpack.c.bf16 %v2844_v34, %v2843_v43 }
0x1abd   : > { %3531 = vmatmul.mubr.msk.bf16.vlgmr.msra.gmra.mrb[60].mxu0 %vm1654_vm7, %v2845_v7 }
0x1b90   : > { %v2905_v47 = vpop.f32.mrb[60].mxu0 }
0x1b91   : > { %v2906_v48 = vadd.f32 %v3184_v46, %v2905_v47  ;;  %v3532_v12 = vpop.f32.mrb[61].mxu0 }
0x1b92   : > { %v2908_v49 = vpop.f32.mrb[62].mxu0 }
0x1b93   : > { %v2909_v50 = vadd.f32 %v3184_v46, %v2908_v49  ;;  %v3533_v51 = vpop.f32.mrb[63].mxu0  ;;  %v2912_v10 = vadd.f32 %v2906_v48, %v2736_v28 }
0x1b95   : > { %v2914_v45 = vsel %vm583_vm0, %v2912_v10, 0.0  ;;  %v2913_v15 = vadd.f32 %v2909_v50, %v2737_v29 }
0x1b96   : > { %2915 = vadd.xlane.f32.xlu1 %v2914_v45 }
0x1b97   : > { %v2917_v44 = vsel %vm1495_vm6, %v2913_v15, 0.0 }
0x1b98   : > { %2918 = vadd.xlane.f32.xlu0 %v2917_v44 }
0x1c23   : > { %v2916_v11 = vpop.xlane.xlu1 %2915 }
0x1c24   : > { %v2920_v52 = vmul.f32 0.03125, %v2916_v11 }
0x1c25   : > { %v2919_v53 = vpop.xlane.xlu0 %2918 }
0x1c26   : > { %v2922_v20 = vsub.f32 %v2912_v10, %v2920_v52  ;;  %v2921_v54 = vmul.f32 0.03125, %v2919_v53 }
0x1c28   : > { %v2923_v55 = vsub.f32 %v2913_v15, %v2921_v54  ;;  %v2924_v59 = vmul.f32 %v2922_v20, %v2922_v20 }
0x1c2a   : > { %v2926_v56 = vsel %vm583_vm0, %v2924_v59, 0.0  ;;  %v2925_v23 = vmul.f32 %v2923_v55, %v2923_v55 }
0x1c2b   : > { %2927 = vadd.xlane.f32.xlu1 %v2926_v56 }
0x1c2c   : > { %v2929_v57 = vsel %vm1495_vm6, %v2925_v23, 0.0 }
0x1c2d   : > { %2930 = vadd.xlane.f32.xlu0 %v2929_v57 }
0x1cb8   : > { %v2928_v58 = vpop.xlane.xlu1 %2927 }
0x1cb9   : > { %v2932_v60 = vmul.f32 0.03125, %v2928_v58 }
0x1cba   : > { %v2931_v62 = vpop.xlane.xlu0 %2930 }
0x1cbb   : > { %v2934_v63 = vadd.f32 1e-05, %v2932_v60  ;;  %v2933_v1 = vmul.f32 0.03125, %v2931_v62 }
0x1cbd   : > { %3653 = vrsqrt.f32 %v2934_v63  ;;  %v2935_v2 = vadd.f32 1e-05, %v2933_v1 }
0x1cbf   : > { %3655 = vrsqrt.f32 %v2935_v2 }
0x1cc7   : > { %v3654_v4 = vpop.eup %3653 }
0x1cc8   : > { %v2938_v19 = vmul.f32 %v3654_v4, %v2922_v20 }
0x1cc9   : > { %v3656_v6 = vpop.eup %3655 }
0x1cca   : > { %v2946_v9 = vmul.f32 %v3188_v5, %v2938_v19  ;;  %v2939_v3 = vmul.f32 %v3656_v6, %v2923_v55 }
0x1ccc   : > { %v2954_v13 = vadd.f32 %v3189_v8, %v2946_v9  ;;  %v2947_v14 = vmul.f32 %v3188_v5, %v2939_v3 }
0x1cce   : > { %v2958_v42 = vsel %vm583_vm0, %v2954_v13, 0.0  ;;  %v2955_v18 = vadd.f32 %v3189_v8, %v2947_v14 }
0x1ccf   : > { %2959 = vadd.xlane.f32.xlu1 %v2958_v42 }
0x1cd0   : > { %v2961_v21 = vsel %vm1495_vm6, %v2955_v18, 0.0 }
0x1cd1   : > { %2962 = vadd.xlane.f32.xlu0 %v2961_v21 }
0x1d5c   : > { %v2960_v22 = vpop.xlane.xlu1 %2959 }
0x1d5d   : > { %v2964_v61 = vmul.f32 0.03125, %v2960_v22 }
0x1d5e   : > { %v2963_v24 = vpop.xlane.xlu0 %2962 }
0x1d5f   : > { %v2966_v16 = vsub.f32 %v2954_v13, %v2964_v61  ;;  %v2965_v37 = vmul.f32 0.03125, %v2963_v24 }
0x1d61   : > { %v2967_v25 = vsub.f32 %v2955_v18, %v2965_v37  ;;  %v2968_v26 = vmul.f32 %v2966_v16, %v2966_v16 }
0x1d63   : > { %v2970_v17 = vsel %vm583_vm0, %v2968_v26, 0.0  ;;  %v2969_v0 = vmul.f32 %v2967_v25, %v2967_v25 }
0x1d64   : > { %2971 = vadd.xlane.f32.xlu1 %v2970_v17 }
0x1d65   : > { %v2973_v27 = vsel %vm1495_vm6, %v2969_v0, 0.0 }
0x1d66   : > { %2974 = vadd.xlane.f32.xlu0 %v2973_v27 }
0x1df1   : > { %v2972_v28 = vpop.xlane.xlu1 %2971 }
0x1df2   : > { %v2976_v29 = vmul.f32 0.03125, %v2972_v28 }
0x1df3   : > { %v2975_v30 = vpop.xlane.xlu0 %2974 }
0x1df4   : > { %v2978_v32 = vadd.f32 1e-05, %v2976_v29  ;;  %v2977_v33 = vmul.f32 0.03125, %v2975_v30 }
0x1df6   : > { %3657 = vrsqrt.f32 %v2978_v32  ;;  %v2979_v35 = vadd.f32 1e-05, %v2977_v33 }
0x1df8   : > { %3659 = vrsqrt.f32 %v2979_v35 }
0x1e00   : > { %v3658_v36 = vpop.eup %3657 }
0x1e01   : > { %v2982_v39 = vmul.f32 %v3658_v36, %v2966_v16 }
0x1e02   : > { %v3660_v40 = vpop.eup %3659 }
0x1e03   : > { %v2990_v31 = vmul.f32 %v3190_v38, %v2982_v39  ;;  %v2983_v43 = vmul.f32 %v3660_v40, %v2967_v25 }
0x1e05   : > { %v2998_v34 = vadd.f32 %v3191_v41, %v2990_v31  ;;  %v2991_v7 = vmul.f32 %v3190_v38, %v2983_v43 }
0x1e07   : > { %3000 = vst.msk [vmem:[%s535_s23] sm:$0xff] %vm583_vm0, %v2998_v34  ;;  %v2999_v46 = vadd.f32 %v3191_v41, %v2991_v7 }
0x1e09   : > { %3001 = vst.msk [vmem:[%s535_s23 + $0x8] sm:$0x3] %vm1495_vm6, %v2999_v46 }
0x1e0a PF: > { %s26_s21 = sadd.s32 1, %s3668_s21  }
0x1e0b   : > { %p23_p4 = scmp.ge.s32.totalorder %s26_s21, 4  }
0x1e0d   :  { %25 = sbr.rel (!%p23_p4) target bundleno = 2 (0x2), region = 129 }

// kernel: transformer_forward.3
= control target key start
LH: loop header
LB: loop body
LE: loop exit
PB: predicated region body
PF: predicated region fallthrough
CT: control target
= control target key end

     0   :  { %s7139_s0 = inlined_call_operand.vmem [shape: f32[2,8,32], index: 0, kind: input, shape index: {}]   ;;  %s7140_s1 = inlined_call_operand.vmem [shape: f32[2,10,32], index: 1, kind: input, shape index: {}]   ;;  %s7141_s2 = inlined_call_operand.vmem [shape: bf16[2,96,32], index: 2, kind: input, shape index: {}]   ;;  %s7142_s3 = inlined_call_operand.vmem [shape: f32[2,1,96], index: 3, kind: input, shape index: {}]   ;;  %s7143_s4 = inlined_call_operand.vmem [shape: bf16[2,32,32], index: 4, kind: input, shape index: {}]   ;;  %s7144_s5 = inlined_call_operand.vmem [shape: f32[2,1,32], index: 5, kind: input, shape index: {}]   ;;  %s7145_s6 = inlined_call_operand.vmem [shape: bf16[2,96,32], index: 6, kind: input, shape index: {}]   ;;  %s7146_s7 = inlined_call_operand.vmem [shape: f32[2,1,96], index: 7, kind: input, shape index: {}]   ;;  %s7147_s8 = inlined_call_operand.vmem [shape: bf16[2,32,32], index: 8, kind: input, shape index: {}]   ;;  %s7148_s9 = inlined_call_operand.vmem [shape: f32[2,1,32], index: 9, kind: input, shape index: {}]   ;;  %s7149_s10 = inlined_call_operand.vmem [shape: bf16[2,64,32], index: 10, kind: input, shape index: {}]   ;;  %s7150_s11 = inlined_call_operand.vmem [shape: f32[2,1,64], index: 11, kind: input, shape index: {}]   ;;  %s7151_s12 = inlined_call_operand.vmem [shape: bf16[2,32,64], index: 12, kind: input, shape index: {}]   ;;  %s7152_s13 = inlined_call_operand.vmem [shape: f32[2,1,32], index: 13, kind: input, shape index: {}]   ;;  %s7153_s14 = inlined_call_operand.vmem [shape: f32[2,1,32], index: 14, kind: input, shape index: {}]   ;;  %s7154_s15 = inlined_call_operand.vmem [shape: f32[2,1,32], index: 15, kind: input, shape index: {}]   ;;  %s7155_s16 = inlined_call_operand.vmem [shape: f32[2,1,32], index: 16, kind: input, shape index: {}]   ;;  %s7156_s17 = inlined_call_operand.vmem [shape: f32[2,1,32], index: 17, kind: input, shape index: {}]   ;;  %s7157_s18 = inlined_call_operand.vmem [shape: f32[2,1,32], index: 18, kind: input, shape index: {}]   ;;  %s7158_s19 = inlined_call_operand.vmem [shape: f32[2,1,32], index: 19, kind: input, shape index: {}]   ;;  %s7159_s20 = inlined_call_operand.vmem [shape: f32[1,32], index: 20, kind: input, shape index: {}]   ;;  %s7160_s21 = inlined_call_operand.vmem [shape: f32[1,32], index: 21, kind: input, shape index: {}]   ;;  %s7161_s22 = inlined_call_operand.vmem [shape: bf16[128,32], index: 22, kind: input, shape index: {}]   ;;  %s7162_s23 = inlined_call_operand.vmem [shape: f32[1,128], index: 23, kind: input, shape index: {}]   ;;  %s7163_s24 = inlined_call_operand.vmem [shape: f32[2,8,128], index: 24, kind: output, shape index: {}]  }
   0x1   :  { %7185 = sst [smem:[#allocation3_spill]] %s7139_s0 }
   0x2   :  { %7186 = sst [smem:[#allocation4_spill]] %s7140_s1 }
   0x3   :  { %7187 = sst [smem:[#allocation5_spill]] %s7141_s2 }
   0x4   :  { %7188 = sst [smem:[#allocation6_spill]] %s7142_s3 }
   0x5   :  { %7189 = sst [smem:[#allocation7_spill]] %s7143_s4 }
   0x6   :  { %7190 = sst [smem:[#allocation8_spill]] %s7144_s5  ;;  %s6170_s5 = smov 0  }
   0x7   :  { %7191 = sst [smem:[#allocation9_spill]] %s7145_s6 }
   0x8   :  { %7192 = sst [smem:[#allocation10_spill]] %s7146_s7 }
   0x9   :  { %7193 = sst [smem:[#allocation11_spill]] %s7147_s8 }
   0xa   :  { %7194 = sst [smem:[#allocation12_spill]] %s7159_s20 }
   0xb   :  { %7195 = sst [smem:[#allocation13_spill]] %s7160_s21 }
   0xc   :  { %7196 = sst [smem:[#allocation14_spill]] %s7162_s23 }
   0xd   :  { %7197 = sst [smem:[#allocation15_spill]] %s7163_s24 }
   0xe LB: > { %7198 = sst [smem:[#allocation2_spill]] %s6036_s5  ;;  %s5024_s26 = sadd.s32 4294967295, %s6036_s5   ;;  %s6036_s5 = sphi %s6170_s5, %s34_s5  }
   0xf   : > { %p5028_p0 = scmp.ge.s32.totalorder %s6036_s5, 1  ;;  %p671_p1 = scmp.lt.s32.totalorder %s6036_s5, 3 }
  0x11   : > { %p672_p2 = pnand %p5028_p0, %p671_p1 }
  0x12   : > { %s7199_s6 = sld [smem:[#allocation5_spill]] (!%p672_p2)  ;;  %v6038_v1 = vmov (!%p672_p2), 0.0   ;;  %vm800_vm0 = vcmask (!%p672_p2), 261120   ;;  %p740_p3 = scmp.lt.s32.totalorder (!%p672_p2), %s5024_s26, 1  ;;  %vm6039_vm1 = vmmov (!%p672_p2), 0   ;;  %vm972_vm2 = vcmask (!%p672_p2), 64512  }
  0x13   : > { %675 = sbr.rel (%p672_p2) target bundleno = 13683 (0x3573), region = 116  ;;  %5409 = vmatprep.subr.bf16.mxu1 (!%p672_p2), %v6038_v1  ;;  %5445 = vmatprep.subr.bf16.mxu0 (!%p672_p2), %v6038_v1  ;;  %s7200_s4 = sld [smem:[#allocation6_spill]] (!%p672_p2)  ;;  %v757_v38 = vlaneseq (!%p672_p2)  ;;  %vm1034_vm4 = vcmask (!%p672_p2), 1043456   ;;  %vm1931_vm5 = vcmask (!%p672_p2), 80896   ;;  %vm1947_vm6 = vcmask (!%p672_p2), 1044480  }
  0x14   : > { %5413 = vmatprep.mubr.msk.bf16.mxu1 (!%p672_p2), %vm6039_vm1, %v6038_v1  ;;  %5447 = vmatprep.mubr.msk.bf16.mxu0 (!%p672_p2), %vm6039_vm1, %v6038_v1  ;;  %s7180_s27 = smov (!%p672_p2), 96   ;;  %s7201_s29 = sld [smem:[#allocation3_spill]] (!%p672_p2)  ;;  %vm2699_vm7 = vcmask (!%p672_p2), 523264  }
  0x15   : > { %s7178_s8 = smov (!%p672_p2), 120   ;;  %v758_v39 = vshrl.u32 (!%p672_p2), %v757_v38, 7  ;;  %v760_v40 = vand.u32 (!%p672_p2), 127, %v757_v38  ;;  %s7176_s28 = smov (!%p672_p2), 64  }
  0x16   : > { %s7174_s3 = smov (!%p672_p2), 112   ;;  %s7172_s25 = smov (!%p672_p2), 104  }
  0x17   : > { %vm761_vm3 = vcmp.gt.s32.totalorder (!%p672_p2), %v760_v40, %v758_v39  ;;  %s7203_s7 = sld [smem:[#allocation8_spill]] (!%p672_p2)  ;;  %s7208_s2 = smov (!%p672_p2), 120  }
  0x18   : > { %v5900_v0 = vld [vmem:[%s7199_s6] sm:$0xff] (!%p672_p2)   ;;  %v5901_v3 = vld [vmem:[%s7199_s6 + $0x8] sm:$0xff] (!%p672_p2)   ;;  %v5902_v4 = vld [vmem:[%s7199_s6 + $0x10] sm:$0xff] (!%p672_p2)   ;;  %v6264_v41 = vsel (!%p672_p2), %vm761_vm3, -1e+09, %v6038_v1  ;;  %s7209_s30 = smov (!%p672_p2), 64  }
  0x19   : > { %v805_v2 = vsel (!%p672_p2), %vm800_vm0, %v5900_v0, 0  ;;  %v5903_v5 = vld [vmem:[%s7199_s6 + $0x18] sm:$0xff] (!%p672_p2)   ;;  %v6201_v6 = vld [vmem:[%s7200_s4] ss:$0 sm:$0xff] (!%p672_p2)  ;;  %v808_v7 = vsel (!%p672_p2), %vm800_vm0, %v5901_v3, 0  ;;  %v864_v8 = vsel (!%p672_p2), %vm800_vm0, %v5902_v4, 0 }
  0x1a   : > { %5410 = vmatpush3.bf16.xpose.msra.mxu1 %v805_v2  ;;  %s7220_s26 = smov (!%p740_p3, %s5024_s26), 1  ;;  %860 = vrot.lane.b32.xlu0 %v6201_v6, %s7180_s27  ;;  %v867_v9 = vsel %vm800_vm0, %v5903_v5, 0  ;;  %v5904_v12 = vld [vmem:[%s7199_s6 + $0x20] sm:$0xff]   ;;  %v5905_v14 = vld [vmem:[%s7199_s6 + $0x28] sm:$0xff]   ;;  %s7205_s27 = sld [smem:[#allocation4_spill]] }
  0x1b   : > { %5411 = vmatprep.subr.bf16.mxu1 %v6038_v1  ;;  %s7171_s1 = sshll.u32 %s7220_s26, 3  ;;  %v923_v13 = vsel %vm800_vm0, %v5904_v12, 0  ;;  %v926_v15 = vsel %vm800_vm0, %v5905_v14, 0  ;;  %s7211_s24 = smov 112  }
  0x1c   : > { %s743_s0 = scalar_lea.vmem %s7201_s29, %s7171_s1  ;;  %s5235_s1 = sshll.u32 %s7220_s26, 4 }
  0x1d   : > { %v6216_v10 = vld [vmem:[%s743_s0] sm:$0xff]  ;;  %s7202_s0 = sld [smem:[#allocation7_spill]]  ;;  %s7215_s23 = sld [smem:[#allocation14_spill]] }
  0x1e   : > { %v783_v11 = vpack.c.bf16 %v6216_v10, %v6216_v10 }
  0x20   : > { %s748_s5 = scalar_lea.vmem %s7205_s27, %s5235_s1  ;;  %s7210_s27 = sld [smem:[#allocation11_spill]] }
  0x21   : > { %s7216_s1 = sshll.u32 %s7220_s26, 3 }
  0x22   : > { %5412 = vmatpush3.bf16.xpose.msra.mxu1 %v808_v7 }
  0x23   : > { %5417 = vmatprep.subr.bf16.mxu1 %v6038_v1  ;;  %v6275_v54 = vld [vmem:[%s7202_s0] sm:$0xff]   ;;  %v6282_v56 = vld [vmem:[%s7202_s0 + $0x8] sm:$0xff]  }
  0x29   : > { %5414 = vmatmul.mubr.msk.bf16.vlgmr.msra.gmra.mrb[0].mxu1 %vm800_vm0, %v783_v11 }
  0x2a   : > { %5418 = vmatpush3.bf16.xpose.msra.mxu1 %v864_v8  ;;  %5421 = vmatprep.mubr.msk.bf16.mxu1 %vm6039_vm1, %v6038_v1 }
  0x2b   : > { %5419 = vmatprep.subr.bf16.mxu1 %v6038_v1 }
  0x32   : > { %5420 = vmatpush3.bf16.xpose.msra.mxu1 %v867_v9 }
  0x33   : > { %5425 = vmatprep.subr.bf16.mxu1 %v6038_v1 }
  0x39   : > { %5422 = vmatmul.mubr.msk.bf16.vlgmr.msra.gmra.mrb[4].mxu1 %vm800_vm0, %v783_v11 }
  0x3a   : > { %5429 = vmatprep.mubr.msk.bf16.mxu1 %vm6039_vm1, %v6038_v1  ;;  %5426 = vmatpush3.bf16.xpose.msra.mxu1 %v923_v13 }
  0x3b   : > { %5427 = vmatprep.subr.bf16.mxu1 %v6038_v1 }
  0x42   : > { %5428 = vmatpush3.bf16.xpose.msra.mxu1 %v926_v15 }
  0x43   : > { %5433 = vmatprep.subr.bf16.mxu1 %v6038_v1 }
  0x49   : > { %5430 = vmatmul.mubr.msk.bf16.vlgmr.msra.gmra.mrb[8].mxu1 %vm800_vm0, %v783_v11 }
  0x4a   : > { %5435 = vmatprep.mubr.msk.bf16.mxu1 %vm6039_vm1, %v6038_v1 }
  0x8c   : > { %v861_v23 = vpop.permute.xlu0 %860 }
  0xfc   : > { %v844_v16 = vpop.f32.mrb[0].mxu1 }
  0xfd   : > { %v845_v17 = vadd.f32 %v6201_v6, %v844_v16  ;;  %v5415_v18 = vpop.f32.mrb[1].mxu1 }
  0xfe   : > { %v847_v19 = vpop.f32.mrb[2].mxu1 }
  0xff   : > { %v968_v20 = vmul.f32 0.35355338, %v845_v17  ;;  %v5416_v21 = vpop.f32.mrb[3].mxu1 }
 0x101   : > { %v6243_v22 = vpack.c.bf16 %v968_v20, %v968_v20 }
 0x103   : > { %1080 = vrot.lane.b32.xlu1 %v6243_v22, %s7178_s8 }
 0x10c   : > { %v903_v24 = vpop.f32.mrb[4].mxu1 }
 0x10d   : > { %v904_v25 = vadd.f32 %v903_v24, %v861_v23  ;;  %v5423_v26 = vpop.f32.mrb[5].mxu1  ;;  %v1260_v23 = vsel %vm972_vm2, %v6275_v54, 0  ;;  %v1263_v24 = vsel %vm972_vm2, %v6282_v56, 0 }
 0x10e   : > { %v906_v27 = vpop.f32.mrb[6].mxu1 }
 0x10f   : > { %v6247_v28 = vpack.c.bf16 %v904_v25, %v904_v25  ;;  %v5424_v29 = vpop.f32.mrb[7].mxu1 }
 0x111   : > { %1083 = vrot.lane.b32.xlu0 %v6247_v28, %s7178_s8  ;;  %v977_v30 = vsel %vm972_vm2, %v6247_v28, 0 }
 0x112   : > { %5434 = vmatpush3.bf16.xpose.msra.mxu1 %v977_v30 }
 0x113   : > { %5439 = vmatprep.subr.bf16.mxu1 %v6038_v1 }
 0x119   : > { %5436 = vmatmul.mubr.msk.bf16.vlgmr.msra.gmra.mrb[12].mxu1 %vm972_vm2, %v6243_v22 }
 0x11a   : > { %5441 = vmatprep.mubr.msk.bf16.mxu1 %vm6039_vm1, %v6038_v1 }
 0x11c   : > { %v962_v31 = vpop.f32.mrb[8].mxu1 }
 0x11d   : > { %v5431_v32 = vpop.f32.mrb[9].mxu1 }
 0x11e   : > { %v965_v33 = vpop.f32.mrb[10].mxu1 }
 0x11f   : > { %v5432_v34 = vpop.f32.mrb[11].mxu1 }
 0x175   : > { %v1081_v37 = vpop.permute.xlu1 %1080 }
 0x183   : > { %v1084_v35 = vpop.permute.xlu0 %1083 }
 0x184   : > { %v1089_v36 = vsel %vm972_vm2, %v1084_v35, 0 }
 0x185   : > { %5446 = vmatpush3.bf16.xpose.msra.mxu0 %v1089_v36 }
 0x186   : > { %5457 = vmatprep.subr.bf16.mxu0 %v6038_v1 }
 0x18c   : > { %5448 = vmatmul.mubr.msk.bf16.vlgmr.msra.gmra.mrb[0].mxu0 %vm972_vm2, %v1081_v37 }
 0x18d   : > { %5461 = vmatprep.mubr.msk.bf16.mxu0 %vm6039_vm1, %v6038_v1 }
 0x1ec   : > { %v1013_v42 = vpop.f32.mrb[12].mxu1 }
 0x1ed   : > { %v1014_v43 = vadd.f32 %v1013_v42, %v6264_v41  ;;  %v5437_v44 = vpop.f32.mrb[13].mxu1 }
 0x1ee   : > { %v1016_v45 = vpop.f32.mrb[14].mxu1 }
 0x1ef   : > { %v5438_v46 = vpop.f32.mrb[15].mxu1  ;;  %v1019_v47 = vsel %vm972_vm2, %v1014_v43, -inf }
 0x1f0   : > { %1020 = vmax.xlane.f32.xlu1 %v1019_v47 }
 0x25f   : > { %v1125_v48 = vpop.f32.mrb[0].mxu0 }
 0x260   : > { %v1126_v49 = vadd.f32 %v1125_v48, %v6264_v41  ;;  %v5449_v50 = vpop.f32.mrb[1].mxu0 }
 0x261   : > { %v1128_v51 = vpop.f32.mrb[2].mxu0 }
 0x262   : > { %v5450_v52 = vpop.f32.mrb[3].mxu0  ;;  %v1131_v53 = vsel %vm972_vm2, %v1126_v49, -inf }
 0x263   : > { %1132 = vmax.xlane.f32.xlu0 %v1131_v53 }
 0x279   : > { %919 = vrot.lane.b32.xlu0 %v6201_v6, %s7176_s28  ;;  %s7207_s28 = smov 96  }
 0x27d   : > { %1203 = vrot.lane.b32.xlu0 %v6275_v54, %s7178_s8  ;;  %v1021_v55 = vpop.xlane.xlu1 %1020 }
 0x27e   : > { %v1022_v57 = vsub.f32 %v1014_v43, %v1021_v55 }
 0x280   : > { %v1023_v58 = vmul.f32 1.442695, %v1022_v57 }
 0x281   : > { %1205 = vrot.lane.b32.xlu0 %v6282_v56, %s7178_s8 }
 0x282   : > { %5952 = vpow2.f32 %v1023_v58 }
 0x285   : > { %1305 = vrot.lane.b32.xlu0 %v6243_v22, %s7174_s3 }
 0x28c   : > { %v5953_v59 = vpop.eup %5952 }
 0x28d   : > { %v1025_v60 = vsel %vm972_vm2, %v5953_v59, 0.0 }
 0x28e   : > { %1026 = vadd.xlane.f32.xlu1 %v1025_v60 }
 0x2f0   : > { %v1133_v61 = vpop.xlane.xlu0 %1132 }
 0x2f1   : > { %v1134_v62 = vsub.f32 %v1126_v49, %v1133_v61 }
 0x2f3   : > { %v1135_v63 = vmul.f32 1.442695, %v1134_v62 }
 0x2f4   : > { %v920_v0 = vpop.permute.xlu0 %919 }
 0x2f5   : > { %5954 = vpow2.f32 %v1135_v63  ;;  %v963_v2 = vadd.f32 %v962_v31, %v920_v0 }
 0x2f7   : > { %v6289_v3 = vpack.c.bf16 %v963_v2, %v963_v2 }
 0x2f8   : > { %v1204_v4 = vpop.permute.xlu0 %1203 }
 0x2f9   : > { %v1211_v5 = vsel %vm972_vm2, %v1204_v4, 0  ;;  %v1036_v6 = vsel %vm1034_vm4, %v6289_v3, 0 }
 0x2fa   : > { %5440 = vmatpush3.bf16.msra.mxu1 %v1036_v6  ;;  %5458 = vmatpush3.bf16.xpose.msra.mxu0 %v1211_v5 }
 0x2fb   : > { %5451 = vmatprep.subr.bf16.mxu1 %v6038_v1  ;;  %5459 = vmatprep.subr.bf16.mxu0 %v6038_v1 }
 0x2fc   : > { %v1206_v7 = vpop.permute.xlu0 %1205 }
 0x2fd   : > { %v1214_v9 = vsel %vm972_vm2, %v1206_v7, 0 }
 0x2ff   : > { %v5955_v8 = vpop.eup %5954 }
 0x300   : > { %v1137_v11 = vsel %vm972_vm2, %v5955_v8, 0.0  ;;  %v1306_v38 = vpop.permute.xlu0 %1305 }
 0x301   : > { %1138 = vadd.xlane.f32.xlu1 %v1137_v11 }
 0x302   : > { %5460 = vmatpush3.bf16.xpose.msra.mxu0 %v1214_v9 }
 0x303   : > { %5473 = vmatprep.subr.bf16.mxu0 %v6038_v1 }
 0x312   : > { %1144 = vrot.lane.b32.xlu1 %v6289_v3, %s7178_s8  ;;  %s7206_s8 = sld [smem:[#allocation10_spill]] }
 0x316   : > { %1307 = vrot.lane.b32.xlu1 %v6247_v28, %s7174_s3 }
 0x31b   : > { %v1027_v12 = vpop.xlane.xlu1 %1026 }
 0x31c   : > { %5956 = vrcp.f32 %v1027_v12 }
 0x326   : > { %v5957_v13 = vpop.eup %5956 }
 0x327   : > { %v1029_v14 = vmul.f32 %v5957_v13, %v5953_v59 }
 0x329   : > { %v1030_v15 = vpack.c.bf16 %v1029_v14, %v1029_v14 }
 0x32b   : > { %5442 = vmatmul.mubr.msk.bf16.vlgmr.msra.gmra.mrb[16].mxu1 %vm972_vm2, %v1030_v15 }
 0x32c   : > { %5453 = vmatprep.mubr.msk.bf16.mxu1 %vm6039_vm1, %v6038_v1 }
 0x38e   : > { %v1139_v16 = vpop.xlane.xlu1 %1138 }
 0x38f   : > { %5958 = vrcp.f32 %v1139_v16 }
 0x392   : > { %v1145_v17 = vpop.permute.xlu1 %1144 }
 0x393   : > { %v1150_v18 = vsel %vm1034_vm4, %v1145_v17, 0 }
 0x394   : > { %5452 = vmatpush3.bf16.msra.mxu1 %v1150_v18 }
 0x395   : > { %5465 = vmatprep.subr.bf16.mxu1 %v6038_v1 }
 0x396   : > { %v1308_v31 = vpop.permute.xlu1 %1307 }
 0x397   : > { %v1313_v36 = vsel %vm972_vm2, %v1308_v31, 0 }
 0x399   : > { %v5959_v19 = vpop.eup %5958 }
 0x39a   : > { %v1141_v20 = vmul.f32 %v5959_v19, %v5955_v8 }
 0x39c   : > { %v1142_v21 = vpack.c.bf16 %v1141_v20, %v1141_v20 }
 0x39e   : > { %5454 = vmatmul.mubr.msk.bf16.vlgmr.msra.gmra.mrb[20].mxu1 %vm972_vm2, %v1142_v21 }
 0x39f   : > { %5466 = vmatpush3.bf16.xpose.msra.mxu1 %v1260_v23  ;;  %5469 = vmatprep.mubr.msk.bf16.mxu1 %vm6039_vm1, %v6038_v1 }
 0x3a0   : > { %5467 = vmatprep.subr.bf16.mxu1 %v6038_v1 }
 0x3a7   : > { %5468 = vmatpush3.bf16.xpose.msra.mxu1 %v1263_v24 }
 0x3a8   : > { %5479 = vmatprep.subr.bf16.mxu1 %v6038_v1 }
 0x3fe   : > { %v1072_v25 = vpop.f32.mrb[16].mxu1 }
 0x3ff   : > { %v1078_v26 = vpack.c.bf16 %v1072_v25, %v1072_v25  ;;  %v5443_v27 = vpop.f32.mrb[17].mxu1 }
 0x400   : > { %v1075_v29 = vpop.f32.mrb[18].mxu1 }
 0x401   : > { %v5444_v30 = vpop.f32.mrb[19].mxu1  ;;  %5470 = vmatmul.mubr.msk.bf16.vlgmr.msra.gmra.mrb[24].mxu1 %vm972_vm2, %v1078_v26 }
 0x402   : > { %5481 = vmatprep.mubr.msk.bf16.mxu1 %vm6039_vm1, %v6038_v1 }
 0x471   : > { %v1186_v32 = vpop.f32.mrb[20].mxu1 }
 0x472   : > { %v1192_v33 = vpack.c.bf16 %v1186_v32, %v1186_v32  ;;  %v5455_v34 = vpop.f32.mrb[21].mxu1 }
 0x473   : > { %v1189_v35 = vpop.f32.mrb[22].mxu1 }
 0x474   : > { %v5456_v37 = vpop.f32.mrb[23].mxu1  ;;  %5462 = vmatmul.mubr.msk.bf16.vlgmr.msra.gmra.mrb[4].mxu0 %vm972_vm2, %v1192_v33 }
 0x475   : > { %5474 = vmatpush3.bf16.xpose.msra.mxu0 %v1313_v36  ;;  %5475 = vmatprep.mubr.msk.bf16.mxu0 %vm6039_vm1, %v6038_v1 }
 0x476   : > { %5485 = vmatprep.subr.bf16.mxu0 %v6038_v1 }
 0x47c   : > { %5476 = vmatmul.mubr.msk.bf16.vlgmr.msra.gmra.mrb[8].mxu0 %vm972_vm2, %v1306_v38 }
 0x47d   : > { %5489 = vmatprep.mubr.msk.bf16.mxu0 %vm6039_vm1, %v6038_v1 }
 0x4d4   : > { %v1299_v39 = vpop.f32.mrb[24].mxu1 }
 0x4d5   : > { %v5471_v40 = vpop.f32.mrb[25].mxu1 }
 0x4d6   : > { %v1302_v42 = vpop.f32.mrb[26].mxu1 }
 0x4d7   : > { %v5472_v43 = vpop.f32.mrb[27].mxu1 }
 0x547   : > { %v1250_v44 = vpop.f32.mrb[4].mxu0 }
 0x548   : > { %v6328_v45 = vadd.f32 %v1299_v39, %v1250_v44  ;;  %v5463_v46 = vpop.f32.mrb[5].mxu0 }
 0x549   : > { %v1253_v47 = vpop.f32.mrb[6].mxu0 }
 0x54a   : > { %v5464_v48 = vpop.f32.mrb[7].mxu0 }
 0x54f   : > { %v1349_v49 = vpop.f32.mrb[8].mxu0 }
 0x550   : > { %v1350_v50 = vadd.f32 %v1349_v49, %v6264_v41  ;;  %v5477_v51 = vpop.f32.mrb[9].mxu0 }
 0x551   : > { %v1352_v52 = vpop.f32.mrb[10].mxu0 }
 0x552   : > { %v5478_v53 = vpop.f32.mrb[11].mxu0  ;;  %v1355_v55 = vsel %vm972_vm2, %v1350_v50, -inf }
 0x553   : > { %1356 = vmax.xlane.f32.xlu1 %v1355_v55  ;;  %v5057_v53 = vld [vmem:[%s7203_s7] ss:$0 sm:$0xff] }
 0x564   : > { %1472 = vrot.lane.b32.xlu1 %v6247_v28, %s7172_s25 }
 0x568   : > { %1470 = vrot.lane.b32.xlu1 %v6243_v22, %s7172_s25 }
 0x5e0   : > { %v1357_v57 = vpop.xlane.xlu1 %1356 }
 0x5e1   : > { %v1358_v58 = vsub.f32 %v1350_v50, %v1357_v57 }
 0x5e3   : > { %v1359_v59 = vmul.f32 1.442695, %v1358_v58 }
 0x5e4   : > { %v1473_v2 = vpop.permute.xlu1 %1472 }
 0x5e5   : > { %5960 = vpow2.f32 %v1359_v59  ;;  %v1478_v5 = vsel %vm972_vm2, %v1473_v2, 0 }
 0x5e8   : > { %v1471_v6 = vpop.permute.xlu1 %1470 }
 0x5ef   : > { %v5961_v60 = vpop.eup %5960 }
 0x5f0   : > { %v1361_v61 = vsel %vm972_vm2, %v5961_v60, 0.0 }
 0x5f1   : > { %1362 = vadd.xlane.f32.xlu0 %v1361_v61 }
 0x607   : > { %1367 = vrot.lane.b32.xlu0 %v6289_v3, %s7174_s3 }
 0x67e   : > { %v1363_v62 = vpop.xlane.xlu0 %1362 }
 0x67f   : > { %5962 = vrcp.f32 %v1363_v62 }
 0x682   : > { %v1368_v63 = vpop.permute.xlu0 %1367 }
 0x683   : > { %v1373_v0 = vsel %vm1034_vm4, %v1368_v63, 0 }
 0x684   : > { %5480 = vmatpush3.bf16.msra.mxu1 %v1373_v0 }
 0x685   : > { %5493 = vmatprep.subr.bf16.mxu1 %v6038_v1 }
 0x689   : > { %v5963_v22 = vpop.eup %5962 }
 0x68a   : > { %v1365_v28 = vmul.f32 %v5963_v22, %v5961_v60 }
 0x68c   : > { %v1366_v4 = vpack.c.bf16 %v1365_v28, %v1365_v28 }
 0x68e   : > { %5482 = vmatmul.mubr.msk.bf16.vlgmr.msra.gmra.mrb[28].mxu1 %vm972_vm2, %v1366_v4 }
 0x68f   : > { %5494 = vmatpush3.bf16.xpose.msra.mxu1 %v1478_v5  ;;  %5495 = vmatprep.mubr.msk.bf16.mxu1 %vm6039_vm1, %v6038_v1  ;;  %v755_v5 = vld [vmem:[%s748_s5] sm:$0xff] }
 0x690   : > { %5499 = vmatprep.subr.bf16.mxu1 %v6038_v1 }
 0x696   : > { %5496 = vmatmul.mubr.msk.bf16.vlgmr.msra.gmra.mrb[32].mxu1 %vm972_vm2, %v1471_v6  ;;  %v756_v6 = vld [vmem:[%s748_s5 + $0x8] sm:$0x3] }
 0x697   : > { %5501 = vmatprep.mubr.msk.bf16.mxu1 %vm6039_vm1, %v6038_v1 }
 0x761   : > { %v1409_v7 = vpop.f32.mrb[28].mxu1 }
 0x762   : > { %v5483_v8 = vpop.f32.mrb[29].mxu1  ;;  %v1415_v33 = vpack.c.bf16 %v1409_v7, %v1409_v7  ;;  %v6407_v7 = vpack.c.bf16 %v756_v6, %v755_v5 }
 0x763   : > { %v1412_v9 = vpop.f32.mrb[30].mxu1 }
 0x764   : > { %v5484_v11 = vpop.f32.mrb[31].mxu1 }
 0x765   : > { %v5060_v11 = vld [vmem:[%s7206_s8] ss:$0 sm:$0xff] }
 0x769   : > { %v1514_v12 = vpop.f32.mrb[32].mxu1 }
 0x76a   : > { %v1515_v13 = vadd.f32 %v1514_v12, %v6264_v41  ;;  %v5497_v14 = vpop.f32.mrb[33].mxu1 }
 0x76b   : > { %v1517_v15 = vpop.f32.mrb[34].mxu1 }
 0x76c   : > { %v5498_v16 = vpop.f32.mrb[35].mxu1  ;;  %v1520_v17 = vsel %vm972_vm2, %v1515_v13, -inf }
 0x76d   : > { %1521 = vmax.xlane.f32.xlu0 %v1520_v17  ;;  %v5058_v16 = vld [vmem:[%s7153_s14] ss:$0 sm:$0xff] }
 0x783   : > { %1532 = vrot.lane.b32.xlu0 %v6289_v3, %s7172_s25 }
 0x787   : > { %1418 = vrot.lane.b32.xlu0 %v6282_v56, %s7174_s3 }
 0x78b   : > { %1583 = vrot.lane.b32.xlu0 %v6282_v56, %s7172_s25 }
 0x7fa   : > { %v1522_v18 = vpop.xlane.xlu0 %1521 }
 0x7fb   : > { %v1523_v19 = vsub.f32 %v1515_v13, %v1522_v18  ;;  %v5059_v18 = vld [vmem:[%s7154_s15] ss:$0 sm:$0xff] }
 0x7fd   : > { %v1524_v20 = vmul.f32 1.442695, %v1523_v19 }
 0x7fe   : > { %v1533_v21 = vpop.permute.xlu0 %1532 }
 0x7ff   : > { %5964 = vpow2.f32 %v1524_v20  ;;  %v1538_v23 = vsel %vm1034_vm4, %v1533_v21, 0 }
 0x800   : > { %5500 = vmatpush3.bf16.msra.mxu1 %v1538_v23 }
 0x801   : > { %5513 = vmatprep.subr.bf16.mxu1 %v6038_v1 }
 0x802   : > { %v1419_v27 = vpop.permute.xlu0 %1418 }
 0x803   : > { %v1427_v30 = vsel %vm972_vm2, %v1419_v27, 0 }
 0x806   : > { %v1584_v35 = vpop.permute.xlu0 %1583 }
 0x807   : > { %v1592_v36 = vsel %vm972_vm2, %v1584_v35, 0 }
 0x809   : > { %v5965_v24 = vpop.eup %5964 }
 0x80a   : > { %v1526_v25 = vsel %vm972_vm2, %v5965_v24, 0.0 }
 0x80b   : > { %1527 = vadd.xlane.f32.xlu1 %v1526_v25 }
 0x81c   : > { %1416 = vrot.lane.b32.xlu1 %v6275_v54, %s7174_s3  ;;  %s7212_s3 = smov 104  }
 0x820   : > { %1581 = vrot.lane.b32.xlu1 %v6275_v54, %s7172_s25  ;;  %s7204_s25 = sld [smem:[#allocation9_spill]] }
 0x826   : > { %v5909_v22 = vld [vmem:[%s7204_s25 + $0x18] sm:$0xff]   ;;  %v5910_v2 = vld [vmem:[%s7204_s25] sm:$0xff]   ;;  %v5911_v8 = vld [vmem:[%s7204_s25 + $0x8] sm:$0xff]  }
 0x827   : > { %v1778_v28 = vsel %vm800_vm0, %v5909_v22, 0  ;;  %v1713_v4 = vsel %vm800_vm0, %v5910_v2, 0  ;;  %v1716_v9 = vsel %vm800_vm0, %v5911_v8, 0 }
 0x898   : > { %v1528_v56 = vpop.xlane.xlu1 %1527 }
 0x899   : > { %5966 = vrcp.f32 %v1528_v56 }
 0x89c   : > { %v1417_v3 = vpop.permute.xlu1 %1416 }
 0x89d   : > { %v1424_v26 = vsel %vm972_vm2, %v1417_v3, 0 }
 0x89e   : > { %5486 = vmatpush3.bf16.xpose.msra.mxu0 %v1424_v26 }
 0x89f   : > { %5487 = vmatprep.subr.bf16.mxu0 %v6038_v1 }
 0x8a0   : > { %v1582_v54 = vpop.permute.xlu1 %1581 }
 0x8a1   : > { %v1589_v34 = vsel %vm972_vm2, %v1582_v54, 0 }
 0x8a3   : > { %v5967_v29 = vpop.eup %5966 }
 0x8a4   : > { %v1530_v31 = vmul.f32 %v5967_v29, %v5965_v24 }
 0x8a6   : > { %5488 = vmatpush3.bf16.xpose.msra.mxu0 %v1427_v30  ;;  %v1531_v32 = vpack.c.bf16 %v1530_v31, %v1530_v31 }
 0x8a7   : > { %5505 = vmatprep.subr.bf16.mxu0 %v6038_v1 }
 0x8a8   : > { %5502 = vmatmul.mubr.msk.bf16.vlgmr.msra.gmra.mrb[36].mxu1 %vm972_vm2, %v1531_v32 }
 0x8a9   : > { %5517 = vmatprep.mubr.msk.bf16.mxu1 %vm6039_vm1, %v6038_v1  ;;  %5514 = vmatpush3.bf16.xpose.msra.mxu1 %v1713_v4 }
 0x8aa   : > { %5515 = vmatprep.subr.bf16.mxu1 %v6038_v1 }
 0x8ad   : > { %5490 = vmatmul.mubr.msk.bf16.vlgmr.msra.gmra.mrb[12].mxu0 %vm972_vm2, %v1415_v33 }
 0x8ae   : > { %5506 = vmatpush3.bf16.xpose.msra.mxu0 %v1589_v34  ;;  %5509 = vmatprep.mubr.msk.bf16.mxu0 %vm6039_vm1, %v6038_v1 }
 0x8af   : > { %5507 = vmatprep.subr.bf16.mxu0 %v6038_v1 }
 0x8b1   : > { %5516 = vmatpush3.bf16.xpose.msra.mxu1 %v1716_v9 }
 0x8b2   : > { %5529 = vmatprep.subr.bf16.mxu1 %v6038_v1 }
 0x8b6   : > { %5508 = vmatpush3.bf16.xpose.msra.mxu0 %v1592_v36 }
 0x8b7   : > { %5521 = vmatprep.subr.bf16.mxu0 %v6038_v1 }
 0x97b   : > { %v1574_v37 = vpop.f32.mrb[36].mxu1 }
 0x97c   : > { %v1580_v38 = vpack.c.bf16 %v1574_v37, %v1574_v37  ;;  %v5503_v39 = vpop.f32.mrb[37].mxu1 }
 0x97d   : > { %v1577_v40 = vpop.f32.mrb[38].mxu1 }
 0x97e   : > { %v5504_v42 = vpop.f32.mrb[39].mxu1  ;;  %5510 = vmatmul.mubr.msk.bf16.vlgmr.msra.gmra.mrb[16].mxu0 %vm972_vm2, %v1580_v38  ;;  %v5914_v40 = vld [vmem:[%s7204_s25 + $0x20] sm:$0xff]  }
 0x97f   : > { %5525 = vmatprep.mubr.msk.bf16.mxu0 %vm6039_vm1, %v6038_v1  ;;  %v1835_v42 = vsel %vm800_vm0, %v5914_v40, 0 }
 0x980   : > { %v1463_v43 = vpop.f32.mrb[12].mxu0 }
 0x981   : > { %v1469_v44 = vadd.f32 %v1463_v43, %v6328_v45  ;;  %v5491_v46 = vpop.f32.mrb[13].mxu0  ;;  %v5908_v45 = vld [vmem:[%s7204_s25 + $0x10] sm:$0xff]   ;;  %v5915_v43 = vld [vmem:[%s7204_s25 + $0x28] sm:$0xff]  }
 0x982   : > { %v1466_v47 = vpop.f32.mrb[14].mxu0  ;;  %v1775_v60 = vsel %vm800_vm0, %v5908_v45, 0 }
 0x983   : > { %v5492_v48 = vpop.f32.mrb[15].mxu0  ;;  %5522 = vmatpush3.bf16.xpose.msra.mxu0 %v1775_v60 }
 0x984   : > { %5523 = vmatprep.subr.bf16.mxu0 %v6038_v1 }
 0x98b   : > { %5524 = vmatpush3.bf16.xpose.msra.mxu0 %v1778_v28 }
 0x98c   : > { %5537 = vmatprep.subr.bf16.mxu0 %v6038_v1 }
 0x992   : > { %5526 = vmatmul.mubr.msk.bf16.vlgmr.msra.gmra.mrb[20].mxu0 %vm800_vm0, %v6407_v7 }
 0x993   : > { %5539 = vmatprep.mubr.msk.bf16.mxu0 %vm6039_vm1, %v6038_v1 }
 0xa51   : > { %v1628_v49 = vpop.f32.mrb[16].mxu0 }
 0xa52   : > { %v1634_v50 = vadd.f32 %v1628_v49, %v1469_v44  ;;  %v5511_v51 = vpop.f32.mrb[17].mxu0  ;;  %v1838_v44 = vsel %vm800_vm0, %v5915_v43, 0 }
 0xa53   : > { %v1631_v52 = vpop.f32.mrb[18].mxu0  ;;  %v6474_v51 = vld [vmem:[%s7210_s27] sm:$0xff]  }
 0xa54   : > { %v1635_v55 = vadd.f32 %v1634_v50, %v6216_v10  ;;  %v5512_v57 = vpop.f32.mrb[19].mxu0  ;;  %v6481_v52 = vld [vmem:[%s7210_s27 + $0x8] sm:$0xff]  }
 0xa56   : > { %v1642_v58 = vadd.f32 %v5057_v53, %v1635_v55 }
 0xa58   : > { %v1643_v59 = vsel %vm800_vm0, %v1642_v58, 0.0 }
 0xa59   : > { %1644 = vadd.xlane.f32.xlu1 %v1643_v59 }
 0xa65   : > { %v1814_v24 = vpop.f32.mrb[20].mxu0 }
 0xa66   : > { %v5527_v25 = vpop.f32.mrb[21].mxu0 }
 0xa67   : > { %v1817_v3 = vpop.f32.mrb[22].mxu0 }
 0xa68   : > { %v5528_v27 = vpop.f32.mrb[23].mxu0 }
 0xae6   : > { %v1645_v61 = vpop.xlane.xlu1 %1644 }
 0xae7   : > { %v1647_v62 = vmul.f32 0.03125, %v1645_v61 }
 0xae9   : > { %v1648_v63 = vsub.f32 %v1642_v58, %v1647_v62 }
 0xaeb   : > { %v1649_v0 = vmul.f32 %v1648_v63, %v1648_v63 }
 0xaed   : > { %v1650_v10 = vsel %vm800_vm0, %v1649_v0, 0.0 }
 0xaee   : > { %1651 = vadd.xlane.f32.xlu0 %v1650_v10 }
 0xb04   : > { %1768 = vrot.lane.b32.xlu0 %v5060_v11, %s7207_s28 }
 0xb7b   : > { %v1652_v12 = vpop.xlane.xlu0 %1651 }
 0xb7c   : > { %v1653_v13 = vmul.f32 0.03125, %v1652_v12 }
 0xb7e   : > { %v1654_v14 = vadd.f32 1e-05, %v1653_v13 }
 0xb7f   : > { %v1769_v23 = vpop.permute.xlu0 %1768 }
 0xb80   : > { %5968 = vrsqrt.f32 %v1654_v14  ;;  %v1815_v56 = vadd.f32 %v1814_v24, %v1769_v23  ;;  %v1818_v26 = vadd.f32 %v1817_v3, %v1769_v23 }
 0xb82   : > { %v6435_v29 = vpack.c.bf16 %v1818_v26, %v1815_v56 }
 0xb84   : > { %1996 = vrot.lane.b32.xlu1 %v6435_v29, %s7208_s2  ;;  %v1889_v30 = vsel %vm972_vm2, %v6435_v29, 0 }
 0xb85   : > { %5538 = vmatpush3.bf16.xpose.msra.mxu0 %v1889_v30 }
 0xb86   : > { %5549 = vmatprep.subr.bf16.mxu0 %v6038_v1 }
 0xb8a   : > { %v5969_v15 = vpop.eup %5968 }
 0xb8b   : > { %v1656_v17 = vmul.f32 %v5969_v15, %v1648_v63 }
 0xb8d   : > { %v1663_v19 = vmul.f32 %v5058_v16, %v1656_v17 }
 0xb8f   : > { %v6428_v20 = vadd.f32 %v5059_v18, %v1663_v19 }
 0xb91   : > { %v1691_v21 = vpack.c.bf16 %v6428_v20, %v6428_v20 }
 0xb93   : > { %5518 = vmatmul.mubr.msk.bf16.vlgmr.msra.gmra.mrb[40].mxu1 %vm800_vm0, %v1691_v21 }
 0xb94   : > { %5533 = vmatprep.mubr.msk.bf16.mxu1 %vm6039_vm1, %v6038_v1  ;;  %5530 = vmatpush3.bf16.xpose.msra.mxu1 %v1835_v42 }
 0xb95   : > { %5531 = vmatprep.subr.bf16.mxu1 %v6038_v1 }
 0xb9c   : > { %5532 = vmatpush3.bf16.xpose.msra.mxu1 %v1838_v44 }
 0xb9d   : > { %5543 = vmatprep.subr.bf16.mxu1 %v6038_v1 }
 0xba3   : > { %5534 = vmatmul.mubr.msk.bf16.vlgmr.msra.gmra.mrb[44].mxu1 %vm800_vm0, %v6407_v7 }
 0xba4   : > { %5545 = vmatprep.mubr.msk.bf16.mxu1 %vm6039_vm1, %v6038_v1 }
 0xbf6   : > { %v1997_v34 = vpop.permute.xlu1 %1996 }
 0xbf7   : > { %v2002_v38 = vsel %vm972_vm2, %v1997_v34, 0 }
 0xc66   : > { %v1752_v31 = vpop.f32.mrb[40].mxu1 }
 0xc67   : > { %v1753_v32 = vadd.f32 %v5060_v11, %v1752_v31  ;;  %v5519_v54 = vpop.f32.mrb[41].mxu1  ;;  %v2173_v31 = vsel %vm972_vm2, %v6474_v51, 0 }
 0xc68   : > { %v1755_v33 = vpop.f32.mrb[42].mxu1 }
 0xc69   : > { %v1881_v35 = vmul.f32 0.35355338, %v1753_v32  ;;  %v5520_v36 = vpop.f32.mrb[43].mxu1  ;;  %v2176_v32 = vsel %vm972_vm2, %v6481_v52, 0 }
 0xc6b   : > { %v6442_v37 = vpack.c.bf16 %v1881_v35, %v1881_v35 }
 0xc6d   : > { %1993 = vrot.lane.b32.xlu1 %v6442_v37, %s7208_s2  ;;  %5540 = vmatmul.mubr.msk.bf16.vlgmr.msra.gmra.mrb[24].mxu0 %vm972_vm2, %v6442_v37 }
 0xc6e   : > { %5550 = vmatpush3.bf16.xpose.msra.mxu0 %v2002_v38  ;;  %5551 = vmatprep.mubr.msk.bf16.mxu0 %vm6039_vm1, %v6038_v1 }
 0xc6f   : > { %5561 = vmatprep.subr.bf16.mxu0 %v6038_v1 }
 0xc76   : > { %v1874_v63 = vpop.f32.mrb[44].mxu1 }
 0xc77   : > { %v5535_v10 = vpop.f32.mrb[45].mxu1 }
 0xc78   : > { %v1877_v22 = vpop.f32.mrb[46].mxu1 }
 0xc79   : > { %v5536_v2 = vpop.f32.mrb[47].mxu1 }
 0xcdf   : > { %v1994_v39 = vpop.permute.xlu1 %1993 }
 0xce0   : > { %5552 = vmatmul.mubr.msk.bf16.vlgmr.msra.gmra.mrb[28].mxu0 %vm972_vm2, %v1994_v39 }
 0xce1   : > { %5565 = vmatprep.mubr.msk.bf16.mxu0 %vm6039_vm1, %v6038_v1 }
 0xd40   : > { %v1925_v46 = vpop.f32.mrb[24].mxu0 }
 0xd41   : > { %v5541_v47 = vpop.f32.mrb[25].mxu0  ;;  %v1932_v48 = vsel %vm1931_vm5, %v1925_v46, -inf }
 0xd42   : > { %1933 = vmax.xlane.f32.xlu0 %v1932_v48  ;;  %v1928_v49 = vpop.f32.mrb[26].mxu0 }
 0xd43   : > { %v5542_v50 = vpop.f32.mrb[27].mxu0 }
 0xd58   : > { %1831 = vrot.lane.b32.xlu0 %v5060_v11, %s7209_s30 }
 0xd5c   : > { %2116 = vrot.lane.b32.xlu0 %v6474_v51, %s7208_s2 }
 0xd60   : > { %2118 = vrot.lane.b32.xlu0 %v6481_v52, %s7208_s2 }
 0xd64   : > { %2220 = vrot.lane.b32.xlu0 %v6435_v29, %s7211_s24 }
 0xdb3   : > { %v2038_v53 = vpop.f32.mrb[28].mxu0 }
 0xdb4   : > { %v5553_v55 = vpop.f32.mrb[29].mxu0  ;;  %v2044_v57 = vsel %vm1931_vm5, %v2038_v53, -inf }
 0xdb5   : > { %2045 = vmax.xlane.f32.xlu1 %v2044_v57  ;;  %v2041_v58 = vpop.f32.mrb[30].mxu0 }
 0xdb6   : > { %v5554_v59 = vpop.f32.mrb[31].mxu0 }
 0xdcf   : > { %v1934_v45 = vpop.xlane.xlu0 %1933 }
 0xdd0   : > { %v1935_v60 = vsub.f32 %v1925_v46, %v1934_v45 }
 0xdd2   : > { %v1936_v61 = vmul.f32 1.442695, %v1935_v60 }
 0xdd3   : > { %v1832_v62 = vpop.permute.xlu0 %1831 }
 0xdd4   : > { %5970 = vpow2.f32 %v1936_v61  ;;  %v1875_v0 = vadd.f32 %v1874_v63, %v1832_v62  ;;  %v1878_v28 = vadd.f32 %v1877_v22, %v1832_v62 }
 0xdd6   : > { %v6489_v6 = vpack.c.bf16 %v1878_v28, %v1875_v0 }
 0xdd7   : > { %v2117_v4 = vpop.permute.xlu0 %2116 }
 0xdd8   : > { %v2124_v5 = vsel %vm972_vm2, %v2117_v4, 0  ;;  %v1949_v13 = vsel %vm1947_vm6, %v6489_v6, 0 }
 0xdd9   : > { %5562 = vmatpush3.bf16.xpose.msra.mxu0 %v2124_v5  ;;  %5544 = vmatpush3.bf16.msra.mxu1 %v1949_v13 }
 0xdda   : > { %5563 = vmatprep.subr.bf16.mxu0 %v6038_v1  ;;  %5555 = vmatprep.subr.bf16.mxu1 %v6038_v1 }
 0xddb   : > { %v2119_v8 = vpop.permute.xlu0 %2118 }
 0xddc   : > { %v2127_v11 = vsel %vm972_vm2, %v2119_v8, 0 }
 0xdde   : > { %v5971_v9 = vpop.eup %5970 }
 0xddf   : > { %v1938_v12 = vsel %vm1931_vm5, %v5971_v9, 0.0  ;;  %v2221_v38 = vpop.permute.xlu0 %2220 }
 0xde0   : > { %1939 = vadd.xlane.f32.xlu1 %v1938_v12  ;;  %v2226_v44 = vsel %vm972_vm2, %v2221_v38, 0 }
 0xde1   : > { %5564 = vmatpush3.bf16.xpose.msra.mxu0 %v2127_v11 }
 0xde2   : > { %5577 = vmatprep.subr.bf16.mxu0 %v6038_v1 }
 0xe42   : > { %v2046_v14 = vpop.xlane.xlu1 %2045 }
 0xe43   : > { %v2047_v15 = vsub.f32 %v2038_v53, %v2046_v14 }
 0xe45   : > { %v2048_v16 = vmul.f32 1.442695, %v2047_v15 }
 0xe47   : > { %5972 = vpow2.f32 %v2048_v16 }
 0xe51   : > { %v5973_v17 = vpop.eup %5972 }
 0xe52   : > { %v2050_v18 = vsel %vm1931_vm5, %v5973_v17, 0.0 }
 0xe53   : > { %2051 = vadd.xlane.f32.xlu1 %v2050_v18 }
 0xe64   : > { %2057 = vrot.lane.b32.xlu1 %v6489_v6, %s7208_s2 }
 0xe68   : > { %2218 = vrot.lane.b32.xlu1 %v6442_v37, %s7211_s24 }
 0xe6d   : > { %v1940_v19 = vpop.xlane.xlu1 %1939 }
 0xe6e   : > { %5974 = vrcp.f32 %v1940_v19 }
 0xe78   : > { %v5975_v21 = vpop.eup %5974 }
 0xe79   : > { %v1942_v23 = vmul.f32 %v5975_v21, %v5971_v9 }
 0xe7b   : > { %v1943_v24 = vpack.c.bf16 %v1942_v23, %v1942_v23 }
 0xe7d   : > { %5546 = vmatmul.mubr.msk.bf16.vlgmr.msra.gmra.mrb[48].mxu1 %vm1931_vm5, %v1943_v24 }
 0xe7e   : > { %5557 = vmatprep.mubr.msk.bf16.mxu1 %vm6039_vm1, %v6038_v1 }
 0xee0   : > { %v2052_v25 = vpop.xlane.xlu1 %2051 }
 0xee1   : > { %5976 = vrcp.f32 %v2052_v25 }
 0xee4   : > { %v2058_v56 = vpop.permute.xlu1 %2057 }
 0xee5   : > { %v2063_v3 = vsel %vm1947_vm6, %v2058_v56, 0 }
 0xee6   : > { %5556 = vmatpush3.bf16.msra.mxu1 %v2063_v3 }
 0xee7   : > { %5569 = vmatprep.subr.bf16.mxu1 %v6038_v1 }
 0xee8   : > { %v2219_v47 = vpop.permute.xlu1 %2218 }
 0xeeb   : > { %v5977_v26 = vpop.eup %5976 }
 0xeec   : > { %v2054_v27 = vmul.f32 %v5977_v26, %v5973_v17 }
 0xeee   : > { %v2055_v30 = vpack.c.bf16 %v2054_v27, %v2054_v27 }
 0xef0   : > { %5558 = vmatmul.mubr.msk.bf16.vlgmr.msra.gmra.mrb[52].mxu1 %vm1931_vm5, %v2055_v30 }
 0xef1   : > { %5570 = vmatpush3.bf16.xpose.msra.mxu1 %v2173_v31  ;;  %5573 = vmatprep.mubr.msk.bf16.mxu1 %vm6039_vm1, %v6038_v1 }
 0xef2   : > { %5571 = vmatprep.subr.bf16.mxu1 %v6038_v1 }
 0xef9   : > { %5572 = vmatpush3.bf16.xpose.msra.mxu1 %v2176_v32 }
 0xefa   : > { %5583 = vmatprep.subr.bf16.mxu1 %v6038_v1 }
 0xf50   : > { %v1985_v54 = vpop.f32.mrb[48].mxu1 }
 0xf51   : > { %v1991_v33 = vpack.c.bf16 %v1985_v54, %v1985_v54  ;;  %v5547_v34 = vpop.f32.mrb[49].mxu1 }
 0xf52   : > { %v1988_v35 = vpop.f32.mrb[50].mxu1 }
 0xf53   : > { %v5548_v36 = vpop.f32.mrb[51].mxu1  ;;  %5574 = vmatmul.mubr.msk.bf16.vlgmr.msra.gmra.mrb[56].mxu1 %vm972_vm2, %v1991_v33 }
 0xf54   : > { %5585 = vmatprep.mubr.msk.bf16.mxu1 %vm6039_vm1, %v6038_v1 }
 0xfc3   : > { %v2099_v39 = vpop.f32.mrb[52].mxu1 }
 0xfc4   : > { %v2105_v40 = vpack.c.bf16 %v2099_v39, %v2099_v39  ;;  %v5559_v42 = vpop.f32.mrb[53].mxu1 }
 0xfc5   : > { %v2102_v43 = vpop.f32.mrb[54].mxu1 }
 0xfc6   : > { %v5560_v46 = vpop.f32.mrb[55].mxu1  ;;  %5566 = vmatmul.mubr.msk.bf16.vlgmr.msra.gmra.mrb[32].mxu0 %vm972_vm2, %v2105_v40 }
 0xfc7   : > { %5578 = vmatpush3.bf16.xpose.msra.mxu0 %v2226_v44  ;;  %5579 = vmatprep.mubr.msk.bf16.mxu0 %vm6039_vm1, %v6038_v1 }
 0xfc8   : > { %5589 = vmatprep.subr.bf16.mxu0 %v6038_v1 }
 0xfce   : > { %5580 = vmatmul.mubr.msk.bf16.vlgmr.msra.gmra.mrb[36].mxu0 %vm972_vm2, %v2219_v47 }
 0xfcf   : > { %5593 = vmatprep.mubr.msk.bf16.mxu0 %vm6039_vm1, %v6038_v1 }
0x1026   : > { %v2212_v48 = vpop.f32.mrb[56].mxu1 }
0x1027   : > { %v5575_v49 = vpop.f32.mrb[57].mxu1 }
0x1028   : > { %v2215_v50 = vpop.f32.mrb[58].mxu1 }
0x1029   : > { %v5576_v53 = vpop.f32.mrb[59].mxu1 }
0x1099   : > { %v2163_v55 = vpop.f32.mrb[32].mxu0 }
0x109a   : > { %v6528_v57 = vadd.f32 %v2212_v48, %v2163_v55  ;;  %v5567_v58 = vpop.f32.mrb[33].mxu0 }
0x109b   : > { %v2166_v59 = vpop.f32.mrb[34].mxu0 }
0x109c   : > { %v5568_v45 = vpop.f32.mrb[35].mxu0 }
0x10a1   : > { %v2262_v60 = vpop.f32.mrb[36].mxu0 }
0x10a2   : > { %v5581_v61 = vpop.f32.mrb[37].mxu0  ;;  %v2268_v62 = vsel %vm1931_vm5, %v2262_v60, -inf }
0x10a3   : > { %2269 = vmax.xlane.f32.xlu0 %v2268_v62  ;;  %v2265_v63 = vpop.f32.mrb[38].mxu0 }
0x10a4   : > { %v5582_v0 = vpop.f32.mrb[39].mxu0 }
0x10b9   : > { %2280 = vrot.lane.b32.xlu0 %v6489_v6, %s7211_s24 }
0x10bd   : > { %2383 = vrot.lane.b32.xlu0 %v6442_v37, %s7212_s3 }
0x1130   : > { %v2270_v10 = vpop.xlane.xlu0 %2269 }
0x1131   : > { %v2271_v22 = vsub.f32 %v2262_v60, %v2270_v10 }
0x1133   : > { %v2272_v28 = vmul.f32 1.442695, %v2271_v22 }
0x1134   : > { %v2281_v2 = vpop.permute.xlu0 %2280 }
0x1135   : > { %5978 = vpow2.f32 %v2272_v28  ;;  %v2286_v4 = vsel %vm1947_vm6, %v2281_v2, 0  ;;  %v5916_v28 = vld [vmem:[%s7149_s10] sm:$0xff]  }
0x1136   : > { %5584 = vmatpush3.bf16.msra.mxu1 %v2286_v4  ;;  %v2630_v2 = vsel %vm800_vm0, %v5916_v28, 0  ;;  %v5097_v28 = vld [vmem:[%s7157_s18] ss:$0 sm:$0xff] }
0x1137   : > { %5597 = vmatprep.subr.bf16.mxu1 %v6038_v1 }
0x1138   : > { %v2384_v15 = vpop.permute.xlu0 %2383 }
0x113f   : > { %v5979_v5 = vpop.eup %5978 }
0x1140   : > { %v2274_v8 = vsel %vm1931_vm5, %v5979_v5, 0.0 }
0x1141   : > { %2275 = vadd.xlane.f32.xlu1 %v2274_v8 }
0x1152   : > { %2385 = vrot.lane.b32.xlu1 %v6435_v29, %s7212_s3 }
0x11ce   : > { %v2276_v9 = vpop.xlane.xlu1 %2275 }
0x11cf   : > { %5980 = vrcp.f32 %v2276_v9 }
0x11d2   : > { %v2386_v12 = vpop.permute.xlu1 %2385 }
0x11d3   : > { %v2391_v14 = vsel %vm972_vm2, %v2386_v12, 0  ;;  %v5918_v12 = vld [vmem:[%s7149_s10 + $0x10] sm:$0xff]  }
0x11d9   : > { %v5981_v37 = vpop.eup %5980 }
0x11da   : > { %v2278_v11 = vmul.f32 %v5981_v37, %v5979_v5  ;;  %v5917_v37 = vld [vmem:[%s7149_s10 + $0x8] sm:$0xff]  }
0x11dc   : > { %v2279_v13 = vpack.c.bf16 %v2278_v11, %v2278_v11  ;;  %v2633_v11 = vsel %vm800_vm0, %v5917_v37, 0 }
0x11de   : > { %5586 = vmatmul.mubr.msk.bf16.vlgmr.msra.gmra.mrb[60].mxu1 %vm1931_vm5, %v2279_v13  ;;  %v2636_v13 = vsel %vm800_vm0, %v5918_v12, 0 }
0x11df   : > { %5598 = vmatpush3.bf16.xpose.msra.mxu1 %v2391_v14  ;;  %5599 = vmatprep.mubr.msk.bf16.mxu1 %vm6039_vm1, %v6038_v1  ;;  %v5919_v14 = vld [vmem:[%s7149_s10 + $0x18] sm:$0xff]  }
0x11e0   : > { %5603 = vmatprep.subr.bf16.mxu1 %v6038_v1 }
0x11e6   : > { %5600 = vmatmul.mubr.msk.bf16.vlgmr.msra.gmra.mrb[64].mxu1 %vm972_vm2, %v2384_v15  ;;  %v2639_v15 = vsel %vm800_vm0, %v5919_v14, 0 }
0x11e7   : > { %5605 = vmatprep.mubr.msk.bf16.mxu1 %vm6039_vm1, %v6038_v1 }
0x12b1   : > { %v2322_v29 = vpop.f32.mrb[60].mxu1 }
0x12b2   : > { %v5587_v16 = vpop.f32.mrb[61].mxu1 }
0x12b3   : > { %v2325_v17 = vpop.f32.mrb[62].mxu1 }
0x12b4   : > { %v5588_v18 = vpop.f32.mrb[63].mxu1 }
0x12b9   : > { %v2427_v19 = vpop.f32.mrb[64].mxu1 }
0x12ba   : > { %v5601_v21 = vpop.f32.mrb[65].mxu1  ;;  %v2433_v23 = vsel %vm1931_vm5, %v2427_v19, -inf }
0x12bb   : > { %2434 = vmax.xlane.f32.xlu1 %v2433_v23  ;;  %v2430_v24 = vpop.f32.mrb[66].mxu1  ;;  %v5085_v23 = vld [vmem:[%s7155_s16] ss:$0 sm:$0xff] }
0x12bc   : > { %v5602_v25 = vpop.f32.mrb[67].mxu1 }
0x12bd   : > { %v5086_v25 = vld [vmem:[%s7156_s17] ss:$0 sm:$0xff] }
0x12cc   : > { %2329 = vrot.lane.b32.xlu1 %v6474_v51, %s7211_s24 }
0x12d0   : > { %2331 = vrot.lane.b32.xlu1 %v6481_v52, %s7211_s24 }
0x12d4   : > { %2496 = vrot.lane.b32.xlu1 %v6481_v52, %s7212_s3  ;;  %v2328_v52 = vpack.c.bf16 %v2322_v29, %v2322_v29  ;;  %v5920_v29 = vld [vmem:[%s7151_s12] sm:$0xff]  }
0x12d5   : > { %v2704_v16 = vsel %vm2699_vm7, %v5920_v29, 0 }
0x1348   : > { %v2435_v56 = vpop.xlane.xlu1 %2434 }
0x1349   : > { %v2436_v3 = vsub.f32 %v2427_v19, %v2435_v56 }
0x134b   : > { %v2437_v26 = vmul.f32 1.442695, %v2436_v3 }
0x134c   : > { %v2330_v27 = vpop.permute.xlu1 %2329 }
0x134d   : > { %5982 = vpow2.f32 %v2437_v26  ;;  %v2337_v30 = vsel %vm972_vm2, %v2330_v27, 0  ;;  %v5921_v27 = vld [vmem:[%s7151_s12 + $0x8] sm:$0xff]  }
0x134e   : > { %5590 = vmatpush3.bf16.xpose.msra.mxu0 %v2337_v30  ;;  %v2707_v30 = vsel %vm2699_vm7, %v5921_v27, 0 }
0x134f   : > { %5591 = vmatprep.subr.bf16.mxu0 %v6038_v1 }
0x1350   : > { %v2332_v31 = vpop.permute.xlu1 %2331 }
0x1351   : > { %v2340_v32 = vsel %vm972_vm2, %v2332_v31, 0  ;;  %v5087_v31 = vld [vmem:[%s7150_s11] ss:$0 sm:$0xff] }
0x1356   : > { %5592 = vmatpush3.bf16.xpose.msra.mxu0 %v2340_v32 }
0x1357   : > { %v5983_v54 = vpop.eup %5982  ;;  %5609 = vmatprep.subr.bf16.mxu0 %v6038_v1 }
0x1358   : > { %v2439_v33 = vsel %vm1931_vm5, %v5983_v54, 0.0 }
0x1359   : > { %2440 = vadd.xlane.f32.xlu0 %v2439_v33 }
0x135d   : > { %5594 = vmatmul.mubr.msk.bf16.vlgmr.msra.gmra.mrb[40].mxu0 %vm972_vm2, %v2328_v52 }
0x135e   : > { %5613 = vmatprep.mubr.msk.bf16.mxu0 %vm6039_vm1, %v6038_v1 }
0x136f   : > { %2445 = vrot.lane.b32.xlu0 %v6489_v6, %s7212_s3  ;;  %v2497_v6 = vpop.permute.xlu1 %2496 }
0x1373   : > { %2494 = vrot.lane.b32.xlu0 %v6474_v51, %s7212_s3  ;;  %v2505_v51 = vsel %vm972_vm2, %v2497_v6, 0 }
0x13e6   : > { %v2441_v34 = vpop.xlane.xlu0 %2440 }
0x13e7   : > { %5984 = vrcp.f32 %v2441_v34 }
0x13ea   : > { %v2446_v35 = vpop.permute.xlu0 %2445 }
0x13eb   : > { %v2451_v36 = vsel %vm1947_vm6, %v2446_v35, 0 }
0x13ec   : > { %5604 = vmatpush3.bf16.msra.mxu1 %v2451_v36 }
0x13ed   : > { %5617 = vmatprep.subr.bf16.mxu1 %v6038_v1 }
0x13ee   : > { %v2495_v38 = vpop.permute.xlu0 %2494 }
0x13ef   : > { %v2502_v39 = vsel %vm972_vm2, %v2495_v38, 0  ;;  %v5093_v38 = vld [vmem:[%s7152_s13] ss:$0 sm:$0xff] }
0x13f0   : > { %5610 = vmatpush3.bf16.xpose.msra.mxu0 %v2502_v39 }
0x13f1   : > { %v5985_v40 = vpop.eup %5984  ;;  %5611 = vmatprep.subr.bf16.mxu0 %v6038_v1 }
0x13f2   : > { %v2443_v42 = vmul.f32 %v5985_v40, %v5983_v54 }
0x13f4   : > { %v2444_v43 = vpack.c.bf16 %v2443_v42, %v2443_v42 }
0x13f6   : > { %5606 = vmatmul.mubr.msk.bf16.vlgmr.msra.gmra.mrb[68].mxu1 %vm1931_vm5, %v2444_v43 }
0x13f7   : > { %5625 = vmatprep.mubr.msk.bf16.mxu1 %vm6039_vm1, %v6038_v1  ;;  %5618 = vmatpush3.bf16.xpose.msra.mxu1 %v2630_v2 }
0x13f8   : > { %5612 = vmatpush3.bf16.xpose.msra.mxu0 %v2505_v51  ;;  %5619 = vmatprep.subr.bf16.mxu1 %v6038_v1 }
0x13f9   : > { %5629 = vmatprep.subr.bf16.mxu0 %v6038_v1 }
0x13ff   : > { %5620 = vmatpush3.bf16.xpose.msra.mxu1 %v2633_v11  ;;  %v5927_v11 = vld [vmem:[%s7199_s6 + $0x58] sm:$0xff]  }
0x1400   : > { %5621 = vmatprep.subr.bf16.mxu1 %v6038_v1  ;;  %v2945_v12 = vsel %vm800_vm0, %v5927_v11, 0 }
0x1407   : > { %5622 = vmatpush3.bf16.xpose.msra.mxu1 %v2636_v13 }
0x1408   : > { %5623 = vmatprep.subr.bf16.mxu1 %v6038_v1 }
0x140f   : > { %5624 = vmatpush3.bf16.xpose.msra.mxu1 %v2639_v15 }
0x1410   : > { %5645 = vmatprep.subr.bf16.mxu1 %v6038_v1 }
0x1430   : > { %v2376_v44 = vpop.f32.mrb[40].mxu0 }
0x1431   : > { %v2382_v46 = vadd.f32 %v2376_v44, %v6528_v57  ;;  %v5595_v47 = vpop.f32.mrb[41].mxu0  ;;  %v5084_v57 = vld [vmem:[%s7148_s9] ss:$0 sm:$0xff] }
0x1432   : > { %v2379_v48 = vpop.f32.mrb[42].mxu0 }
0x1433   : > { %v5596_v49 = vpop.f32.mrb[43].mxu0 }
0x14c9   : > { %v2487_v50 = vpop.f32.mrb[68].mxu1 }
0x14ca   : > { %v2493_v53 = vpack.c.bf16 %v2487_v50, %v2487_v50  ;;  %v5607_v55 = vpop.f32.mrb[69].mxu1 }
0x14cb   : > { %v2490_v58 = vpop.f32.mrb[70].mxu1  ;;  %v5923_v55 = vld [vmem:[%s7199_s6 + $0x40] sm:$0xff]  }
0x14cc   : > { %v5608_v59 = vpop.f32.mrb[71].mxu1  ;;  %5614 = vmatmul.mubr.msk.bf16.vlgmr.msra.gmra.mrb[44].mxu0 %vm972_vm2, %v2493_v53  ;;  %v5922_v53 = vld [vmem:[%s7199_s6 + $0x30] sm:$0xff]  }
0x14cd   : > { %5633 = vmatprep.mubr.msk.bf16.mxu0 %vm6039_vm1, %v6038_v1  ;;  %5630 = vmatpush3.bf16.xpose.msra.mxu0 %v2704_v16  ;;  %v2824_v58 = vsel %vm800_vm0, %v5922_v53, 0  ;;  %v2883_v59 = vsel %vm800_vm0, %v5923_v55, 0 }
0x14ce   : > { %5631 = vmatprep.subr.bf16.mxu0 %v6038_v1 }
0x14d5   : > { %5632 = vmatpush3.bf16.xpose.msra.mxu0 %v2707_v30 }
0x14d6   : > { %5637 = vmatprep.subr.bf16.mxu0 %v6038_v1 }
0x159f   : > { %v2541_v45 = vpop.f32.mrb[44].mxu0 }
0x15a0   : > { %v2547_v60 = vadd.f32 %v2541_v45, %v2382_v46  ;;  %v5615_v61 = vpop.f32.mrb[45].mxu0  ;;  %v5924_v45 = vld [vmem:[%s7199_s6 + $0x38] sm:$0xff]  }
0x15a1   : > { %v2544_v62 = vpop.f32.mrb[46].mxu0  ;;  %v2827_v61 = vsel %vm800_vm0, %v5924_v45, 0 }
0x15a2   : > { %v2548_v63 = vadd.f32 %v2547_v60, %v6428_v20  ;;  %v5616_v0 = vpop.f32.mrb[47].mxu0  ;;  %v5925_v60 = vld [vmem:[%s7199_s6 + $0x48] sm:$0xff]  }
0x15a3   : > { %v2886_v62 = vsel %vm800_vm0, %v5925_v60, 0 }
0x15a4   : > { %v2555_v10 = vadd.f32 %v5084_v57, %v2548_v63  ;;  %v6659_v57 = vld [vmem:[%s7200_s4 + $0x1] ss:$0 sm:$0xff]  ;;  %s7217_s4 = sld [smem:[#allocation15_spill]] }
0x15a6   : > { %v2556_v22 = vsel %vm800_vm0, %v2555_v10, 0.0 }
0x15a7   : > { %2557 = vadd.xlane.f32.xlu0 %v2556_v22 }
0x15aa   : > { %s752_s29 = scalar_lea.vmem %s7217_s4, %s7216_s1 }
0x1634   : > { %v2558_v4 = vpop.xlane.xlu0 %2557 }
0x1635   : > { %v2559_v5 = vmul.f32 0.03125, %v2558_v4  ;;  %v5098_v4 = vld [vmem:[%s7158_s19] ss:$0 sm:$0xff] }
0x1637   : > { %v2560_v8 = vsub.f32 %v2555_v10, %v2559_v5 }
0x1639   : > { %v2561_v9 = vmul.f32 %v2560_v8, %v2560_v8 }
0x163b   : > { %v2562_v20 = vsel %vm800_vm0, %v2561_v9, 0.0 }
0x163c   : > { %2563 = vadd.xlane.f32.xlu1 %v2562_v20 }
0x164d   : > { %2879 = vrot.lane.b32.xlu1 %v6659_v57, %s7207_s28 }
0x16c9   : > { %v2564_v17 = vpop.xlane.xlu1 %2563 }
0x16ca   : > { %v2565_v18 = vmul.f32 0.03125, %v2564_v17 }
0x16cc   : > { %v2566_v19 = vadd.f32 1e-05, %v2565_v18 }
0x16cd   : > { %v2880_v13 = vpop.permute.xlu1 %2879 }
0x16ce   : > { %5986 = vrsqrt.f32 %v2566_v19 }
0x16d8   : > { %v5987_v21 = vpop.eup %5986 }
0x16d9   : > { %v2568_v24 = vmul.f32 %v5987_v21, %v2560_v8  ;;  %v5926_v8 = vld [vmem:[%s7199_s6 + $0x50] sm:$0xff]  }
0x16da   : > { %v2942_v37 = vsel %vm800_vm0, %v5926_v8, 0 }
0x16db   : > { %v2575_v56 = vmul.f32 %v5085_v23, %v2568_v24 }
0x16dd   : > { %v2582_v3 = vadd.f32 %v5086_v25, %v2575_v56 }
0x16df   : > { %v2599_v26 = vpack.c.bf16 %v2582_v3, %v2582_v3 }
0x16e1   : > { %5626 = vmatmul.mubr.msk.bf16.vlgmr.msra.gmra.mrb[72].mxu1 %vm800_vm0, %v2599_v26 }
0x16e2   : > { %5649 = vmatprep.mubr.msk.bf16.mxu1 %vm6039_vm1, %v6038_v1  ;;  %5646 = vmatpush3.bf16.xpose.msra.mxu1 %v2883_v59 }
0x16e3   : > { %5647 = vmatprep.subr.bf16.mxu1 %v6038_v1 }
0x16ea   : > { %5648 = vmatpush3.bf16.xpose.msra.mxu1 %v2886_v62 }
0x16eb   : > { %5661 = vmatprep.subr.bf16.mxu1 %v6038_v1 }
0x17b4   : > { %v2675_v32 = vpop.f32.mrb[72].mxu1 }
0x17b5   : > { %v2676_v54 = vadd.f32 %v5087_v31, %v2675_v32  ;;  %v5627_v33 = vpop.f32.mrb[73].mxu1 }
0x17b6   : > { %v2678_v52 = vpop.f32.mrb[74].mxu1 }
0x17b7   : > { %v2681_v34 = vmax.f32 %v2676_v54, 0.0  ;;  %v5628_v35 = vpop.f32.mrb[75].mxu1 }
0x17b9   : > { %v2682_v36 = vpack.c.bf16 %v2681_v34, %v2681_v34 }
0x17bb   : > { %5634 = vmatmul.mubr.msk.bf16.vlgmr.msra.gmra.mrb[48].mxu0 %vm2699_vm7, %v2682_v36 }
0x17bc   : > { %5641 = vmatprep.mubr.msk.bf16.mxu0 %vm6039_vm1, %v6038_v1  ;;  %5638 = vmatpush3.bf16.xpose.msra.mxu0 %v2824_v58 }
0x17bd   : > { %5639 = vmatprep.subr.bf16.mxu0 %v6038_v1 }
0x17c4   : > { %5640 = vmatpush3.bf16.xpose.msra.mxu0 %v2827_v61 }
0x17c5   : > { %5653 = vmatprep.subr.bf16.mxu0 %v6038_v1 }
0x188e   : > { %v2743_v39 = vpop.f32.mrb[48].mxu0 }
0x188f   : > { %v2744_v40 = vadd.f32 %v5093_v38, %v2743_v39  ;;  %v5635_v42 = vpop.f32.mrb[49].mxu0 }
0x1890   : > { %v2746_v6 = vpop.f32.mrb[50].mxu0 }
0x1891   : > { %v5636_v43 = vpop.f32.mrb[51].mxu0  ;;  %v2749_v51 = vadd.f32 %v2744_v40, %v2582_v3 }
0x1893   : > { %v2750_v44 = vsel %vm800_vm0, %v2749_v51, 0.0 }
0x1894   : > { %2751 = vadd.xlane.f32.xlu0 %v2750_v44 }
0x1921   : > { %v2752_v46 = vpop.xlane.xlu0 %2751 }
0x1922   : > { %v2753_v47 = vmul.f32 0.03125, %v2752_v46 }
0x1924   : > { %v2754_v48 = vsub.f32 %v2749_v51, %v2753_v47  ;;  %v6722_v47 = vld [vmem:[%s7202_s0 + $0x10] sm:$0xff]  }
0x1926   : > { %v2755_v49 = vmul.f32 %v2754_v48, %v2754_v48 }
0x1928   : > { %v2756_v50 = vsel %vm800_vm0, %v2755_v49, 0.0  ;;  %v6729_v49 = vld [vmem:[%s7202_s0 + $0x18] sm:$0xff]  }
0x1929   : > { %2757 = vadd.xlane.f32.xlu0 %v2756_v50 }
0x19b6   : > { %v2758_v63 = vpop.xlane.xlu0 %2757 }
0x19b7   : > { %v2759_v0 = vmul.f32 0.03125, %v2758_v63 }
0x19b9   : > { %v2760_v10 = vadd.f32 1e-05, %v2759_v0 }
0x19bb   : > { %5988 = vrsqrt.f32 %v2760_v10 }
0x19c5   : > { %v5989_v22 = vpop.eup %5988 }
0x19c6   : > { %v2762_v2 = vmul.f32 %v5989_v22, %v2754_v48 }
0x19c8   : > { %v2769_v5 = vmul.f32 %v5097_v28, %v2762_v2 }
0x19ca   : > { %v6672_v9 = vadd.f32 %v5098_v4, %v2769_v5 }
0x19cc   : > { %v2803_v20 = vpack.c.bf16 %v6672_v9, %v6672_v9 }
0x19ce   : > { %5642 = vmatmul.mubr.msk.bf16.vlgmr.msra.gmra.mrb[52].mxu0 %vm800_vm0, %v2803_v20  ;;  %5650 = vmatmul.mubr.msk.bf16.vlgmr.msra.gmra.mrb[76].mxu1 %vm800_vm0, %v2803_v20 }
0x19cf   : > { %5654 = vmatpush3.bf16.xpose.msra.mxu0 %v2942_v37  ;;  %5657 = vmatprep.mubr.msk.bf16.mxu0 %vm6039_vm1, %v6038_v1 }
0x19d0   : > { %5655 = vmatprep.subr.bf16.mxu0 %v6038_v1  ;;  %5663 = vmatprep.mubr.msk.bf16.mxu1 %vm6039_vm1, %v6038_v1 }
0x19d7   : > { %5656 = vmatpush3.bf16.xpose.msra.mxu0 %v2945_v12 }
0x19d8   : > { %5673 = vmatprep.subr.bf16.mxu0 %v6038_v1 }
0x19de   : > { %5658 = vmatmul.mubr.msk.bf16.vlgmr.msra.gmra.mrb[56].mxu0 %vm800_vm0, %v2803_v20 }
0x19df   : > { %5675 = vmatprep.mubr.msk.bf16.mxu0 %vm6039_vm1, %v6038_v1 }
0x1aa1   : > { %v2863_v14 = vpop.f32.mrb[52].mxu0  ;;  %v2922_v15 = vpop.f32.mrb[76].mxu1 }
0x1aa2   : > { %v2864_v29 = vadd.f32 %v6659_v57, %v2863_v14  ;;  %v2923_v16 = vadd.f32 %v2922_v15, %v2880_v13  ;;  %v5643_v17 = vpop.f32.mrb[53].mxu0  ;;  %v5651_v18 = vpop.f32.mrb[77].mxu1 }
0x1aa3   : > { %v2866_v19 = vpop.f32.mrb[54].mxu0  ;;  %v2925_v21 = vpop.f32.mrb[78].mxu1  ;;  %v3280_v17 = vsel %vm972_vm2, %v6729_v49, 0 }
0x1aa4   : > { %v2987_v23 = vmul.f32 0.35355338, %v2864_v29  ;;  %v6693_v24 = vpack.c.bf16 %v2923_v16, %v2923_v16  ;;  %v5644_v25 = vpop.f32.mrb[55].mxu0  ;;  %v5652_v56 = vpop.f32.mrb[79].mxu1  ;;  %v3277_v16 = vsel %vm972_vm2, %v6722_v47, 0 }
0x1aa6   : > { %v6695_v3 = vpack.c.bf16 %v2987_v23, %v2987_v23  ;;  %3100 = vrot.lane.b32.xlu0 %v6693_v24, %s7208_s2  ;;  %v2995_v26 = vsel %vm972_vm2, %v6693_v24, 0 }
0x1aa7   : > { %5662 = vmatpush3.bf16.xpose.msra.mxu1 %v2995_v26 }
0x1aa8   : > { %3097 = vrot.lane.b32.xlu1 %v6695_v3, %s7208_s2  ;;  %5667 = vmatprep.subr.bf16.mxu1 %v6038_v1 }
0x1aae   : > { %5664 = vmatmul.mubr.msk.bf16.vlgmr.msra.gmra.mrb[80].mxu1 %vm972_vm2, %v6695_v3 }
0x1aaf   : > { %5669 = vmatprep.mubr.msk.bf16.mxu1 %vm6039_vm1, %v6038_v1 }
0x1ab1   : > { %v2981_v27 = vpop.f32.mrb[56].mxu0 }
0x1ab2   : > { %v5659_v30 = vpop.f32.mrb[57].mxu0 }
0x1ab3   : > { %v2984_v31 = vpop.f32.mrb[58].mxu0 }
0x1ab4   : > { %v5660_v32 = vpop.f32.mrb[59].mxu0 }
0x1b18   : > { %v3101_v54 = vpop.permute.xlu0 %3100 }
0x1b19   : > { %v3106_v33 = vsel %vm972_vm2, %v3101_v54, 0 }
0x1b1a   : > { %5674 = vmatpush3.bf16.xpose.msra.mxu0 %v3106_v33  ;;  %v3098_v52 = vpop.permute.xlu1 %3097 }
0x1b1b   : > { %5685 = vmatprep.subr.bf16.mxu0 %v6038_v1 }
0x1b21   : > { %5676 = vmatmul.mubr.msk.bf16.vlgmr.msra.gmra.mrb[60].mxu0 %vm972_vm2, %v3098_v52 }
0x1b22   : > { %5689 = vmatprep.mubr.msk.bf16.mxu0 %vm6039_vm1, %v6038_v1 }
0x1b81   : > { %v3031_v34 = vpop.f32.mrb[80].mxu1 }
0x1b82   : > { %v3032_v35 = vadd.f32 %v3031_v34, %v6264_v41  ;;  %v5665_v36 = vpop.f32.mrb[81].mxu1 }
0x1b83   : > { %v3034_v38 = vpop.f32.mrb[82].mxu1 }
0x1b84   : > { %v5666_v39 = vpop.f32.mrb[83].mxu1  ;;  %v3037_v40 = vsel %vm972_vm2, %v3032_v35, -inf }
0x1b85   : > { %3038 = vmax.xlane.f32.xlu1 %v3037_v40 }
0x1bf4   : > { %v3142_v42 = vpop.f32.mrb[60].mxu0 }
0x1bf5   : > { %v3143_v6 = vadd.f32 %v3142_v42, %v6264_v41  ;;  %v5677_v43 = vpop.f32.mrb[61].mxu0 }
0x1bf6   : > { %v3145_v51 = vpop.f32.mrb[62].mxu0 }
0x1bf7   : > { %v5678_v44 = vpop.f32.mrb[63].mxu0  ;;  %v3148_v46 = vsel %vm972_vm2, %v3143_v6, -inf }
0x1bf8   : > { %3149 = vmax.xlane.f32.xlu0 %v3148_v46 }
0x1c0e   : > { %2938 = vrot.lane.b32.xlu0 %v6659_v57, %s7209_s30 }
0x1c12   : > { %3220 = vrot.lane.b32.xlu0 %v6722_v47, %s7208_s2  ;;  %v3039_v48 = vpop.xlane.xlu1 %3038 }
0x1c13   : > { %v3040_v50 = vsub.f32 %v3032_v35, %v3039_v48 }
0x1c15   : > { %v3041_v53 = vmul.f32 1.442695, %v3040_v50 }
0x1c16   : > { %3222 = vrot.lane.b32.xlu0 %v6729_v49, %s7208_s2 }
0x1c17   : > { %5990 = vpow2.f32 %v3041_v53 }
0x1c1a   : > { %3322 = vrot.lane.b32.xlu0 %v6695_v3, %s7211_s24 }
0x1c21   : > { %v5991_v55 = vpop.eup %5990 }
0x1c22   : > { %v3043_v58 = vsel %vm972_vm2, %v5991_v55, 0.0 }
0x1c23   : > { %3044 = vadd.xlane.f32.xlu1 %v3043_v58 }
0x1c85   : > { %v3150_v59 = vpop.xlane.xlu0 %3149 }
0x1c86   : > { %v3151_v45 = vsub.f32 %v3143_v6, %v3150_v59 }
0x1c88   : > { %v3152_v60 = vmul.f32 1.442695, %v3151_v45 }
0x1c89   : > { %v2939_v61 = vpop.permute.xlu0 %2938 }
0x1c8a   : > { %5992 = vpow2.f32 %v3152_v60  ;;  %v2982_v62 = vadd.f32 %v2981_v27, %v2939_v61 }
0x1c8c   : > { %v6736_v57 = vpack.c.bf16 %v2982_v62, %v2982_v62 }
0x1c8d   : > { %v3221_v63 = vpop.permute.xlu0 %3220 }
0x1c8e   : > { %v3228_v0 = vsel %vm972_vm2, %v3221_v63, 0  ;;  %v3053_v10 = vsel %vm1034_vm4, %v6736_v57, 0 }
0x1c8f   : > { %5668 = vmatpush3.bf16.msra.mxu1 %v3053_v10  ;;  %5686 = vmatpush3.bf16.xpose.msra.mxu0 %v3228_v0 }
0x1c90   : > { %5679 = vmatprep.subr.bf16.mxu1 %v6038_v1  ;;  %5687 = vmatprep.subr.bf16.mxu0 %v6038_v1 }
0x1c91   : > { %v3223_v22 = vpop.permute.xlu0 %3222 }
0x1c92   : > { %v3231_v2 = vsel %vm972_vm2, %v3223_v22, 0 }
0x1c94   : > { %v5993_v28 = vpop.eup %5992 }
0x1c95   : > { %v3154_v4 = vsel %vm972_vm2, %v5993_v28, 0.0  ;;  %v3323_v33 = vpop.permute.xlu0 %3322 }
0x1c96   : > { %3155 = vadd.xlane.f32.xlu1 %v3154_v4 }
0x1c97   : > { %5688 = vmatpush3.bf16.xpose.msra.mxu0 %v3231_v2 }
0x1c98   : > { %5701 = vmatprep.subr.bf16.mxu0 %v6038_v1 }
0x1ca7   : > { %3161 = vrot.lane.b32.xlu1 %v6736_v57, %s7208_s2 }
0x1cab   : > { %3324 = vrot.lane.b32.xlu1 %v6693_v24, %s7211_s24 }
0x1cb0   : > { %v3045_v5 = vpop.xlane.xlu1 %3044 }
0x1cb1   : > { %5994 = vrcp.f32 %v3045_v5 }
0x1cbb   : > { %v5995_v8 = vpop.eup %5994 }
0x1cbc   : > { %v3047_v20 = vmul.f32 %v5995_v8, %v5991_v55 }
0x1cbe   : > { %v3048_v37 = vpack.c.bf16 %v3047_v20, %v3047_v20 }
0x1cc0   : > { %5670 = vmatmul.mubr.msk.bf16.vlgmr.msra.gmra.mrb[84].mxu1 %vm972_vm2, %v3048_v37 }
0x1cc1   : > { %5681 = vmatprep.mubr.msk.bf16.mxu1 %vm6039_vm1, %v6038_v1 }
0x1d23   : > { %v3156_v11 = vpop.xlane.xlu1 %3155 }
0x1d24   : > { %5996 = vrcp.f32 %v3156_v11 }
0x1d27   : > { %v3162_v12 = vpop.permute.xlu1 %3161 }
0x1d28   : > { %v3167_v13 = vsel %vm1034_vm4, %v3162_v12, 0 }
0x1d29   : > { %5680 = vmatpush3.bf16.msra.mxu1 %v3167_v13 }
0x1d2a   : > { %5693 = vmatprep.subr.bf16.mxu1 %v6038_v1 }
0x1d2b   : > { %v3325_v56 = vpop.permute.xlu1 %3324 }
0x1d2c   : > { %v3330_v32 = vsel %vm972_vm2, %v3325_v56, 0 }
0x1d2e   : > { %v5997_v14 = vpop.eup %5996 }
0x1d2f   : > { %v3158_v15 = vmul.f32 %v5997_v14, %v5993_v28 }
0x1d31   : > { %v3159_v29 = vpack.c.bf16 %v3158_v15, %v3158_v15 }
0x1d33   : > { %5682 = vmatmul.mubr.msk.bf16.vlgmr.msra.gmra.mrb[88].mxu1 %vm972_vm2, %v3159_v29 }
0x1d34   : > { %5694 = vmatpush3.bf16.xpose.msra.mxu1 %v3277_v16  ;;  %5697 = vmatprep.mubr.msk.bf16.mxu1 %vm6039_vm1, %v6038_v1 }
0x1d35   : > { %5695 = vmatprep.subr.bf16.mxu1 %v6038_v1 }
0x1d3c   : > { %5696 = vmatpush3.bf16.xpose.msra.mxu1 %v3280_v17 }
0x1d3d   : > { %5707 = vmatprep.subr.bf16.mxu1 %v6038_v1 }
0x1d93   : > { %v3089_v18 = vpop.f32.mrb[84].mxu1 }
0x1d94   : > { %v3095_v19 = vpack.c.bf16 %v3089_v18, %v3089_v18  ;;  %v5671_v21 = vpop.f32.mrb[85].mxu1 }
0x1d95   : > { %v3092_v23 = vpop.f32.mrb[86].mxu1 }
0x1d96   : > { %v5672_v25 = vpop.f32.mrb[87].mxu1  ;;  %5698 = vmatmul.mubr.msk.bf16.vlgmr.msra.gmra.mrb[92].mxu1 %vm972_vm2, %v3095_v19 }
0x1d97   : > { %5709 = vmatprep.mubr.msk.bf16.mxu1 %vm6039_vm1, %v6038_v1 }
0x1e06   : > { %v3203_v26 = vpop.f32.mrb[88].mxu1 }
0x1e07   : > { %v3209_v27 = vpack.c.bf16 %v3203_v26, %v3203_v26  ;;  %v5683_v30 = vpop.f32.mrb[89].mxu1 }
0x1e08   : > { %v3206_v31 = vpop.f32.mrb[90].mxu1 }
0x1e09   : > { %v5684_v54 = vpop.f32.mrb[91].mxu1  ;;  %5690 = vmatmul.mubr.msk.bf16.vlgmr.msra.gmra.mrb[64].mxu0 %vm972_vm2, %v3209_v27 }
0x1e0a   : > { %5702 = vmatpush3.bf16.xpose.msra.mxu0 %v3330_v32  ;;  %5703 = vmatprep.mubr.msk.bf16.mxu0 %vm6039_vm1, %v6038_v1 }
0x1e0b   : > { %5713 = vmatprep.subr.bf16.mxu0 %v6038_v1 }
0x1e11   : > { %5704 = vmatmul.mubr.msk.bf16.vlgmr.msra.gmra.mrb[68].mxu0 %vm972_vm2, %v3323_v33 }
0x1e12   : > { %5717 = vmatprep.mubr.msk.bf16.mxu0 %vm6039_vm1, %v6038_v1 }
0x1e69   : > { %v3316_v52 = vpop.f32.mrb[92].mxu1 }
0x1e6a   : > { %v5699_v34 = vpop.f32.mrb[93].mxu1 }
0x1e6b   : > { %v3319_v35 = vpop.f32.mrb[94].mxu1 }
0x1e6c   : > { %v5700_v36 = vpop.f32.mrb[95].mxu1 }
0x1edc   : > { %v3267_v38 = vpop.f32.mrb[64].mxu0 }
0x1edd   : > { %v6775_v39 = vadd.f32 %v3316_v52, %v3267_v38  ;;  %v5691_v40 = vpop.f32.mrb[65].mxu0 }
0x1ede   : > { %v3270_v42 = vpop.f32.mrb[66].mxu0 }
0x1edf   : > { %v5692_v6 = vpop.f32.mrb[67].mxu0 }
0x1ee4   : > { %v3366_v43 = vpop.f32.mrb[68].mxu0 }
0x1ee5   : > { %v3367_v51 = vadd.f32 %v3366_v43, %v6264_v41  ;;  %v5705_v44 = vpop.f32.mrb[69].mxu0 }
0x1ee6   : > { %v3369_v46 = vpop.f32.mrb[70].mxu0 }
0x1ee7   : > { %v5706_v48 = vpop.f32.mrb[71].mxu0  ;;  %v3372_v50 = vsel %vm972_vm2, %v3367_v51, -inf }
0x1ee8   : > { %3373 = vmax.xlane.f32.xlu1 %v3372_v50  ;;  %v5143_v48 = vld [vmem:[%s7203_s7 + $0x1] ss:$0 sm:$0xff] }
0x1ef9   : > { %3489 = vrot.lane.b32.xlu1 %v6693_v24, %s7212_s3 }
0x1efd   : > { %3487 = vrot.lane.b32.xlu1 %v6695_v3, %s7212_s3 }
0x1f75   : > { %v3374_v53 = vpop.xlane.xlu1 %3373 }
0x1f76   : > { %v3375_v55 = vsub.f32 %v3367_v51, %v3374_v53 }
0x1f78   : > { %v3376_v58 = vmul.f32 1.442695, %v3375_v55 }
0x1f79   : > { %v3490_v63 = vpop.permute.xlu1 %3489 }
0x1f7a   : > { %5998 = vpow2.f32 %v3376_v58  ;;  %v3495_v10 = vsel %vm972_vm2, %v3490_v63, 0  ;;  %v5932_v63 = vld [vmem:[%s7204_s25 + $0x30] sm:$0xff]  }
0x1f7d   : > { %v3488_v22 = vpop.permute.xlu1 %3487 }
0x1f84   : > { %v5999_v59 = vpop.eup %5998 }
0x1f85   : > { %v3378_v45 = vsel %vm972_vm2, %v5999_v59, 0.0 }
0x1f86   : > { %3379 = vadd.xlane.f32.xlu0 %v3378_v45 }
0x1f9c   : > { %3384 = vrot.lane.b32.xlu0 %v6736_v57, %s7211_s24 }
0x2013   : > { %v3380_v60 = vpop.xlane.xlu0 %3379 }
0x2014   : > { %6000 = vrcp.f32 %v3380_v60 }
0x2017   : > { %v3385_v61 = vpop.permute.xlu0 %3384 }
0x2018   : > { %v3390_v62 = vsel %vm1034_vm4, %v3385_v61, 0 }
0x2019   : > { %5708 = vmatpush3.bf16.msra.mxu1 %v3390_v62 }
0x201a   : > { %5721 = vmatprep.subr.bf16.mxu1 %v6038_v1 }
0x201e   : > { %v6001_v24 = vpop.eup %6000 }
0x201f   : > { %v3382_v3 = vmul.f32 %v6001_v24, %v5999_v59  ;;  %v5931_v24 = vld [vmem:[%s7204_s25 + $0x48] sm:$0xff]  }
0x2021   : > { %v3383_v0 = vpack.c.bf16 %v3382_v3, %v3382_v3  ;;  %v3796_v3 = vsel %vm800_vm0, %v5931_v24, 0 }
0x2023   : > { %5710 = vmatmul.mubr.msk.bf16.vlgmr.msra.gmra.mrb[96].mxu1 %vm972_vm2, %v3383_v0  ;;  %v3734_v0 = vsel %vm800_vm0, %v5932_v63, 0 }
0x2024   : > { %5722 = vmatpush3.bf16.xpose.msra.mxu1 %v3495_v10  ;;  %5723 = vmatprep.mubr.msk.bf16.mxu1 %vm6039_vm1, %v6038_v1  ;;  %v5933_v10 = vld [vmem:[%s7204_s25 + $0x38] sm:$0xff]  }
0x2025   : > { %5727 = vmatprep.subr.bf16.mxu1 %v6038_v1 }
0x202b   : > { %5724 = vmatmul.mubr.msk.bf16.vlgmr.msra.gmra.mrb[100].mxu1 %vm972_vm2, %v3488_v22  ;;  %v3737_v22 = vsel %vm800_vm0, %v5933_v10, 0 }
0x202c   : > { %5729 = vmatprep.mubr.msk.bf16.mxu1 %vm6039_vm1, %v6038_v1 }
0x20f6   : > { %v3426_v28 = vpop.f32.mrb[96].mxu1 }
0x20f7   : > { %v5711_v2 = vpop.f32.mrb[97].mxu1  ;;  %v3432_v27 = vpack.c.bf16 %v3426_v28, %v3426_v28  ;;  %v5166_v28 = vld [vmem:[%s7206_s8 + $0x1] ss:$0 sm:$0xff] }
0x20f8   : > { %v3429_v4 = vpop.f32.mrb[98].mxu1 }
0x20f9   : > { %v5712_v5 = vpop.f32.mrb[99].mxu1 }
0x20fe   : > { %v3531_v8 = vpop.f32.mrb[100].mxu1 }
0x20ff   : > { %v3532_v20 = vadd.f32 %v3531_v8, %v6264_v41  ;;  %v5725_v37 = vpop.f32.mrb[101].mxu1 }
0x2100   : > { %v3534_v11 = vpop.f32.mrb[102].mxu1 }
0x2101   : > { %v5726_v12 = vpop.f32.mrb[103].mxu1  ;;  %v3537_v13 = vsel %vm972_vm2, %v3532_v20, -inf  ;;  %v5145_v11 = vld [vmem:[%s7154_s15 + $0x1] ss:$0 sm:$0xff] }
0x2102   : > { %3538 = vmax.xlane.f32.xlu0 %v3537_v13 }
0x2118   : > { %3549 = vrot.lane.b32.xlu0 %v6736_v57, %s7212_s3 }
0x211c   : > { %3435 = vrot.lane.b32.xlu0 %v6729_v49, %s7211_s24 }
0x2120   : > { %3600 = vrot.lane.b32.xlu0 %v6729_v49, %s7212_s3 }
0x218f   : > { %v3539_v14 = vpop.xlane.xlu0 %3538 }
0x2190   : > { %v3540_v15 = vsub.f32 %v3532_v20, %v3539_v14  ;;  %v5144_v20 = vld [vmem:[%s7153_s14 + $0x1] ss:$0 sm:$0xff] }
0x2192   : > { %v3541_v29 = vmul.f32 1.442695, %v3540_v15 }
0x2193   : > { %v3550_v16 = vpop.permute.xlu0 %3549 }
0x2194   : > { %6002 = vpow2.f32 %v3541_v29  ;;  %v3555_v41 = vsel %vm1034_vm4, %v3550_v16, 0 }
0x2195   : > { %5728 = vmatpush3.bf16.msra.mxu1 %v3555_v41 }
0x2196   : > { %5741 = vmatprep.subr.bf16.mxu1 %v6038_v1 }
0x2197   : > { %v3436_v21 = vpop.permute.xlu0 %3435 }
0x2198   : > { %v3444_v25 = vsel %vm972_vm2, %v3436_v21, 0 }
0x219b   : > { %v3601_v31 = vpop.permute.xlu0 %3600 }
0x219c   : > { %v3609_v32 = vsel %vm972_vm2, %v3601_v31, 0 }
0x219e   : > { %v6003_v17 = vpop.eup %6002 }
0x219f   : > { %v3543_v18 = vsel %vm972_vm2, %v6003_v17, 0.0 }
0x21a0   : > { %3544 = vadd.xlane.f32.xlu1 %v3543_v18 }
0x21b1   : > { %3433 = vrot.lane.b32.xlu1 %v6722_v47, %s7211_s24 }
0x21b5   : > { %3598 = vrot.lane.b32.xlu1 %v6722_v47, %s7212_s3 }
0x222d   : > { %v3545_v49 = vpop.xlane.xlu1 %3544 }
0x222e   : > { %6004 = vrcp.f32 %v3545_v49 }
0x2231   : > { %v3434_v57 = vpop.permute.xlu1 %3433 }
0x2232   : > { %v3441_v19 = vsel %vm972_vm2, %v3434_v57, 0 }
0x2233   : > { %5714 = vmatpush3.bf16.xpose.msra.mxu0 %v3441_v19 }
0x2234   : > { %5715 = vmatprep.subr.bf16.mxu0 %v6038_v1 }
0x2235   : > { %v3599_v47 = vpop.permute.xlu1 %3598 }
0x2236   : > { %v3606_v30 = vsel %vm972_vm2, %v3599_v47, 0 }
0x2238   : > { %v6005_v23 = vpop.eup %6004 }
0x2239   : > { %v3547_v56 = vmul.f32 %v6005_v23, %v6003_v17 }
0x223b   : > { %5716 = vmatpush3.bf16.xpose.msra.mxu0 %v3444_v25  ;;  %v3548_v26 = vpack.c.bf16 %v3547_v56, %v3547_v56 }
0x223c   : > { %5733 = vmatprep.subr.bf16.mxu0 %v6038_v1 }
0x223d   : > { %5730 = vmatmul.mubr.msk.bf16.vlgmr.msra.gmra.mrb[104].mxu1 %vm972_vm2, %v3548_v26 }
0x223e   : > { %5745 = vmatprep.mubr.msk.bf16.mxu1 %vm6039_vm1, %v6038_v1  ;;  %5742 = vmatpush3.bf16.xpose.msra.mxu1 %v3734_v0 }
0x223f   : > { %5743 = vmatprep.subr.bf16.mxu1 %v6038_v1 }
0x2242   : > { %5718 = vmatmul.mubr.msk.bf16.vlgmr.msra.gmra.mrb[72].mxu0 %vm972_vm2, %v3432_v27 }
0x2243   : > { %5734 = vmatpush3.bf16.xpose.msra.mxu0 %v3606_v30  ;;  %5737 = vmatprep.mubr.msk.bf16.mxu0 %vm6039_vm1, %v6038_v1 }
0x2244   : > { %5735 = vmatprep.subr.bf16.mxu0 %v6038_v1 }
0x2246   : > { %5744 = vmatpush3.bf16.xpose.msra.mxu1 %v3737_v22 }
0x2247   : > { %5757 = vmatprep.subr.bf16.mxu1 %v6038_v1 }
0x224b   : > { %5736 = vmatpush3.bf16.xpose.msra.mxu0 %v3609_v32 }
0x224c   : > { %5749 = vmatprep.subr.bf16.mxu0 %v6038_v1 }
0x2310   : > { %v3591_v54 = vpop.f32.mrb[104].mxu1 }
0x2311   : > { %v3597_v33 = vpack.c.bf16 %v3591_v54, %v3591_v54  ;;  %v5731_v52 = vpop.f32.mrb[105].mxu1  ;;  %v5936_v54 = vld [vmem:[%s7204_s25 + $0x50] sm:$0xff]  }
0x2312   : > { %v3594_v34 = vpop.f32.mrb[106].mxu1  ;;  %v5937_v52 = vld [vmem:[%s7204_s25 + $0x58] sm:$0xff]  }
0x2313   : > { %v5732_v35 = vpop.f32.mrb[107].mxu1  ;;  %5738 = vmatmul.mubr.msk.bf16.vlgmr.msra.gmra.mrb[76].mxu0 %vm972_vm2, %v3597_v33  ;;  %v3853_v33 = vsel %vm800_vm0, %v5936_v54, 0  ;;  %v3856_v34 = vsel %vm800_vm0, %v5937_v52, 0 }
0x2314   : > { %5753 = vmatprep.mubr.msk.bf16.mxu0 %vm6039_vm1, %v6038_v1 }
0x2315   : > { %v3480_v36 = vpop.f32.mrb[72].mxu0 }
0x2316   : > { %v3486_v38 = vadd.f32 %v3480_v36, %v6775_v39  ;;  %v5719_v40 = vpop.f32.mrb[73].mxu0  ;;  %v5930_v39 = vld [vmem:[%s7204_s25 + $0x40] sm:$0xff]  }
0x2317   : > { %v3483_v42 = vpop.f32.mrb[74].mxu0  ;;  %v3793_v59 = vsel %vm800_vm0, %v5930_v39, 0 }
0x2318   : > { %v5720_v6 = vpop.f32.mrb[75].mxu0  ;;  %5750 = vmatpush3.bf16.xpose.msra.mxu0 %v3793_v59 }
0x2319   : > { %5751 = vmatprep.subr.bf16.mxu0 %v6038_v1  ;;  %v6915_v6 = vld [vmem:[%s7210_s27 + $0x10] sm:$0xff]  }
0x2320   : > { %5752 = vmatpush3.bf16.xpose.msra.mxu0 %v3796_v3 }
0x2321   : > { %5765 = vmatprep.subr.bf16.mxu0 %v6038_v1 }
0x2327   : > { %5754 = vmatmul.mubr.msk.bf16.vlgmr.msra.gmra.mrb[80].mxu0 %vm800_vm0, %v6407_v7 }
0x2328   : > { %5767 = vmatprep.mubr.msk.bf16.mxu0 %vm6039_vm1, %v6038_v1 }
0x23e6   : > { %v3645_v43 = vpop.f32.mrb[76].mxu0 }
0x23e7   : > { %v3651_v51 = vadd.f32 %v3645_v43, %v3486_v38  ;;  %v5739_v44 = vpop.f32.mrb[77].mxu0 }
0x23e8   : > { %v3648_v46 = vpop.f32.mrb[78].mxu0 }
0x23e9   : > { %v3652_v50 = vadd.f32 %v3651_v51, %v6672_v9  ;;  %v5740_v53 = vpop.f32.mrb[79].mxu0 }
0x23eb   : > { %v3659_v55 = vadd.f32 %v5143_v48, %v3652_v50 }
0x23ed   : > { %v3660_v58 = vsel %vm800_vm0, %v3659_v55, 0.0 }
0x23ee   : > { %3661 = vadd.xlane.f32.xlu1 %v3660_v58 }
0x23fa   : > { %v3832_v29 = vpop.f32.mrb[80].mxu0 }
0x23fb   : > { %v5755_v16 = vpop.f32.mrb[81].mxu0 }
0x23fc   : > { %v3835_v17 = vpop.f32.mrb[82].mxu0 }
0x23fd   : > { %v5756_v49 = vpop.f32.mrb[83].mxu0 }
0x23fe   : > { %v4189_v49 = vsel %vm972_vm2, %v6915_v6, 0 }
0x247b   : > { %v3662_v45 = vpop.xlane.xlu1 %3661 }
0x247c   : > { %v3663_v60 = vmul.f32 0.03125, %v3662_v45 }
0x247e   : > { %v3664_v61 = vsub.f32 %v3659_v55, %v3663_v60 }
0x2480   : > { %v3665_v62 = vmul.f32 %v3664_v61, %v3664_v61 }
0x2482   : > { %v3666_v9 = vsel %vm800_vm0, %v3665_v62, 0.0 }
0x2483   : > { %3667 = vadd.xlane.f32.xlu0 %v3666_v9 }
0x2499   : > { %3789 = vrot.lane.b32.xlu0 %v5166_v28, %s7207_s28 }
0x2510   : > { %v3668_v2 = vpop.xlane.xlu0 %3667 }
0x2511   : > { %v3669_v4 = vmul.f32 0.03125, %v3668_v2 }
0x2513   : > { %v3670_v5 = vadd.f32 1e-05, %v3669_v4 }
0x2514   : > { %v3790_v15 = vpop.permute.xlu0 %3789 }
0x2515   : > { %6006 = vrsqrt.f32 %v3670_v5  ;;  %v3833_v41 = vadd.f32 %v3832_v29, %v3790_v15  ;;  %v3836_v18 = vadd.f32 %v3835_v17, %v3790_v15 }
0x2517   : > { %v6876_v57 = vpack.c.bf16 %v3836_v18, %v3833_v41 }
0x2519   : > { %4012 = vrot.lane.b32.xlu1 %v6876_v57, %s7208_s2  ;;  %v3907_v19 = vsel %vm972_vm2, %v6876_v57, 0 }
0x251a   : > { %5766 = vmatpush3.bf16.xpose.msra.mxu0 %v3907_v19 }
0x251b   : > { %5777 = vmatprep.subr.bf16.mxu0 %v6038_v1 }
0x251f   : > { %v6007_v8 = vpop.eup %6006 }
0x2520   : > { %v3672_v37 = vmul.f32 %v6007_v8, %v3664_v61 }
0x2522   : > { %v3679_v12 = vmul.f32 %v5144_v20, %v3672_v37 }
0x2524   : > { %v6869_v13 = vadd.f32 %v5145_v11, %v3679_v12 }
0x2526   : > { %v3713_v14 = vpack.c.bf16 %v6869_v13, %v6869_v13 }
0x2528   : > { %5746 = vmatmul.mubr.msk.bf16.vlgmr.msra.gmra.mrb[108].mxu1 %vm800_vm0, %v3713_v14 }
0x2529   : > { %5761 = vmatprep.mubr.msk.bf16.mxu1 %vm6039_vm1, %v6038_v1  ;;  %5758 = vmatpush3.bf16.xpose.msra.mxu1 %v3853_v33 }
0x252a   : > { %5759 = vmatprep.subr.bf16.mxu1 %v6038_v1 }
0x2531   : > { %5760 = vmatpush3.bf16.xpose.msra.mxu1 %v3856_v34 }
0x2532   : > { %5771 = vmatprep.subr.bf16.mxu1 %v6038_v1 }
0x2538   : > { %5762 = vmatmul.mubr.msk.bf16.vlgmr.msra.gmra.mrb[112].mxu1 %vm800_vm0, %v6407_v7  ;;  %v6922_v7 = vld [vmem:[%s7210_s27 + $0x18] sm:$0xff]  }
0x2539   : > { %5773 = vmatprep.mubr.msk.bf16.mxu1 %vm6039_vm1, %v6038_v1  ;;  %v4192_v19 = vsel %vm972_vm2, %v6922_v7, 0 }
0x258b   : > { %v4013_v26 = vpop.permute.xlu1 %4012 }
0x258c   : > { %v4018_v31 = vsel %vm972_vm2, %v4013_v26, 0 }
0x25fb   : > { %v3773_v21 = vpop.f32.mrb[108].mxu1 }
0x25fc   : > { %v3774_v23 = vadd.f32 %v5166_v28, %v3773_v21  ;;  %v5747_v25 = vpop.f32.mrb[109].mxu1 }
0x25fd   : > { %v3776_v56 = vpop.f32.mrb[110].mxu1 }
0x25fe   : > { %v3899_v47 = vmul.f32 0.35355338, %v3774_v23  ;;  %v5748_v27 = vpop.f32.mrb[111].mxu1 }
0x2600   : > { %v6883_v30 = vpack.c.bf16 %v3899_v47, %v3899_v47 }
0x2602   : > { %4009 = vrot.lane.b32.xlu1 %v6883_v30, %s7208_s2  ;;  %5768 = vmatmul.mubr.msk.bf16.vlgmr.msra.gmra.mrb[84].mxu0 %vm972_vm2, %v6883_v30 }
0x2603   : > { %5778 = vmatpush3.bf16.xpose.msra.mxu0 %v4018_v31  ;;  %5779 = vmatprep.mubr.msk.bf16.mxu0 %vm6039_vm1, %v6038_v1 }
0x2604   : > { %5789 = vmatprep.subr.bf16.mxu0 %v6038_v1 }
0x260b   : > { %v3892_v39 = vpop.f32.mrb[112].mxu1 }
0x260c   : > { %v5763_v45 = vpop.f32.mrb[113].mxu1 }
0x260d   : > { %v3895_v60 = vpop.f32.mrb[114].mxu1 }
0x260e   : > { %v5764_v62 = vpop.f32.mrb[115].mxu1 }
0x2674   : > { %v4010_v32 = vpop.permute.xlu1 %4009 }
0x2675   : > { %5780 = vmatmul.mubr.msk.bf16.vlgmr.msra.gmra.mrb[88].mxu0 %vm972_vm2, %v4010_v32 }
0x2676   : > { %5793 = vmatprep.mubr.msk.bf16.mxu0 %vm6039_vm1, %v6038_v1 }
0x26d5   : > { %v3943_v35 = vpop.f32.mrb[84].mxu0 }
0x26d6   : > { %v5769_v36 = vpop.f32.mrb[85].mxu0  ;;  %v3949_v38 = vsel %vm1931_vm5, %v3943_v35, -inf }
0x26d7   : > { %3950 = vmax.xlane.f32.xlu0 %v3949_v38  ;;  %v3946_v40 = vpop.f32.mrb[86].mxu0 }
0x26d8   : > { %v5770_v42 = vpop.f32.mrb[87].mxu0 }
0x26ed   : > { %3849 = vrot.lane.b32.xlu0 %v5166_v28, %s7209_s30 }
0x26f1   : > { %4132 = vrot.lane.b32.xlu0 %v6915_v6, %s7208_s2 }
0x26f5   : > { %4134 = vrot.lane.b32.xlu0 %v6922_v7, %s7208_s2 }
0x26f9   : > { %4236 = vrot.lane.b32.xlu0 %v6876_v57, %s7211_s24 }
0x2748   : > { %v4054_v43 = vpop.f32.mrb[88].mxu0 }
0x2749   : > { %v5781_v51 = vpop.f32.mrb[89].mxu0  ;;  %v4060_v44 = vsel %vm1931_vm5, %v4054_v43, -inf }
0x274a   : > { %4061 = vmax.xlane.f32.xlu1 %v4060_v44  ;;  %v4057_v46 = vpop.f32.mrb[90].mxu0 }
0x274b   : > { %v5782_v48 = vpop.f32.mrb[91].mxu0 }
0x2764   : > { %v3951_v50 = vpop.xlane.xlu0 %3950 }
0x2765   : > { %v3952_v53 = vsub.f32 %v3943_v35, %v3951_v50 }
0x2767   : > { %v3953_v55 = vmul.f32 1.442695, %v3952_v53 }
0x2768   : > { %v3850_v58 = vpop.permute.xlu0 %3849 }
0x2769   : > { %6008 = vpow2.f32 %v3953_v55  ;;  %v3893_v59 = vadd.f32 %v3892_v39, %v3850_v58  ;;  %v3896_v61 = vadd.f32 %v3895_v60, %v3850_v58 }
0x276b   : > { %v6930_v3 = vpack.c.bf16 %v3896_v61, %v3893_v59 }
0x276c   : > { %v4133_v9 = vpop.permute.xlu0 %4132 }
0x276d   : > { %v4140_v24 = vsel %vm972_vm2, %v4133_v9, 0  ;;  %v3965_v28 = vsel %vm1947_vm6, %v6930_v3, 0 }
0x276e   : > { %5790 = vmatpush3.bf16.xpose.msra.mxu0 %v4140_v24  ;;  %5772 = vmatpush3.bf16.msra.mxu1 %v3965_v28 }
0x276f   : > { %5791 = vmatprep.subr.bf16.mxu0 %v6038_v1  ;;  %5783 = vmatprep.subr.bf16.mxu1 %v6038_v1 }
0x2770   : > { %v4135_v63 = vpop.permute.xlu0 %4134 }
0x2771   : > { %v4143_v10 = vsel %vm972_vm2, %v4135_v63, 0 }
0x2773   : > { %v6009_v0 = vpop.eup %6008 }
0x2774   : > { %v3955_v22 = vsel %vm1931_vm5, %v6009_v0, 0.0  ;;  %v4237_v47 = vpop.permute.xlu0 %4236 }
0x2775   : > { %3956 = vadd.xlane.f32.xlu1 %v3955_v22  ;;  %v4242_v33 = vsel %vm972_vm2, %v4237_v47, 0 }
0x2776   : > { %5792 = vmatpush3.bf16.xpose.msra.mxu0 %v4143_v10 }
0x2777   : > { %5805 = vmatprep.subr.bf16.mxu0 %v6038_v1 }
0x27d7   : > { %v4062_v2 = vpop.xlane.xlu1 %4061 }
0x27d8   : > { %v4063_v4 = vsub.f32 %v4054_v43, %v4062_v2 }
0x27da   : > { %v4064_v5 = vmul.f32 1.442695, %v4063_v4 }
0x27dc   : > { %6010 = vpow2.f32 %v4064_v5 }
0x27e6   : > { %v6011_v8 = vpop.eup %6010 }
0x27e7   : > { %v4066_v20 = vsel %vm1931_vm5, %v6011_v8, 0.0 }
0x27e8   : > { %4067 = vadd.xlane.f32.xlu1 %v4066_v20 }
0x27f9   : > { %4073 = vrot.lane.b32.xlu1 %v6930_v3, %s7208_s2 }
0x27fd   : > { %4234 = vrot.lane.b32.xlu1 %v6883_v30, %s7211_s24 }
0x2802   : > { %v3957_v37 = vpop.xlane.xlu1 %3956 }
0x2803   : > { %6012 = vrcp.f32 %v3957_v37 }
0x280d   : > { %v6013_v11 = vpop.eup %6012 }
0x280e   : > { %v3959_v12 = vmul.f32 %v6013_v11, %v6009_v0 }
0x2810   : > { %v3960_v14 = vpack.c.bf16 %v3959_v12, %v3959_v12 }
0x2812   : > { %5774 = vmatmul.mubr.msk.bf16.vlgmr.msra.gmra.mrb[116].mxu1 %vm1931_vm5, %v3960_v14 }
0x2813   : > { %5785 = vmatprep.mubr.msk.bf16.mxu1 %vm6039_vm1, %v6038_v1 }
0x2875   : > { %v4068_v15 = vpop.xlane.xlu1 %4067 }
0x2876   : > { %6014 = vrcp.f32 %v4068_v15 }
0x2879   : > { %v4074_v29 = vpop.permute.xlu1 %4073 }
0x287a   : > { %v4079_v16 = vsel %vm1947_vm6, %v4074_v29, 0 }
0x287b   : > { %5784 = vmatpush3.bf16.msra.mxu1 %v4079_v16 }
0x287c   : > { %5797 = vmatprep.subr.bf16.mxu1 %v6038_v1 }
0x287d   : > { %v4235_v34 = vpop.permute.xlu1 %4234 }
0x2880   : > { %v6015_v41 = vpop.eup %6014 }
0x2881   : > { %v4070_v17 = vmul.f32 %v6015_v41, %v6011_v8 }
0x2883   : > { %v4071_v18 = vpack.c.bf16 %v4070_v17, %v4070_v17 }
0x2885   : > { %5786 = vmatmul.mubr.msk.bf16.vlgmr.msra.gmra.mrb[120].mxu1 %vm1931_vm5, %v4071_v18 }
0x2886   : > { %5798 = vmatpush3.bf16.xpose.msra.mxu1 %v4189_v49  ;;  %5801 = vmatprep.mubr.msk.bf16.mxu1 %vm6039_vm1, %v6038_v1 }
0x2887   : > { %5799 = vmatprep.subr.bf16.mxu1 %v6038_v1 }
0x288e   : > { %5800 = vmatpush3.bf16.xpose.msra.mxu1 %v4192_v19 }
0x288f   : > { %5811 = vmatprep.subr.bf16.mxu1 %v6038_v1 }
0x28e5   : > { %v4001_v21 = vpop.f32.mrb[116].mxu1 }
0x28e6   : > { %v4007_v23 = vpack.c.bf16 %v4001_v21, %v4001_v21  ;;  %v5775_v25 = vpop.f32.mrb[117].mxu1 }
0x28e7   : > { %v4004_v56 = vpop.f32.mrb[118].mxu1 }
0x28e8   : > { %v5776_v26 = vpop.f32.mrb[119].mxu1  ;;  %5802 = vmatmul.mubr.msk.bf16.vlgmr.msra.gmra.mrb[124].mxu1 %vm972_vm2, %v4007_v23 }
0x28e9   : > { %5813 = vmatprep.mubr.msk.bf16.mxu1 %vm6039_vm1, %v6038_v1 }
0x2958   : > { %v4115_v27 = vpop.f32.mrb[120].mxu1 }
0x2959   : > { %v4121_v31 = vpack.c.bf16 %v4115_v27, %v4115_v27  ;;  %v5787_v32 = vpop.f32.mrb[121].mxu1 }
0x295a   : > { %v4118_v54 = vpop.f32.mrb[122].mxu1 }
0x295b   : > { %v5788_v52 = vpop.f32.mrb[123].mxu1  ;;  %5794 = vmatmul.mubr.msk.bf16.vlgmr.msra.gmra.mrb[92].mxu0 %vm972_vm2, %v4121_v31 }
0x295c   : > { %5806 = vmatpush3.bf16.xpose.msra.mxu0 %v4242_v33  ;;  %5807 = vmatprep.mubr.msk.bf16.mxu0 %vm6039_vm1, %v6038_v1 }
0x295d   : > { %5817 = vmatprep.subr.bf16.mxu0 %v6038_v1 }
0x2963   : > { %5808 = vmatmul.mubr.msk.bf16.vlgmr.msra.gmra.mrb[96].mxu0 %vm972_vm2, %v4235_v34 }
0x2964   : > { %5821 = vmatprep.mubr.msk.bf16.mxu0 %vm6039_vm1, %v6038_v1 }
0x29bb   : > { %v4228_v35 = vpop.f32.mrb[124].mxu1 }
0x29bc   : > { %v5803_v36 = vpop.f32.mrb[125].mxu1 }
0x29bd   : > { %v4231_v38 = vpop.f32.mrb[126].mxu1 }
0x29be   : > { %v5804_v40 = vpop.f32.mrb[127].mxu1 }
0x2a2e   : > { %v4179_v42 = vpop.f32.mrb[92].mxu0 }
0x2a2f   : > { %v6969_v43 = vadd.f32 %v4228_v35, %v4179_v42  ;;  %v5795_v51 = vpop.f32.mrb[93].mxu0 }
0x2a30   : > { %v4182_v44 = vpop.f32.mrb[94].mxu0 }
0x2a31   : > { %v5796_v46 = vpop.f32.mrb[95].mxu0 }
0x2a36   : > { %v4278_v48 = vpop.f32.mrb[96].mxu0 }
0x2a37   : > { %v5809_v50 = vpop.f32.mrb[97].mxu0  ;;  %v4284_v53 = vsel %vm1931_vm5, %v4278_v48, -inf }
0x2a38   : > { %4285 = vmax.xlane.f32.xlu0 %v4284_v53  ;;  %v4281_v55 = vpop.f32.mrb[98].mxu0 }
0x2a39   : > { %v5810_v58 = vpop.f32.mrb[99].mxu0 }
0x2a4e   : > { %4296 = vrot.lane.b32.xlu0 %v6930_v3, %s7211_s24 }
0x2a52   : > { %4399 = vrot.lane.b32.xlu0 %v6883_v30, %s7212_s3 }
0x2ac5   : > { %v4286_v39 = vpop.xlane.xlu0 %4285 }
0x2ac6   : > { %v4287_v59 = vsub.f32 %v4278_v48, %v4286_v39  ;;  %v5938_v39 = vld [vmem:[%s7149_s10 + $0x20] sm:$0xff]  }
0x2ac8   : > { %v4288_v45 = vmul.f32 1.442695, %v4287_v59  ;;  %v4652_v59 = vsel %vm800_vm0, %v5938_v39, 0 }
0x2ac9   : > { %v4297_v60 = vpop.permute.xlu0 %4296 }
0x2aca   : > { %6016 = vpow2.f32 %v4288_v45  ;;  %v4302_v61 = vsel %vm1947_vm6, %v4297_v60, 0 }
0x2acb   : > { %5812 = vmatpush3.bf16.msra.mxu1 %v4302_v61 }
0x2acc   : > { %5825 = vmatprep.subr.bf16.mxu1 %v6038_v1 }
0x2acd   : > { %v4400_v28 = vpop.permute.xlu0 %4399 }
0x2ad4   : > { %v6017_v62 = vpop.eup %6016 }
0x2ad5   : > { %v4290_v9 = vsel %vm1931_vm5, %v6017_v62, 0.0 }
0x2ad6   : > { %4291 = vadd.xlane.f32.xlu1 %v4290_v9  ;;  %v5939_v9 = vld [vmem:[%s7149_s10 + $0x28] sm:$0xff]  }
0x2ae7   : > { %4401 = vrot.lane.b32.xlu1 %v6876_v57, %s7212_s3 }
0x2b63   : > { %v4292_v24 = vpop.xlane.xlu1 %4291 }
0x2b64   : > { %6018 = vrcp.f32 %v4292_v24  ;;  %v4655_v24 = vsel %vm800_vm0, %v5939_v9, 0 }
0x2b67   : > { %v4402_v0 = vpop.permute.xlu1 %4401 }
0x2b68   : > { %v4407_v22 = vsel %vm972_vm2, %v4402_v0, 0  ;;  %v5941_v0 = vld [vmem:[%s7149_s10 + $0x38] sm:$0xff]  }
0x2b6e   : > { %v6019_v30 = vpop.eup %6018 }
0x2b6f   : > { %v4294_v63 = vmul.f32 %v6019_v30, %v6017_v62  ;;  %v5940_v30 = vld [vmem:[%s7149_s10 + $0x30] sm:$0xff]  }
0x2b71   : > { %v4295_v10 = vpack.c.bf16 %v4294_v63, %v4294_v63  ;;  %v4658_v63 = vsel %vm800_vm0, %v5940_v30, 0 }
0x2b73   : > { %5814 = vmatmul.mubr.msk.bf16.vlgmr.msra.gmra.mrb[128].mxu1 %vm1931_vm5, %v4295_v10  ;;  %v4661_v10 = vsel %vm800_vm0, %v5941_v0, 0 }
0x2b74   : > { %5826 = vmatpush3.bf16.xpose.msra.mxu1 %v4407_v22  ;;  %5827 = vmatprep.mubr.msk.bf16.mxu1 %vm6039_vm1, %v6038_v1  ;;  %v5942_v22 = vld [vmem:[%s7151_s12 + $0x10] sm:$0xff]  }
0x2b75   : > { %5831 = vmatprep.subr.bf16.mxu1 %v6038_v1 }
0x2b7b   : > { %5828 = vmatmul.mubr.msk.bf16.vlgmr.msra.gmra.mrb[132].mxu1 %vm972_vm2, %v4400_v28  ;;  %v4725_v28 = vsel %vm2699_vm7, %v5942_v22, 0 }
0x2b7c   : > { %5833 = vmatprep.mubr.msk.bf16.mxu1 %vm6039_vm1, %v6038_v1 }
0x2c46   : > { %v4338_v57 = vpop.f32.mrb[128].mxu1 }
0x2c47   : > { %v5815_v2 = vpop.f32.mrb[129].mxu1 }
0x2c48   : > { %v4341_v4 = vpop.f32.mrb[130].mxu1 }
0x2c49   : > { %v5816_v5 = vpop.f32.mrb[131].mxu1 }
0x2c4e   : > { %v4443_v8 = vpop.f32.mrb[132].mxu1 }
0x2c4f   : > { %v5829_v20 = vpop.f32.mrb[133].mxu1  ;;  %v4449_v37 = vsel %vm1931_vm5, %v4443_v8, -inf }
0x2c50   : > { %4450 = vmax.xlane.f32.xlu1 %v4449_v37  ;;  %v4446_v11 = vpop.f32.mrb[134].mxu1  ;;  %v5192_v37 = vld [vmem:[%s7156_s17 + $0x1] ss:$0 sm:$0xff] }
0x2c51   : > { %v5830_v12 = vpop.f32.mrb[135].mxu1 }
0x2c61   : > { %4345 = vrot.lane.b32.xlu1 %v6915_v6, %s7211_s24 }
0x2c65   : > { %4347 = vrot.lane.b32.xlu1 %v6922_v7, %s7211_s24  ;;  %s7213_s24 = sld [smem:[#allocation12_spill]] }
0x2c69   : > { %4512 = vrot.lane.b32.xlu1 %v6922_v7, %s7212_s3  ;;  %v4344_v7 = vpack.c.bf16 %v4338_v57, %v4338_v57 }
0x2cdd   : > { %v4451_v14 = vpop.xlane.xlu1 %4450 }
0x2cde   : > { %v4452_v15 = vsub.f32 %v4443_v8, %v4451_v14  ;;  %v5191_v8 = vld [vmem:[%s7155_s16 + $0x1] ss:$0 sm:$0xff] }
0x2ce0   : > { %v4453_v29 = vmul.f32 1.442695, %v4452_v15  ;;  %v5943_v15 = vld [vmem:[%s7151_s12 + $0x18] sm:$0xff]  }
0x2ce1   : > { %v4346_v16 = vpop.permute.xlu1 %4345 }
0x2ce2   : > { %6020 = vpow2.f32 %v4453_v29  ;;  %v4353_v41 = vsel %vm972_vm2, %v4346_v16, 0  ;;  %v4728_v29 = vsel %vm2699_vm7, %v5943_v15, 0  ;;  %v5209_v16 = vld [vmem:[%s7150_s11 + $0x1] ss:$0 sm:$0xff]  ;;  %v5223_v15 = vld [vmem:[%s7215_s23] ss:$0 sm:$0xff] }
0x2ce3   : > { %5818 = vmatpush3.bf16.xpose.msra.mxu0 %v4353_v41 }
0x2ce4   : > { %5819 = vmatprep.subr.bf16.mxu0 %v6038_v1 }
0x2ce5   : > { %v4348_v17 = vpop.permute.xlu1 %4347 }
0x2ce6   : > { %v4356_v18 = vsel %vm972_vm2, %v4348_v17, 0 }
0x2ceb   : > { %5820 = vmatpush3.bf16.xpose.msra.mxu0 %v4356_v18 }
0x2cec   : > { %v6021_v49 = vpop.eup %6020  ;;  %5837 = vmatprep.subr.bf16.mxu0 %v6038_v1 }
0x2ced   : > { %v4455_v19 = vsel %vm1931_vm5, %v6021_v49, 0.0 }
0x2cee   : > { %4456 = vadd.xlane.f32.xlu0 %v4455_v19 }
0x2cf2   : > { %5822 = vmatmul.mubr.msk.bf16.vlgmr.msra.gmra.mrb[100].mxu0 %vm972_vm2, %v4344_v7 }
0x2cf3   : > { %5841 = vmatprep.mubr.msk.bf16.mxu0 %vm6039_vm1, %v6038_v1 }
0x2d04   : > { %4461 = vrot.lane.b32.xlu0 %v6930_v3, %s7212_s3  ;;  %v4513_v3 = vpop.permute.xlu1 %4512 }
0x2d08   : > { %4510 = vrot.lane.b32.xlu0 %v6915_v6, %s7212_s3  ;;  %v4521_v6 = vsel %vm972_vm2, %v4513_v3, 0  ;;  %s7214_s3 = sld [smem:[#allocation13_spill]] }
0x2d7b   : > { %v4457_v21 = vpop.xlane.xlu0 %4456 }
0x2d7c   : > { %6022 = vrcp.f32 %v4457_v21 }
0x2d7f   : > { %v4462_v23 = vpop.permute.xlu0 %4461 }
0x2d80   : > { %v4467_v25 = vsel %vm1947_vm6, %v4462_v23, 0  ;;  %v5215_v23 = vld [vmem:[%s7152_s13 + $0x1] ss:$0 sm:$0xff] }
0x2d81   : > { %5832 = vmatpush3.bf16.msra.mxu1 %v4467_v25 }
0x2d82   : > { %5845 = vmatprep.subr.bf16.mxu1 %v6038_v1 }
0x2d83   : > { %v4511_v56 = vpop.permute.xlu0 %4510 }
0x2d84   : > { %v4518_v26 = vsel %vm972_vm2, %v4511_v56, 0 }
0x2d85   : > { %5838 = vmatpush3.bf16.xpose.msra.mxu0 %v4518_v26 }
0x2d86   : > { %v6023_v47 = vpop.eup %6022  ;;  %5839 = vmatprep.subr.bf16.mxu0 %v6038_v1 }
0x2d87   : > { %v4459_v27 = vmul.f32 %v6023_v47, %v6021_v49 }
0x2d89   : > { %v4460_v31 = vpack.c.bf16 %v4459_v27, %v4459_v27 }
0x2d8b   : > { %5834 = vmatmul.mubr.msk.bf16.vlgmr.msra.gmra.mrb[136].mxu1 %vm1931_vm5, %v4460_v31 }
0x2d8c   : > { %5853 = vmatprep.mubr.msk.bf16.mxu1 %vm6039_vm1, %v6038_v1  ;;  %5846 = vmatpush3.bf16.xpose.msra.mxu1 %v4652_v59  ;;  %v5947_v59 = vld [vmem:[%s7161_s22 + $0x18] sm:$0xff]  }
0x2d8d   : > { %5840 = vmatpush3.bf16.xpose.msra.mxu0 %v4521_v6  ;;  %5847 = vmatprep.subr.bf16.mxu1 %v6038_v1 }
0x2d8e   : > { %5857 = vmatprep.subr.bf16.mxu0 %v6038_v1 }
0x2d94   : > { %5848 = vmatpush3.bf16.xpose.msra.mxu1 %v4655_v24 }
0x2d95   : > { %5849 = vmatprep.subr.bf16.mxu1 %v6038_v1 }
0x2d9c   : > { %5850 = vmatpush3.bf16.xpose.msra.mxu1 %v4658_v63  ;;  %v5949_v63 = vld [vmem:[%s7161_s22 + $0x28] sm:$0xff]  }
0x2d9d   : > { %5851 = vmatprep.subr.bf16.mxu1 %v6038_v1  ;;  %v4910_v0 = vsel %vm800_vm0, %v5949_v63, 0 }
0x2da4   : > { %5852 = vmatpush3.bf16.xpose.msra.mxu1 %v4661_v10  ;;  %v5950_v10 = vld [vmem:[%s7161_s22 + $0x30] sm:$0xff]  }
0x2da5   : > { %v4913_v22 = vsel %vm800_vm0, %v5950_v10, 0 }
0x2dc5   : > { %v4392_v32 = vpop.f32.mrb[100].mxu0 }
0x2dc6   : > { %v4398_v54 = vadd.f32 %v4392_v32, %v6969_v43  ;;  %v5823_v33 = vpop.f32.mrb[101].mxu0  ;;  %v5190_v43 = vld [vmem:[%s7148_s9 + $0x1] ss:$0 sm:$0xff] }
0x2dc7   : > { %v4395_v52 = vpop.f32.mrb[102].mxu0 }
0x2dc8   : > { %v5824_v34 = vpop.f32.mrb[103].mxu0 }
0x2e5e   : > { %v4503_v35 = vpop.f32.mrb[136].mxu1 }
0x2e5f   : > { %v4509_v36 = vpack.c.bf16 %v4503_v35, %v4503_v35  ;;  %v5835_v38 = vpop.f32.mrb[137].mxu1 }
0x2e60   : > { %v4506_v40 = vpop.f32.mrb[138].mxu1 }
0x2e61   : > { %v5836_v42 = vpop.f32.mrb[139].mxu1  ;;  %5842 = vmatmul.mubr.msk.bf16.vlgmr.msra.gmra.mrb[104].mxu0 %vm972_vm2, %v4509_v36  ;;  %v5219_v40 = vld [vmem:[%s7157_s18 + $0x1] ss:$0 sm:$0xff] }
0x2e62   : > { %5861 = vmatprep.mubr.msk.bf16.mxu0 %vm6039_vm1, %v6038_v1  ;;  %5858 = vmatpush3.bf16.xpose.msra.mxu0 %v4725_v28  ;;  %v5951_v28 = vld [vmem:[%s7161_s22 + $0x38] sm:$0xff]  }
0x2e63   : > { %5859 = vmatprep.subr.bf16.mxu0 %v6038_v1 }
0x2e6a   : > { %5860 = vmatpush3.bf16.xpose.msra.mxu0 %v4728_v29 }
0x2e6b   : > { %5865 = vmatprep.subr.bf16.mxu0 %v6038_v1 }
0x2f34   : > { %v4557_v51 = vpop.f32.mrb[104].mxu0 }
0x2f35   : > { %v4563_v44 = vadd.f32 %v4557_v51, %v4398_v54  ;;  %v5843_v46 = vpop.f32.mrb[105].mxu0  ;;  %v5220_v51 = vld [vmem:[%s7158_s19 + $0x1] ss:$0 sm:$0xff] }
0x2f36   : > { %v4560_v48 = vpop.f32.mrb[106].mxu0 }
0x2f37   : > { %v4564_v50 = vadd.f32 %v4563_v44, %v6869_v13  ;;  %v5844_v53 = vpop.f32.mrb[107].mxu0 }
0x2f38   : > { %v5945_v53 = vld [vmem:[%s7161_s22 + $0x8] sm:$0xff]  }
0x2f39   : > { %v4571_v55 = vadd.f32 %v5190_v43, %v4564_v50  ;;  %v5944_v43 = vld [vmem:[%s7161_s22] sm:$0xff]  }
0x2f3a   : > { %v4895_v50 = vsel %vm800_vm0, %v5944_v43, 0 }
0x2f3b   : > { %v4572_v58 = vsel %vm800_vm0, %v4571_v55, 0.0 }
0x2f3c   : > { %4573 = vadd.xlane.f32.xlu0 %v4572_v58  ;;  %v5946_v58 = vld [vmem:[%s7161_s22 + $0x10] sm:$0xff]  }
0x2f3d   : > { %v4901_v39 = vsel %vm800_vm0, %v5946_v58, 0 }
0x2fc9   : > { %v4574_v45 = vpop.xlane.xlu0 %4573 }
0x2fca   : > { %v4575_v60 = vmul.f32 0.03125, %v4574_v45  ;;  %v4904_v45 = vsel %vm800_vm0, %v5947_v59, 0 }
0x2fcc   : > { %v4576_v61 = vsub.f32 %v4571_v55, %v4575_v60  ;;  %v4898_v55 = vsel %vm800_vm0, %v5945_v53, 0  ;;  %v5948_v60 = vld [vmem:[%s7161_s22 + $0x20] sm:$0xff]  }
0x2fce   : > { %v4577_v62 = vmul.f32 %v4576_v61, %v4576_v61 }
0x2fd0   : > { %v4578_v13 = vsel %vm800_vm0, %v4577_v62, 0.0 }
0x2fd1   : > { %4579 = vadd.xlane.f32.xlu1 %v4578_v13 }
0x305e   : > { %v4580_v57 = vpop.xlane.xlu1 %4579 }
0x305f   : > { %v4581_v2 = vmul.f32 0.03125, %v4580_v57  ;;  %v4916_v57 = vsel %vm800_vm0, %v5951_v28, 0 }
0x3061   : > { %v4582_v4 = vadd.f32 1e-05, %v4581_v2 }
0x3063   : > { %6024 = vrsqrt.f32 %v4582_v4 }
0x306d   : > { %v6025_v5 = vpop.eup %6024 }
0x306e   : > { %v4584_v20 = vmul.f32 %v6025_v5, %v4576_v61  ;;  %v4907_v61 = vsel %vm800_vm0, %v5948_v60, 0 }
0x3070   : > { %v4591_v11 = vmul.f32 %v5191_v8, %v4584_v20  ;;  %v5221_v20 = vld [vmem:[%s7213_s24] ss:$0 sm:$0xff] }
0x3072   : > { %v4598_v12 = vadd.f32 %v5192_v37, %v4591_v11 }
0x3074   : > { %v4621_v14 = vpack.c.bf16 %v4598_v12, %v4598_v12 }
0x3076   : > { %5854 = vmatmul.mubr.msk.bf16.vlgmr.msra.gmra.mrb[140].mxu1 %vm800_vm0, %v4621_v14 }
0x3149   : > { %v4697_v41 = vpop.f32.mrb[140].mxu1 }
0x314a   : > { %v4698_v17 = vadd.f32 %v5209_v16, %v4697_v41  ;;  %v5855_v18 = vpop.f32.mrb[141].mxu1 }
0x314b   : > { %v4700_v49 = vpop.f32.mrb[142].mxu1 }
0x314c   : > { %v4703_v19 = vmax.f32 %v4698_v17, 0.0  ;;  %v5856_v7 = vpop.f32.mrb[143].mxu1 }
0x314e   : > { %v4704_v21 = vpack.c.bf16 %v4703_v19, %v4703_v19 }
0x3150   : > { %5862 = vmatmul.mubr.msk.bf16.vlgmr.msra.gmra.mrb[108].mxu0 %vm2699_vm7, %v4704_v21 }
0x3151   : > { %5881 = vmatprep.mubr.msk.bf16.mxu0 %vm6039_vm1, %v6038_v1  ;;  %5866 = vmatpush3.bf16.xpose.msra.mxu0 %v4895_v50 }
0x3152   : > { %5867 = vmatprep.subr.bf16.mxu0 %v6038_v1 }
0x3159   : > { %5868 = vmatpush3.bf16.xpose.msra.mxu0 %v4898_v55 }
0x315a   : > { %5869 = vmatprep.subr.bf16.mxu0 %v6038_v1 }
0x3161   : > { %5870 = vmatpush3.bf16.xpose.msra.mxu0 %v4901_v39 }
0x3162   : > { %5871 = vmatprep.subr.bf16.mxu0 %v6038_v1 }
0x3169   : > { %5872 = vmatpush3.bf16.xpose.msra.mxu0 %v4904_v45 }
0x316a   : > { %5873 = vmatprep.subr.bf16.mxu0 %v6038_v1 }
0x3171   : > { %5874 = vmatpush3.bf16.xpose.msra.mxu0 %v4907_v61 }
0x3172   : > { %5875 = vmatprep.subr.bf16.mxu0 %v6038_v1 }
0x3179   : > { %5876 = vmatpush3.bf16.xpose.msra.mxu0 %v4910_v0 }
0x317a   : > { %5877 = vmatprep.subr.bf16.mxu0 %v6038_v1 }
0x3181   : > { %5878 = vmatpush3.bf16.xpose.msra.mxu0 %v4913_v22 }
0x3182   : > { %5879 = vmatprep.subr.bf16.mxu0 %v6038_v1  ;;  %v5222_v1 = vld [vmem:[%s7214_s3] ss:$0 sm:$0xff] }
0x3189   : > { %5880 = vmatpush3.bf16.xpose.msra.mxu0 %v4916_v57 }
0x3223   : > { %v4764_v25 = vpop.f32.mrb[108].mxu0 }
0x3224   : > { %v4765_v56 = vadd.f32 %v5215_v23, %v4764_v25  ;;  %v5863_v26 = vpop.f32.mrb[109].mxu0 }
0x3225   : > { %v4767_v47 = vpop.f32.mrb[110].mxu0 }
0x3226   : > { %v4770_v27 = vadd.f32 %v4765_v56, %v4598_v12  ;;  %v5864_v3 = vpop.f32.mrb[111].mxu0 }
0x3228   : > { %v4771_v31 = vsel %vm800_vm0, %v4770_v27, 0.0 }
0x3229   : > { %4772 = vadd.xlane.f32.xlu0 %v4771_v31 }
0x32b6   : > { %v4773_v6 = vpop.xlane.xlu0 %4772 }
0x32b7   : > { %v4774_v32 = vmul.f32 0.03125, %v4773_v6 }
0x32b9   : > { %v4775_v54 = vsub.f32 %v4770_v27, %v4774_v32 }
0x32bb   : > { %v4776_v33 = vmul.f32 %v4775_v54, %v4775_v54 }
0x32bd   : > { %v4777_v52 = vsel %vm800_vm0, %v4776_v33, 0.0 }
0x32be   : > { %4778 = vadd.xlane.f32.xlu0 %v4777_v52 }
0x334b   : > { %v4779_v34 = vpop.xlane.xlu0 %4778 }
0x334c   : > { %v4780_v35 = vmul.f32 0.03125, %v4779_v34 }
0x334e   : > { %v4781_v36 = vadd.f32 1e-05, %v4780_v35 }
0x3350   : > { %6026 = vrsqrt.f32 %v4781_v36 }
0x335a   : > { %v6027_v38 = vpop.eup %6026 }
0x335b   : > { %v4783_v42 = vmul.f32 %v6027_v38, %v4775_v54 }
0x335d   : > { %v4790_v44 = vmul.f32 %v5219_v40, %v4783_v42 }
0x335f   : > { %v4797_v46 = vadd.f32 %v5220_v51, %v4790_v44 }
0x3361   : > { %v4800_v48 = vsel %vm800_vm0, %v4797_v46, 0.0 }
0x3362   : > { %4801 = vadd.xlane.f32.xlu1 %v4800_v48 }
0x33ef   : > { %v4802_v62 = vpop.xlane.xlu1 %4801 }
0x33f0   : > { %v4803_v13 = vmul.f32 0.03125, %v4802_v62 }
0x33f2   : > { %v4804_v9 = vsub.f32 %v4797_v46, %v4803_v13 }
0x33f4   : > { %v4805_v24 = vmul.f32 %v4804_v9, %v4804_v9 }
0x33f6   : > { %v4806_v30 = vsel %vm800_vm0, %v4805_v24, 0.0 }
0x33f7   : > { %4807 = vadd.xlane.f32.xlu0 %v4806_v30 }
0x3484   : > { %v4808_v2 = vpop.xlane.xlu0 %4807 }
0x3485   : > { %v4809_v4 = vmul.f32 0.03125, %v4808_v2 }
0x3487   : > { %v4810_v5 = vadd.f32 1e-05, %v4809_v4 }
0x3489   : > { %6028 = vrsqrt.f32 %v4810_v5 }
0x3493   : > { %v6029_v8 = vpop.eup %6028 }
0x3494   : > { %v4812_v37 = vmul.f32 %v6029_v8, %v4804_v9 }
0x3496   : > { %v4819_v11 = vmul.f32 %v5221_v20, %v4812_v37 }
0x3498   : > { %v4826_v12 = vadd.f32 %v5222_v1, %v4819_v11 }
0x349a   : > { %v4827_v14 = vpack.c.bf16 %v4826_v12, %v4826_v12 }
0x349c   : > { %5882 = vmatmul.mubr.msk.bf16.vlgmr.msra.gmra.mrb[112].mxu0 %vm800_vm0, %v4827_v14 }
0x356f   : > { %v4952_v29 = vpop.f32.mrb[112].mxu0 }
0x3570   : > { %v4953_v16 = vadd.f32 %v5223_v15, %v4952_v29  ;;  %v5883_v41 = vpop.f32.mrb[113].mxu0 }
0x3571   : > { %v4955_v17 = vpop.f32.mrb[114].mxu0 }
0x3572   : > { %4958 = vst [vmem:[%s752_s29] sm:$0xff] %v4953_v16  ;;  %v5884_v18 = vpop.f32.mrb[115].mxu0 }
0x3573 PF: > { %s7218_s28 = sld [smem:[#allocation2_spill]] }
0x3579   : > { %s34_s5 = sadd.s32 1, %s7218_s28  }
0x357a   : > { %p31_p4 = scmp.ge.s32.totalorder %s34_s5, 4  }
0x357c   :  { %33 = sbr.rel (!%p31_p4) target bundleno = 14 (0xe), region = 167 }

</bundles_post_ra>
